<compile_context>
chip_gen: v7x
topology: tpu7x:2x2x1
jax: 0.10.0
libtpu: 0.0.40
codegen_flags: <defaults>
</compile_context>

<pallas_src>
import functools

import jax
import jax.numpy as jnp
from jax.experimental import pallas as pl
from jax.experimental.pallas import tpu as pltpu

_LANE = 128
_NEG_SENTINEL = -1.0e30  # finite "-inf" baked into padded output-bias lanes


def _round_up(n, m):
    return ((n + m - 1) // m) * m


def mlp_log_softmax_kernel(*refs):
    """refs = (x_ref, W0, b0, W1, b1, ..., Wout, bout, out_ref)."""
    x_ref, out_ref = refs[0], refs[-1]
    params = refs[1:-1]
    n_layers = len(params) // 2

    # Cast to bf16 in-kernel (avoids a separate XLA cast + HBM round trip).
    h = x_ref[...].astype(jnp.bfloat16)

    # Hidden layers: Linear -> ReLU -> Dropout (eval-mode dropout == identity).
    # TODO(synk): training-mode dropout (p=0.5 via pltpu.prng_*) is not emitted;
    # this matches nn.Dropout in .eval() (inference/validation path).
    for li in range(n_layers - 1):
        w_ref, b_ref = params[2 * li], params[2 * li + 1]
        a = jnp.dot(h, w_ref[...],                       # bf16 MXU, f32 accum
                    preferred_element_type=jnp.float32) + b_ref[...]
        h = jnp.maximum(a, 0.0).astype(jnp.bfloat16)     # ReLU in f32, cast for MXU

    # Output layer. Padded logit lanes get bias = -1e30 (their weight columns
    # are zero), so exp underflows to 0 and they never affect the softmax --
    # no iota/compare/select needed.
    wo_ref, bo_ref = params[-2], params[-1]
    logits = jnp.dot(h, wo_ref[...],
                     preferred_element_type=jnp.float32) + bo_ref[...]

    # Numerically stable log_softmax over dim=1 (feature axis), f32 math.
    m = jnp.max(logits, axis=1, keepdims=True)
    z = logits - m
    lse = jnp.log(jnp.sum(jnp.exp(z), axis=1, keepdims=True))
    out_ref[...] = (z - lse).astype(out_ref.dtype)


def prepare_params(params, lane=_LANE):
    """Zero-pad feature dims to multiples of `lane`, cast weights to bf16.

    Padded hidden weight columns/rows and bias entries are zero, so padded
    hidden activations are exactly 0 after ReLU and never perturb real outputs.
    Padded entries of the *last* bias are a finite -1e30 sentinel so padded
    logits drop out of the softmax with no in-kernel masking.
    """
    prepped = []
    n = len(params)
    prev_out_p = params[0][0].shape[0]          # input size (kept as-is)
    for li, (W, b) in enumerate(params):
        fi, fo = W.shape
        fo_p = _round_up(fo, lane)
        Wp = jnp.zeros((prev_out_p, fo_p), jnp.bfloat16)
        Wp = Wp.at[:fi, :fo].set(W.astype(jnp.bfloat16))
        fill = _NEG_SENTINEL if li == n - 1 else 0.0
        bp = jnp.full((1, fo_p), fill, jnp.float32)
        bp = bp.at[:, :fo].set(b.reshape(1, -1).astype(jnp.float32))
        prepped.append((Wp, bp))
        prev_out_p = fo_p
    return prepped


def _num_tensorcores():
    """TensorCores per chip: 2 on v7x, 1 on v5e/v6e."""
    try:
        kind = str(jax.devices()[0].device_kind).lower()
    except Exception:
        return 1
    return 2 if "7" in kind else 1


def network_forward(x, prepped, *, real_out, out_dtype=jnp.bfloat16,
                    padded_output=False, max_tile_b=1024):
    """x: (B, input_size) f32. prepped: output of prepare_params()."""
    batch, in_size = x.shape
    out_p = prepped[-1][0].shape[1]

    # Per-generation grid sizing: one tile on v5e/v6e, one tile per TC on v7x.
    # Cap tile rows so very large batches don't inflate transient VMEM.
    num_tc = _num_tensorcores()
    per_core = -(-batch // num_tc)              # ceil
    tb = min(per_core, max_tile_b)
    if tb != batch:
        tb = _round_up(tb, 8)                   # sublane-aligned tile
    grid = (pl.cdiv(batch, tb),)                # uneven last tile: masked writes

    flat_args = [x]
    in_specs = [pl.BlockSpec((tb, in_size), lambda i: (i, 0))]
    for W, b in prepped:
        flat_args += [W, b]
        # Constant index_map -> weights/biases stay resident in VMEM across tiles.
        in_specs += [pl.BlockSpec(W.shape, lambda i: (0, 0)),
                     pl.BlockSpec(b.shape, lambda i: (0, 0))]

    out = pl.pallas_call(
        mlp_log_softmax_kernel,
        grid=grid,
        in_specs=in_specs,
        out_specs=pl.BlockSpec((tb, out_p), lambda i: (i, 0)),
        out_shape=jax.ShapeDtypeStruct((batch, out_p), out_dtype),
        compiler_params=pltpu.CompilerParams(
            dimension_semantics=("parallel",)),   # shards tiles across v7x's 2 TCs
    )(*flat_args)

    if padded_output:
        return out                               # (batch, 128) lane-dense bf16
    return out[:, :real_out]                     # tiny bf16 slice


def init_params(key, input_size, output_size, hidden_layers):
    """Deterministic init mimicking nn.Linear default (uniform +-1/sqrt(fan_in))."""
    sizes = [input_size] + list(hidden_layers) + [output_size]
    params = []
    for fan_in, fan_out in zip(sizes[:-1], sizes[1:]):
        key, kw, kb = jax.random.split(key, 3)
        bound = 1.0 / jnp.sqrt(jnp.float32(fan_in))
        W = jax.random.uniform(kw, (fan_in, fan_out), jnp.float32, -bound, bound)
        b = jax.random.uniform(kb, (1, fan_out), jnp.float32, -bound, bound)
        params.append((W, b))
    return params


def reference_forward(x, params):
    """Pure-JAX reference with the same bf16-weight / f32-accumulate precision."""
    h = x.astype(jnp.bfloat16)
    for W, b in params[:-1]:
        a = jnp.dot(h, W.astype(jnp.bfloat16),
                    preferred_element_type=jnp.float32) + b
        h = jnp.maximum(a, 0.0).astype(jnp.bfloat16)
    Wl, bl = params[-1]
    logits = jnp.dot(h, Wl.astype(jnp.bfloat16),
                     preferred_element_type=jnp.float32) + bl
    return jax.nn.log_softmax(logits, axis=1)


if __name__ == "__main__":
    input_size = 32
    output_size = 10
    hidden_layers = [512, 256, 128, 64]
    batch = 1024   # one tile on v5e/v6e; two 512-row tiles (one per TC) on v7x

    key = jax.random.PRNGKey(0)
    key, kx = jax.random.split(key)
    x = jax.random.normal(kx, (batch, input_size), jnp.float32)

    params = init_params(key, input_size, output_size, hidden_layers)
    prepped = prepare_params(params)

    fwd = jax.jit(functools.partial(network_forward, real_out=output_size))
    out = jax.block_until_ready(fwd(x, prepped))

    assert out.shape == (batch, output_size)
    out_f32 = out.astype(jnp.float32)

    # sanity: rows of log_softmax exponentiate & sum to 1 (bf16 output tolerance)
    row_sums = jnp.sum(jnp.exp(out_f32), axis=1)
    assert bool(jnp.allclose(row_sums, 1.0, atol=2e-2)), "row sums off"

    # sanity: matches pure-JAX reference on the same bf16/f32 precision path
    ref = reference_forward(x, params)
    assert bool(jnp.allclose(out_f32, ref, atol=3e-2, rtol=3e-2)), "mismatch vs reference"

    print("KERNEL_OK")
</pallas_src>

<mosaic_0001>
module attributes {stable_mosaic.version = 11 : i64} {
  func.func @mlp_log_softmax_kernel(%arg0: i32, %arg1: memref<1024x32xf32, #tpu.memory_space<vmem>>, %arg2: memref<32x512xbf16, #tpu.memory_space<vmem>>, %arg3: memref<1x512xf32, #tpu.memory_space<vmem>>, %arg4: memref<512x256xbf16, #tpu.memory_space<vmem>>, %arg5: memref<1x256xf32, #tpu.memory_space<vmem>>, %arg6: memref<256x128xbf16, #tpu.memory_space<vmem>>, %arg7: memref<1x128xf32, #tpu.memory_space<vmem>>, %arg8: memref<128x128xbf16, #tpu.memory_space<vmem>>, %arg9: memref<1x128xf32, #tpu.memory_space<vmem>>, %arg10: memref<128x128xbf16, #tpu.memory_space<vmem>>, %arg11: memref<1x128xf32, #tpu.memory_space<vmem>>, %arg12: memref<1024x128xbf16, #tpu.memory_space<vmem>>) attributes {dimension_semantics = [#tpu.dimension_semantics<parallel>], iteration_bounds = array<i64: 1>, scalar_prefetch = 0 : i64, scratch_operands = 0 : i64, tpu.core_type = #tpu.core_type<tc>, window_params = [{transform_indices = @transform_0, window_bounds = array<i64: 1024, 32>}, {pipeline_mode = #tpu.pipeline_mode<synchronous>, transform_indices = @transform_1, window_bounds = array<i64: 32, 512>}, {pipeline_mode = #tpu.pipeline_mode<synchronous>, transform_indices = @transform_2, window_bounds = array<i64: 1, 512>}, {pipeline_mode = #tpu.pipeline_mode<synchronous>, transform_indices = @transform_3, window_bounds = array<i64: 512, 256>}, {pipeline_mode = #tpu.pipeline_mode<synchronous>, transform_indices = @transform_4, window_bounds = array<i64: 1, 256>}, {pipeline_mode = #tpu.pipeline_mode<synchronous>, transform_indices = @transform_5, window_bounds = array<i64: 256, 128>}, {pipeline_mode = #tpu.pipeline_mode<synchronous>, transform_indices = @transform_6, window_bounds = array<i64: 1, 128>}, {pipeline_mode = #tpu.pipeline_mode<synchronous>, transform_indices = @transform_7, window_bounds = array<i64: 128, 128>}, {pipeline_mode = #tpu.pipeline_mode<synchronous>, transform_indices = @transform_8, window_bounds = array<i64: 1, 128>}, {pipeline_mode = #tpu.pipeline_mode<synchronous>, transform_indices = @transform_9, window_bounds = array<i64: 128, 128>}, {pipeline_mode = #tpu.pipeline_mode<synchronous>, transform_indices = @transform_10, window_bounds = array<i64: 1, 128>}, {transform_indices = @transform_11, window_bounds = array<i64: 1024, 128>}]} {
    %c0 = arith.constant 0 : index
    %c0_0 = arith.constant 0 : index
    %0 = vector.load %arg1[%c0, %c0_0] : memref<1024x32xf32, #tpu.memory_space<vmem>>, vector<1024x32xf32>
    %1 = arith.truncf %0 : vector<1024x32xf32> to vector<1024x32xbf16>
    %c0_1 = arith.constant 0 : index
    %c0_2 = arith.constant 0 : index
    %2 = vector.load %arg2[%c0_1, %c0_2] : memref<32x512xbf16, #tpu.memory_space<vmem>>, vector<32x512xbf16>
    %cst = arith.constant dense<0.000000e+00> : vector<1024x512xf32>
    %3 = tpu.matmul %1, %2, %cst {dimension_numbers = #tpu.dot_dimension_numbers<[1], [0], [0], [1], [0, 0, 1, 1], [], []>} : vector<1024x32xbf16>, vector<32x512xbf16>, vector<1024x512xf32> -> vector<1024x512xf32>
    %c0_3 = arith.constant 0 : index
    %c0_4 = arith.constant 0 : index
    %4 = vector.load %arg3[%c0_3, %c0_4] : memref<1x512xf32, #tpu.memory_space<vmem>>, vector<1x512xf32>
    %5 = vector.broadcast %4 : vector<1x512xf32> to vector<1024x512xf32>
    %6 = arith.addf %3, %5 : vector<1024x512xf32>
    %cst_5 = arith.constant 0.000000e+00 : f32
    %7 = vector.broadcast %cst_5 : f32 to vector<1024x512xf32>
    %8 = arith.maximumf %6, %7 : vector<1024x512xf32>
    %9 = arith.truncf %8 : vector<1024x512xf32> to vector<1024x512xbf16>
    %c0_6 = arith.constant 0 : index
    %c0_7 = arith.constant 0 : index
    %10 = vector.load %arg4[%c0_6, %c0_7] : memref<512x256xbf16, #tpu.memory_space<vmem>>, vector<512x256xbf16>
    %cst_8 = arith.constant dense<0.000000e+00> : vector<1024x256xf32>
    %11 = tpu.matmul %9, %10, %cst_8 {dimension_numbers = #tpu.dot_dimension_numbers<[1], [0], [0], [1], [0, 0, 1, 1], [], []>} : vector<1024x512xbf16>, vector<512x256xbf16>, vector<1024x256xf32> -> vector<1024x256xf32>
    %c0_9 = arith.constant 0 : index
    %c0_10 = arith.constant 0 : index
    %12 = vector.load %arg5[%c0_9, %c0_10] : memref<1x256xf32, #tpu.memory_space<vmem>>, vector<1x256xf32>
    %13 = vector.broadcast %12 : vector<1x256xf32> to vector<1024x256xf32>
    %14 = arith.addf %11, %13 : vector<1024x256xf32>
    %cst_11 = arith.constant 0.000000e+00 : f32
    %15 = vector.broadcast %cst_11 : f32 to vector<1024x256xf32>
    %16 = arith.maximumf %14, %15 : vector<1024x256xf32>
    %17 = arith.truncf %16 : vector<1024x256xf32> to vector<1024x256xbf16>
    %c0_12 = arith.constant 0 : index
    %c0_13 = arith.constant 0 : index
    %18 = vector.load %arg6[%c0_12, %c0_13] : memref<256x128xbf16, #tpu.memory_space<vmem>>, vector<256x128xbf16>
    %cst_14 = arith.constant dense<0.000000e+00> : vector<1024x128xf32>
    %19 = tpu.matmul %17, %18, %cst_14 {dimension_numbers = #tpu.dot_dimension_numbers<[1], [0], [0], [1], [0, 0, 1, 1], [], []>} : vector<1024x256xbf16>, vector<256x128xbf16>, vector<1024x128xf32> -> vector<1024x128xf32>
    %c0_15 = arith.constant 0 : index
    %c0_16 = arith.constant 0 : index
    %20 = vector.load %arg7[%c0_15, %c0_16] : memref<1x128xf32, #tpu.memory_space<vmem>>, vector<1x128xf32>
    %21 = vector.broadcast %20 : vector<1x128xf32> to vector<1024x128xf32>
    %22 = arith.addf %19, %21 : vector<1024x128xf32>
    %cst_17 = arith.constant 0.000000e+00 : f32
    %23 = vector.broadcast %cst_17 : f32 to vector<1024x128xf32>
    %24 = arith.maximumf %22, %23 : vector<1024x128xf32>
    %25 = arith.truncf %24 : vector<1024x128xf32> to vector<1024x128xbf16>
    %c0_18 = arith.constant 0 : index
    %c0_19 = arith.constant 0 : index
    %26 = vector.load %arg8[%c0_18, %c0_19] : memref<128x128xbf16, #tpu.memory_space<vmem>>, vector<128x128xbf16>
    %cst_20 = arith.constant dense<0.000000e+00> : vector<1024x128xf32>
    %27 = tpu.matmul %25, %26, %cst_20 {dimension_numbers = #tpu.dot_dimension_numbers<[1], [0], [0], [1], [0, 0, 1, 1], [], []>} : vector<1024x128xbf16>, vector<128x128xbf16>, vector<1024x128xf32> -> vector<1024x128xf32>
    %c0_21 = arith.constant 0 : index
    %c0_22 = arith.constant 0 : index
    %28 = vector.load %arg9[%c0_21, %c0_22] : memref<1x128xf32, #tpu.memory_space<vmem>>, vector<1x128xf32>
    %29 = vector.broadcast %28 : vector<1x128xf32> to vector<1024x128xf32>
    %30 = arith.addf %27, %29 : vector<1024x128xf32>
    %cst_23 = arith.constant 0.000000e+00 : f32
    %31 = vector.broadcast %cst_23 : f32 to vector<1024x128xf32>
    %32 = arith.maximumf %30, %31 : vector<1024x128xf32>
    %33 = arith.truncf %32 : vector<1024x128xf32> to vector<1024x128xbf16>
    %c0_24 = arith.constant 0 : index
    %c0_25 = arith.constant 0 : index
    %34 = vector.load %arg10[%c0_24, %c0_25] : memref<128x128xbf16, #tpu.memory_space<vmem>>, vector<128x128xbf16>
    %cst_26 = arith.constant dense<0.000000e+00> : vector<1024x128xf32>
    %35 = tpu.matmul %33, %34, %cst_26 {dimension_numbers = #tpu.dot_dimension_numbers<[1], [0], [0], [1], [0, 0, 1, 1], [], []>} : vector<1024x128xbf16>, vector<128x128xbf16>, vector<1024x128xf32> -> vector<1024x128xf32>
    %c0_27 = arith.constant 0 : index
    %c0_28 = arith.constant 0 : index
    %36 = vector.load %arg11[%c0_27, %c0_28] : memref<1x128xf32, #tpu.memory_space<vmem>>, vector<1x128xf32>
    %37 = vector.broadcast %36 : vector<1x128xf32> to vector<1024x128xf32>
    %38 = arith.addf %35, %37 : vector<1024x128xf32>
    %cst_29 = arith.constant dense<0xFF800000> : vector<1024xf32>
    %39 = vector.multi_reduction <maximumf>, %38, %cst_29 [1] : vector<1024x128xf32> to vector<1024xf32>
    %40 = vector.shape_cast %39 : vector<1024xf32> to vector<1024x1xf32>
    %41 = vector.broadcast %40 : vector<1024x1xf32> to vector<1024x128xf32>
    %42 = arith.subf %38, %41 : vector<1024x128xf32>
    %43 = math.exp %42 : vector<1024x128xf32>
    %cst_30 = arith.constant dense<0.000000e+00> : vector<1024xf32>
    %44 = vector.multi_reduction <add>, %43, %cst_30 [1] : vector<1024x128xf32> to vector<1024xf32>
    %45 = vector.shape_cast %44 : vector<1024xf32> to vector<1024x1xf32>
    %46 = math.log %45 : vector<1024x1xf32>
    %47 = vector.broadcast %46 : vector<1024x1xf32> to vector<1024x128xf32>
    %48 = arith.subf %42, %47 : vector<1024x128xf32>
    %49 = arith.truncf %48 : vector<1024x128xf32> to vector<1024x128xbf16>
    %c0_31 = arith.constant 0 : index
    %c0_32 = arith.constant 0 : index
    %50 = vector.load %arg12[%c0_31, %c0_32] : memref<1024x128xbf16, #tpu.memory_space<vmem>>, vector<1024x128xbf16>
    tpu.vector_store %arg12[%c0_31, %c0_32], %49 {strides = array<i32>} : memref<1024x128xbf16, #tpu.memory_space<vmem>>, vector<1024x128xbf16>,
    return
  }
  func.func @transform_0(%arg0: i32) -> (i32, i32) {
    %c0_i32 = arith.constant 0 : i32
    %c0_i32_0 = arith.constant 0 : i32
    return %arg0, %c0_i32 : i32, i32
  }
  func.func @transform_1(%arg0: i32) -> (i32, i32) {
    %c0_i32 = arith.constant 0 : i32
    %c0_i32_0 = arith.constant 0 : i32
    %c0_i32_1 = arith.constant 0 : i32
    return %c0_i32, %c0_i32_0 : i32, i32
  }
  func.func @transform_2(%arg0: i32) -> (i32, i32) {
    %c0_i32 = arith.constant 0 : i32
    %c0_i32_0 = arith.constant 0 : i32
    %c0_i32_1 = arith.constant 0 : i32
    return %c0_i32, %c0_i32_0 : i32, i32
  }
  func.func @transform_3(%arg0: i32) -> (i32, i32) {
    %c0_i32 = arith.constant 0 : i32
    %c0_i32_0 = arith.constant 0 : i32
    %c0_i32_1 = arith.constant 0 : i32
    return %c0_i32, %c0_i32_0 : i32, i32
  }
  func.func @transform_4(%arg0: i32) -> (i32, i32) {
    %c0_i32 = arith.constant 0 : i32
    %c0_i32_0 = arith.constant 0 : i32
    %c0_i32_1 = arith.constant 0 : i32
    return %c0_i32, %c0_i32_0 : i32, i32
  }
  func.func @transform_5(%arg0: i32) -> (i32, i32) {
    %c0_i32 = arith.constant 0 : i32
    %c0_i32_0 = arith.constant 0 : i32
    %c0_i32_1 = arith.constant 0 : i32
    return %c0_i32, %c0_i32_0 : i32, i32
  }
  func.func @transform_6(%arg0: i32) -> (i32, i32) {
    %c0_i32 = arith.constant 0 : i32
    %c0_i32_0 = arith.constant 0 : i32
    %c0_i32_1 = arith.constant 0 : i32
    return %c0_i32, %c0_i32_0 : i32, i32
  }
  func.func @transform_7(%arg0: i32) -> (i32, i32) {
    %c0_i32 = arith.constant 0 : i32
    %c0_i32_0 = arith.constant 0 : i32
    %c0_i32_1 = arith.constant 0 : i32
    return %c0_i32, %c0_i32_0 : i32, i32
  }
  func.func @transform_8(%arg0: i32) -> (i32, i32) {
    %c0_i32 = arith.constant 0 : i32
    %c0_i32_0 = arith.constant 0 : i32
    %c0_i32_1 = arith.constant 0 : i32
    return %c0_i32, %c0_i32_0 : i32, i32
  }
  func.func @transform_9(%arg0: i32) -> (i32, i32) {
    %c0_i32 = arith.constant 0 : i32
    %c0_i32_0 = arith.constant 0 : i32
    %c0_i32_1 = arith.constant 0 : i32
    return %c0_i32, %c0_i32_0 : i32, i32
  }
  func.func @transform_10(%arg0: i32) -> (i32, i32) {
    %c0_i32 = arith.constant 0 : i32
    %c0_i32_0 = arith.constant 0 : i32
    %c0_i32_1 = arith.constant 0 : i32
    return %c0_i32, %c0_i32_0 : i32, i32
  }
  func.func @transform_11(%arg0: i32) -> (i32, i32) {
    %c0_i32 = arith.constant 0 : i32
    %c0_i32_0 = arith.constant 0 : i32
    return %arg0, %c0_i32 : i32, i32
  }
}

</mosaic_0001>

<bundles_post_ra>
// kernel: network_forward.1
= control target key start
LH: loop header
LB: loop body
LE: loop exit
PB: predicated region body
PF: predicated region fallthrough
CT: control target
= control target key end

     0   :  { %v16651_v1 = vmov 0   ;;  %vm301_vm0 = vcmask 261120   ;;  %s16637_s1 = inlined_call_operand.vmem [shape: bf16[32,512], index: 1, kind: input, shape index: {}]   ;;  %s16638_s0 = inlined_call_operand.vmem [shape: f32[1024,32], index: 0, kind: input, shape index: {}]   ;;  %s16639_s3 = inlined_call_operand.vmem [shape: bf16[512,256], index: 3, kind: input, shape index: {}]   ;;  %s16640_s2 = inlined_call_operand.vmem [shape: f32[1,512], index: 2, kind: input, shape index: {}]   ;;  %s16641_s5 = inlined_call_operand.vmem [shape: bf16[256,128], index: 5, kind: input, shape index: {}]   ;;  %s16642_s7 = inlined_call_operand.vmem [shape: bf16[128,128], index: 7, kind: input, shape index: {}]   ;;  %s16643_s4 = inlined_call_operand.vmem [shape: f32[1,256], index: 4, kind: input, shape index: {}]   ;;  %s16644_s6 = inlined_call_operand.vmem [shape: f32[1,128], index: 6, kind: input, shape index: {}]   ;;  %s16645_s9 = inlined_call_operand.vmem [shape: bf16[128,128], index: 9, kind: input, shape index: {}]   ;;  %s16646_s8 = inlined_call_operand.vmem [shape: f32[1,128], index: 8, kind: input, shape index: {}]   ;;  %s16647_s10 = inlined_call_operand.vmem [shape: f32[1,128], index: 10, kind: input, shape index: {}]   ;;  %s16648_s11 = inlined_call_operand.vmem [shape: bf16[1024,128], index: 11, kind: output, shape index: {}]  }
   0x1   :  { %v10773_v0 = vld [vmem:[%s16637_s1 + $0x4] ss:$16 sps:$4 sm:$0xff]   ;;  %526 = vmatprep.mubr.bf16.mxu0 %v16651_v1  ;;  %1199 = vmatprep.mubr.bf16.mxu1 %v16651_v1  ;;  %v10775_v2 = vld [vmem:[%s16637_s1] ss:$16 sps:$4 sm:$0xff]   ;;  %v40_v6 = vld [vmem:[%s16638_s0 + $0x8] sm:$0xff] }
   0x2   :  { %494 = vmatprep.subr.bf16.mxu0 %v10773_v0  ;;  %v10776_v3 = vld [vmem:[%s16637_s1 + $0x24] ss:$16 sps:$4 sm:$0xff]   ;;  %v10778_v4 = vld [vmem:[%s16637_s1 + $0x20] ss:$16 sps:$4 sm:$0xff]   ;;  %v42_v12 = vld [vmem:[%s16638_s0 + $0x18] sm:$0xff] }
   0x3   :  { %v39_v5 = vld [vmem:[%s16638_s0] sm:$0xff]  ;;  %495 = vmatpush1.bf16.msra.mxu0 %v10775_v2  ;;  %v10784_v10 = vld [vmem:[%s16639_s3 + $0x14] ss:$8 sps:$4 sm:$0xff]   ;;  %v10782_v13 = vld [vmem:[%s16639_s3 + $0x10] ss:$8 sps:$4 sm:$0xff]  }
   0x4   :  { %496 = vmatprep.subr.bf16.mxu0 %v10776_v3  ;;  %v10781_v7 = vld [vmem:[%s16639_s3 + $0x4] ss:$8 sps:$4 sm:$0xff]   ;;  %v11513_v8 = vpack.c.bf16 %v40_v6, %v39_v5  ;;  %v10779_v9 = vld [vmem:[%s16639_s3] ss:$8 sps:$4 sm:$0xff]   ;;  %v41_v11 = vld [vmem:[%s16638_s0 + $0x10] sm:$0xff] }
   0x5   :  { %v10787_v14 = vld [vmem:[%s16639_s3 + $0x24] ss:$8 sps:$4 sm:$0xff]   ;;  %v11536_v15 = vpack.c.bf16 %v42_v12, %v41_v11  ;;  %v10785_v16 = vld [vmem:[%s16639_s3 + $0x20] ss:$8 sps:$4 sm:$0xff]   ;;  %v10790_v17 = vld [vmem:[%s16639_s3 + $0x34] ss:$8 sps:$4 sm:$0xff]  }
   0x6   :  { %v43_v18 = vld [vmem:[%s16638_s0 + $0x20] sm:$0xff]  ;;  %v44_v19 = vld [vmem:[%s16638_s0 + $0x28] sm:$0xff]  ;;  %v10788_v20 = vld [vmem:[%s16639_s3 + $0x30] ss:$8 sps:$4 sm:$0xff]  }
   0x7   :  { %497 = vmatpush1.bf16.msra.mxu0 %v10778_v4  ;;  %v10793_v21 = vld [vmem:[%s16639_s3 + $0x44] ss:$8 sps:$4 sm:$0xff]   ;;  %v10791_v22 = vld [vmem:[%s16639_s3 + $0x40] ss:$8 sps:$4 sm:$0xff]   ;;  %v11562_v23 = vpack.c.bf16 %v44_v19, %v43_v18  ;;  %v45_v24 = vld [vmem:[%s16638_s0 + $0x30] sm:$0xff] }
   0x8   :  { %3004 = vmatprep.subr.bf16.mxu0 %v10781_v7  ;;  %v46_v25 = vld [vmem:[%s16638_s0 + $0x38] sm:$0xff]  ;;  %v47_v27 = vld [vmem:[%s16638_s0 + $0x40] sm:$0xff]  ;;  %v48_v28 = vld [vmem:[%s16638_s0 + $0x48] sm:$0xff] }
   0x9   :  { %v11573_v26 = vpack.c.bf16 %v46_v25, %v45_v24  ;;  %v11584_v29 = vpack.c.bf16 %v48_v28, %v47_v27  ;;  %v10794_v30 = vld [vmem:[%s16639_s3 + $0x50] ss:$8 sps:$4 sm:$0xff]   ;;  %v10796_v31 = vld [vmem:[%s16639_s3 + $0x54] ss:$8 sps:$4 sm:$0xff]   ;;  %v51_v35 = vld [vmem:[%s16638_s0 + $0x60] sm:$0xff] }
   0xa   :  { %8962 = vmatmul.mubr.msk.bf16.vlgmr.msra.gmra.mrb[0].mxu0 %vm301_vm0, %v11513_v8  ;;  %v49_v32 = vld [vmem:[%s16638_s0 + $0x50] sm:$0xff]  ;;  %v50_v33 = vld [vmem:[%s16638_s0 + $0x58] sm:$0xff]  ;;  %v52_v36 = vld [vmem:[%s16638_s0 + $0x68] sm:$0xff] }
   0xb   :  { %3005 = vmatpush1.bf16.msra.mxu0 %v10779_v9  ;;  %536 = vmatprep.mubr.bf16.mxu0 %v16651_v1  ;;  %v11601_v34 = vpack.c.bf16 %v50_v33, %v49_v32  ;;  %v11612_v37 = vpack.c.bf16 %v52_v36, %v51_v35  ;;  %v53_v38 = vld [vmem:[%s16638_s0 + $0x70] sm:$0xff]  ;;  %v54_v39 = vld [vmem:[%s16638_s0 + $0x78] sm:$0xff]  ;;  %v55_v41 = vld [vmem:[%s16638_s0 + $0x80] sm:$0xff] }
   0xc   :  { %3006 = vmatprep.subr.bf16.mxu0 %v10784_v10  ;;  %v11623_v40 = vpack.c.bf16 %v54_v39, %v53_v38  ;;  %v56_v42 = vld [vmem:[%s16638_s0 + $0x88] sm:$0xff]  ;;  %v57_v46 = vld [vmem:[%s16638_s0 + $0x90] sm:$0xff]  ;;  %v58_v47 = vld [vmem:[%s16638_s0 + $0x98] sm:$0xff] }
   0xd   :  { %16887 = vst [vmem:[#allocation2_spill] sm:$0xff] %v11612_v37  ;;  %v11634_v43 = vpack.c.bf16 %v56_v42, %v55_v41  ;;  %v10797_v44 = vld [vmem:[%s16639_s3 + $0x60] ss:$8 sps:$4 sm:$0xff]   ;;  %v10799_v45 = vld [vmem:[%s16639_s3 + $0x64] ss:$8 sps:$4 sm:$0xff]   ;;  %v11651_v48 = vpack.c.bf16 %v58_v47, %v57_v46  ;;  %v61_v52 = vld [vmem:[%s16638_s0 + $0xb0] sm:$0xff] }
   0xe   :  { %16888 = vst [vmem:[#allocation3_spill] sm:$0xff] %v11623_v40  ;;  %v59_v49 = vld [vmem:[%s16638_s0 + $0xa0] sm:$0xff]  ;;  %v60_v50 = vld [vmem:[%s16638_s0 + $0xa8] sm:$0xff]  ;;  %v62_v53 = vld [vmem:[%s16638_s0 + $0xb8] sm:$0xff] }
   0xf   :  { %3007 = vmatpush1.bf16.msra.mxu0 %v10782_v13  ;;  %16889 = vst [vmem:[#allocation4_spill] sm:$0xff] %v11634_v43  ;;  %16890 = vst [vmem:[#allocation5_spill] sm:$0xff] %v11651_v48  ;;  %v11662_v51 = vpack.c.bf16 %v60_v50, %v59_v49  ;;  %v11673_v54 = vpack.c.bf16 %v62_v53, %v61_v52  ;;  %v63_v55 = vld [vmem:[%s16638_s0 + $0xc0] sm:$0xff]  ;;  %v64_v56 = vld [vmem:[%s16638_s0 + $0xc8] sm:$0xff]  ;;  %v241_v53 = vlaneseq }
  0x10   :  { %3008 = vmatprep.subr.bf16.mxu0 %v10787_v14  ;;  %v11684_v57 = vpack.c.bf16 %v64_v56, %v63_v55  ;;  %v65_v58 = vld [vmem:[%s16638_s0 + $0xd0] sm:$0xff]  ;;  %v66_v59 = vld [vmem:[%s16638_s0 + $0xd8] sm:$0xff]  ;;  %v67_v63 = vld [vmem:[%s16638_s0 + $0xe0] sm:$0xff] }
  0x11   :  { %16891 = vst [vmem:[#allocation6_spill] sm:$0xff] %v11662_v51  ;;  %16892 = vst [vmem:[#allocation7_spill] sm:$0xff] %v11673_v54  ;;  %v10800_v60 = vld [vmem:[%s16639_s3 + $0x70] ss:$8 sps:$4 sm:$0xff]   ;;  %v10802_v61 = vld [vmem:[%s16639_s3 + $0x74] ss:$8 sps:$4 sm:$0xff]   ;;  %v11701_v62 = vpack.c.bf16 %v66_v59, %v65_v58 }
  0x12   :  { %8963 = vmatmul.mubr.msk.bf16.gmra.mrb[4].mxu0 %vm301_vm0, %v11536_v15  ;;  %16893 = vst [vmem:[#allocation8_spill] sm:$0xff] %v11684_v57  ;;  %v68_v0 = vld [vmem:[%s16638_s0 + $0xe8] sm:$0xff]  ;;  %v69_v3 = vld [vmem:[%s16638_s0 + $0xf0] sm:$0xff]  ;;  %v70_v4 = vld [vmem:[%s16638_s0 + $0xf8] sm:$0xff]  ;;  %v11855_v55 = vshrl.u32 %v241_v53, 7 }
  0x13   :  { %546 = vmatprep.mubr.bf16.mxu0 %v16651_v1  ;;  %3009 = vmatpush1.bf16.msra.mxu0 %v10785_v16  ;;  %16894 = vst [vmem:[#allocation9_spill] sm:$0xff] %v11701_v62  ;;  %v11712_v2 = vpack.c.bf16 %v68_v0, %v67_v63  ;;  %v11723_v5 = vpack.c.bf16 %v70_v4, %v69_v3  ;;  %v71_v6 = vld [vmem:[%s16638_s0 + $0x100] sm:$0xff]  ;;  %v72_v7 = vld [vmem:[%s16638_s0 + $0x108] sm:$0xff]  ;;  %v73_v10 = vld [vmem:[%s16638_s0 + $0x110] sm:$0xff] }
  0x14   :  { %3010 = vmatprep.subr.bf16.mxu0 %v10790_v17  ;;  %v11734_v9 = vpack.c.bf16 %v72_v7, %v71_v6  ;;  %v74_v11 = vld [vmem:[%s16638_s0 + $0x118] sm:$0xff]  ;;  %v10803_v12 = vld [vmem:[%s16639_s3 + $0x80] ss:$8 sps:$4 sm:$0xff]   ;;  %v10805_v13 = vld [vmem:[%s16639_s3 + $0x84] ss:$8 sps:$4 sm:$0xff]   ;;  %16907 = vst [vmem:[#allocation22_spill] sm:$0xff] %v11855_v55 }
  0x15   :  { %16895 = vst [vmem:[#allocation10_spill] sm:$0xff] %v11712_v2  ;;  %16896 = vst [vmem:[#allocation11_spill] sm:$0xff] %v11723_v5  ;;  %v11751_v14 = vpack.c.bf16 %v74_v11, %v73_v10  ;;  %v75_v16 = vld [vmem:[%s16638_s0 + $0x120] sm:$0xff]  ;;  %v76_v17 = vld [vmem:[%s16638_s0 + $0x128] sm:$0xff]  ;;  %v16649_v63 = vsub.s32 1, %v11855_v55 }
  0x16   :  { %16897 = vst [vmem:[#allocation12_spill] sm:$0xff] %v11734_v9  ;;  %v11762_v18 = vpack.c.bf16 %v76_v17, %v75_v16  ;;  %v77_v19 = vld [vmem:[%s16638_s0 + $0x130] sm:$0xff]  ;;  %v80_v24 = vld [vmem:[%s16638_s0 + $0x148] sm:$0xff]  ;;  %v82_v28 = vld [vmem:[%s16638_s0 + $0x158] sm:$0xff] }
  0x17   :  { %3011 = vmatpush1.bf16.msra.mxu0 %v10788_v20  ;;  %16898 = vst [vmem:[#allocation13_spill] sm:$0xff] %v11751_v14  ;;  %v78_v20 = vld [vmem:[%s16638_s0 + $0x138] sm:$0xff]  ;;  %v81_v27 = vld [vmem:[%s16638_s0 + $0x150] sm:$0xff]  ;;  %v83_v33 = vld [vmem:[%s16638_s0 + $0x160] sm:$0xff] }
  0x18   :  { %3012 = vmatprep.subr.bf16.mxu0 %v10793_v21  ;;  %16899 = vst [vmem:[#allocation14_spill] sm:$0xff] %v11762_v18  ;;  %v11773_v21 = vpack.c.bf16 %v78_v20, %v77_v19  ;;  %v11801_v32 = vpack.c.bf16 %v82_v28, %v81_v27  ;;  %v84_v35 = vld [vmem:[%s16638_s0 + $0x168] sm:$0xff]  ;;  %v85_v38 = vld [vmem:[%s16638_s0 + $0x170] sm:$0xff]  ;;  %v86_v39 = vld [vmem:[%s16638_s0 + $0x178] sm:$0xff] }
  0x19   :  { %v11812_v36 = vpack.c.bf16 %v84_v35, %v83_v33  ;;  %v11823_v41 = vpack.c.bf16 %v86_v39, %v85_v38  ;;  %v87_v42 = vld [vmem:[%s16638_s0 + $0x180] sm:$0xff]  ;;  %v89_v46 = vld [vmem:[%s16638_s0 + $0x190] sm:$0xff]  ;;  %v90_v47 = vld [vmem:[%s16638_s0 + $0x198] sm:$0xff] }
  0x1a   :  { %8964 = vmatmul.mubr.msk.bf16.gmra.mrb[8].mxu0 %vm301_vm0, %v11562_v23  ;;  %16900 = vst [vmem:[#allocation15_spill] sm:$0xff] %v11773_v21  ;;  %16902 = vst [vmem:[#allocation17_spill] sm:$0xff] %v11801_v32  ;;  %v10809_v49 = vld [vmem:[%s16639_s3 + $0xa0] ss:$8 sps:$4 sm:$0xff]   ;;  %v10811_v50 = vld [vmem:[%s16639_s3 + $0xa4] ss:$8 sps:$4 sm:$0xff]   ;;  %v11851_v52 = vpack.c.bf16 %v90_v47, %v89_v46 }
  0x1b   :  { %556 = vmatprep.mubr.bf16.mxu0 %v16651_v1  ;;  %3013 = vmatpush1.bf16.msra.mxu0 %v10791_v22  ;;  %v79_v22 = vld [vmem:[%s16638_s0 + $0x140] sm:$0xff]  ;;  %16903 = vst [vmem:[#allocation18_spill] sm:$0xff] %v11812_v36  ;;  %16904 = vst [vmem:[#allocation19_spill] sm:$0xff] %v11823_v41  ;;  %v92_v58 = vld [vmem:[%s16638_s0 + $0x1a8] sm:$0xff] }
  0x1c   :  { %3014 = vmatprep.subr.bf16.mxu0 %v10796_v31  ;;  %v11784_v25 = vpack.c.bf16 %v80_v24, %v79_v22  ;;  %v10808_v31 = vld [vmem:[%s16639_s3 + $0x94] ss:$8 sps:$4 sm:$0xff]   ;;  %16906 = vst [vmem:[#allocation21_spill] sm:$0xff] %v11851_v52  ;;  %v91_v56 = vld [vmem:[%s16638_s0 + $0x1a0] sm:$0xff]  ;;  %v96_v28 = vld [vmem:[%s16638_s0 + $0x1c8] sm:$0xff] }
  0x1d   :  { %v11864_v59 = vpack.c.bf16 %v92_v58, %v91_v56  ;;  %v93_v4 = vld [vmem:[%s16638_s0 + $0x1b0] sm:$0xff]  ;;  %v94_v6 = vld [vmem:[%s16638_s0 + $0x1b8] sm:$0xff]  ;;  %v95_v27 = vld [vmem:[%s16638_s0 + $0x1c0] sm:$0xff] }
  0x1e   :  { %16901 = vst [vmem:[#allocation16_spill] sm:$0xff] %v11784_v25 }
  0x1f   :  { %3015 = vmatpush1.bf16.msra.mxu0 %v10794_v30  ;;  %v10806_v30 = vld [vmem:[%s16639_s3 + $0x90] ss:$8 sps:$4 sm:$0xff]   ;;  %16908 = vst [vmem:[#allocation23_spill] sm:$0xff] %v11864_v59 }
  0x20   :  { %3016 = vmatprep.subr.bf16.mxu0 %v10799_v45 }
  0x22   :  { %8965 = vmatmul.mubr.msk.bf16.gmra.mrb[12].mxu0 %vm301_vm0, %v11573_v26 }
  0x23   :  { %566 = vmatprep.mubr.bf16.mxu0 %v16651_v1  ;;  %3017 = vmatpush1.bf16.msra.mxu0 %v10797_v44  ;;  %v88_v44 = vld [vmem:[%s16638_s0 + $0x188] sm:$0xff] }
  0x24   :  { %3018 = vmatprep.subr.bf16.mxu0 %v10802_v61  ;;  %v11834_v45 = vpack.c.bf16 %v88_v44, %v87_v42  ;;  %v239_v61 = vld [vmem:[%s16640_s2] sm:$0xf]  ;;  %v11908_v44 = vpack.c.bf16 %v96_v28, %v95_v27 }
  0x25   :  { %v11879_v3 = vrot.slane %v239_v61, %v16649_v63 }
  0x26   :  { %16905 = vst [vmem:[#allocation20_spill] sm:$0xff] %v11834_v45  ;;  %16910 = vst [vmem:[#allocation25_spill] sm:$0xff] %v11908_v44 }
  0x27   :  { %3019 = vmatpush1.bf16.msra.mxu0 %v10800_v60  ;;  %v16650_v60 = vsub.s32 0, %v11855_v55 }
  0x28   :  { %3020 = vmatprep.subr.bf16.mxu0 %v10805_v13 }
  0x29   :  { %v11875_v0 = vrot.slane %v239_v61, %v16650_v60  ;;  %v97_v61 = vld [vmem:[%s16638_s0 + $0x1d0] sm:$0xff] }
  0x2a   :  { %8966 = vmatmul.mubr.msk.bf16.gmra.mrb[16].mxu0 %vm301_vm0, %v11584_v29 }
  0x2b   :  { %576 = vmatprep.mubr.bf16.mxu0 %v16651_v1  ;;  %3021 = vmatpush1.bf16.msra.mxu0 %v10803_v12  ;;  %v11889_v12 = vpack.c.bf16 %v94_v6, %v93_v4  ;;  %v98_v4 = vld [vmem:[%s16638_s0 + $0x1d8] sm:$0xff] }
  0x2c   :  { %3022 = vmatprep.subr.bf16.mxu0 %v10808_v31 }
  0x2d   :  { %16909 = vst [vmem:[#allocation24_spill] sm:$0xff] %v11889_v12 }
  0x2f   :  { %3023 = vmatpush1.bf16.msra.mxu0 %v10806_v30 }
  0x30   :  { %3024 = vmatprep.subr.bf16.mxu0 %v10811_v50 }
  0x32   :  { %8967 = vmatmul.mubr.msk.bf16.gmra.mrb[20].mxu0 %vm301_vm0, %v11601_v34 }
  0x33   :  { %586 = vmatprep.mubr.bf16.mxu0 %v16651_v1  ;;  %3025 = vmatpush1.bf16.msra.mxu0 %v10809_v49 }
  0x3a   :  { %8968 = vmatmul.mubr.msk.bf16.gmra.mrb[24].mxu0 %vm301_vm0, %v11612_v37 }
  0x3b   :  { %596 = vmatprep.mubr.bf16.mxu0 %v16651_v1 }
  0x42   :  { %8969 = vmatmul.mubr.msk.bf16.gmra.mrb[28].mxu0 %vm301_vm0, %v11623_v40 }
  0x43   :  { %606 = vmatprep.mubr.bf16.mxu0 %v16651_v1 }
  0x4a   :  { %8970 = vmatmul.mubr.msk.bf16.gmra.mrb[32].mxu0 %vm301_vm0, %v11634_v43 }
  0x4b   :  { %616 = vmatprep.mubr.bf16.mxu0 %v16651_v1 }
  0x52   :  { %8971 = vmatmul.mubr.msk.bf16.gmra.mrb[36].mxu0 %vm301_vm0, %v11651_v48 }
  0x53   :  { %626 = vmatprep.mubr.bf16.mxu0 %v16651_v1 }
  0x5a   :  { %8972 = vmatmul.mubr.msk.bf16.gmra.mrb[40].mxu0 %vm301_vm0, %v11662_v51 }
  0x5b   :  { %636 = vmatprep.mubr.bf16.mxu0 %v16651_v1 }
  0x62   :  { %8973 = vmatmul.mubr.msk.bf16.gmra.mrb[44].mxu0 %vm301_vm0, %v11673_v54 }
  0x63   :  { %646 = vmatprep.mubr.bf16.mxu0 %v16651_v1 }
  0x6a   :  { %8974 = vmatmul.mubr.msk.bf16.gmra.mrb[48].mxu0 %vm301_vm0, %v11684_v57 }
  0x6b   :  { %656 = vmatprep.mubr.bf16.mxu0 %v16651_v1 }
  0x72   :  { %8975 = vmatmul.mubr.msk.bf16.gmra.mrb[52].mxu0 %vm301_vm0, %v11701_v62 }
  0x73   :  { %666 = vmatprep.mubr.bf16.mxu0 %v16651_v1 }
  0x7a   :  { %8976 = vmatmul.mubr.msk.bf16.gmra.mrb[56].mxu0 %vm301_vm0, %v11712_v2 }
  0x7b   :  { %676 = vmatprep.mubr.bf16.mxu0 %v16651_v1 }
  0x82   :  { %8977 = vmatmul.mubr.msk.bf16.gmra.mrb[60].mxu0 %vm301_vm0, %v11723_v5 }
  0x83   :  { %686 = vmatprep.mubr.bf16.mxu0 %v16651_v1 }
  0x8a   :  { %8978 = vmatmul.mubr.msk.bf16.gmra.mrb[64].mxu0 %vm301_vm0, %v11734_v9 }
  0x8b   :  { %696 = vmatprep.mubr.bf16.mxu0 %v16651_v1 }
  0x92   :  { %8979 = vmatmul.mubr.msk.bf16.gmra.mrb[68].mxu0 %vm301_vm0, %v11751_v14 }
  0x93   :  { %706 = vmatprep.mubr.bf16.mxu0 %v16651_v1 }
  0x9a   :  { %8980 = vmatmul.mubr.msk.bf16.gmra.mrb[72].mxu0 %vm301_vm0, %v11762_v18 }
  0x9b   :  { %716 = vmatprep.mubr.bf16.mxu0 %v16651_v1 }
  0xa2   :  { %8981 = vmatmul.mubr.msk.bf16.gmra.mrb[76].mxu0 %vm301_vm0, %v11773_v21 }
  0xa3   :  { %726 = vmatprep.mubr.bf16.mxu0 %v16651_v1 }
  0xaa   :  { %8982 = vmatmul.mubr.msk.bf16.gmra.mrb[80].mxu0 %vm301_vm0, %v11784_v25 }
  0xab   :  { %736 = vmatprep.mubr.bf16.mxu0 %v16651_v1 }
  0xb2   :  { %8983 = vmatmul.mubr.msk.bf16.gmra.mrb[84].mxu0 %vm301_vm0, %v11801_v32 }
  0xb3   :  { %746 = vmatprep.mubr.bf16.mxu0 %v16651_v1 }
  0xba   :  { %8984 = vmatmul.mubr.msk.bf16.gmra.mrb[88].mxu0 %vm301_vm0, %v11812_v36 }
  0xbb   :  { %756 = vmatprep.mubr.bf16.mxu0 %v16651_v1 }
  0xc2   :  { %8985 = vmatmul.mubr.msk.bf16.gmra.mrb[92].mxu0 %vm301_vm0, %v11823_v41 }
  0xc3   :  { %766 = vmatprep.mubr.bf16.mxu0 %v16651_v1 }
  0xca   :  { %8986 = vmatmul.mubr.msk.bf16.gmra.mrb[96].mxu0 %vm301_vm0, %v11834_v45 }
  0xcb   :  { %776 = vmatprep.mubr.bf16.mxu0 %v16651_v1 }
  0xd2   :  { %8987 = vmatmul.mubr.msk.bf16.gmra.mrb[100].mxu0 %vm301_vm0, %v11851_v52 }
  0xd3   :  { %786 = vmatprep.mubr.bf16.mxu0 %v16651_v1 }
  0xda   :  { %8988 = vmatmul.mubr.msk.bf16.gmra.mrb[104].mxu0 %vm301_vm0, %v11864_v59 }
  0xdb   :  { %796 = vmatprep.mubr.bf16.mxu0 %v16651_v1 }
  0xdd   :  { %v528_v7 = vpop.f32.mrb[0].mxu0 }
  0xde   :  { %v529_v10 = vadd.f32 %v528_v7, %v11875_v0  ;;  %v530_v11 = vpop.f32.mrb[1].mxu0 }
  0xdf   :  { %v531_v13 = vadd.f32 %v530_v11, %v11879_v3  ;;  %v532_v16 = vpop.f32.mrb[2].mxu0  ;;  %v10812_v11 = vld [vmem:[%s16639_s3 + $0xb0] ss:$8 sps:$4 sm:$0xff]  }
  0xe0   :  { %v533_v17 = vadd.f32 %v532_v16, %v11875_v0  ;;  %v534_v19 = vpop.f32.mrb[3].mxu0  ;;  %v1840_v22 = vmax.f32 %v529_v10, 0.0 }
  0xe1   :  { %v535_v20 = vadd.f32 %v534_v19, %v11879_v3  ;;  %v1841_v30 = vmax.f32 %v531_v13, 0.0  ;;  %v10814_v13 = vld [vmem:[%s16639_s3 + $0xb4] ss:$8 sps:$4 sm:$0xff]  }
  0xe2   :  { %v1844_v24 = vmax.f32 %v533_v17, 0.0  ;;  %8989 = vmatmul.mubr.msk.bf16.gmra.mrb[108].mxu0 %vm301_vm0, %v11889_v12  ;;  %3026 = vmatprep.subr.bf16.mxu0 %v10814_v13 }
  0xe3   :  { %806 = vmatprep.mubr.bf16.mxu0 %v16651_v1  ;;  %v1845_v31 = vmax.f32 %v535_v20, 0.0  ;;  %3027 = vmatpush1.bf16.msra.mxu0 %v10812_v11 }
  0xe4   :  { %v11903_v33 = vpack.c.bf16 %v1844_v24, %v1840_v22  ;;  %v11933_v22 = vpack.c.bf16 %v98_v4, %v97_v61 }
  0xe5   :  { %v538_v35 = vpop.f32.mrb[4].mxu0  ;;  %v11905_v38 = vpack.c.bf16 %v1845_v31, %v1841_v30 }
  0xe6   :  { %v539_v39 = vadd.f32 %v538_v35, %v11875_v0  ;;  %v540_v42 = vpop.f32.mrb[5].mxu0  ;;  %16911 = vst [vmem:[#allocation26_spill] sm:$0xff] %v11933_v22 }
  0xe7   :  { %v541_v46 = vadd.f32 %v540_v42, %v11879_v3  ;;  %v542_v47 = vpop.f32.mrb[6].mxu0  ;;  %v99_v42 = vld [vmem:[%s16638_s0 + $0x1e0] sm:$0xff] }
  0xe8   :  { %v543_v49 = vadd.f32 %v542_v47, %v11875_v0  ;;  %v544_v50 = vpop.f32.mrb[7].mxu0  ;;  %v1848_v56 = vmax.f32 %v539_v39, 0.0 }
  0xe9   :  { %v545_v53 = vadd.f32 %v544_v50, %v11879_v3  ;;  %v1849_v6 = vmax.f32 %v541_v46, 0.0  ;;  %v100_v46 = vld [vmem:[%s16638_s0 + $0x1e8] sm:$0xff] }
  0xea   :  { %v1852_v58 = vmax.f32 %v543_v49, 0.0  ;;  %8990 = vmatmul.mubr.msk.bf16.gmra.mrb[112].mxu0 %vm301_vm0, %v11908_v44  ;;  %v11952_v4 = vpack.c.bf16 %v100_v46, %v99_v42 }
  0xeb   :  { %816 = vmatprep.mubr.bf16.mxu0 %v16651_v1  ;;  %v1853_v7 = vmax.f32 %v545_v53, 0.0 }
  0xec   :  { %v11922_v10 = vpack.c.bf16 %v1852_v58, %v1848_v56  ;;  %16912 = vst [vmem:[#allocation27_spill] sm:$0xff] %v11952_v4 }
  0xed   :  { %v548_v16 = vpop.f32.mrb[8].mxu0  ;;  %v11930_v17 = vpack.c.bf16 %v1853_v7, %v1849_v6 }
  0xee   :  { %v549_v19 = vadd.f32 %v548_v16, %v11875_v0  ;;  %v550_v20 = vpop.f32.mrb[9].mxu0 }
  0xef   :  { %v551_v24 = vadd.f32 %v550_v20, %v11879_v3  ;;  %v552_v27 = vpop.f32.mrb[10].mxu0 }
  0xf0   :  { %v553_v28 = vadd.f32 %v552_v27, %v11875_v0  ;;  %v554_v30 = vpop.f32.mrb[11].mxu0  ;;  %v1856_v35 = vmax.f32 %v549_v19, 0.0  ;;  %v102_v27 = vld [vmem:[%s16638_s0 + $0x1f8] sm:$0xff] }
  0xf1   :  { %v555_v31 = vadd.f32 %v554_v30, %v11879_v3  ;;  %v1857_v47 = vmax.f32 %v551_v24, 0.0  ;;  %v101_v24 = vld [vmem:[%s16638_s0 + $0x1f0] sm:$0xff] }
  0xf2   :  { %v1860_v39 = vmax.f32 %v553_v28, 0.0  ;;  %8991 = vmatmul.mubr.msk.bf16.gmra.mrb[116].mxu0 %vm301_vm0, %v11933_v22 }
  0xf3   :  { %826 = vmatprep.mubr.bf16.mxu0 %v16651_v1  ;;  %v1861_v49 = vmax.f32 %v555_v31, 0.0 }
  0xf4   :  { %v11947_v50 = vpack.c.bf16 %v1860_v39, %v1856_v35 }
  0xf5   :  { %v558_v53 = vpop.f32.mrb[12].mxu0  ;;  %v11949_v56 = vpack.c.bf16 %v1861_v49, %v1857_v47  ;;  %v11971_v47 = vpack.c.bf16 %v102_v27, %v101_v24 }
  0xf6   :  { %v559_v58 = vadd.f32 %v558_v53, %v11875_v0  ;;  %v560_v61 = vpop.f32.mrb[13].mxu0 }
  0xf7   :  { %v561_v6 = vadd.f32 %v560_v61, %v11879_v3  ;;  %v562_v7 = vpop.f32.mrb[14].mxu0  ;;  %16913 = vst [vmem:[#allocation28_spill] sm:$0xff] %v11971_v47 }
  0xf8   :  { %v563_v11 = vadd.f32 %v562_v7, %v11875_v0  ;;  %v564_v13 = vpop.f32.mrb[15].mxu0  ;;  %v1864_v19 = vmax.f32 %v559_v58, 0.0 }
  0xf9   :  { %v565_v16 = vadd.f32 %v564_v13, %v11879_v3  ;;  %v1865_v28 = vmax.f32 %v561_v6, 0.0  ;;  %v103_v13 = vld [vmem:[%s16638_s0 + $0x200] sm:$0xff] }
  0xfa   :  { %v1868_v20 = vmax.f32 %v563_v11, 0.0  ;;  %8992 = vmatmul.mubr.msk.bf16.gmra.mrb[120].mxu0 %vm301_vm0, %v11952_v4 }
  0xfb   :  { %836 = vmatprep.mubr.bf16.mxu0 %v16651_v1  ;;  %v1869_v30 = vmax.f32 %v565_v16, 0.0  ;;  %v104_v16 = vld [vmem:[%s16638_s0 + $0x208] sm:$0xff] }
  0xfc   :  { %v11966_v31 = vpack.c.bf16 %v1868_v20, %v1864_v19 }
  0xfd   :  { %v568_v35 = vpop.f32.mrb[16].mxu0  ;;  %v11968_v39 = vpack.c.bf16 %v1869_v30, %v1865_v28 }
  0xfe   :  { %v569_v42 = vadd.f32 %v568_v35, %v11875_v0  ;;  %v570_v46 = vpop.f32.mrb[17].mxu0 }
  0xff   :  { %v571_v49 = vadd.f32 %v570_v46, %v11879_v3  ;;  %v572_v53 = vpop.f32.mrb[18].mxu0 }
 0x100   :  { %v573_v58 = vadd.f32 %v572_v53, %v11875_v0  ;;  %v574_v61 = vpop.f32.mrb[19].mxu0  ;;  %v1872_v6 = vmax.f32 %v569_v42, 0.0  ;;  %v11990_v42 = vpack.c.bf16 %v104_v16, %v103_v13 }
 0x101   :  { %v575_v7 = vadd.f32 %v574_v61, %v11879_v3  ;;  %v1873_v19 = vmax.f32 %v571_v49, 0.0 }
 0x102   :  { %v1876_v11 = vmax.f32 %v573_v58, 0.0  ;;  %8993 = vmatmul.mubr.msk.bf16.gmra.mrb[124].mxu0 %vm301_vm0, %v11971_v47  ;;  %16914 = vst [vmem:[#allocation29_spill] sm:$0xff] %v11990_v42 }
 0x103   :  { %846 = vmatprep.mubr.bf16.mxu0 %v16651_v1  ;;  %v1877_v20 = vmax.f32 %v575_v7, 0.0 }
 0x104   :  { %v11985_v24 = vpack.c.bf16 %v1876_v11, %v1872_v6  ;;  %v105_v6 = vld [vmem:[%s16638_s0 + $0x210] sm:$0xff]  ;;  %v106_v11 = vld [vmem:[%s16638_s0 + $0x218] sm:$0xff] }
 0x105   :  { %v578_v27 = vpop.f32.mrb[20].mxu0  ;;  %v11987_v28 = vpack.c.bf16 %v1877_v20, %v1873_v19  ;;  %v10815_v20 = vld [vmem:[%s16639_s3 + $0xc0] ss:$8 sps:$4 sm:$0xff]  }
 0x106   :  { %v579_v30 = vadd.f32 %v578_v27, %v11875_v0  ;;  %v580_v35 = vpop.f32.mrb[21].mxu0  ;;  %v10817_v27 = vld [vmem:[%s16639_s3 + $0xc4] ss:$8 sps:$4 sm:$0xff]  }
 0x107   :  { %v581_v46 = vadd.f32 %v580_v35, %v11879_v3  ;;  %v582_v53 = vpop.f32.mrb[22].mxu0  ;;  %3028 = vmatprep.subr.bf16.mxu0 %v10817_v27 }
 0x108   :  { %v583_v58 = vadd.f32 %v582_v53, %v11875_v0  ;;  %v584_v61 = vpop.f32.mrb[23].mxu0  ;;  %v1880_v49 = vmax.f32 %v579_v30, 0.0  ;;  %3029 = vmatpush1.bf16.msra.mxu0 %v10815_v20 }
 0x109   :  { %v585_v63 = vadd.f32 %v584_v61, %v11879_v3  ;;  %v1881_v13 = vmax.f32 %v581_v46, 0.0  ;;  %v12015_v61 = vpack.c.bf16 %v106_v11, %v105_v6  ;;  %v107_v6 = vld [vmem:[%s16638_s0 + $0x220] sm:$0xff]  ;;  %v108_v11 = vld [vmem:[%s16638_s0 + $0x228] sm:$0xff] }
 0x10a   :  { %v1884_v7 = vmax.f32 %v583_v58, 0.0  ;;  %8994 = vmatmul.mubr.msk.bf16.gmra.mrb[128].mxu0 %vm301_vm0, %v11990_v42 }
 0x10b   :  { %856 = vmatprep.mubr.bf16.mxu0 %v16651_v1  ;;  %v1885_v16 = vmax.f32 %v585_v63, 0.0  ;;  %16915 = vst [vmem:[#allocation30_spill] sm:$0xff] %v12015_v61 }
 0x10c   :  { %v12004_v19 = vpack.c.bf16 %v1884_v7, %v1880_v49 }
 0x10d   :  { %v588_v30 = vpop.f32.mrb[24].mxu0  ;;  %v12012_v35 = vpack.c.bf16 %v1885_v16, %v1881_v13  ;;  %v16916_v13 = vmov 0  }
 0x10e   :  { %v589_v53 = vadd.f32 %v588_v30, %v11875_v0  ;;  %v590_v58 = vpop.f32.mrb[25].mxu0 }
 0x10f   :  { %v591_v63 = vadd.f32 %v590_v58, %v11879_v3  ;;  %v592_v46 = vpop.f32.mrb[26].mxu0 }
 0x110   :  { %v593_v49 = vadd.f32 %v592_v46, %v11875_v0  ;;  %v594_v7 = vpop.f32.mrb[27].mxu0  ;;  %v1888_v1 = vmax.f32 %v589_v53, 0.0 }
 0x111   :  { %v595_v60 = vadd.f32 %v594_v7, %v11879_v3  ;;  %v1889_v16 = vmax.f32 %v591_v63, 0.0 }
 0x112   :  { %v1892_v42 = vmax.f32 %v593_v49, 0.0  ;;  %8995 = vmatmul.mubr.msk.bf16.gmra.mrb[132].mxu0 %vm301_vm0, %v12015_v61  ;;  %v12034_v49 = vpack.c.bf16 %v108_v11, %v107_v6 }
 0x113   :  { %866 = vmatprep.mubr.bf16.mxu0 %v16916_v13  ;;  %v1893_v20 = vmax.f32 %v595_v60, 0.0 }
 0x114   :  { %v12029_v27 = vpack.c.bf16 %v1892_v42, %v1888_v1  ;;  %16917 = vst [vmem:[#allocation31_spill] sm:$0xff] %v12034_v49  ;;  %v109_v1 = vld [vmem:[%s16638_s0 + $0x230] sm:$0xff]  ;;  %v110_v42 = vld [vmem:[%s16638_s0 + $0x238] sm:$0xff] }
 0x115   :  { %v598_v30 = vpop.f32.mrb[28].mxu0  ;;  %v12031_v53 = vpack.c.bf16 %v1893_v20, %v1889_v16 }
 0x116   :  { %v599_v58 = vadd.f32 %v598_v30, %v11875_v0  ;;  %v600_v46 = vpop.f32.mrb[29].mxu0  ;;  %v12053_v30 = vpack.c.bf16 %v110_v42, %v109_v1 }
 0x117   :  { %v601_v7 = vadd.f32 %v600_v46, %v11879_v3  ;;  %v602_v61 = vpop.f32.mrb[30].mxu0 }
 0x118   :  { %v603_v47 = vadd.f32 %v602_v61, %v11875_v0  ;;  %v604_v4 = vpop.f32.mrb[31].mxu0  ;;  %v1896_v63 = vmax.f32 %v599_v58, 0.0  ;;  %16918 = vst [vmem:[#allocation32_spill] sm:$0xff] %v12053_v30 }
 0x119   :  { %v605_v22 = vadd.f32 %v604_v4, %v11879_v3  ;;  %v1897_v6 = vmax.f32 %v601_v7, 0.0 }
 0x11a   :  { %v1900_v60 = vmax.f32 %v603_v47, 0.0  ;;  %8996 = vmatmul.mubr.msk.bf16.gmra.mrb[136].mxu0 %vm301_vm0, %v12034_v49 }
 0x11b   :  { %876 = vmatprep.mubr.bf16.mxu0 %v16916_v13  ;;  %v1901_v61 = vmax.f32 %v605_v22, 0.0 }
 0x11c   :  { %v12048_v11 = vpack.c.bf16 %v1900_v60, %v1896_v63  ;;  %v111_v63 = vld [vmem:[%s16638_s0 + $0x240] sm:$0xff]  ;;  %v112_v60 = vld [vmem:[%s16638_s0 + $0x248] sm:$0xff] }
 0x11d   :  { %v608_v4 = vpop.f32.mrb[32].mxu0  ;;  %v12050_v16 = vpack.c.bf16 %v1901_v61, %v1897_v6 }
 0x11e   :  { %v609_v47 = vadd.f32 %v608_v4, %v11875_v0  ;;  %v610_v20 = vpop.f32.mrb[33].mxu0 }
 0x11f   :  { %v611_v58 = vadd.f32 %v610_v20, %v11879_v3  ;;  %v612_v46 = vpop.f32.mrb[34].mxu0 }
 0x120   :  { %v613_v49 = vadd.f32 %v612_v46, %v11875_v0  ;;  %v614_v44 = vpop.f32.mrb[35].mxu0  ;;  %v1904_v7 = vmax.f32 %v609_v47, 0.0  ;;  %v12072_v47 = vpack.c.bf16 %v112_v60, %v111_v63 }
 0x121   :  { %v615_v12 = vadd.f32 %v614_v44, %v11879_v3  ;;  %v1905_v1 = vmax.f32 %v611_v58, 0.0 }
 0x122   :  { %v1908_v22 = vmax.f32 %v613_v49, 0.0  ;;  %8997 = vmatmul.mubr.msk.bf16.gmra.mrb[140].mxu0 %vm301_vm0, %v12053_v30  ;;  %16919 = vst [vmem:[#allocation33_spill] sm:$0xff] %v12072_v47 }
 0x123   :  { %886 = vmatprep.mubr.bf16.mxu0 %v16916_v13  ;;  %v1909_v42 = vmax.f32 %v615_v12, 0.0 }
 0x124   :  { %v12067_v6 = vpack.c.bf16 %v1908_v22, %v1904_v7  ;;  %v113_v7 = vld [vmem:[%s16638_s0 + $0x250] sm:$0xff]  ;;  %v114_v22 = vld [vmem:[%s16638_s0 + $0x258] sm:$0xff] }
 0x125   :  { %v618_v44 = vpop.f32.mrb[36].mxu0  ;;  %v12069_v61 = vpack.c.bf16 %v1909_v42, %v1905_v1 }
 0x126   :  { %v619_v49 = vadd.f32 %v618_v44, %v11875_v0  ;;  %v620_v4 = vpop.f32.mrb[37].mxu0 }
 0x127   :  { %v621_v20 = vadd.f32 %v620_v4, %v11879_v3  ;;  %v622_v46 = vpop.f32.mrb[38].mxu0 }
 0x128   :  { %v623_v30 = vadd.f32 %v622_v46, %v11875_v0  ;;  %v624_v59 = vpop.f32.mrb[39].mxu0  ;;  %v1912_v58 = vmax.f32 %v619_v49, 0.0  ;;  %v12097_v46 = vpack.c.bf16 %v114_v22, %v113_v7  ;;  %v115_v7 = vld [vmem:[%s16638_s0 + $0x260] sm:$0xff]  ;;  %v116_v22 = vld [vmem:[%s16638_s0 + $0x268] sm:$0xff] }
 0x129   :  { %v625_v55 = vadd.f32 %v624_v59, %v11879_v3  ;;  %v1913_v63 = vmax.f32 %v621_v20, 0.0  ;;  %v10818_v59 = vld [vmem:[%s16639_s3 + $0xd0] ss:$8 sps:$4 sm:$0xff]  }
 0x12a   :  { %v1916_v12 = vmax.f32 %v623_v30, 0.0  ;;  %8998 = vmatmul.mubr.msk.bf16.gmra.mrb[144].mxu0 %vm301_vm0, %v12072_v47  ;;  %v10820_v30 = vld [vmem:[%s16639_s3 + $0xd4] ss:$8 sps:$4 sm:$0xff]   ;;  %16920 = vst [vmem:[#allocation34_spill] sm:$0xff] %v12097_v46 }
 0x12b   :  { %896 = vmatprep.mubr.bf16.mxu0 %v16916_v13  ;;  %v1917_v60 = vmax.f32 %v625_v55, 0.0  ;;  %3030 = vmatprep.subr.bf16.mxu0 %v10820_v30 }
 0x12c   :  { %v12086_v1 = vpack.c.bf16 %v1916_v12, %v1912_v58  ;;  %3031 = vmatpush1.bf16.msra.mxu0 %v10818_v59 }
 0x12d   :  { %v628_v42 = vpop.f32.mrb[40].mxu0  ;;  %v12094_v44 = vpack.c.bf16 %v1917_v60, %v1913_v63 }
 0x12e   :  { %v629_v49 = vadd.f32 %v628_v42, %v11875_v0  ;;  %v630_v4 = vpop.f32.mrb[41].mxu0 }
 0x12f   :  { %v631_v55 = vadd.f32 %v630_v4, %v11879_v3  ;;  %v632_v20 = vpop.f32.mrb[42].mxu0 }
 0x130   :  { %v633_v58 = vadd.f32 %v632_v20, %v11875_v0  ;;  %v634_v12 = vpop.f32.mrb[43].mxu0  ;;  %v1920_v52 = vmax.f32 %v629_v49, 0.0  ;;  %v12116_v20 = vpack.c.bf16 %v116_v22, %v115_v7 }
 0x131   :  { %v635_v47 = vadd.f32 %v634_v12, %v11879_v3  ;;  %v1921_v63 = vmax.f32 %v631_v55, 0.0 }
 0x132   :  { %v1924_v45 = vmax.f32 %v633_v58, 0.0  ;;  %8999 = vmatmul.mubr.msk.bf16.gmra.mrb[148].mxu0 %vm301_vm0, %v12097_v46  ;;  %16921 = vst [vmem:[#allocation35_spill] sm:$0xff] %v12116_v20 }
 0x133   :  { %906 = vmatprep.mubr.bf16.mxu0 %v16916_v13  ;;  %v1925_v60 = vmax.f32 %v635_v47, 0.0 }
 0x134   :  { %v12111_v59 = vpack.c.bf16 %v1924_v45, %v1920_v52  ;;  %v117_v45 = vld [vmem:[%s16638_s0 + $0x270] sm:$0xff]  ;;  %v118_v52 = vld [vmem:[%s16638_s0 + $0x278] sm:$0xff] }
 0x135   :  { %v638_v30 = vpop.f32.mrb[44].mxu0  ;;  %v12113_v42 = vpack.c.bf16 %v1925_v60, %v1921_v63 }
 0x136   :  { %v639_v49 = vadd.f32 %v638_v30, %v11875_v0  ;;  %v640_v4 = vpop.f32.mrb[45].mxu0 }
 0x137   :  { %v641_v58 = vadd.f32 %v640_v4, %v11879_v3  ;;  %v642_v12 = vpop.f32.mrb[46].mxu0 }
 0x138   :  { %v643_v46 = vadd.f32 %v642_v12, %v11875_v0  ;;  %v644_v41 = vpop.f32.mrb[47].mxu0  ;;  %v1928_v55 = vmax.f32 %v639_v49, 0.0  ;;  %v12135_v49 = vpack.c.bf16 %v118_v52, %v117_v45 }
 0x139   :  { %v645_v36 = vadd.f32 %v644_v41, %v11879_v3  ;;  %v1929_v7 = vmax.f32 %v641_v58, 0.0 }
 0x13a   :  { %v1932_v47 = vmax.f32 %v643_v46, 0.0  ;;  %9000 = vmatmul.mubr.msk.bf16.gmra.mrb[152].mxu0 %vm301_vm0, %v12116_v20  ;;  %16922 = vst [vmem:[#allocation36_spill] sm:$0xff] %v12135_v49 }
 0x13b   :  { %916 = vmatprep.mubr.bf16.mxu0 %v16916_v13  ;;  %v1933_v22 = vmax.f32 %v645_v36, 0.0 }
 0x13c   :  { %v12130_v63 = vpack.c.bf16 %v1932_v47, %v1928_v55  ;;  %v119_v55 = vld [vmem:[%s16638_s0 + $0x280] sm:$0xff]  ;;  %v120_v47 = vld [vmem:[%s16638_s0 + $0x288] sm:$0xff] }
 0x13d   :  { %v648_v41 = vpop.f32.mrb[48].mxu0  ;;  %v12132_v60 = vpack.c.bf16 %v1933_v22, %v1929_v7 }
 0x13e   :  { %v649_v46 = vadd.f32 %v648_v41, %v11875_v0  ;;  %v650_v30 = vpop.f32.mrb[49].mxu0 }
 0x13f   :  { %v651_v4 = vadd.f32 %v650_v30, %v11879_v3  ;;  %v652_v12 = vpop.f32.mrb[50].mxu0 }
 0x140   :  { %v653_v20 = vadd.f32 %v652_v12, %v11875_v0  ;;  %v654_v32 = vpop.f32.mrb[51].mxu0  ;;  %v1936_v58 = vmax.f32 %v649_v46, 0.0  ;;  %v12154_v46 = vpack.c.bf16 %v120_v47, %v119_v55 }
 0x141   :  { %v655_v25 = vadd.f32 %v654_v32, %v11879_v3  ;;  %v1937_v45 = vmax.f32 %v651_v4, 0.0 }
 0x142   :  { %v1940_v36 = vmax.f32 %v653_v20, 0.0  ;;  %9001 = vmatmul.mubr.msk.bf16.gmra.mrb[156].mxu0 %vm301_vm0, %v12135_v49  ;;  %16923 = vst [vmem:[#allocation37_spill] sm:$0xff] %v12154_v46 }
 0x143   :  { %926 = vmatprep.mubr.bf16.mxu0 %v16916_v13  ;;  %v1941_v52 = vmax.f32 %v655_v25, 0.0 }
 0x144   :  { %v12149_v7 = vpack.c.bf16 %v1940_v36, %v1936_v58  ;;  %v121_v58 = vld [vmem:[%s16638_s0 + $0x290] sm:$0xff]  ;;  %v122_v36 = vld [vmem:[%s16638_s0 + $0x298] sm:$0xff] }
 0x145   :  { %v658_v32 = vpop.f32.mrb[52].mxu0  ;;  %v12151_v22 = vpack.c.bf16 %v1941_v52, %v1937_v45 }
 0x146   :  { %v659_v20 = vadd.f32 %v658_v32, %v11875_v0  ;;  %v660_v41 = vpop.f32.mrb[53].mxu0 }
 0x147   :  { %v661_v30 = vadd.f32 %v660_v41, %v11879_v3  ;;  %v662_v12 = vpop.f32.mrb[54].mxu0 }
 0x148   :  { %v663_v49 = vadd.f32 %v662_v12, %v11875_v0  ;;  %v664_v21 = vpop.f32.mrb[55].mxu0  ;;  %v1944_v4 = vmax.f32 %v659_v20, 0.0  ;;  %v12179_v12 = vpack.c.bf16 %v122_v36, %v121_v58  ;;  %v123_v58 = vld [vmem:[%s16638_s0 + $0x2a0] sm:$0xff]  ;;  %v124_v36 = vld [vmem:[%s16638_s0 + $0x2a8] sm:$0xff] }
 0x149   :  { %v665_v18 = vadd.f32 %v664_v21, %v11879_v3  ;;  %v1945_v55 = vmax.f32 %v661_v30, 0.0  ;;  %v10821_v21 = vld [vmem:[%s16639_s3 + $0xe0] ss:$8 sps:$4 sm:$0xff]  }
 0x14a   :  { %v1948_v25 = vmax.f32 %v663_v49, 0.0  ;;  %9002 = vmatmul.mubr.msk.bf16.gmra.mrb[160].mxu0 %vm301_vm0, %v12154_v46  ;;  %v10823_v49 = vld [vmem:[%s16639_s3 + $0xe4] ss:$8 sps:$4 sm:$0xff]   ;;  %16924 = vst [vmem:[#allocation38_spill] sm:$0xff] %v12179_v12 }
 0x14b   :  { %936 = vmatprep.mubr.bf16.mxu0 %v16916_v13  ;;  %v1949_v47 = vmax.f32 %v665_v18, 0.0  ;;  %3032 = vmatprep.subr.bf16.mxu0 %v10823_v49 }
 0x14c   :  { %v12168_v45 = vpack.c.bf16 %v1948_v25, %v1944_v4  ;;  %3033 = vmatpush1.bf16.msra.mxu0 %v10821_v21 }
 0x14d   :  { %v668_v52 = vpop.f32.mrb[56].mxu0  ;;  %v12176_v32 = vpack.c.bf16 %v1949_v47, %v1945_v55 }
 0x14e   :  { %v669_v20 = vadd.f32 %v668_v52, %v11875_v0  ;;  %v670_v41 = vpop.f32.mrb[57].mxu0 }
 0x14f   :  { %v671_v18 = vadd.f32 %v670_v41, %v11879_v3  ;;  %v672_v30 = vpop.f32.mrb[58].mxu0 }
 0x150   :  { %v673_v4 = vadd.f32 %v672_v30, %v11875_v0  ;;  %v674_v25 = vpop.f32.mrb[59].mxu0  ;;  %v1952_v14 = vmax.f32 %v669_v20, 0.0  ;;  %v12198_v30 = vpack.c.bf16 %v124_v36, %v123_v58 }
 0x151   :  { %v675_v46 = vadd.f32 %v674_v25, %v11879_v3  ;;  %v1953_v55 = vmax.f32 %v671_v18, 0.0 }
 0x152   :  { %v1956_v9 = vmax.f32 %v673_v4, 0.0  ;;  %9003 = vmatmul.mubr.msk.bf16.gmra.mrb[164].mxu0 %vm301_vm0, %v12179_v12  ;;  %16925 = vst [vmem:[#allocation39_spill] sm:$0xff] %v12198_v30 }
 0x153   :  { %946 = vmatprep.mubr.bf16.mxu0 %v16916_v13  ;;  %v1957_v47 = vmax.f32 %v675_v46, 0.0 }
 0x154   :  { %v12193_v21 = vpack.c.bf16 %v1956_v9, %v1952_v14  ;;  %v125_v9 = vld [vmem:[%s16638_s0 + $0x2b0] sm:$0xff]  ;;  %v126_v14 = vld [vmem:[%s16638_s0 + $0x2b8] sm:$0xff] }
 0x155   :  { %v678_v49 = vpop.f32.mrb[60].mxu0  ;;  %v12195_v52 = vpack.c.bf16 %v1957_v47, %v1953_v55 }
 0x156   :  { %v679_v20 = vadd.f32 %v678_v49, %v11875_v0  ;;  %v680_v41 = vpop.f32.mrb[61].mxu0 }
 0x157   :  { %v681_v4 = vadd.f32 %v680_v41, %v11879_v3  ;;  %v682_v25 = vpop.f32.mrb[62].mxu0 }
 0x158   :  { %v683_v12 = vadd.f32 %v682_v25, %v11875_v0  ;;  %v684_v5 = vpop.f32.mrb[63].mxu0  ;;  %v1960_v18 = vmax.f32 %v679_v20, 0.0  ;;  %v12217_v20 = vpack.c.bf16 %v126_v14, %v125_v9 }
 0x159   :  { %v685_v2 = vadd.f32 %v684_v5, %v11879_v3  ;;  %v1961_v58 = vmax.f32 %v681_v4, 0.0 }
 0x15a   :  { %v1964_v46 = vmax.f32 %v683_v12, 0.0  ;;  %9004 = vmatmul.mubr.msk.bf16.gmra.mrb[168].mxu0 %vm301_vm0, %v12198_v30  ;;  %16926 = vst [vmem:[#allocation40_spill] sm:$0xff] %v12217_v20 }
 0x15b   :  { %956 = vmatprep.mubr.bf16.mxu0 %v16916_v13  ;;  %v1965_v36 = vmax.f32 %v685_v2, 0.0 }
 0x15c   :  { %v12212_v55 = vpack.c.bf16 %v1964_v46, %v1960_v18  ;;  %v127_v18 = vld [vmem:[%s16638_s0 + $0x2c0] sm:$0xff]  ;;  %v128_v46 = vld [vmem:[%s16638_s0 + $0x2c8] sm:$0xff] }
 0x15d   :  { %v688_v5 = vpop.f32.mrb[64].mxu0  ;;  %v12214_v47 = vpack.c.bf16 %v1965_v36, %v1961_v58 }
 0x15e   :  { %v689_v12 = vadd.f32 %v688_v5, %v11875_v0  ;;  %v690_v49 = vpop.f32.mrb[65].mxu0 }
 0x15f   :  { %v691_v41 = vadd.f32 %v690_v49, %v11879_v3  ;;  %v692_v25 = vpop.f32.mrb[66].mxu0 }
 0x160   :  { %v693_v30 = vadd.f32 %v692_v25, %v11875_v0  ;;  %v694_v62 = vpop.f32.mrb[67].mxu0  ;;  %v1968_v4 = vmax.f32 %v689_v12, 0.0  ;;  %v12236_v12 = vpack.c.bf16 %v128_v46, %v127_v18 }
 0x161   :  { %v695_v57 = vadd.f32 %v694_v62, %v11879_v3  ;;  %v1969_v9 = vmax.f32 %v691_v41, 0.0 }
 0x162   :  { %v1972_v2 = vmax.f32 %v693_v30, 0.0  ;;  %9005 = vmatmul.mubr.msk.bf16.gmra.mrb[172].mxu0 %vm301_vm0, %v12217_v20  ;;  %16927 = vst [vmem:[#allocation41_spill] sm:$0xff] %v12236_v12 }
 0x163   :  { %966 = vmatprep.mubr.bf16.mxu0 %v16916_v13  ;;  %v1973_v14 = vmax.f32 %v695_v57, 0.0 }
 0x164   :  { %v12231_v58 = vpack.c.bf16 %v1972_v2, %v1968_v4  ;;  %v129_v4 = vld [vmem:[%s16638_s0 + $0x2d0] sm:$0xff]  ;;  %v130_v2 = vld [vmem:[%s16638_s0 + $0x2d8] sm:$0xff] }
 0x165   :  { %v698_v62 = vpop.f32.mrb[68].mxu0  ;;  %v12233_v36 = vpack.c.bf16 %v1973_v14, %v1969_v9 }
 0x166   :  { %v699_v30 = vadd.f32 %v698_v62, %v11875_v0  ;;  %v700_v5 = vpop.f32.mrb[69].mxu0 }
 0x167   :  { %v701_v49 = vadd.f32 %v700_v5, %v11879_v3  ;;  %v702_v25 = vpop.f32.mrb[70].mxu0 }
 0x168   :  { %v703_v20 = vadd.f32 %v702_v25, %v11875_v0  ;;  %v704_v54 = vpop.f32.mrb[71].mxu0  ;;  %v1976_v41 = vmax.f32 %v699_v30, 0.0  ;;  %v12261_v25 = vpack.c.bf16 %v130_v2, %v129_v4  ;;  %v131_v4 = vld [vmem:[%s16638_s0 + $0x2e0] sm:$0xff]  ;;  %v132_v2 = vld [vmem:[%s16638_s0 + $0x2e8] sm:$0xff] }
 0x169   :  { %v705_v51 = vadd.f32 %v704_v54, %v11879_v3  ;;  %v1977_v18 = vmax.f32 %v701_v49, 0.0  ;;  %v10824_v54 = vld [vmem:[%s16639_s3 + $0xf0] ss:$8 sps:$4 sm:$0xff]  }
 0x16a   :  { %v1980_v57 = vmax.f32 %v703_v20, 0.0  ;;  %9006 = vmatmul.mubr.msk.bf16.gmra.mrb[176].mxu0 %vm301_vm0, %v12236_v12  ;;  %v10826_v20 = vld [vmem:[%s16639_s3 + $0xf4] ss:$8 sps:$4 sm:$0xff]   ;;  %16928 = vst [vmem:[#allocation42_spill] sm:$0xff] %v12261_v25 }
 0x16b   :  { %976 = vmatprep.mubr.bf16.mxu0 %v16916_v13  ;;  %v1981_v46 = vmax.f32 %v705_v51, 0.0  ;;  %3034 = vmatprep.subr.bf16.mxu0 %v10826_v20 }
 0x16c   :  { %v12250_v9 = vpack.c.bf16 %v1980_v57, %v1976_v41  ;;  %3035 = vmatpush1.bf16.msra.mxu0 %v10824_v54 }
 0x16d   :  { %v708_v14 = vpop.f32.mrb[72].mxu0  ;;  %v12258_v62 = vpack.c.bf16 %v1981_v46, %v1977_v18 }
 0x16e   :  { %v709_v30 = vadd.f32 %v708_v14, %v11875_v0  ;;  %v710_v5 = vpop.f32.mrb[73].mxu0 }
 0x16f   :  { %v711_v51 = vadd.f32 %v710_v5, %v11879_v3  ;;  %v712_v49 = vpop.f32.mrb[74].mxu0 }
 0x170   :  { %v713_v41 = vadd.f32 %v712_v49, %v11875_v0  ;;  %v714_v57 = vpop.f32.mrb[75].mxu0  ;;  %v1984_v48 = vmax.f32 %v709_v30, 0.0  ;;  %v12280_v49 = vpack.c.bf16 %v132_v2, %v131_v4 }
 0x171   :  { %v715_v12 = vadd.f32 %v714_v57, %v11879_v3  ;;  %v1985_v18 = vmax.f32 %v711_v51, 0.0 }
 0x172   :  { %v1988_v43 = vmax.f32 %v713_v41, 0.0  ;;  %9007 = vmatmul.mubr.msk.bf16.gmra.mrb[180].mxu0 %vm301_vm0, %v12261_v25  ;;  %16931 = vst [vmem:[#allocation45_spill] sm:$0xff] %v12280_v49 }
 0x173   :  { %986 = vmatprep.mubr.bf16.mxu0 %v16916_v13  ;;  %v1989_v46 = vmax.f32 %v715_v12, 0.0 }
 0x174   :  { %v12275_v54 = vpack.c.bf16 %v1988_v43, %v1984_v48  ;;  %v133_v43 = vld [vmem:[%s16638_s0 + $0x2f0] sm:$0xff]  ;;  %v134_v48 = vld [vmem:[%s16638_s0 + $0x2f8] sm:$0xff] }
 0x175   :  { %v718_v20 = vpop.f32.mrb[76].mxu0  ;;  %v12277_v14 = vpack.c.bf16 %v1989_v46, %v1985_v18 }
 0x176   :  { %16929 = vst [vmem:[#allocation43_spill] sm:$0xff] %v12275_v54  ;;  %v719_v30 = vadd.f32 %v718_v20, %v11875_v0  ;;  %v720_v5 = vpop.f32.mrb[77].mxu0 }
 0x177   :  { %16930 = vst [vmem:[#allocation44_spill] sm:$0xff] %v12277_v14  ;;  %v721_v41 = vadd.f32 %v720_v5, %v11879_v3  ;;  %v722_v57 = vpop.f32.mrb[78].mxu0 }
 0x178   :  { %v723_v25 = vadd.f32 %v722_v57, %v11875_v0  ;;  %v724_v40 = vpop.f32.mrb[79].mxu0  ;;  %v1992_v51 = vmax.f32 %v719_v30, 0.0  ;;  %v12299_v30 = vpack.c.bf16 %v134_v48, %v133_v43 }
 0x179   :  { %v725_v37 = vadd.f32 %v724_v40, %v11879_v3  ;;  %v1993_v4 = vmax.f32 %v721_v41, 0.0 }
 0x17a   :  { %v1996_v12 = vmax.f32 %v723_v25, 0.0  ;;  %9008 = vmatmul.mubr.msk.bf16.gmra.mrb[184].mxu0 %vm301_vm0, %v12280_v49  ;;  %16934 = vst [vmem:[#allocation48_spill] sm:$0xff] %v12299_v30 }
 0x17b   :  { %996 = vmatprep.mubr.bf16.mxu0 %v16916_v13  ;;  %v1997_v2 = vmax.f32 %v725_v37, 0.0 }
 0x17c   :  { %v12294_v18 = vpack.c.bf16 %v1996_v12, %v1992_v51  ;;  %v135_v51 = vld [vmem:[%s16638_s0 + $0x300] sm:$0xff]  ;;  %v136_v12 = vld [vmem:[%s16638_s0 + $0x308] sm:$0xff] }
 0x17d   :  { %v728_v40 = vpop.f32.mrb[80].mxu0  ;;  %v12296_v46 = vpack.c.bf16 %v1997_v2, %v1993_v4 }
 0x17e   :  { %16932 = vst [vmem:[#allocation46_spill] sm:$0xff] %v12294_v18  ;;  %v729_v25 = vadd.f32 %v728_v40, %v11875_v0  ;;  %v730_v20 = vpop.f32.mrb[81].mxu0 }
 0x17f   :  { %16933 = vst [vmem:[#allocation47_spill] sm:$0xff] %v12296_v46  ;;  %v731_v5 = vadd.f32 %v730_v20, %v11879_v3  ;;  %v732_v57 = vpop.f32.mrb[82].mxu0 }
 0x180   :  { %v733_v49 = vadd.f32 %v732_v57, %v11875_v0  ;;  %v734_v54 = vpop.f32.mrb[83].mxu0  ;;  %v2000_v41 = vmax.f32 %v729_v25, 0.0  ;;  %v12318_v25 = vpack.c.bf16 %v136_v12, %v135_v51 }
 0x181   :  { %v735_v14 = vadd.f32 %v734_v54, %v11879_v3  ;;  %v2001_v43 = vmax.f32 %v731_v5, 0.0 }
 0x182   :  { %v2004_v37 = vmax.f32 %v733_v49, 0.0  ;;  %9009 = vmatmul.mubr.msk.bf16.gmra.mrb[188].mxu0 %vm301_vm0, %v12299_v30  ;;  %16937 = vst [vmem:[#allocation51_spill] sm:$0xff] %v12318_v25 }
 0x183   :  { %1006 = vmatprep.mubr.bf16.mxu0 %v16916_v13  ;;  %v2005_v48 = vmax.f32 %v735_v14, 0.0 }
 0x184   :  { %v12313_v4 = vpack.c.bf16 %v2004_v37, %v2000_v41  ;;  %v137_v41 = vld [vmem:[%s16638_s0 + $0x310] sm:$0xff]  ;;  %v138_v37 = vld [vmem:[%s16638_s0 + $0x318] sm:$0xff] }
 0x185   :  { %v738_v54 = vpop.f32.mrb[84].mxu0  ;;  %v12315_v2 = vpack.c.bf16 %v2005_v48, %v2001_v43 }
 0x186   :  { %16935 = vst [vmem:[#allocation49_spill] sm:$0xff] %v12313_v4  ;;  %v739_v49 = vadd.f32 %v738_v54, %v11875_v0  ;;  %v740_v40 = vpop.f32.mrb[85].mxu0 }
 0x187   :  { %16936 = vst [vmem:[#allocation50_spill] sm:$0xff] %v12315_v2  ;;  %v741_v20 = vadd.f32 %v740_v40, %v11879_v3  ;;  %v742_v57 = vpop.f32.mrb[86].mxu0  ;;  %v12340_v40 = vpack.c.bf16 %v138_v37, %v137_v41  ;;  %v139_v41 = vld [vmem:[%s16638_s0 + $0x320] sm:$0xff]  ;;  %v140_v37 = vld [vmem:[%s16638_s0 + $0x328] sm:$0xff] }
 0x188   :  { %v743_v30 = vadd.f32 %v742_v57, %v11875_v0  ;;  %v744_v18 = vpop.f32.mrb[87].mxu0  ;;  %v2008_v5 = vmax.f32 %v739_v49, 0.0 }
 0x189   :  { %v745_v46 = vadd.f32 %v744_v18, %v11879_v3  ;;  %v2009_v51 = vmax.f32 %v741_v20, 0.0  ;;  %v10829_v18 = vld [vmem:[%s16639_s3 + $0x104] ss:$8 sps:$4 sm:$0xff]   ;;  %16940 = vst [vmem:[#allocation54_spill] sm:$0xff] %v12340_v40 }
 0x18a   :  { %v2012_v14 = vmax.f32 %v743_v30, 0.0  ;;  %9010 = vmatmul.mubr.msk.bf16.gmra.mrb[192].mxu0 %vm301_vm0, %v12318_v25  ;;  %3677 = vmatprep.subr.bf16.mxu0 %v10829_v18 }
 0x18b   :  { %1016 = vmatprep.mubr.bf16.mxu0 %v16916_v13  ;;  %v2013_v12 = vmax.f32 %v745_v46, 0.0 }
 0x18c   :  { %v12332_v43 = vpack.c.bf16 %v2012_v14, %v2008_v5 }
 0x18d   :  { %v748_v30 = vpop.f32.mrb[88].mxu0  ;;  %v12337_v48 = vpack.c.bf16 %v2013_v12, %v2009_v51 }
 0x18e   :  { %16938 = vst [vmem:[#allocation52_spill] sm:$0xff] %v12332_v43  ;;  %v749_v54 = vadd.f32 %v748_v30, %v11875_v0  ;;  %v750_v49 = vpop.f32.mrb[89].mxu0 }
 0x18f   :  { %16939 = vst [vmem:[#allocation53_spill] sm:$0xff] %v12337_v48  ;;  %v751_v57 = vadd.f32 %v750_v49, %v11879_v3  ;;  %v752_v25 = vpop.f32.mrb[90].mxu0 }
 0x190   :  { %v753_v46 = vadd.f32 %v752_v25, %v11875_v0  ;;  %v754_v20 = vpop.f32.mrb[91].mxu0  ;;  %v2016_v14 = vmax.f32 %v749_v54, 0.0 }
 0x191   :  { %v755_v5 = vadd.f32 %v754_v20, %v11879_v3  ;;  %v2017_v51 = vmax.f32 %v751_v57, 0.0 }
 0x192   :  { %v2020_v43 = vmax.f32 %v753_v46, 0.0  ;;  %9011 = vmatmul.mubr.msk.bf16.gmra.mrb[196].mxu0 %vm301_vm0, %v12340_v40  ;;  %v12359_v46 = vpack.c.bf16 %v140_v37, %v139_v41 }
 0x193   :  { %1026 = vmatprep.mubr.bf16.mxu0 %v16916_v13  ;;  %v2021_v25 = vmax.f32 %v755_v5, 0.0 }
 0x194   :  { %v12354_v12 = vpack.c.bf16 %v2020_v43, %v2016_v14  ;;  %16943 = vst [vmem:[#allocation57_spill] sm:$0xff] %v12359_v46  ;;  %v141_v43 = vld [vmem:[%s16638_s0 + $0x330] sm:$0xff]  ;;  %v142_v14 = vld [vmem:[%s16638_s0 + $0x338] sm:$0xff] }
 0x195   :  { %v758_v18 = vpop.f32.mrb[92].mxu0  ;;  %v12356_v30 = vpack.c.bf16 %v2021_v25, %v2017_v51 }
 0x196   :  { %16941 = vst [vmem:[#allocation55_spill] sm:$0xff] %v12354_v12  ;;  %v759_v54 = vadd.f32 %v758_v18, %v11875_v0  ;;  %v760_v49 = vpop.f32.mrb[93].mxu0  ;;  %v12378_v18 = vpack.c.bf16 %v142_v14, %v141_v43 }
 0x197   :  { %16942 = vst [vmem:[#allocation56_spill] sm:$0xff] %v12356_v30  ;;  %v761_v20 = vadd.f32 %v760_v49, %v11879_v3  ;;  %v762_v40 = vpop.f32.mrb[94].mxu0 }
 0x198   :  { %v763_v48 = vadd.f32 %v762_v40, %v11875_v0  ;;  %v764_v4 = vpop.f32.mrb[95].mxu0  ;;  %v2024_v57 = vmax.f32 %v759_v54, 0.0  ;;  %16946 = vst [vmem:[#allocation60_spill] sm:$0xff] %v12378_v18 }
 0x199   :  { %v765_v2 = vadd.f32 %v764_v4, %v11879_v3  ;;  %v2025_v41 = vmax.f32 %v761_v20, 0.0 }
 0x19a   :  { %v2028_v5 = vmax.f32 %v763_v48, 0.0  ;;  %9012 = vmatmul.mubr.msk.bf16.gmra.mrb[200].mxu0 %vm301_vm0, %v12359_v46 }
 0x19b   :  { %1036 = vmatprep.mubr.bf16.mxu0 %v16916_v13  ;;  %v2029_v40 = vmax.f32 %v765_v2, 0.0 }
 0x19c   :  { %v12373_v37 = vpack.c.bf16 %v2028_v5, %v2024_v57  ;;  %v143_v57 = vld [vmem:[%s16638_s0 + $0x340] sm:$0xff]  ;;  %v144_v5 = vld [vmem:[%s16638_s0 + $0x348] sm:$0xff] }
 0x19d   :  { %v768_v4 = vpop.f32.mrb[96].mxu0  ;;  %v12375_v51 = vpack.c.bf16 %v2029_v40, %v2025_v41 }
 0x19e   :  { %16944 = vst [vmem:[#allocation58_spill] sm:$0xff] %v12373_v37  ;;  %v769_v48 = vadd.f32 %v768_v4, %v11875_v0  ;;  %v770_v25 = vpop.f32.mrb[97].mxu0 }
 0x19f   :  { %16945 = vst [vmem:[#allocation59_spill] sm:$0xff] %v12375_v51  ;;  %v771_v54 = vadd.f32 %v770_v25, %v11879_v3  ;;  %v772_v49 = vpop.f32.mrb[98].mxu0 }
 0x1a0   :  { %v773_v46 = vadd.f32 %v772_v49, %v11875_v0  ;;  %v774_v12 = vpop.f32.mrb[99].mxu0  ;;  %v2032_v20 = vmax.f32 %v769_v48, 0.0  ;;  %v12397_v48 = vpack.c.bf16 %v144_v5, %v143_v57 }
 0x1a1   :  { %v775_v30 = vadd.f32 %v774_v12, %v11879_v3  ;;  %v2033_v43 = vmax.f32 %v771_v54, 0.0 }
 0x1a2   :  { %v2036_v2 = vmax.f32 %v773_v46, 0.0  ;;  %9013 = vmatmul.mubr.msk.bf16.gmra.mrb[204].mxu0 %vm301_vm0, %v12378_v18  ;;  %16949 = vst [vmem:[#allocation63_spill] sm:$0xff] %v12397_v48 }
 0x1a3   :  { %1046 = vmatprep.mubr.bf16.mxu0 %v16916_v13  ;;  %v2037_v14 = vmax.f32 %v775_v30, 0.0 }
 0x1a4   :  { %v12392_v41 = vpack.c.bf16 %v2036_v2, %v2032_v20  ;;  %v145_v20 = vld [vmem:[%s16638_s0 + $0x350] sm:$0xff]  ;;  %v146_v2 = vld [vmem:[%s16638_s0 + $0x358] sm:$0xff] }
 0x1a5   :  { %v778_v12 = vpop.f32.mrb[100].mxu0  ;;  %v12394_v40 = vpack.c.bf16 %v2037_v14, %v2033_v43 }
 0x1a6   :  { %16947 = vst [vmem:[#allocation61_spill] sm:$0xff] %v12392_v41  ;;  %v779_v46 = vadd.f32 %v778_v12, %v11875_v0  ;;  %v780_v4 = vpop.f32.mrb[101].mxu0 }
 0x1a7   :  { %16948 = vst [vmem:[#allocation62_spill] sm:$0xff] %v12394_v40  ;;  %v781_v25 = vadd.f32 %v780_v4, %v11879_v3  ;;  %v782_v49 = vpop.f32.mrb[102].mxu0 }
 0x1a8   :  { %v783_v18 = vadd.f32 %v782_v49, %v11875_v0  ;;  %v784_v37 = vpop.f32.mrb[103].mxu0  ;;  %v2040_v54 = vmax.f32 %v779_v46, 0.0  ;;  %v12416_v46 = vpack.c.bf16 %v146_v2, %v145_v20 }
 0x1a9   :  { %v785_v51 = vadd.f32 %v784_v37, %v11879_v3  ;;  %v2041_v57 = vmax.f32 %v781_v25, 0.0 }
 0x1aa   :  { %v2044_v30 = vmax.f32 %v783_v18, 0.0  ;;  %9014 = vmatmul.mubr.msk.bf16.gmra.mrb[208].mxu0 %vm301_vm0, %v12397_v48  ;;  %16952 = vst [vmem:[#allocation66_spill] sm:$0xff] %v12416_v46 }
 0x1ab   :  { %1056 = vmatprep.mubr.bf16.mxu0 %v16916_v13  ;;  %v2045_v5 = vmax.f32 %v785_v51, 0.0 }
 0x1ac   :  { %v12411_v43 = vpack.c.bf16 %v2044_v30, %v2040_v54  ;;  %v147_v54 = vld [vmem:[%s16638_s0 + $0x360] sm:$0xff]  ;;  %v148_v30 = vld [vmem:[%s16638_s0 + $0x368] sm:$0xff] }
 0x1ad   :  { %v788_v37 = vpop.f32.mrb[104].mxu0  ;;  %v12413_v14 = vpack.c.bf16 %v2045_v5, %v2041_v57 }
 0x1ae   :  { %16950 = vst [vmem:[#allocation64_spill] sm:$0xff] %v12411_v43  ;;  %v789_v18 = vadd.f32 %v788_v37, %v11875_v0  ;;  %v790_v12 = vpop.f32.mrb[105].mxu0 }
 0x1af   :  { %16951 = vst [vmem:[#allocation65_spill] sm:$0xff] %v12413_v14  ;;  %v791_v4 = vadd.f32 %v790_v12, %v11879_v3  ;;  %v792_v49 = vpop.f32.mrb[106].mxu0 }
 0x1b0   :  { %v793_v48 = vadd.f32 %v792_v49, %v11875_v0  ;;  %v794_v41 = vpop.f32.mrb[107].mxu0  ;;  %v2048_v25 = vmax.f32 %v789_v18, 0.0  ;;  %v12435_v18 = vpack.c.bf16 %v148_v30, %v147_v54 }
 0x1b1   :  { %v795_v40 = vadd.f32 %v794_v41, %v11879_v3  ;;  %v2049_v20 = vmax.f32 %v791_v4, 0.0 }
 0x1b2   :  { %v2052_v51 = vmax.f32 %v793_v48, 0.0  ;;  %9015 = vmatmul.mubr.msk.bf16.gmra.mrb[212].mxu0 %vm301_vm0, %v12416_v46  ;;  %16955 = vst [vmem:[#allocation69_spill] sm:$0xff] %v12435_v18 }
 0x1b3   :  { %1066 = vmatprep.mubr.bf16.mxu0 %v16916_v13  ;;  %v2053_v2 = vmax.f32 %v795_v40, 0.0 }
 0x1b4   :  { %v12430_v57 = vpack.c.bf16 %v2052_v51, %v2048_v25  ;;  %v149_v25 = vld [vmem:[%s16638_s0 + $0x370] sm:$0xff]  ;;  %v150_v51 = vld [vmem:[%s16638_s0 + $0x378] sm:$0xff] }
 0x1b5   :  { %v798_v41 = vpop.f32.mrb[108].mxu0  ;;  %v12432_v5 = vpack.c.bf16 %v2053_v2, %v2049_v20 }
 0x1b6   :  { %16953 = vst [vmem:[#allocation67_spill] sm:$0xff] %v12430_v57  ;;  %v799_v48 = vadd.f32 %v798_v41, %v11875_v0  ;;  %v800_v37 = vpop.f32.mrb[109].mxu0 }
 0x1b7   :  { %16954 = vst [vmem:[#allocation68_spill] sm:$0xff] %v12432_v5  ;;  %v801_v12 = vadd.f32 %v800_v37, %v11879_v3  ;;  %v802_v49 = vpop.f32.mrb[110].mxu0 }
 0x1b8   :  { %v803_v46 = vadd.f32 %v802_v49, %v11875_v0  ;;  %v804_v43 = vpop.f32.mrb[111].mxu0  ;;  %v2056_v4 = vmax.f32 %v799_v48, 0.0  ;;  %v12454_v48 = vpack.c.bf16 %v150_v51, %v149_v25 }
 0x1b9   :  { %v805_v14 = vadd.f32 %v804_v43, %v11879_v3  ;;  %v2057_v54 = vmax.f32 %v801_v12, 0.0 }
 0x1ba   :  { %v2060_v40 = vmax.f32 %v803_v46, 0.0  ;;  %9016 = vmatmul.mubr.msk.bf16.gmra.mrb[216].mxu0 %vm301_vm0, %v12435_v18  ;;  %16958 = vst [vmem:[#allocation72_spill] sm:$0xff] %v12454_v48 }
 0x1bb   :  { %1076 = vmatprep.mubr.bf16.mxu0 %v16916_v13  ;;  %v2061_v30 = vmax.f32 %v805_v14, 0.0 }
 0x1bc   :  { %v12449_v20 = vpack.c.bf16 %v2060_v40, %v2056_v4  ;;  %v151_v4 = vld [vmem:[%s16638_s0 + $0x380] sm:$0xff]  ;;  %v152_v40 = vld [vmem:[%s16638_s0 + $0x388] sm:$0xff] }
 0x1bd   :  { %v808_v43 = vpop.f32.mrb[112].mxu0  ;;  %v12451_v2 = vpack.c.bf16 %v2061_v30, %v2057_v54 }
 0x1be   :  { %16956 = vst [vmem:[#allocation70_spill] sm:$0xff] %v12449_v20  ;;  %v809_v46 = vadd.f32 %v808_v43, %v11875_v0  ;;  %v810_v41 = vpop.f32.mrb[113].mxu0 }
 0x1bf   :  { %16957 = vst [vmem:[#allocation71_spill] sm:$0xff] %v12451_v2  ;;  %v811_v37 = vadd.f32 %v810_v41, %v11879_v3  ;;  %v812_v49 = vpop.f32.mrb[114].mxu0 }
 0x1c0   :  { %v813_v18 = vadd.f32 %v812_v49, %v11875_v0  ;;  %v814_v57 = vpop.f32.mrb[115].mxu0  ;;  %v2064_v12 = vmax.f32 %v809_v46, 0.0  ;;  %v12473_v46 = vpack.c.bf16 %v152_v40, %v151_v4 }
 0x1c1   :  { %v815_v5 = vadd.f32 %v814_v57, %v11879_v3  ;;  %v2065_v25 = vmax.f32 %v811_v37, 0.0 }
 0x1c2   :  { %v2068_v14 = vmax.f32 %v813_v18, 0.0  ;;  %9017 = vmatmul.mubr.msk.bf16.gmra.mrb[220].mxu0 %vm301_vm0, %v12454_v48  ;;  %16961 = vst [vmem:[#allocation75_spill] sm:$0xff] %v12473_v46 }
 0x1c3   :  { %1086 = vmatprep.mubr.bf16.mxu0 %v16916_v13  ;;  %v2069_v51 = vmax.f32 %v815_v5, 0.0 }
 0x1c4   :  { %v12468_v54 = vpack.c.bf16 %v2068_v14, %v2064_v12  ;;  %v153_v12 = vld [vmem:[%s16638_s0 + $0x390] sm:$0xff]  ;;  %v154_v14 = vld [vmem:[%s16638_s0 + $0x398] sm:$0xff] }
 0x1c5   :  { %v818_v57 = vpop.f32.mrb[116].mxu0  ;;  %v12470_v30 = vpack.c.bf16 %v2069_v51, %v2065_v25 }
 0x1c6   :  { %16959 = vst [vmem:[#allocation73_spill] sm:$0xff] %v12468_v54  ;;  %v819_v18 = vadd.f32 %v818_v57, %v11875_v0  ;;  %v820_v43 = vpop.f32.mrb[117].mxu0 }
 0x1c7   :  { %16960 = vst [vmem:[#allocation74_spill] sm:$0xff] %v12470_v30  ;;  %v821_v41 = vadd.f32 %v820_v43, %v11879_v3  ;;  %v822_v49 = vpop.f32.mrb[118].mxu0 }
 0x1c8   :  { %v823_v48 = vadd.f32 %v822_v49, %v11875_v0  ;;  %v824_v20 = vpop.f32.mrb[119].mxu0  ;;  %v2072_v37 = vmax.f32 %v819_v18, 0.0  ;;  %v12492_v18 = vpack.c.bf16 %v154_v14, %v153_v12 }
 0x1c9   :  { %v825_v2 = vadd.f32 %v824_v20, %v11879_v3  ;;  %v2073_v4 = vmax.f32 %v821_v41, 0.0 }
 0x1ca   :  { %v2076_v5 = vmax.f32 %v823_v48, 0.0  ;;  %9018 = vmatmul.mubr.msk.bf16.gmra.mrb[224].mxu0 %vm301_vm0, %v12473_v46  ;;  %16964 = vst [vmem:[#allocation78_spill] sm:$0xff] %v12492_v18 }
 0x1cb   :  { %1096 = vmatprep.mubr.bf16.mxu0 %v16916_v13  ;;  %v2077_v40 = vmax.f32 %v825_v2, 0.0 }
 0x1cc   :  { %v12487_v25 = vpack.c.bf16 %v2076_v5, %v2072_v37  ;;  %v155_v37 = vld [vmem:[%s16638_s0 + $0x3a0] sm:$0xff]  ;;  %v156_v5 = vld [vmem:[%s16638_s0 + $0x3a8] sm:$0xff] }
 0x1cd   :  { %v828_v20 = vpop.f32.mrb[120].mxu0  ;;  %v12489_v51 = vpack.c.bf16 %v2077_v40, %v2073_v4 }
 0x1ce   :  { %16962 = vst [vmem:[#allocation76_spill] sm:$0xff] %v12487_v25  ;;  %v829_v48 = vadd.f32 %v828_v20, %v11875_v0  ;;  %v830_v57 = vpop.f32.mrb[121].mxu0 }
 0x1cf   :  { %16963 = vst [vmem:[#allocation77_spill] sm:$0xff] %v12489_v51  ;;  %v831_v43 = vadd.f32 %v830_v57, %v11879_v3  ;;  %v832_v49 = vpop.f32.mrb[122].mxu0 }
 0x1d0   :  { %v833_v46 = vadd.f32 %v832_v49, %v11875_v0  ;;  %v834_v54 = vpop.f32.mrb[123].mxu0  ;;  %v2080_v41 = vmax.f32 %v829_v48, 0.0  ;;  %v12511_v48 = vpack.c.bf16 %v156_v5, %v155_v37 }
 0x1d1   :  { %v835_v30 = vadd.f32 %v834_v54, %v11879_v3  ;;  %v2081_v12 = vmax.f32 %v831_v43, 0.0 }
 0x1d2   :  { %v2084_v2 = vmax.f32 %v833_v46, 0.0  ;;  %9019 = vmatmul.mubr.msk.bf16.gmra.mrb[228].mxu0 %vm301_vm0, %v12492_v18  ;;  %16967 = vst [vmem:[#allocation81_spill] sm:$0xff] %v12511_v48 }
 0x1d3   :  { %1106 = vmatprep.mubr.bf16.mxu0 %v16916_v13  ;;  %v2085_v14 = vmax.f32 %v835_v30, 0.0 }
 0x1d4   :  { %v12506_v4 = vpack.c.bf16 %v2084_v2, %v2080_v41  ;;  %v157_v41 = vld [vmem:[%s16638_s0 + $0x3b0] sm:$0xff]  ;;  %v158_v2 = vld [vmem:[%s16638_s0 + $0x3b8] sm:$0xff] }
 0x1d5   :  { %v838_v54 = vpop.f32.mrb[124].mxu0  ;;  %v12508_v40 = vpack.c.bf16 %v2085_v14, %v2081_v12 }
 0x1d6   :  { %16965 = vst [vmem:[#allocation79_spill] sm:$0xff] %v12506_v4  ;;  %v839_v46 = vadd.f32 %v838_v54, %v11875_v0  ;;  %v840_v20 = vpop.f32.mrb[125].mxu0 }
 0x1d7   :  { %16966 = vst [vmem:[#allocation80_spill] sm:$0xff] %v12508_v40  ;;  %v841_v57 = vadd.f32 %v840_v20, %v11879_v3  ;;  %v842_v49 = vpop.f32.mrb[126].mxu0 }
 0x1d8   :  { %v843_v18 = vadd.f32 %v842_v49, %v11875_v0  ;;  %v844_v25 = vpop.f32.mrb[127].mxu0  ;;  %v2088_v43 = vmax.f32 %v839_v46, 0.0  ;;  %v12530_v46 = vpack.c.bf16 %v158_v2, %v157_v41 }
 0x1d9   :  { %v845_v51 = vadd.f32 %v844_v25, %v11879_v3  ;;  %v2089_v37 = vmax.f32 %v841_v57, 0.0 }
 0x1da   :  { %v2092_v30 = vmax.f32 %v843_v18, 0.0  ;;  %9020 = vmatmul.mubr.msk.bf16.gmra.mrb[232].mxu0 %vm301_vm0, %v12511_v48  ;;  %16970 = vst [vmem:[#allocation84_spill] sm:$0xff] %v12530_v46 }
 0x1db   :  { %1116 = vmatprep.mubr.bf16.mxu0 %v16916_v13  ;;  %v2093_v5 = vmax.f32 %v845_v51, 0.0 }
 0x1dc   :  { %v12525_v12 = vpack.c.bf16 %v2092_v30, %v2088_v43  ;;  %v159_v43 = vld [vmem:[%s16638_s0 + $0x3c0] sm:$0xff]  ;;  %v160_v30 = vld [vmem:[%s16638_s0 + $0x3c8] sm:$0xff] }
 0x1dd   :  { %v848_v25 = vpop.f32.mrb[128].mxu0  ;;  %v12527_v14 = vpack.c.bf16 %v2093_v5, %v2089_v37 }
 0x1de   :  { %16968 = vst [vmem:[#allocation82_spill] sm:$0xff] %v12525_v12  ;;  %v849_v18 = vadd.f32 %v848_v25, %v11875_v0  ;;  %v850_v54 = vpop.f32.mrb[129].mxu0 }
 0x1df   :  { %16969 = vst [vmem:[#allocation83_spill] sm:$0xff] %v12527_v14  ;;  %v851_v20 = vadd.f32 %v850_v54, %v11879_v3  ;;  %v852_v49 = vpop.f32.mrb[130].mxu0 }
 0x1e0   :  { %v853_v48 = vadd.f32 %v852_v49, %v11875_v0  ;;  %v854_v4 = vpop.f32.mrb[131].mxu0  ;;  %v2096_v57 = vmax.f32 %v849_v18, 0.0  ;;  %v12549_v18 = vpack.c.bf16 %v160_v30, %v159_v43 }
 0x1e1   :  { %v855_v40 = vadd.f32 %v854_v4, %v11879_v3  ;;  %v2097_v41 = vmax.f32 %v851_v20, 0.0 }
 0x1e2   :  { %v2100_v51 = vmax.f32 %v853_v48, 0.0  ;;  %9021 = vmatmul.mubr.msk.bf16.gmra.mrb[236].mxu0 %vm301_vm0, %v12530_v46  ;;  %16973 = vst [vmem:[#allocation87_spill] sm:$0xff] %v12549_v18 }
 0x1e3   :  { %1126 = vmatprep.mubr.bf16.mxu0 %v16916_v13  ;;  %v2101_v2 = vmax.f32 %v855_v40, 0.0 }
 0x1e4   :  { %v12544_v37 = vpack.c.bf16 %v2100_v51, %v2096_v57  ;;  %v161_v57 = vld [vmem:[%s16638_s0 + $0x3d0] sm:$0xff]  ;;  %v162_v51 = vld [vmem:[%s16638_s0 + $0x3d8] sm:$0xff] }
 0x1e5   :  { %v858_v4 = vpop.f32.mrb[132].mxu0  ;;  %v12546_v5 = vpack.c.bf16 %v2101_v2, %v2097_v41 }
 0x1e6   :  { %16971 = vst [vmem:[#allocation85_spill] sm:$0xff] %v12544_v37  ;;  %v859_v48 = vadd.f32 %v858_v4, %v11875_v0  ;;  %v860_v25 = vpop.f32.mrb[133].mxu0 }
 0x1e7   :  { %16972 = vst [vmem:[#allocation86_spill] sm:$0xff] %v12546_v5  ;;  %v861_v54 = vadd.f32 %v860_v25, %v11879_v3  ;;  %v862_v49 = vpop.f32.mrb[134].mxu0 }
 0x1e8   :  { %v863_v46 = vadd.f32 %v862_v49, %v11875_v0  ;;  %v864_v12 = vpop.f32.mrb[135].mxu0  ;;  %v2104_v20 = vmax.f32 %v859_v48, 0.0  ;;  %v12568_v48 = vpack.c.bf16 %v162_v51, %v161_v57 }
 0x1e9   :  { %v865_v14 = vadd.f32 %v864_v12, %v11879_v3  ;;  %v2105_v43 = vmax.f32 %v861_v54, 0.0 }
 0x1ea   :  { %v2108_v40 = vmax.f32 %v863_v46, 0.0  ;;  %9022 = vmatmul.mubr.msk.bf16.gmra.mrb[240].mxu0 %vm301_vm0, %v12549_v18  ;;  %16976 = vst [vmem:[#allocation90_spill] sm:$0xff] %v12568_v48 }
 0x1eb   :  { %1136 = vmatprep.mubr.bf16.mxu0 %v16916_v13  ;;  %v2109_v30 = vmax.f32 %v865_v14, 0.0 }
 0x1ec   :  { %v12563_v41 = vpack.c.bf16 %v2108_v40, %v2104_v20  ;;  %v163_v20 = vld [vmem:[%s16638_s0 + $0x3e0] sm:$0xff]  ;;  %v164_v40 = vld [vmem:[%s16638_s0 + $0x3e8] sm:$0xff] }
 0x1ed   :  { %v868_v12 = vpop.f32.mrb[136].mxu0  ;;  %v12565_v2 = vpack.c.bf16 %v2109_v30, %v2105_v43 }
 0x1ee   :  { %16974 = vst [vmem:[#allocation88_spill] sm:$0xff] %v12563_v41  ;;  %v869_v46 = vadd.f32 %v868_v12, %v11875_v0  ;;  %v870_v4 = vpop.f32.mrb[137].mxu0 }
 0x1ef   :  { %16975 = vst [vmem:[#allocation89_spill] sm:$0xff] %v12565_v2  ;;  %v871_v25 = vadd.f32 %v870_v4, %v11879_v3  ;;  %v872_v49 = vpop.f32.mrb[138].mxu0 }
 0x1f0   :  { %v873_v18 = vadd.f32 %v872_v49, %v11875_v0  ;;  %v874_v37 = vpop.f32.mrb[139].mxu0  ;;  %v2112_v54 = vmax.f32 %v869_v46, 0.0  ;;  %v12587_v46 = vpack.c.bf16 %v164_v40, %v163_v20 }
 0x1f1   :  { %v875_v5 = vadd.f32 %v874_v37, %v11879_v3  ;;  %v2113_v57 = vmax.f32 %v871_v25, 0.0 }
 0x1f2   :  { %v2116_v14 = vmax.f32 %v873_v18, 0.0  ;;  %9023 = vmatmul.mubr.msk.bf16.gmra.mrb[244].mxu0 %vm301_vm0, %v12568_v48  ;;  %16979 = vst [vmem:[#allocation93_spill] sm:$0xff] %v12587_v46 }
 0x1f3   :  { %1146 = vmatprep.mubr.bf16.mxu0 %v16916_v13  ;;  %v2117_v51 = vmax.f32 %v875_v5, 0.0 }
 0x1f4   :  { %v12582_v43 = vpack.c.bf16 %v2116_v14, %v2112_v54  ;;  %v165_v54 = vld [vmem:[%s16638_s0 + $0x3f0] sm:$0xff]  ;;  %v166_v14 = vld [vmem:[%s16638_s0 + $0x3f8] sm:$0xff] }
 0x1f5   :  { %v878_v37 = vpop.f32.mrb[140].mxu0  ;;  %v12584_v30 = vpack.c.bf16 %v2117_v51, %v2113_v57 }
 0x1f6   :  { %16977 = vst [vmem:[#allocation91_spill] sm:$0xff] %v12582_v43  ;;  %v879_v18 = vadd.f32 %v878_v37, %v11875_v0  ;;  %v880_v12 = vpop.f32.mrb[141].mxu0 }
 0x1f7   :  { %16978 = vst [vmem:[#allocation92_spill] sm:$0xff] %v12584_v30  ;;  %v881_v4 = vadd.f32 %v880_v12, %v11879_v3  ;;  %v882_v49 = vpop.f32.mrb[142].mxu0 }
 0x1f8   :  { %v883_v48 = vadd.f32 %v882_v49, %v11875_v0  ;;  %v884_v41 = vpop.f32.mrb[143].mxu0  ;;  %v2120_v25 = vmax.f32 %v879_v18, 0.0  ;;  %v12606_v18 = vpack.c.bf16 %v166_v14, %v165_v54 }
 0x1f9   :  { %v885_v2 = vadd.f32 %v884_v41, %v11879_v3  ;;  %v2121_v20 = vmax.f32 %v881_v4, 0.0 }
 0x1fa   :  { %v2124_v5 = vmax.f32 %v883_v48, 0.0  ;;  %9024 = vmatmul.mubr.msk.bf16.gmra.mrb[248].mxu0 %vm301_vm0, %v12587_v46  ;;  %16980 = vst [vmem:[#allocation94_spill] sm:$0xff] %v12606_v18 }
 0x1fb   :  { %1156 = vmatprep.mubr.bf16.mxu0 %v16916_v13  ;;  %v2125_v40 = vmax.f32 %v885_v2, 0.0 }
 0x1fc   :  { %v12601_v57 = vpack.c.bf16 %v2124_v5, %v2120_v25 }
 0x1fd   :  { %v888_v41 = vpop.f32.mrb[144].mxu0  ;;  %v12603_v51 = vpack.c.bf16 %v2125_v40, %v2121_v20 }
 0x1fe   :  { %v889_v48 = vadd.f32 %v888_v41, %v11875_v0  ;;  %v890_v37 = vpop.f32.mrb[145].mxu0 }
 0x1ff   :  { %v891_v12 = vadd.f32 %v890_v37, %v11879_v3  ;;  %v892_v49 = vpop.f32.mrb[146].mxu0 }
 0x200   :  { %v893_v46 = vadd.f32 %v892_v49, %v11875_v0  ;;  %v894_v43 = vpop.f32.mrb[147].mxu0  ;;  %v2128_v4 = vmax.f32 %v889_v48, 0.0 }
 0x201   :  { %v895_v30 = vadd.f32 %v894_v43, %v11879_v3  ;;  %v2129_v25 = vmax.f32 %v891_v12, 0.0 }
 0x202   :  { %v2132_v2 = vmax.f32 %v893_v46, 0.0  ;;  %9025 = vmatmul.mubr.msk.bf16.gmra.mrb[252].mxu0 %vm301_vm0, %v12606_v18  ;;  %v10827_v46 = vld [vmem:[%s16639_s3 + $0x100] ss:$8 sps:$4 sm:$0xff]  }
 0x203   :  { %3036 = vmatprep.mubr.bf16.mxu0 %v11905_v38  ;;  %v2133_v5 = vmax.f32 %v895_v30, 0.0  ;;  %v10832_v30 = vld [vmem:[%s16639_s3 + $0x114] ss:$8 sps:$4 sm:$0xff]  }
 0x204   :  { %v12614_v20 = vpack.c.bf16 %v2132_v2, %v2128_v4  ;;  %v10830_v2 = vld [vmem:[%s16639_s3 + $0x110] ss:$8 sps:$4 sm:$0xff]  }
 0x205   :  { %v898_v54 = vpop.f32.mrb[148].mxu0  ;;  %v12616_v14 = vpack.c.bf16 %v2133_v5, %v2129_v25 }
 0x206   :  { %v899_v40 = vadd.f32 %v898_v54, %v11875_v0  ;;  %v900_v41 = vpop.f32.mrb[149].mxu0 }
 0x207   :  { %v901_v37 = vadd.f32 %v900_v41, %v11879_v3  ;;  %v902_v43 = vpop.f32.mrb[150].mxu0  ;;  %v10835_v41 = vld [vmem:[%s16639_s3 + $0x124] ss:$8 sps:$4 sm:$0xff]  }
 0x208   :  { %v903_v48 = vadd.f32 %v902_v43, %v11875_v0  ;;  %v904_v38 = vpop.f32.mrb[151].mxu0  ;;  %v2136_v49 = vmax.f32 %v899_v40, 0.0 }
 0x209   :  { %v905_v12 = vadd.f32 %v904_v38, %v11879_v3  ;;  %v2137_v25 = vmax.f32 %v901_v37, 0.0  ;;  %v10833_v37 = vld [vmem:[%s16639_s3 + $0x120] ss:$8 sps:$4 sm:$0xff]  }
 0x20a   :  { %v2140_v4 = vmax.f32 %v903_v48, 0.0  ;;  %3037 = vmatmul.mubr.bf16.vlgmr.msra.gmra.mrb[0].mxu0 %v11903_v33 }
 0x20b   :  { %3046 = vmatprep.mubr.bf16.mxu0 %v11930_v17  ;;  %3678 = vmatpush1.bf16.msra.mxu0 %v10827_v46  ;;  %v2141_v5 = vmax.f32 %v905_v12, 0.0  ;;  %v10838_v12 = vld [vmem:[%s16639_s3 + $0x134] ss:$8 sps:$4 sm:$0xff]  }
 0x20c   :  { %v12633_v54 = vpack.c.bf16 %v2140_v4, %v2136_v49  ;;  %3679 = vmatprep.subr.bf16.mxu0 %v10832_v30 }
 0x20d   :  { %v908_v40 = vpop.f32.mrb[152].mxu0  ;;  %v12638_v43 = vpack.c.bf16 %v2141_v5, %v2137_v25 }
 0x20e   :  { %v909_v33 = vadd.f32 %v908_v40, %v11875_v0  ;;  %v910_v17 = vpop.f32.mrb[153].mxu0 }
 0x20f   :  { %v911_v46 = vadd.f32 %v910_v17, %v11879_v3  ;;  %v912_v48 = vpop.f32.mrb[154].mxu0  ;;  %3680 = vmatpush1.bf16.msra.mxu0 %v10830_v2  ;;  %v10836_v2 = vld [vmem:[%s16639_s3 + $0x130] ss:$8 sps:$4 sm:$0xff]   ;;  %v10841_v17 = vld [vmem:[%s16639_s3 + $0x144] ss:$8 sps:$4 sm:$0xff]  }
 0x210   :  { %v913_v38 = vadd.f32 %v912_v48, %v11875_v0  ;;  %v914_v30 = vpop.f32.mrb[155].mxu0  ;;  %3681 = vmatprep.subr.bf16.mxu0 %v10835_v41  ;;  %v2144_v4 = vmax.f32 %v909_v33, 0.0 }
 0x211   :  { %v915_v49 = vadd.f32 %v914_v30, %v11879_v3  ;;  %v2145_v5 = vmax.f32 %v911_v46, 0.0  ;;  %v10839_v46 = vld [vmem:[%s16639_s3 + $0x140] ss:$8 sps:$4 sm:$0xff]  }
 0x212   :  { %v2148_v25 = vmax.f32 %v913_v38, 0.0  ;;  %3047 = vmatmul.mubr.bf16.gmra.mrb[4].mxu0 %v11922_v10 }
 0x213   :  { %3056 = vmatprep.mubr.bf16.mxu0 %v11949_v56  ;;  %3682 = vmatpush1.bf16.msra.mxu0 %v10833_v37  ;;  %v2149_v40 = vmax.f32 %v915_v49, 0.0 }
 0x214   :  { %v12655_v41 = vpack.c.bf16 %v2148_v25, %v2144_v4  ;;  %3683 = vmatprep.subr.bf16.mxu0 %v10838_v12 }
 0x215   :  { %v918_v33 = vpop.f32.mrb[156].mxu0  ;;  %v12660_v48 = vpack.c.bf16 %v2149_v40, %v2145_v5 }
 0x216   :  { %v919_v10 = vadd.f32 %v918_v33, %v11875_v0  ;;  %v920_v56 = vpop.f32.mrb[157].mxu0 }
 0x217   :  { %v921_v37 = vadd.f32 %v920_v56, %v11879_v3  ;;  %v922_v38 = vpop.f32.mrb[158].mxu0  ;;  %3684 = vmatpush1.bf16.msra.mxu0 %v10836_v2 }
 0x218   :  { %v923_v30 = vadd.f32 %v922_v38, %v11875_v0  ;;  %v924_v12 = vpop.f32.mrb[159].mxu0  ;;  %3685 = vmatprep.subr.bf16.mxu0 %v10841_v17  ;;  %v2152_v4 = vmax.f32 %v919_v10, 0.0 }
 0x219   :  { %v925_v49 = vadd.f32 %v924_v12, %v11879_v3  ;;  %v2153_v5 = vmax.f32 %v921_v37, 0.0 }
 0x21a   :  { %v2156_v25 = vmax.f32 %v923_v30, 0.0  ;;  %3057 = vmatmul.mubr.bf16.gmra.mrb[8].mxu0 %v11947_v50 }
 0x21b   :  { %3066 = vmatprep.mubr.bf16.mxu0 %v11968_v39  ;;  %3686 = vmatpush1.bf16.msra.mxu0 %v10839_v46  ;;  %v2157_v40 = vmax.f32 %v925_v49, 0.0 }
 0x21c   :  { %v12671_v2 = vpack.c.bf16 %v2156_v25, %v2152_v4 }
 0x21d   :  { %v928_v33 = vpop.f32.mrb[160].mxu0  ;;  %v12673_v56 = vpack.c.bf16 %v2157_v40, %v2153_v5 }
 0x21e   :  { %v929_v38 = vadd.f32 %v928_v33, %v11875_v0  ;;  %v930_v18 = vpop.f32.mrb[161].mxu0 }
 0x21f   :  { %v931_v17 = vadd.f32 %v930_v18, %v11879_v3  ;;  %v932_v12 = vpop.f32.mrb[162].mxu0 }
 0x220   :  { %v933_v10 = vadd.f32 %v932_v12, %v11875_v0  ;;  %v934_v30 = vpop.f32.mrb[163].mxu0  ;;  %v2160_v39 = vmax.f32 %v929_v38, 0.0 }
 0x221   :  { %v935_v50 = vadd.f32 %v934_v30, %v11879_v3  ;;  %v2161_v37 = vmax.f32 %v931_v17, 0.0 }
 0x222   :  { %v2164_v46 = vmax.f32 %v933_v10, 0.0  ;;  %3067 = vmatmul.mubr.bf16.gmra.mrb[12].mxu0 %v11966_v31 }
 0x223   :  { %3076 = vmatprep.mubr.bf16.mxu0 %v11987_v28  ;;  %v2165_v49 = vmax.f32 %v935_v50, 0.0 }
 0x224   :  { %v12681_v4 = vpack.c.bf16 %v2164_v46, %v2160_v39  ;;  %v10842_v46 = vld [vmem:[%s16639_s3 + $0x150] ss:$8 sps:$4 sm:$0xff]  }
 0x225   :  { %v938_v25 = vpop.f32.mrb[164].mxu0  ;;  %v12683_v5 = vpack.c.bf16 %v2165_v49, %v2161_v37  ;;  %v10844_v37 = vld [vmem:[%s16639_s3 + $0x154] ss:$8 sps:$4 sm:$0xff]  }
 0x226   :  { %v939_v18 = vadd.f32 %v938_v25, %v11875_v0  ;;  %v940_v40 = vpop.f32.mrb[165].mxu0  ;;  %3687 = vmatprep.subr.bf16.mxu0 %v10844_v37 }
 0x227   :  { %v941_v33 = vadd.f32 %v940_v40, %v11879_v3  ;;  %v942_v12 = vpop.f32.mrb[166].mxu0  ;;  %3688 = vmatpush1.bf16.msra.mxu0 %v10842_v46 }
 0x228   :  { %v943_v38 = vadd.f32 %v942_v12, %v11875_v0  ;;  %v944_v10 = vpop.f32.mrb[167].mxu0  ;;  %v2168_v30 = vmax.f32 %v939_v18, 0.0 }
 0x229   :  { %v945_v31 = vadd.f32 %v944_v10, %v11879_v3  ;;  %v2169_v17 = vmax.f32 %v941_v33, 0.0 }
 0x22a   :  { %v2172_v28 = vmax.f32 %v943_v38, 0.0  ;;  %3077 = vmatmul.mubr.bf16.gmra.mrb[16].mxu0 %v11985_v24 }
 0x22b   :  { %3086 = vmatprep.mubr.bf16.mxu0 %v12012_v35  ;;  %v2173_v50 = vmax.f32 %v945_v31, 0.0 }
 0x22c   :  { %v12691_v39 = vpack.c.bf16 %v2172_v28, %v2168_v30 }
 0x22d   :  { %v948_v49 = vpop.f32.mrb[168].mxu0  ;;  %v12699_v25 = vpack.c.bf16 %v2173_v50, %v2169_v17 }
 0x22e   :  { %v949_v18 = vadd.f32 %v948_v49, %v11875_v0  ;;  %v950_v24 = vpop.f32.mrb[169].mxu0 }
 0x22f   :  { %v951_v35 = vadd.f32 %v950_v24, %v11879_v3  ;;  %v952_v40 = vpop.f32.mrb[170].mxu0 }
 0x230   :  { %v953_v33 = vadd.f32 %v952_v40, %v11875_v0  ;;  %v954_v12 = vpop.f32.mrb[171].mxu0  ;;  %v2176_v10 = vmax.f32 %v949_v18, 0.0 }
 0x231   :  { %v955_v38 = vadd.f32 %v954_v12, %v11879_v3  ;;  %v2177_v30 = vmax.f32 %v951_v35, 0.0 }
 0x232   :  { %v2180_v31 = vmax.f32 %v953_v33, 0.0  ;;  %3087 = vmatmul.mubr.bf16.gmra.mrb[20].mxu0 %v12004_v19 }
 0x233   :  { %3096 = vmatprep.mubr.bf16.mxu0 %v12031_v53  ;;  %v2181_v28 = vmax.f32 %v955_v38, 0.0 }
 0x234   :  { %v12707_v17 = vpack.c.bf16 %v2180_v31, %v2176_v10 }
 0x235   :  { %v958_v50 = vpop.f32.mrb[172].mxu0  ;;  %v12709_v37 = vpack.c.bf16 %v2181_v28, %v2177_v30 }
 0x236   :  { %v959_v46 = vadd.f32 %v958_v50, %v11875_v0  ;;  %v960_v49 = vpop.f32.mrb[173].mxu0 }
 0x237   :  { %v961_v24 = vadd.f32 %v960_v49, %v11879_v3  ;;  %v962_v40 = vpop.f32.mrb[174].mxu0 }
 0x238   :  { %v963_v18 = vadd.f32 %v962_v40, %v11875_v0  ;;  %v964_v33 = vpop.f32.mrb[175].mxu0  ;;  %v2184_v12 = vmax.f32 %v959_v46, 0.0 }
 0x239   :  { %v965_v19 = vadd.f32 %v964_v33, %v11879_v3  ;;  %v2185_v35 = vmax.f32 %v961_v24, 0.0 }
 0x23a   :  { %v2188_v53 = vmax.f32 %v963_v18, 0.0  ;;  %3097 = vmatmul.mubr.bf16.gmra.mrb[24].mxu0 %v12029_v27 }
 0x23b   :  { %3106 = vmatprep.mubr.bf16.mxu0 %v12050_v16  ;;  %v2189_v38 = vmax.f32 %v965_v19, 0.0 }
 0x23c   :  { %v12717_v10 = vpack.c.bf16 %v2188_v53, %v2184_v12 }
 0x23d   :  { %v968_v31 = vpop.f32.mrb[176].mxu0  ;;  %v12719_v30 = vpack.c.bf16 %v2189_v38, %v2185_v35 }
 0x23e   :  { %v969_v28 = vadd.f32 %v968_v31, %v11875_v0  ;;  %v970_v50 = vpop.f32.mrb[177].mxu0 }
 0x23f   :  { %v971_v49 = vadd.f32 %v970_v50, %v11879_v3  ;;  %v972_v40 = vpop.f32.mrb[178].mxu0 }
 0x240   :  { %v973_v46 = vadd.f32 %v972_v40, %v11875_v0  ;;  %v974_v18 = vpop.f32.mrb[179].mxu0  ;;  %v2192_v33 = vmax.f32 %v969_v28, 0.0 }
 0x241   :  { %v975_v27 = vadd.f32 %v974_v18, %v11879_v3  ;;  %v2193_v24 = vmax.f32 %v971_v49, 0.0 }
 0x242   :  { %v2196_v16 = vmax.f32 %v973_v46, 0.0  ;;  %3107 = vmatmul.mubr.bf16.gmra.mrb[28].mxu0 %v12048_v11 }
 0x243   :  { %3116 = vmatprep.mubr.bf16.mxu0 %v12069_v61  ;;  %v2197_v19 = vmax.f32 %v975_v27, 0.0 }
 0x244   :  { %v12727_v12 = vpack.c.bf16 %v2196_v16, %v2192_v33  ;;  %v10845_v16 = vld [vmem:[%s16639_s3 + $0x160] ss:$8 sps:$4 sm:$0xff]  }
 0x245   :  { %v978_v53 = vpop.f32.mrb[180].mxu0  ;;  %v12729_v35 = vpack.c.bf16 %v2197_v19, %v2193_v24  ;;  %v10847_v24 = vld [vmem:[%s16639_s3 + $0x164] ss:$8 sps:$4 sm:$0xff]  }
 0x246   :  { %v979_v38 = vadd.f32 %v978_v53, %v11875_v0  ;;  %v980_v31 = vpop.f32.mrb[181].mxu0  ;;  %3689 = vmatprep.subr.bf16.mxu0 %v10847_v24 }
 0x247   :  { %v981_v50 = vadd.f32 %v980_v31, %v11879_v3  ;;  %v982_v40 = vpop.f32.mrb[182].mxu0  ;;  %3690 = vmatpush1.bf16.msra.mxu0 %v10845_v16 }
 0x248   :  { %v983_v28 = vadd.f32 %v982_v40, %v11875_v0  ;;  %v984_v46 = vpop.f32.mrb[183].mxu0  ;;  %v2200_v18 = vmax.f32 %v979_v38, 0.0 }
 0x249   :  { %v985_v11 = vadd.f32 %v984_v46, %v11879_v3  ;;  %v2201_v49 = vmax.f32 %v981_v50, 0.0 }
 0x24a   :  { %v2204_v61 = vmax.f32 %v983_v28, 0.0  ;;  %3117 = vmatmul.mubr.bf16.gmra.mrb[32].mxu0 %v12067_v6 }
 0x24b   :  { %3126 = vmatprep.mubr.bf16.mxu0 %v12094_v44  ;;  %v2205_v27 = vmax.f32 %v985_v11, 0.0 }
 0x24c   :  { %v12737_v33 = vpack.c.bf16 %v2204_v61, %v2200_v18 }
 0x24d   :  { %v988_v19 = vpop.f32.mrb[184].mxu0  ;;  %v12745_v53 = vpack.c.bf16 %v2205_v27, %v2201_v49 }
 0x24e   :  { %v989_v38 = vadd.f32 %v988_v19, %v11875_v0  ;;  %v990_v6 = vpop.f32.mrb[185].mxu0 }
 0x24f   :  { %v991_v44 = vadd.f32 %v990_v6, %v11879_v3  ;;  %v992_v31 = vpop.f32.mrb[186].mxu0 }
 0x250   :  { %v993_v50 = vadd.f32 %v992_v31, %v11875_v0  ;;  %v994_v40 = vpop.f32.mrb[187].mxu0  ;;  %v2208_v46 = vmax.f32 %v989_v38, 0.0 }
 0x251   :  { %v995_v28 = vadd.f32 %v994_v40, %v11879_v3  ;;  %v2209_v18 = vmax.f32 %v991_v44, 0.0  ;;  %v10848_v44 = vld [vmem:[%s16637_s1 + $0xc] ss:$16 sps:$4 sm:$0xff]  }
 0x252   :  { %v2212_v11 = vmax.f32 %v993_v50, 0.0  ;;  %3127 = vmatmul.mubr.bf16.gmra.mrb[36].mxu0 %v12086_v1  ;;  %1167 = vmatprep.subr.bf16.mxu1 %v10848_v44 }
 0x253   :  { %3136 = vmatprep.mubr.bf16.mxu0 %v12113_v42  ;;  %v2213_v61 = vmax.f32 %v995_v28, 0.0 }
 0x254   :  { %v12753_v49 = vpack.c.bf16 %v2212_v11, %v2208_v46 }
 0x255   :  { %v998_v27 = vpop.f32.mrb[188].mxu0  ;;  %v12755_v24 = vpack.c.bf16 %v2213_v61, %v2209_v18  ;;  %v10850_v18 = vld [vmem:[%s16637_s1 + $0x8] ss:$16 sps:$4 sm:$0xff]   ;;  %v10851_v61 = vld [vmem:[%s16637_s1 + $0x2c] ss:$16 sps:$4 sm:$0xff]  }
 0x256   :  { %v999_v16 = vadd.f32 %v998_v27, %v11875_v0  ;;  %v1000_v19 = vpop.f32.mrb[189].mxu0  ;;  %1168 = vmatpush1.bf16.msra.mxu1 %v10850_v18  ;;  %v10854_v18 = vld [vmem:[%s16641_s5] sm:$0xff]  }
 0x257   :  { %v1001_v6 = vadd.f32 %v1000_v19, %v11879_v3  ;;  %v1002_v31 = vpop.f32.mrb[190].mxu0  ;;  %1169 = vmatprep.subr.bf16.mxu1 %v10851_v61 }
 0x258   :  { %v1003_v38 = vadd.f32 %v1002_v31, %v11875_v0  ;;  %v1004_v50 = vpop.f32.mrb[191].mxu0  ;;  %v2216_v40 = vmax.f32 %v999_v16, 0.0 }
 0x259   :  { %v1005_v1 = vadd.f32 %v1004_v50, %v11879_v3  ;;  %v2217_v28 = vmax.f32 %v1001_v6, 0.0  ;;  %v10853_v50 = vld [vmem:[%s16637_s1 + $0x28] ss:$16 sps:$4 sm:$0xff]  }
 0x25a   :  { %v2220_v42 = vmax.f32 %v1003_v38, 0.0  ;;  %3137 = vmatmul.mubr.bf16.gmra.mrb[40].mxu0 %v12111_v59  ;;  %1170 = vmatpush1.bf16.msra.mxu1 %v10853_v50  ;;  %v10855_v50 = vld [vmem:[%s16639_s3 + $0x170] ss:$8 sps:$4 sm:$0xff]  }
 0x25b   :  { %3146 = vmatprep.mubr.bf16.mxu0 %v12132_v60  ;;  %v2221_v46 = vmax.f32 %v1005_v1, 0.0  ;;  %4869 = vmatprep.subr.bf16.mxu1 %v16916_v13 }
 0x25c   :  { %v12766_v11 = vpack.c.bf16 %v2220_v42, %v2216_v40 }
 0x25d   :  { %v1008_v27 = vpop.f32.mrb[192].mxu0  ;;  %v12774_v59 = vpack.c.bf16 %v2221_v46, %v2217_v28  ;;  %9026 = vmatmul.mubr.msk.bf16.vlgmr.msra.gmra.mrb[0].mxu1 %vm301_vm0, %v11513_v8 }
 0x25e   :  { %v1009_v60 = vadd.f32 %v1008_v27, %v11875_v0  ;;  %v1010_v16 = vpop.f32.mrb[193].mxu0  ;;  %4870 = vmatpush1.bf16.msra.mxu1 %v10854_v18  ;;  %1209 = vmatprep.mubr.bf16.mxu1 %v16916_v13 }
 0x25f   :  { %v1011_v19 = vadd.f32 %v1010_v16, %v11879_v3  ;;  %v1012_v6 = vpop.f32.mrb[194].mxu0  ;;  %4871 = vmatprep.subr.bf16.mxu1 %v16916_v13 }
 0x260   :  { %v1013_v31 = vadd.f32 %v1012_v6, %v11875_v0  ;;  %v1014_v38 = vpop.f32.mrb[195].mxu0  ;;  %v2224_v40 = vmax.f32 %v1009_v60, 0.0 }
 0x261   :  { %v1015_v1 = vadd.f32 %v1014_v38, %v11879_v3  ;;  %v2225_v44 = vmax.f32 %v1011_v19, 0.0 }
 0x262   :  { %v2228_v42 = vmax.f32 %v1013_v31, 0.0  ;;  %3147 = vmatmul.mubr.bf16.gmra.mrb[44].mxu0 %v12130_v63 }
 0x263   :  { %3156 = vmatprep.mubr.bf16.mxu0 %v12151_v22  ;;  %v2229_v28 = vmax.f32 %v1015_v1, 0.0  ;;  %v10857_v1 = vld [vmem:[%s16639_s3 + $0x174] ss:$8 sps:$4 sm:$0xff]  }
 0x264   :  { %v12786_v46 = vpack.c.bf16 %v2228_v42, %v2224_v40  ;;  %3691 = vmatprep.subr.bf16.mxu0 %v10857_v1 }
 0x265   :  { %v1018_v61 = vpop.f32.mrb[196].mxu0  ;;  %v12793_v27 = vpack.c.bf16 %v2229_v28, %v2225_v44  ;;  %3692 = vmatpush1.bf16.msra.mxu0 %v10855_v50  ;;  %9027 = vmatmul.mubr.msk.bf16.gmra.mrb[4].mxu1 %vm301_vm0, %v11536_v15 }
 0x266   :  { %v1019_v63 = vadd.f32 %v1018_v61, %v11875_v0  ;;  %v1020_v60 = vpop.f32.mrb[197].mxu0  ;;  %1219 = vmatprep.mubr.bf16.mxu1 %v16916_v13 }
 0x267   :  { %v1021_v22 = vadd.f32 %v1020_v60, %v11879_v3  ;;  %v1022_v16 = vpop.f32.mrb[198].mxu0 }
 0x268   :  { %v1023_v19 = vadd.f32 %v1022_v16, %v11875_v0  ;;  %v1024_v6 = vpop.f32.mrb[199].mxu0  ;;  %v2232_v38 = vmax.f32 %v1019_v63, 0.0 }
 0x269   :  { %v1025_v31 = vadd.f32 %v1024_v6, %v11879_v3  ;;  %v2233_v40 = vmax.f32 %v1021_v22, 0.0 }
 0x26a   :  { %v2236_v8 = vmax.f32 %v1023_v19, 0.0  ;;  %3157 = vmatmul.mubr.bf16.gmra.mrb[48].mxu0 %v12149_v7 }
 0x26b   :  { %3166 = vmatprep.mubr.bf16.mxu0 %v12176_v32  ;;  %v2237_v42 = vmax.f32 %v1025_v31, 0.0 }
 0x26c   :  { %v12809_v44 = vpack.c.bf16 %v2236_v8, %v2232_v38 }
 0x26d   :  { %v1028_v28 = vpop.f32.mrb[200].mxu0  ;;  %v12813_v7 = vpack.c.bf16 %v2237_v42, %v2233_v40  ;;  %9028 = vmatmul.mubr.msk.bf16.gmra.mrb[8].mxu1 %vm301_vm0, %v11562_v23 }
 0x26e   :  { %v1029_v18 = vadd.f32 %v1028_v28, %v11875_v0  ;;  %v1030_v61 = vpop.f32.mrb[201].mxu0  ;;  %1229 = vmatprep.mubr.bf16.mxu1 %v16916_v13 }
 0x26f   :  { %v1031_v63 = vadd.f32 %v1030_v61, %v11879_v3  ;;  %v1032_v32 = vpop.f32.mrb[202].mxu0 }
 0x270   :  { %v1033_v60 = vadd.f32 %v1032_v32, %v11875_v0  ;;  %v1034_v22 = vpop.f32.mrb[203].mxu0  ;;  %v2240_v19 = vmax.f32 %v1029_v18, 0.0 }
 0x271   :  { %v1035_v16 = vadd.f32 %v1034_v22, %v11879_v3  ;;  %v2241_v15 = vmax.f32 %v1031_v63, 0.0 }
 0x272   :  { %v2244_v6 = vmax.f32 %v1033_v60, 0.0  ;;  %3167 = vmatmul.mubr.bf16.gmra.mrb[52].mxu0 %v12168_v45 }
 0x273   :  { %3176 = vmatprep.mubr.bf16.mxu0 %v12195_v52  ;;  %v2245_v31 = vmax.f32 %v1035_v16, 0.0 }
 0x274   :  { %v12822_v38 = vpack.c.bf16 %v2244_v6, %v2240_v19 }
 0x275   :  { %v1038_v8 = vpop.f32.mrb[204].mxu0  ;;  %v12826_v50 = vpack.c.bf16 %v2245_v31, %v2241_v15  ;;  %9029 = vmatmul.mubr.msk.bf16.gmra.mrb[12].mxu1 %vm301_vm0, %v11573_v26  ;;  %v10858_v26 = vld [vmem:[%s16641_s5 + $0x8] sm:$0xff]  }
 0x276   :  { %v1039_v1 = vadd.f32 %v1038_v8, %v11875_v0  ;;  %v1040_v40 = vpop.f32.mrb[205].mxu0  ;;  %1239 = vmatprep.mubr.bf16.mxu1 %v16916_v13  ;;  %4872 = vmatpush1.bf16.msra.mxu1 %v10858_v26 }
 0x277   :  { %v1041_v42 = vadd.f32 %v1040_v40, %v11879_v3  ;;  %v1042_v45 = vpop.f32.mrb[206].mxu0  ;;  %4873 = vmatprep.subr.bf16.mxu1 %v16916_v13 }
 0x278   :  { %v1043_v52 = vadd.f32 %v1042_v45, %v11875_v0  ;;  %v1044_v28 = vpop.f32.mrb[207].mxu0  ;;  %v2248_v61 = vmax.f32 %v1039_v1, 0.0 }
 0x279   :  { %v1045_v18 = vadd.f32 %v1044_v28, %v11879_v3  ;;  %v2249_v23 = vmax.f32 %v1041_v42, 0.0 }
 0x27a   :  { %v2252_v63 = vmax.f32 %v1043_v52, 0.0  ;;  %3177 = vmatmul.mubr.bf16.gmra.mrb[56].mxu0 %v12193_v21 }
 0x27b   :  { %3186 = vmatprep.mubr.bf16.mxu0 %v12214_v47  ;;  %v2253_v32 = vmax.f32 %v1045_v18, 0.0 }
 0x27c   :  { %v12835_v60 = vpack.c.bf16 %v2252_v63, %v2248_v61 }
 0x27d   :  { %v1048_v22 = vpop.f32.mrb[208].mxu0  ;;  %v12839_v16 = vpack.c.bf16 %v2253_v32, %v2249_v23  ;;  %9030 = vmatmul.mubr.msk.bf16.gmra.mrb[16].mxu1 %vm301_vm0, %v11584_v29 }
 0x27e   :  { %v1049_v19 = vadd.f32 %v1048_v22, %v11875_v0  ;;  %v1050_v6 = vpop.f32.mrb[209].mxu0  ;;  %1249 = vmatprep.mubr.bf16.mxu1 %v16916_v13 }
 0x27f   :  { %v1051_v15 = vadd.f32 %v1050_v6, %v11879_v3  ;;  %v1052_v21 = vpop.f32.mrb[210].mxu0  ;;  %v10859_v6 = vld [vmem:[%s16639_s3 + $0x180] ss:$8 sps:$4 sm:$0xff]  }
 0x280   :  { %v1053_v47 = vadd.f32 %v1052_v21, %v11875_v0  ;;  %v1054_v31 = vpop.f32.mrb[211].mxu0  ;;  %v2256_v1 = vmax.f32 %v1049_v19, 0.0 }
 0x281   :  { %v1055_v8 = vadd.f32 %v1054_v31, %v11879_v3  ;;  %v2257_v42 = vmax.f32 %v1051_v15, 0.0  ;;  %v10861_v15 = vld [vmem:[%s16639_s3 + $0x184] ss:$8 sps:$4 sm:$0xff]  }
 0x282   :  { %v2260_v40 = vmax.f32 %v1053_v47, 0.0  ;;  %3187 = vmatmul.mubr.bf16.gmra.mrb[60].mxu0 %v12212_v55  ;;  %3693 = vmatprep.subr.bf16.mxu0 %v10861_v15 }
 0x283   :  { %3196 = vmatprep.mubr.bf16.mxu0 %v12233_v36  ;;  %v2261_v45 = vmax.f32 %v1055_v8, 0.0  ;;  %3694 = vmatpush1.bf16.msra.mxu0 %v10859_v6 }
 0x284   :  { %v12851_v52 = vpack.c.bf16 %v2260_v40, %v2256_v1 }
 0x285   :  { %v1058_v28 = vpop.f32.mrb[212].mxu0  ;;  %v12855_v18 = vpack.c.bf16 %v2261_v45, %v2257_v42  ;;  %9031 = vmatmul.mubr.msk.bf16.gmra.mrb[20].mxu1 %vm301_vm0, %v11601_v34  ;;  %v16981_v34 = vld [vmem:[#allocation44_spill] sm:$0xff] }
 0x286   :  { %v1059_v61 = vadd.f32 %v1058_v28, %v11875_v0  ;;  %v1060_v63 = vpop.f32.mrb[213].mxu0  ;;  %1259 = vmatprep.mubr.bf16.mxu1 %v16916_v13 }
 0x287   :  { %v1061_v55 = vadd.f32 %v1060_v63, %v11879_v3  ;;  %v1062_v36 = vpop.f32.mrb[214].mxu0 }
 0x288   :  { %v1063_v23 = vadd.f32 %v1062_v36, %v11875_v0  ;;  %v1064_v32 = vpop.f32.mrb[215].mxu0  ;;  %v2264_v19 = vmax.f32 %v1059_v61, 0.0 }
 0x289   :  { %v1065_v22 = vadd.f32 %v1064_v32, %v11879_v3  ;;  %v2265_v21 = vmax.f32 %v1061_v55, 0.0 }
 0x28a   :  { %v2268_v29 = vmax.f32 %v1063_v23, 0.0  ;;  %3197 = vmatmul.mubr.bf16.gmra.mrb[64].mxu0 %v12231_v58 }
 0x28b   :  { %3206 = vmatprep.mubr.bf16.mxu0 %v12258_v62  ;;  %v2269_v47 = vmax.f32 %v1065_v22, 0.0  ;;  %v16982_v22 = vld [vmem:[#allocation2_spill] sm:$0xff] }
 0x28c   :  { %v12871_v31 = vpack.c.bf16 %v2268_v29, %v2264_v19 }
 0x28d   :  { %v1068_v8 = vpop.f32.mrb[216].mxu0  ;;  %v12875_v58 = vpack.c.bf16 %v2269_v47, %v2265_v21  ;;  %9032 = vmatmul.mubr.msk.bf16.gmra.mrb[24].mxu1 %vm301_vm0, %v16982_v22 }
 0x28e   :  { %v1069_v1 = vadd.f32 %v1068_v8, %v11875_v0  ;;  %v1070_v40 = vpop.f32.mrb[217].mxu0  ;;  %1269 = vmatprep.mubr.bf16.mxu1 %v16916_v13 }
 0x28f   :  { %v1071_v26 = vadd.f32 %v1070_v40, %v11879_v3  ;;  %v1072_v62 = vpop.f32.mrb[218].mxu0 }
 0x290   :  { %v1073_v42 = vadd.f32 %v1072_v62, %v11875_v0  ;;  %v1074_v45 = vpop.f32.mrb[219].mxu0  ;;  %v2272_v61 = vmax.f32 %v1069_v1, 0.0  ;;  %v16984_v62 = vld [vmem:[#allocation47_spill] sm:$0xff] }
 0x291   :  { %v1075_v28 = vadd.f32 %v1074_v45, %v11879_v3  ;;  %v2273_v55 = vmax.f32 %v1071_v26, 0.0  ;;  %v16983_v26 = vld [vmem:[#allocation43_spill] sm:$0xff] }
 0x292   :  { %v2276_v63 = vmax.f32 %v1073_v42, 0.0  ;;  %3207 = vmatmul.mubr.bf16.gmra.mrb[68].mxu0 %v12250_v9 }
 0x293   :  { %3216 = vmatprep.mubr.bf16.mxu0 %v16981_v34  ;;  %v2277_v36 = vmax.f32 %v1075_v28, 0.0 }
 0x294   :  { %v12884_v23 = vpack.c.bf16 %v2276_v63, %v2272_v61  ;;  %v16985_v63 = vld [vmem:[#allocation3_spill] sm:$0xff] }
 0x295   :  { %v1078_v32 = vpop.f32.mrb[220].mxu0  ;;  %v12888_v19 = vpack.c.bf16 %v2277_v36, %v2273_v55  ;;  %9033 = vmatmul.mubr.msk.bf16.gmra.mrb[28].mxu1 %vm301_vm0, %v16985_v63 }
 0x296   :  { %v1079_v29 = vadd.f32 %v1078_v32, %v11875_v0  ;;  %v1080_v6 = vpop.f32.mrb[221].mxu0  ;;  %1279 = vmatprep.mubr.bf16.mxu1 %v16916_v13 }
 0x297   :  { %v1081_v15 = vadd.f32 %v1080_v6, %v11879_v3  ;;  %v1082_v9 = vpop.f32.mrb[222].mxu0 }
 0x298   :  { %v1083_v21 = vadd.f32 %v1082_v9, %v11875_v0  ;;  %v1084_v47 = vpop.f32.mrb[223].mxu0  ;;  %v2280_v1 = vmax.f32 %v1079_v29, 0.0 }
 0x299   :  { %v1085_v8 = vadd.f32 %v1084_v47, %v11879_v3  ;;  %v2281_v42 = vmax.f32 %v1081_v15, 0.0  ;;  %v16986_v47 = vld [vmem:[#allocation46_spill] sm:$0xff] }
 0x29a   :  { %v2284_v40 = vmax.f32 %v1083_v21, 0.0  ;;  %3217 = vmatmul.mubr.bf16.gmra.mrb[72].mxu0 %v16983_v26 }
 0x29b   :  { %3226 = vmatprep.mubr.bf16.mxu0 %v16984_v62  ;;  %v2285_v45 = vmax.f32 %v1085_v8, 0.0  ;;  %v16987_v8 = vld [vmem:[#allocation50_spill] sm:$0xff] }
 0x29c   :  { %v12897_v28 = vpack.c.bf16 %v2284_v40, %v2280_v1  ;;  %v10862_v1 = vld [vmem:[%s16641_s5 + $0x10] sm:$0xff]  }
 0x29d   :  { %v1088_v61 = vpop.f32.mrb[224].mxu0  ;;  %v12901_v34 = vpack.c.bf16 %v2285_v45, %v2281_v42  ;;  %v16988_v45 = vld [vmem:[#allocation4_spill] sm:$0xff]  ;;  %4874 = vmatpush1.bf16.msra.mxu1 %v10862_v1  ;;  %v16990_v1 = vld [vmem:[#allocation53_spill] sm:$0xff] }
 0x29e   :  { %v1089_v55 = vadd.f32 %v1088_v61, %v11875_v0  ;;  %v1090_v36 = vpop.f32.mrb[225].mxu0  ;;  %9034 = vmatmul.mubr.msk.bf16.gmra.mrb[32].mxu1 %vm301_vm0, %v16988_v45  ;;  %4875 = vmatprep.subr.bf16.mxu1 %v16916_v13 }
 0x29f   :  { %v1091_v32 = vadd.f32 %v1090_v36, %v11879_v3  ;;  %v1092_v22 = vpop.f32.mrb[226].mxu0  ;;  %1289 = vmatprep.mubr.bf16.mxu1 %v16916_v13 }
 0x2a0   :  { %v1093_v29 = vadd.f32 %v1092_v22, %v11875_v0  ;;  %v1094_v6 = vpop.f32.mrb[227].mxu0  ;;  %v2288_v9 = vmax.f32 %v1089_v55, 0.0 }
 0x2a1   :  { %v1095_v15 = vadd.f32 %v1094_v6, %v11879_v3  ;;  %v2289_v40 = vmax.f32 %v1091_v32, 0.0 }
 0x2a2   :  { %v2292_v21 = vmax.f32 %v1093_v29, 0.0  ;;  %3227 = vmatmul.mubr.bf16.gmra.mrb[76].mxu0 %v16986_v47  ;;  %v10863_v47 = vld [vmem:[%s16639_s3 + $0x190] ss:$8 sps:$4 sm:$0xff]  }
 0x2a3   :  { %3236 = vmatprep.mubr.bf16.mxu0 %v16987_v8  ;;  %v2293_v26 = vmax.f32 %v1095_v15, 0.0  ;;  %v10865_v8 = vld [vmem:[%s16639_s3 + $0x194] ss:$8 sps:$4 sm:$0xff]  }
 0x2a4   :  { %v12913_v62 = vpack.c.bf16 %v2292_v21, %v2288_v9  ;;  %v16989_v21 = vld [vmem:[#allocation49_spill] sm:$0xff]  ;;  %3695 = vmatprep.subr.bf16.mxu0 %v10865_v8  ;;  %v16994_v8 = vld [vmem:[#allocation52_spill] sm:$0xff] }
 0x2a5   :  { %v1098_v42 = vpop.f32.mrb[228].mxu0  ;;  %v12917_v61 = vpack.c.bf16 %v2293_v26, %v2289_v40  ;;  %3696 = vmatpush1.bf16.msra.mxu0 %v10863_v47 }
 0x2a6   :  { %v1099_v63 = vadd.f32 %v1098_v42, %v11875_v0  ;;  %v1100_v55 = vpop.f32.mrb[229].mxu0 }
 0x2a7   :  { %v1101_v36 = vadd.f32 %v1100_v55, %v11879_v3  ;;  %v1102_v22 = vpop.f32.mrb[230].mxu0 }
 0x2a8   :  { %v1103_v32 = vadd.f32 %v1102_v22, %v11875_v0  ;;  %v1104_v29 = vpop.f32.mrb[231].mxu0  ;;  %v2296_v15 = vmax.f32 %v1099_v63, 0.0  ;;  %v16992_v63 = vld [vmem:[#allocation5_spill] sm:$0xff] }
 0x2a9   :  { %v1105_v6 = vadd.f32 %v1104_v29, %v11879_v3  ;;  %v2297_v40 = vmax.f32 %v1101_v36, 0.0  ;;  %9035 = vmatmul.mubr.msk.bf16.gmra.mrb[36].mxu1 %vm301_vm0, %v16992_v63 }
 0x2aa   :  { %v2300_v9 = vmax.f32 %v1103_v32, 0.0  ;;  %3237 = vmatmul.mubr.bf16.gmra.mrb[80].mxu0 %v16989_v21  ;;  %1299 = vmatprep.mubr.bf16.mxu1 %v16916_v13 }
 0x2ab   :  { %3246 = vmatprep.mubr.bf16.mxu0 %v16990_v1  ;;  %v2301_v26 = vmax.f32 %v1105_v6, 0.0  ;;  %v16995_v1 = vld [vmem:[#allocation56_spill] sm:$0xff] }
 0x2ac   :  { %v12933_v42 = vpack.c.bf16 %v2300_v9, %v2296_v15 }
 0x2ad   :  { %v1108_v45 = vpop.f32.mrb[232].mxu0  ;;  %v12937_v55 = vpack.c.bf16 %v2301_v26, %v2297_v40 }
 0x2ae   :  { %16991 = vst [vmem:[#allocation44_spill] sm:$0xff] %v12933_v42  ;;  %v1109_v22 = vadd.f32 %v1108_v45, %v11875_v0  ;;  %v1110_v32 = vpop.f32.mrb[233].mxu0  ;;  %v16997_v42 = vld [vmem:[#allocation6_spill] sm:$0xff] }
 0x2af   :  { %16993 = vst [vmem:[#allocation2_spill] sm:$0xff] %v12937_v55  ;;  %v1111_v29 = vadd.f32 %v1110_v32, %v11879_v3  ;;  %v1112_v21 = vpop.f32.mrb[234].mxu0 }
 0x2b0   :  { %v1113_v36 = vadd.f32 %v1112_v21, %v11875_v0  ;;  %v1114_v6 = vpop.f32.mrb[235].mxu0  ;;  %v2304_v9 = vmax.f32 %v1109_v22, 0.0 }
 0x2b1   :  { %v1115_v15 = vadd.f32 %v1114_v6, %v11879_v3  ;;  %v2305_v40 = vmax.f32 %v1111_v29, 0.0  ;;  %9036 = vmatmul.mubr.msk.bf16.gmra.mrb[40].mxu1 %vm301_vm0, %v16997_v42  ;;  %v17000_v42 = vld [vmem:[#allocation59_spill] sm:$0xff] }
 0x2b2   :  { %v2308_v47 = vmax.f32 %v1113_v36, 0.0  ;;  %3247 = vmatmul.mubr.bf16.gmra.mrb[84].mxu0 %v16994_v8  ;;  %1309 = vmatprep.mubr.bf16.mxu1 %v16916_v13  ;;  %v16999_v8 = vld [vmem:[#allocation55_spill] sm:$0xff] }
 0x2b3   :  { %3256 = vmatprep.mubr.bf16.mxu0 %v16995_v1  ;;  %v2309_v26 = vmax.f32 %v1115_v15, 0.0 }
 0x2b4   :  { %v12946_v45 = vpack.c.bf16 %v2308_v47, %v2304_v9 }
 0x2b5   :  { %v1118_v63 = vpop.f32.mrb[236].mxu0  ;;  %v12950_v32 = vpack.c.bf16 %v2309_v26, %v2305_v40 }
 0x2b6   :  { %16996 = vst [vmem:[#allocation43_spill] sm:$0xff] %v12946_v45  ;;  %v1119_v21 = vadd.f32 %v1118_v63, %v11875_v0  ;;  %v1120_v55 = vpop.f32.mrb[237].mxu0  ;;  %v17002_v45 = vld [vmem:[#allocation7_spill] sm:$0xff] }
 0x2b7   :  { %16998 = vst [vmem:[#allocation47_spill] sm:$0xff] %v12950_v32  ;;  %v1121_v22 = vadd.f32 %v1120_v55, %v11879_v3  ;;  %v1122_v36 = vpop.f32.mrb[238].mxu0 }
 0x2b8   :  { %v1123_v6 = vadd.f32 %v1122_v36, %v11875_v0  ;;  %v1124_v29 = vpop.f32.mrb[239].mxu0  ;;  %v2312_v9 = vmax.f32 %v1119_v21, 0.0 }
 0x2b9   :  { %v1125_v15 = vadd.f32 %v1124_v29, %v11879_v3  ;;  %v2313_v1 = vmax.f32 %v1121_v22, 0.0  ;;  %9037 = vmatmul.mubr.msk.bf16.gmra.mrb[44].mxu1 %vm301_vm0, %v17002_v45  ;;  %v17005_v45 = vld [vmem:[#allocation62_spill] sm:$0xff] }
 0x2ba   :  { %v2316_v47 = vmax.f32 %v1123_v6, 0.0  ;;  %3257 = vmatmul.mubr.bf16.gmra.mrb[88].mxu0 %v16999_v8  ;;  %1319 = vmatprep.mubr.bf16.mxu1 %v16916_v13  ;;  %v17004_v8 = vld [vmem:[#allocation58_spill] sm:$0xff] }
 0x2bb   :  { %3266 = vmatprep.mubr.bf16.mxu0 %v17000_v42  ;;  %v2317_v40 = vmax.f32 %v1125_v15, 0.0  ;;  %v10866_v42 = vld [vmem:[%s16641_s5 + $0x18] sm:$0xff]  }
 0x2bc   :  { %v12959_v26 = vpack.c.bf16 %v2316_v47, %v2312_v9  ;;  %4876 = vmatpush1.bf16.msra.mxu1 %v10866_v42  ;;  %v10867_v42 = vld [vmem:[%s16639_s3 + $0x1a0] ss:$8 sps:$4 sm:$0xff]  }
 0x2bd   :  { %v1128_v63 = vpop.f32.mrb[240].mxu0  ;;  %v12963_v55 = vpack.c.bf16 %v2317_v40, %v2313_v1  ;;  %4877 = vmatprep.subr.bf16.mxu1 %v16916_v13 }
 0x2be   :  { %17001 = vst [vmem:[#allocation3_spill] sm:$0xff] %v12959_v26  ;;  %v1129_v36 = vadd.f32 %v1128_v63, %v11875_v0  ;;  %v1130_v32 = vpop.f32.mrb[241].mxu0  ;;  %v17007_v26 = vld [vmem:[#allocation8_spill] sm:$0xff] }
 0x2bf   :  { %17003 = vst [vmem:[#allocation46_spill] sm:$0xff] %v12963_v55  ;;  %v1131_v21 = vadd.f32 %v1130_v32, %v11879_v3  ;;  %v1132_v6 = vpop.f32.mrb[242].mxu0 }
 0x2c0   :  { %v1133_v29 = vadd.f32 %v1132_v6, %v11875_v0  ;;  %v1134_v22 = vpop.f32.mrb[243].mxu0  ;;  %v2320_v9 = vmax.f32 %v1129_v36, 0.0 }
 0x2c1   :  { %v1135_v15 = vadd.f32 %v1134_v22, %v11879_v3  ;;  %v2321_v1 = vmax.f32 %v1131_v21, 0.0  ;;  %9038 = vmatmul.mubr.msk.bf16.gmra.mrb[48].mxu1 %vm301_vm0, %v17007_v26 }
 0x2c2   :  { %v2324_v47 = vmax.f32 %v1133_v29, 0.0  ;;  %3267 = vmatmul.mubr.bf16.gmra.mrb[92].mxu0 %v17004_v8  ;;  %1329 = vmatprep.mubr.bf16.mxu1 %v16916_v13 }
 0x2c3   :  { %3276 = vmatprep.mubr.bf16.mxu0 %v17005_v45  ;;  %v2325_v40 = vmax.f32 %v1135_v15, 0.0  ;;  %v17009_v45 = vld [vmem:[#allocation61_spill] sm:$0xff] }
 0x2c4   :  { %v12975_v63 = vpack.c.bf16 %v2324_v47, %v2320_v9 }
 0x2c5   :  { %v1138_v32 = vpop.f32.mrb[244].mxu0  ;;  %v12979_v6 = vpack.c.bf16 %v2325_v40, %v2321_v1  ;;  %v10869_v1 = vld [vmem:[%s16639_s3 + $0x1a4] ss:$8 sps:$4 sm:$0xff]   ;;  %v17010_v40 = vld [vmem:[#allocation65_spill] sm:$0xff] }
 0x2c6   :  { %17006 = vst [vmem:[#allocation50_spill] sm:$0xff] %v12975_v63  ;;  %v1139_v36 = vadd.f32 %v1138_v32, %v11875_v0  ;;  %v1140_v29 = vpop.f32.mrb[245].mxu0  ;;  %3697 = vmatprep.subr.bf16.mxu0 %v10869_v1  ;;  %v17014_v1 = vld [vmem:[#allocation64_spill] sm:$0xff] }
 0x2c7   :  { %17008 = vst [vmem:[#allocation4_spill] sm:$0xff] %v12979_v6  ;;  %v1141_v22 = vadd.f32 %v1140_v29, %v11879_v3  ;;  %v1142_v8 = vpop.f32.mrb[246].mxu0  ;;  %3698 = vmatpush1.bf16.msra.mxu0 %v10867_v42 }
 0x2c8   :  { %v1143_v21 = vadd.f32 %v1142_v8, %v11875_v0  ;;  %v1144_v15 = vpop.f32.mrb[247].mxu0  ;;  %v2328_v47 = vmax.f32 %v1139_v36, 0.0  ;;  %v17012_v36 = vld [vmem:[#allocation9_spill] sm:$0xff] }
 0x2c9   :  { %v1145_v9 = vadd.f32 %v1144_v15, %v11879_v3  ;;  %v2329_v32 = vmax.f32 %v1141_v22, 0.0  ;;  %9039 = vmatmul.mubr.msk.bf16.gmra.mrb[52].mxu1 %vm301_vm0, %v17012_v36  ;;  %v17015_v36 = vld [vmem:[#allocation68_spill] sm:$0xff] }
 0x2ca   :  { %v2332_v26 = vmax.f32 %v1143_v21, 0.0  ;;  %3277 = vmatmul.mubr.bf16.gmra.mrb[96].mxu0 %v17009_v45  ;;  %1339 = vmatprep.mubr.bf16.mxu1 %v16916_v13 }
 0x2cb   :  { %3286 = vmatprep.mubr.bf16.mxu0 %v17010_v40  ;;  %v2333_v29 = vmax.f32 %v1145_v9, 0.0 }
 0x2cc   :  { %v12995_v8 = vpack.c.bf16 %v2332_v26, %v2328_v47 }
 0x2cd   :  { %v1148_v15 = vpop.f32.mrb[248].mxu0  ;;  %v12999_v21 = vpack.c.bf16 %v2333_v29, %v2329_v32 }
 0x2ce   :  { %17011 = vst [vmem:[#allocation49_spill] sm:$0xff] %v12995_v8  ;;  %v1149_v45 = vadd.f32 %v1148_v15, %v11875_v0  ;;  %v1150_v63 = vpop.f32.mrb[249].mxu0 }
 0x2cf   :  { %17013 = vst [vmem:[#allocation53_spill] sm:$0xff] %v12999_v21  ;;  %v1151_v6 = vadd.f32 %v1150_v63, %v11879_v3  ;;  %v1152_v40 = vpop.f32.mrb[250].mxu0  ;;  %v17016_v21 = vld [vmem:[#allocation10_spill] sm:$0xff] }
 0x2d0   :  { %v1153_v22 = vadd.f32 %v1152_v40, %v11875_v0  ;;  %v1154_v9 = vpop.f32.mrb[251].mxu0  ;;  %v2336_v26 = vmax.f32 %v1149_v45, 0.0 }
 0x2d1   :  { %v1155_v47 = vadd.f32 %v1154_v9, %v11879_v3  ;;  %v2337_v32 = vmax.f32 %v1151_v6, 0.0  ;;  %9040 = vmatmul.mubr.msk.bf16.gmra.mrb[56].mxu1 %vm301_vm0, %v17016_v21  ;;  %v17018_v21 = vld [vmem:[#allocation71_spill] sm:$0xff] }
 0x2d2   :  { %v2340_v42 = vmax.f32 %v1153_v22, 0.0  ;;  %3287 = vmatmul.mubr.bf16.gmra.mrb[100].mxu0 %v17014_v1  ;;  %1349 = vmatprep.mubr.bf16.mxu1 %v16916_v13  ;;  %v17017_v1 = vld [vmem:[#allocation67_spill] sm:$0xff] }
 0x2d3   :  { %3296 = vmatprep.mubr.bf16.mxu0 %v17015_v36  ;;  %v2341_v29 = vmax.f32 %v1155_v47, 0.0 }
 0x2d4   :  { %v13008_v15 = vpack.c.bf16 %v2340_v42, %v2336_v26 }
 0x2d5   :  { %v1158_v8 = vpop.f32.mrb[252].mxu0  ;;  %v13012_v63 = vpack.c.bf16 %v2341_v29, %v2337_v32  ;;  %v17019_v29 = vld [vmem:[#allocation11_spill] sm:$0xff] }
 0x2d6   :  { %v1159_v40 = vadd.f32 %v1158_v8, %v11875_v0  ;;  %v1160_v55 = vpop.f32.mrb[253].mxu0 }
 0x2d7   :  { %v1161_v45 = vadd.f32 %v1160_v55, %v11879_v3  ;;  %v1162_v22 = vpop.f32.mrb[254].mxu0 }
 0x2d8   :  { %v1163_v9 = vadd.f32 %v1162_v22, %v11875_v0  ;;  %v1164_v6 = vpop.f32.mrb[255].mxu0  ;;  %v2344_v26 = vmax.f32 %v1159_v40, 0.0  ;;  %v17020_v0 = vld [vmem:[#allocation70_spill] sm:$0xff]  ;;  %v17022_v22 = vld [vmem:[#allocation12_spill] sm:$0xff] }
 0x2d9   :  { %v1165_v47 = vadd.f32 %v1164_v6, %v11879_v3  ;;  %v2345_v36 = vmax.f32 %v1161_v45, 0.0  ;;  %9041 = vmatmul.mubr.msk.bf16.gmra.mrb[60].mxu1 %vm301_vm0, %v17019_v29  ;;  %v17021_v3 = vld [vmem:[#allocation74_spill] sm:$0xff]  ;;  %v17023_v45 = vld [vmem:[#allocation73_spill] sm:$0xff]  ;;  %v17031_v29 = vld [vmem:[#allocation15_spill] sm:$0xff] }
 0x2da   :  { %v2348_v42 = vmax.f32 %v1163_v9, 0.0  ;;  %3297 = vmatmul.mubr.bf16.gmra.mrb[104].mxu0 %v17017_v1  ;;  %1359 = vmatprep.mubr.bf16.mxu1 %v16916_v13  ;;  %v10870_v40 = vld [vmem:[%s16641_s5 + $0x20] sm:$0xff]   ;;  %v10871_v9 = vld [vmem:[%s16639_s3 + $0x1b0] ss:$8 sps:$4 sm:$0xff]   ;;  %v10873_v6 = vld [vmem:[%s16639_s3 + $0x1b4] ss:$8 sps:$4 sm:$0xff]  }
 0x2db   :  { %3306 = vmatprep.mubr.bf16.mxu0 %v17018_v21  ;;  %v2349_v32 = vmax.f32 %v1165_v47, 0.0  ;;  %4878 = vmatpush1.bf16.msra.mxu1 %v10870_v40  ;;  %v17024_v47 = vld [vmem:[#allocation77_spill] sm:$0xff]  ;;  %v17027_v1 = vld [vmem:[#allocation80_spill] sm:$0xff]  ;;  %v17028_v21 = vld [vmem:[#allocation14_spill] sm:$0xff] }
 0x2dc   :  { %v13021_v8 = vpack.c.bf16 %v2348_v42, %v2344_v26  ;;  %4879 = vmatprep.subr.bf16.mxu1 %v16916_v13  ;;  %3699 = vmatprep.subr.bf16.mxu0 %v10873_v6  ;;  %v17025_v26 = vld [vmem:[#allocation13_spill] sm:$0xff]  ;;  %v17026_v42 = vld [vmem:[#allocation76_spill] sm:$0xff]  ;;  %v10874_v40 = vld [vmem:[%s16641_s5 + $0x28] sm:$0xff]  }
 0x2dd   :  { %v13025_v55 = vpack.c.bf16 %v2349_v32, %v2345_v36  ;;  %3700 = vmatpush1.bf16.msra.mxu0 %v10871_v9  ;;  %v17029_v36 = vld [vmem:[#allocation79_spill] sm:$0xff] }
 0x2de   :  { %v17030_v32 = vld [vmem:[#allocation83_spill] sm:$0xff] }
 0x2df   :  { %4880 = vmatpush1.bf16.msra.mxu1 %v10874_v40  ;;  %v10875_v9 = vld [vmem:[%s16639_s3 + $0x1c0] ss:$8 sps:$4 sm:$0xff]   ;;  %v10877_v6 = vld [vmem:[%s16639_s3 + $0x1c4] ss:$8 sps:$4 sm:$0xff]  }
 0x2e0   :  { %4881 = vmatprep.subr.bf16.mxu1 %v16916_v13  ;;  %3701 = vmatprep.subr.bf16.mxu0 %v10877_v6 }
 0x2e1   :  { %9042 = vmatmul.mubr.msk.bf16.gmra.mrb[64].mxu1 %vm301_vm0, %v17022_v22  ;;  %v17034_v22 = vld [vmem:[#allocation16_spill] sm:$0xff]  ;;  %3702 = vmatpush1.bf16.msra.mxu0 %v10875_v9 }
 0x2e2   :  { %3307 = vmatmul.mubr.bf16.gmra.mrb[108].mxu0 %v17020_v0  ;;  %1369 = vmatprep.mubr.bf16.mxu1 %v16916_v13  ;;  %v17032_v0 = vld [vmem:[#allocation82_spill] sm:$0xff] }
 0x2e3   :  { %3316 = vmatprep.mubr.bf16.mxu0 %v17021_v3  ;;  %v17033_v3 = vld [vmem:[#allocation86_spill] sm:$0xff] }
 0x2e9   :  { %9043 = vmatmul.mubr.msk.bf16.gmra.mrb[68].mxu1 %vm301_vm0, %v17025_v26  ;;  %v17037_v26 = vld [vmem:[#allocation17_spill] sm:$0xff] }
 0x2ea   :  { %3317 = vmatmul.mubr.bf16.gmra.mrb[112].mxu0 %v17023_v45  ;;  %1379 = vmatprep.mubr.bf16.mxu1 %v16916_v13  ;;  %v17035_v45 = vld [vmem:[#allocation85_spill] sm:$0xff] }
 0x2eb   :  { %3326 = vmatprep.mubr.bf16.mxu0 %v17024_v47  ;;  %v17036_v47 = vld [vmem:[#allocation89_spill] sm:$0xff] }
 0x2f1   :  { %9044 = vmatmul.mubr.msk.bf16.gmra.mrb[72].mxu1 %vm301_vm0, %v17028_v21  ;;  %v17040_v21 = vld [vmem:[#allocation18_spill] sm:$0xff] }
 0x2f2   :  { %3327 = vmatmul.mubr.bf16.gmra.mrb[116].mxu0 %v17026_v42  ;;  %1389 = vmatprep.mubr.bf16.mxu1 %v16916_v13  ;;  %v17038_v42 = vld [vmem:[#allocation88_spill] sm:$0xff] }
 0x2f3   :  { %3336 = vmatprep.mubr.bf16.mxu0 %v17027_v1  ;;  %v17039_v1 = vld [vmem:[#allocation92_spill] sm:$0xff] }
 0x2f9   :  { %9045 = vmatmul.mubr.msk.bf16.gmra.mrb[76].mxu1 %vm301_vm0, %v17031_v29  ;;  %v10878_v29 = vld [vmem:[%s16641_s5 + $0x30] sm:$0xff]  }
 0x2fa   :  { %3337 = vmatmul.mubr.bf16.gmra.mrb[120].mxu0 %v17029_v36  ;;  %1399 = vmatprep.mubr.bf16.mxu1 %v16916_v13  ;;  %v17041_v36 = vld [vmem:[#allocation91_spill] sm:$0xff] }
 0x2fb   :  { %3346 = vmatprep.mubr.bf16.mxu0 %v17030_v32  ;;  %v17042_v32 = vld [vmem:[#allocation19_spill] sm:$0xff]  ;;  %4882 = vmatpush1.bf16.msra.mxu1 %v10878_v29 }
 0x2fc   :  { %4883 = vmatprep.subr.bf16.mxu1 %v16916_v13 }
 0x301   :  { %9046 = vmatmul.mubr.msk.bf16.gmra.mrb[80].mxu1 %vm301_vm0, %v17034_v22  ;;  %v17046_v22 = vld [vmem:[#allocation23_spill] sm:$0xff] }
 0x302   :  { %3347 = vmatmul.mubr.bf16.gmra.mrb[124].mxu0 %v17032_v0  ;;  %1409 = vmatprep.mubr.bf16.mxu1 %v16916_v13  ;;  %v17043_v0 = vld [vmem:[#allocation20_spill] sm:$0xff] }
 0x303   :  { %3356 = vmatprep.mubr.bf16.mxu0 %v17033_v3  ;;  %v17045_v3 = vld [vmem:[#allocation22_spill] sm:$0xff] }
 0x304   :  { %v251_v40 = vsub.s32 2, %v17045_v3 }
 0x309   :  { %9047 = vmatmul.mubr.msk.bf16.gmra.mrb[84].mxu1 %vm301_vm0, %v17037_v26 }
 0x30a   :  { %3357 = vmatmul.mubr.bf16.gmra.mrb[128].mxu0 %v17035_v45  ;;  %1419 = vmatprep.mubr.bf16.mxu1 %v16916_v13 }
 0x30b   :  { %3366 = vmatprep.mubr.bf16.mxu0 %v17036_v47 }
 0x311   :  { %9048 = vmatmul.mubr.msk.bf16.gmra.mrb[88].mxu1 %vm301_vm0, %v17040_v21 }
 0x312   :  { %3367 = vmatmul.mubr.bf16.gmra.mrb[132].mxu0 %v17038_v42  ;;  %1429 = vmatprep.mubr.bf16.mxu1 %v16916_v13 }
 0x313   :  { %3376 = vmatprep.mubr.bf16.mxu0 %v17039_v1 }
 0x319   :  { %9049 = vmatmul.mubr.msk.bf16.gmra.mrb[92].mxu1 %vm301_vm0, %v17042_v32 }
 0x31a   :  { %3377 = vmatmul.mubr.bf16.gmra.mrb[136].mxu0 %v17041_v36  ;;  %1439 = vmatprep.mubr.bf16.mxu1 %v16916_v13 }
 0x31b   :  { %3386 = vmatprep.mubr.bf16.mxu0 %v12603_v51  ;;  %v10881_v51 = vld [vmem:[%s16639_s3 + $0x1d4] ss:$8 sps:$4 sm:$0xff]  }
 0x31c   :  { %3703 = vmatprep.subr.bf16.mxu0 %v10881_v51 }
 0x321   :  { %9050 = vmatmul.mubr.msk.bf16.gmra.mrb[96].mxu1 %vm301_vm0, %v17043_v0  ;;  %v17047_v0 = vld [vmem:[#allocation24_spill] sm:$0xff] }
 0x322   :  { %3387 = vmatmul.mubr.bf16.gmra.mrb[140].mxu0 %v12601_v57  ;;  %1449 = vmatprep.mubr.bf16.mxu1 %v16916_v13  ;;  %v10879_v57 = vld [vmem:[%s16639_s3 + $0x1d0] ss:$8 sps:$4 sm:$0xff]  }
 0x323   :  { %3396 = vmatprep.mubr.bf16.mxu0 %v12616_v14  ;;  %3704 = vmatpush1.bf16.msra.mxu0 %v10879_v57  ;;  %v17044_v14 = vld [vmem:[#allocation21_spill] sm:$0xff] }
 0x329   :  { %9051 = vmatmul.mubr.msk.bf16.gmra.mrb[100].mxu1 %vm301_vm0, %v17044_v14 }
 0x32a   :  { %3397 = vmatmul.mubr.bf16.gmra.mrb[144].mxu0 %v12614_v20  ;;  %1459 = vmatprep.mubr.bf16.mxu1 %v16916_v13  ;;  %v255_v20 = vsub.s32 3, %v17045_v3  ;;  %v17079_v3 = vld [vmem:[#allocation50_spill] sm:$0xff] }
 0x32b   :  { %3406 = vmatprep.mubr.bf16.mxu0 %v12638_v43  ;;  %v11425_v43 = vld [vmem:[%s16640_s2] sm:$0xf] }
 0x32c   :  { %v13117_v45 = vrot.slane %v11425_v43, %v251_v40  ;;  %v13119_v9 = vrot.slane %v11425_v43, %v255_v20 }
 0x330   :  { %v1201_v6 = vpop.f32.mrb[0].mxu1 }
 0x331   :  { %9052 = vmatmul.mubr.msk.bf16.gmra.mrb[104].mxu1 %vm301_vm0, %v17046_v22  ;;  %v1203_v47 = vpop.f32.mrb[1].mxu1 }
 0x332   :  { %3407 = vmatmul.mubr.bf16.gmra.mrb[148].mxu0 %v12633_v54  ;;  %1469 = vmatprep.mubr.bf16.mxu1 %v16916_v13  ;;  %v1202_v54 = vadd.f32 %v1201_v6, %v13117_v45  ;;  %v1205_v26 = vpop.f32.mrb[2].mxu1 }
 0x333   :  { %3416 = vmatprep.mubr.bf16.mxu0 %v12660_v48  ;;  %v1204_v48 = vadd.f32 %v1203_v47, %v13119_v9  ;;  %v1206_v1 = vadd.f32 %v1205_v26, %v13117_v45  ;;  %v1207_v21 = vpop.f32.mrb[3].mxu1  ;;  %v10882_v47 = vld [vmem:[%s16641_s5 + $0x38] sm:$0xff]  }
 0x334   :  { %v1842_v42 = vmax.f32 %v1202_v54, 0.0  ;;  %v1208_v32 = vadd.f32 %v1207_v21, %v13119_v9  ;;  %4884 = vmatpush1.bf16.msra.mxu1 %v10882_v47 }
 0x335   :  { %v1843_v36 = vmax.f32 %v1204_v48, 0.0  ;;  %v1846_v29 = vmax.f32 %v1206_v1, 0.0  ;;  %v17048_v1 = vld [vmem:[#allocation25_spill] sm:$0xff]  ;;  %4885 = vmatprep.subr.bf16.mxu1 %v16916_v13 }
 0x336   :  { %v1847_v57 = vmax.f32 %v1208_v32, 0.0 }
 0x338   :  { %v1211_v51 = vpop.f32.mrb[4].mxu1  ;;  %v13133_v14 = vpack.c.bf16 %v1847_v57, %v1843_v36  ;;  %v10883_v57 = vld [vmem:[%s16639_s3 + $0x1e0] ss:$8 sps:$4 sm:$0xff]  }
 0x339   :  { %9053 = vmatmul.mubr.msk.bf16.gmra.mrb[108].mxu1 %vm301_vm0, %v17047_v0  ;;  %v1213_v40 = vpop.f32.mrb[5].mxu1 }
 0x33a   :  { %3417 = vmatmul.mubr.bf16.gmra.mrb[152].mxu0 %v12655_v41  ;;  %1479 = vmatprep.mubr.bf16.mxu1 %v16916_v13  ;;  %v13131_v41 = vpack.c.bf16 %v1846_v29, %v1842_v42  ;;  %v1214_v20 = vadd.f32 %v1213_v40, %v13119_v9  ;;  %v1215_v22 = vpop.f32.mrb[6].mxu1 }
 0x33b   :  { %3426 = vmatprep.mubr.bf16.mxu0 %v12673_v56  ;;  %v1212_v56 = vadd.f32 %v1211_v51, %v13117_v45  ;;  %v1216_v6 = vadd.f32 %v1215_v22, %v13117_v45  ;;  %v1217_v54 = vpop.f32.mrb[7].mxu1  ;;  %v10885_v51 = vld [vmem:[%s16639_s3 + $0x1e4] ss:$8 sps:$4 sm:$0xff]  }
 0x33c   :  { %v1851_v48 = vmax.f32 %v1214_v20, 0.0  ;;  %v1218_v26 = vadd.f32 %v1217_v54, %v13119_v9  ;;  %3705 = vmatprep.subr.bf16.mxu0 %v10885_v51  ;;  %v17049_v54 = vld [vmem:[#allocation26_spill] sm:$0xff] }
 0x33d   :  { %v1850_v43 = vmax.f32 %v1212_v56, 0.0  ;;  %v1854_v42 = vmax.f32 %v1216_v6, 0.0  ;;  %3706 = vmatpush1.bf16.msra.mxu0 %v10883_v57 }
 0x340   :  { %v1221_v21 = vpop.f32.mrb[8].mxu1 }
 0x341   :  { %9054 = vmatmul.mubr.msk.bf16.gmra.mrb[112].mxu1 %vm301_vm0, %v17048_v1  ;;  %v1222_v32 = vadd.f32 %v1221_v21, %v13117_v45  ;;  %v1223_v29 = vpop.f32.mrb[9].mxu1 }
 0x342   :  { %3427 = vmatmul.mubr.bf16.gmra.mrb[156].mxu0 %v12671_v2  ;;  %v1855_v2 = vmax.f32 %v1218_v26, 0.0  ;;  %1489 = vmatprep.mubr.bf16.mxu1 %v16916_v13  ;;  %v1224_v0 = vadd.f32 %v1223_v29, %v13119_v9  ;;  %v1225_v56 = vpop.f32.mrb[10].mxu1 }
 0x343   :  { %3436 = vmatprep.mubr.bf16.mxu0 %v12683_v5  ;;  %v13147_v5 = vpack.c.bf16 %v1854_v42, %v1850_v43  ;;  %v1858_v40 = vmax.f32 %v1222_v32, 0.0  ;;  %v1226_v20 = vadd.f32 %v1225_v56, %v13117_v45  ;;  %v1227_v22 = vpop.f32.mrb[11].mxu1 }
 0x344   :  { %v13150_v36 = vpack.c.bf16 %v1855_v2, %v1851_v48  ;;  %v1859_v43 = vmax.f32 %v1224_v0, 0.0 }
 0x345   :  { %v1862_v6 = vmax.f32 %v1226_v20, 0.0 }
 0x347   :  { %v13167_v48 = vpack.c.bf16 %v1862_v6, %v1858_v40  ;;  %v17050_v40 = vld [vmem:[#allocation27_spill] sm:$0xff] }
 0x348   :  { %v1231_v26 = vpop.f32.mrb[12].mxu1 }
 0x349   :  { %9055 = vmatmul.mubr.msk.bf16.gmra.mrb[116].mxu1 %vm301_vm0, %v17049_v54  ;;  %v1232_v42 = vadd.f32 %v1231_v26, %v13117_v45  ;;  %v1233_v1 = vpop.f32.mrb[13].mxu1 }
 0x34a   :  { %3437 = vmatmul.mubr.bf16.gmra.mrb[160].mxu0 %v12681_v4  ;;  %v1228_v4 = vadd.f32 %v1227_v22, %v13119_v9  ;;  %1499 = vmatprep.mubr.bf16.mxu1 %v16916_v13  ;;  %v1234_v2 = vadd.f32 %v1233_v1, %v13119_v9  ;;  %v1235_v21 = vpop.f32.mrb[14].mxu1 }
 0x34b   :  { %3446 = vmatprep.mubr.bf16.mxu0 %v12699_v25  ;;  %v1866_v32 = vmax.f32 %v1232_v42, 0.0  ;;  %v1236_v29 = vadd.f32 %v1235_v21, %v13117_v45  ;;  %v1237_v0 = vpop.f32.mrb[15].mxu1 }
 0x34c   :  { %v1863_v47 = vmax.f32 %v1228_v4, 0.0  ;;  %v1867_v57 = vmax.f32 %v1234_v2, 0.0  ;;  %v1238_v51 = vadd.f32 %v1237_v0, %v13119_v9 }
 0x34d   :  { %v1870_v56 = vmax.f32 %v1236_v29, 0.0 }
 0x34e   :  { %v13169_v25 = vpack.c.bf16 %v1863_v47, %v1859_v43  ;;  %v1871_v20 = vmax.f32 %v1238_v51, 0.0 }
 0x350   :  { %v1241_v22 = vpop.f32.mrb[16].mxu1  ;;  %v13182_v43 = vpack.c.bf16 %v1871_v20, %v1867_v57 }
 0x351   :  { %9056 = vmatmul.mubr.msk.bf16.gmra.mrb[120].mxu1 %vm301_vm0, %v17050_v40  ;;  %v1243_v4 = vpop.f32.mrb[17].mxu1 }
 0x352   :  { %3447 = vmatmul.mubr.bf16.gmra.mrb[164].mxu0 %v12691_v39  ;;  %1509 = vmatprep.mubr.bf16.mxu1 %v16916_v13  ;;  %v13180_v39 = vpack.c.bf16 %v1870_v56, %v1866_v32  ;;  %v1244_v6 = vadd.f32 %v1243_v4, %v13119_v9  ;;  %v1245_v54 = vpop.f32.mrb[18].mxu1  ;;  %v17051_v32 = vld [vmem:[#allocation28_spill] sm:$0xff]  ;;  %v10886_v4 = vld [vmem:[%s16641_s5 + $0x40] sm:$0xff]  }
 0x353   :  { %3456 = vmatprep.mubr.bf16.mxu0 %v12709_v37  ;;  %v1242_v37 = vadd.f32 %v1241_v22, %v13117_v45  ;;  %v1246_v26 = vadd.f32 %v1245_v54, %v13117_v45  ;;  %v1247_v42 = vpop.f32.mrb[19].mxu1  ;;  %4886 = vmatpush1.bf16.msra.mxu1 %v10886_v4 }
 0x354   :  { %v1875_v1 = vmax.f32 %v1244_v6, 0.0  ;;  %v1248_v2 = vadd.f32 %v1247_v42, %v13119_v9  ;;  %4887 = vmatprep.subr.bf16.mxu1 %v16916_v13 }
 0x355   :  { %v1874_v47 = vmax.f32 %v1242_v37, 0.0  ;;  %v1878_v21 = vmax.f32 %v1246_v26, 0.0  ;;  %v17052_v26 = vld [vmem:[#allocation29_spill] sm:$0xff] }
 0x356   :  { %v1879_v29 = vmax.f32 %v1248_v2, 0.0 }
 0x358   :  { %v1251_v0 = vpop.f32.mrb[20].mxu1  ;;  %v13195_v57 = vpack.c.bf16 %v1879_v29, %v1875_v1  ;;  %v10887_v29 = vld [vmem:[%s16639_s3 + $0x1f0] ss:$8 sps:$4 sm:$0xff]  }
 0x359   :  { %9057 = vmatmul.mubr.msk.bf16.gmra.mrb[124].mxu1 %vm301_vm0, %v17051_v32  ;;  %v1253_v51 = vpop.f32.mrb[21].mxu1 }
 0x35a   :  { %3457 = vmatmul.mubr.bf16.gmra.mrb[168].mxu0 %v12707_v17  ;;  %1519 = vmatprep.mubr.bf16.mxu1 %v16916_v13  ;;  %v13193_v17 = vpack.c.bf16 %v1878_v21, %v1874_v47  ;;  %v1254_v56 = vadd.f32 %v1253_v51, %v13119_v9  ;;  %v1255_v40 = vpop.f32.mrb[22].mxu1 }
 0x35b   :  { %3466 = vmatprep.mubr.bf16.mxu0 %v12719_v30  ;;  %v1252_v30 = vadd.f32 %v1251_v0, %v13117_v45  ;;  %v1256_v22 = vadd.f32 %v1255_v40, %v13117_v45  ;;  %v1257_v37 = vpop.f32.mrb[23].mxu1  ;;  %v10889_v0 = vld [vmem:[%s16639_s3 + $0x1f4] ss:$8 sps:$4 sm:$0xff]  }
 0x35c   :  { %v1883_v6 = vmax.f32 %v1254_v56, 0.0  ;;  %v1258_v54 = vadd.f32 %v1257_v37, %v13119_v9  ;;  %3707 = vmatprep.subr.bf16.mxu0 %v10889_v0  ;;  %v17053_v37 = vld [vmem:[#allocation30_spill] sm:$0xff] }
 0x35d   :  { %v1882_v20 = vmax.f32 %v1252_v30, 0.0  ;;  %v1886_v47 = vmax.f32 %v1256_v22, 0.0  ;;  %3708 = vmatpush1.bf16.msra.mxu0 %v10887_v29 }
 0x360   :  { %v1261_v42 = vpop.f32.mrb[24].mxu1 }
 0x361   :  { %9058 = vmatmul.mubr.msk.bf16.gmra.mrb[128].mxu1 %vm301_vm0, %v17052_v26  ;;  %v1262_v2 = vadd.f32 %v1261_v42, %v13117_v45  ;;  %v1263_v21 = vpop.f32.mrb[25].mxu1 }
 0x362   :  { %3467 = vmatmul.mubr.bf16.gmra.mrb[172].mxu0 %v12717_v10  ;;  %v1887_v10 = vmax.f32 %v1258_v54, 0.0  ;;  %1529 = vmatprep.mubr.bf16.mxu1 %v16916_v13  ;;  %v1264_v32 = vadd.f32 %v1263_v21, %v13119_v9  ;;  %v1265_v30 = vpop.f32.mrb[26].mxu1 }
 0x363   :  { %3476 = vmatprep.mubr.bf16.mxu0 %v12729_v35  ;;  %v13209_v35 = vpack.c.bf16 %v1886_v47, %v1882_v20  ;;  %v1890_v51 = vmax.f32 %v1262_v2, 0.0  ;;  %v1266_v56 = vadd.f32 %v1265_v30, %v13117_v45  ;;  %v1267_v40 = vpop.f32.mrb[27].mxu1 }
 0x364   :  { %v13212_v1 = vpack.c.bf16 %v1887_v10, %v1883_v6  ;;  %v1891_v20 = vmax.f32 %v1264_v32, 0.0 }
 0x365   :  { %v1894_v22 = vmax.f32 %v1266_v56, 0.0 }
 0x367   :  { %v13229_v6 = vpack.c.bf16 %v1894_v22, %v1890_v51  ;;  %v17054_v51 = vld [vmem:[#allocation31_spill] sm:$0xff] }
 0x368   :  { %v1271_v54 = vpop.f32.mrb[28].mxu1 }
 0x369   :  { %9059 = vmatmul.mubr.msk.bf16.gmra.mrb[132].mxu1 %vm301_vm0, %v17053_v37  ;;  %v1272_v47 = vadd.f32 %v1271_v54, %v13117_v45  ;;  %v1273_v26 = vpop.f32.mrb[29].mxu1 }
 0x36a   :  { %3477 = vmatmul.mubr.bf16.gmra.mrb[176].mxu0 %v12727_v12  ;;  %v1268_v12 = vadd.f32 %v1267_v40, %v13119_v9  ;;  %1539 = vmatprep.mubr.bf16.mxu1 %v16916_v13  ;;  %v1274_v10 = vadd.f32 %v1273_v26, %v13119_v9  ;;  %v1275_v42 = vpop.f32.mrb[30].mxu1 }
 0x36b   :  { %3486 = vmatprep.mubr.bf16.mxu0 %v12745_v53  ;;  %v1898_v2 = vmax.f32 %v1272_v47, 0.0  ;;  %v1276_v21 = vadd.f32 %v1275_v42, %v13117_v45  ;;  %v1277_v32 = vpop.f32.mrb[31].mxu1 }
 0x36c   :  { %v1895_v4 = vmax.f32 %v1268_v12, 0.0  ;;  %v1899_v29 = vmax.f32 %v1274_v10, 0.0  ;;  %v1278_v0 = vadd.f32 %v1277_v32, %v13119_v9 }
 0x36d   :  { %v1902_v30 = vmax.f32 %v1276_v21, 0.0 }
 0x36e   :  { %v13231_v53 = vpack.c.bf16 %v1895_v4, %v1891_v20  ;;  %v1903_v56 = vmax.f32 %v1278_v0, 0.0 }
 0x370   :  { %v13244_v20 = vpack.c.bf16 %v1903_v56, %v1899_v29 }
 0x371   :  { %9060 = vmatmul.mubr.msk.bf16.gmra.mrb[136].mxu1 %vm301_vm0, %v17054_v51  ;;  %v1281_v40 = vpop.f32.mrb[32].mxu1 }
 0x372   :  { %3487 = vmatmul.mubr.bf16.gmra.mrb[180].mxu0 %v12737_v33  ;;  %1549 = vmatprep.mubr.bf16.mxu1 %v16916_v13  ;;  %v13242_v33 = vpack.c.bf16 %v1902_v30, %v1898_v2  ;;  %v1283_v12 = vpop.f32.mrb[33].mxu1  ;;  %v17055_v2 = vld [vmem:[#allocation32_spill] sm:$0xff] }
 0x373   :  { %3496 = vmatprep.mubr.bf16.mxu0 %v12755_v24  ;;  %v1282_v24 = vadd.f32 %v1281_v40, %v13117_v45  ;;  %v1284_v22 = vadd.f32 %v1283_v12, %v13119_v9  ;;  %v1285_v37 = vpop.f32.mrb[34].mxu1  ;;  %v10890_v12 = vld [vmem:[%s16641_s5 + $0x48] sm:$0xff]  }
 0x374   :  { %v1286_v54 = vadd.f32 %v1285_v37, %v13117_v45  ;;  %v1287_v47 = vpop.f32.mrb[35].mxu1  ;;  %4888 = vmatpush1.bf16.msra.mxu1 %v10890_v12 }
 0x375   :  { %v1906_v4 = vmax.f32 %v1282_v24, 0.0  ;;  %v1907_v26 = vmax.f32 %v1284_v22, 0.0  ;;  %v1288_v10 = vadd.f32 %v1287_v47, %v13119_v9  ;;  %4889 = vmatprep.subr.bf16.mxu1 %v16916_v13 }
 0x376   :  { %v1910_v42 = vmax.f32 %v1286_v54, 0.0  ;;  %v17056_v54 = vld [vmem:[#allocation33_spill] sm:$0xff] }
 0x377   :  { %v1911_v21 = vmax.f32 %v1288_v10, 0.0 }
 0x379   :  { %9061 = vmatmul.mubr.msk.bf16.gmra.mrb[140].mxu1 %vm301_vm0, %v17055_v2  ;;  %v13257_v29 = vpack.c.bf16 %v1911_v21, %v1907_v26 }
 0x37a   :  { %3497 = vmatmul.mubr.bf16.gmra.mrb[184].mxu0 %v12753_v49  ;;  %1559 = vmatprep.mubr.bf16.mxu1 %v16916_v13  ;;  %v13255_v49 = vpack.c.bf16 %v1910_v42, %v1906_v4 }
 0x37b   :  { %3506 = vmatprep.mubr.bf16.mxu0 %v12774_v59 }
 0x37c   :  { %v1291_v32 = vpop.f32.mrb[36].mxu1 }
 0x37d   :  { %v1292_v59 = vadd.f32 %v1291_v32, %v13117_v45  ;;  %v1293_v0 = vpop.f32.mrb[37].mxu1 }
 0x37e   :  { %v1294_v30 = vadd.f32 %v1293_v0, %v13119_v9  ;;  %v1295_v51 = vpop.f32.mrb[38].mxu1 }
 0x37f   :  { %v1914_v56 = vmax.f32 %v1292_v59, 0.0  ;;  %v1296_v40 = vadd.f32 %v1295_v51, %v13117_v45  ;;  %v1297_v24 = vpop.f32.mrb[39].mxu1 }
 0x380   :  { %v1915_v22 = vmax.f32 %v1294_v30, 0.0  ;;  %v1298_v37 = vadd.f32 %v1297_v24, %v13119_v9 }
 0x381   :  { %v1918_v4 = vmax.f32 %v1296_v40, 0.0  ;;  %9062 = vmatmul.mubr.msk.bf16.gmra.mrb[144].mxu1 %vm301_vm0, %v17056_v54  ;;  %v17057_v40 = vld [vmem:[#allocation34_spill] sm:$0xff] }
 0x382   :  { %3507 = vmatmul.mubr.bf16.gmra.mrb[188].mxu0 %v12766_v11  ;;  %v1919_v11 = vmax.f32 %v1298_v37, 0.0  ;;  %1569 = vmatprep.mubr.bf16.mxu1 %v16916_v13 }
 0x383   :  { %3516 = vmatprep.mubr.bf16.mxu0 %v12793_v27  ;;  %v13271_v27 = vpack.c.bf16 %v1918_v4, %v1914_v56 }
 0x384   :  { %v1301_v47 = vpop.f32.mrb[40].mxu1  ;;  %v13274_v26 = vpack.c.bf16 %v1919_v11, %v1915_v22 }
 0x385   :  { %v1302_v10 = vadd.f32 %v1301_v47, %v13117_v45  ;;  %v1303_v42 = vpop.f32.mrb[41].mxu1 }
 0x386   :  { %v1304_v2 = vadd.f32 %v1303_v42, %v13119_v9  ;;  %v1305_v21 = vpop.f32.mrb[42].mxu1 }
 0x387   :  { %v1922_v32 = vmax.f32 %v1302_v10, 0.0  ;;  %v1306_v59 = vadd.f32 %v1305_v21, %v13117_v45  ;;  %v1307_v0 = vpop.f32.mrb[43].mxu1 }
 0x388   :  { %v1923_v30 = vmax.f32 %v1304_v2, 0.0  ;;  %v1308_v51 = vadd.f32 %v1307_v0, %v13119_v9 }
 0x389   :  { %v1926_v56 = vmax.f32 %v1306_v59, 0.0  ;;  %9063 = vmatmul.mubr.msk.bf16.gmra.mrb[148].mxu1 %vm301_vm0, %v17057_v40 }
 0x38a   :  { %3517 = vmatmul.mubr.bf16.gmra.mrb[192].mxu0 %v12786_v46  ;;  %v1927_v24 = vmax.f32 %v1308_v51, 0.0  ;;  %1579 = vmatprep.mubr.bf16.mxu1 %v16916_v13 }
 0x38b   :  { %3526 = vmatprep.mubr.bf16.mxu0 %v12813_v7  ;;  %v13285_v46 = vpack.c.bf16 %v1926_v56, %v1922_v32  ;;  %v17058_v32 = vld [vmem:[#allocation35_spill] sm:$0xff] }
 0x38c   :  { %v1311_v12 = vpop.f32.mrb[44].mxu1  ;;  %v13287_v22 = vpack.c.bf16 %v1927_v24, %v1923_v30 }
 0x38d   :  { %v1312_v7 = vadd.f32 %v1311_v12, %v13117_v45  ;;  %v1313_v37 = vpop.f32.mrb[45].mxu1 }
 0x38e   :  { %v1314_v4 = vadd.f32 %v1313_v37, %v13119_v9  ;;  %v1315_v54 = vpop.f32.mrb[46].mxu1 }
 0x38f   :  { %v1930_v11 = vmax.f32 %v1312_v7, 0.0  ;;  %v1316_v47 = vadd.f32 %v1315_v54, %v13117_v45  ;;  %v1317_v10 = vpop.f32.mrb[47].mxu1 }
 0x390   :  { %v1931_v42 = vmax.f32 %v1314_v4, 0.0  ;;  %v1318_v2 = vadd.f32 %v1317_v10, %v13119_v9 }
 0x391   :  { %v1934_v21 = vmax.f32 %v1316_v47, 0.0  ;;  %9064 = vmatmul.mubr.msk.bf16.gmra.mrb[152].mxu1 %vm301_vm0, %v17058_v32 }
 0x392   :  { %3527 = vmatmul.mubr.bf16.gmra.mrb[196].mxu0 %v12809_v44  ;;  %v1935_v59 = vmax.f32 %v1318_v2, 0.0  ;;  %1589 = vmatprep.mubr.bf16.mxu1 %v16916_v13 }
 0x393   :  { %3536 = vmatprep.mubr.bf16.mxu0 %v12826_v50  ;;  %v13298_v44 = vpack.c.bf16 %v1934_v21, %v1930_v11  ;;  %v17059_v11 = vld [vmem:[#allocation36_spill] sm:$0xff] }
 0x394   :  { %v1321_v0 = vpop.f32.mrb[48].mxu1  ;;  %v13300_v30 = vpack.c.bf16 %v1935_v59, %v1931_v42 }
 0x395   :  { %v1322_v50 = vadd.f32 %v1321_v0, %v13117_v45  ;;  %v1323_v51 = vpop.f32.mrb[49].mxu1 }
 0x396   :  { %v1324_v56 = vadd.f32 %v1323_v51, %v13119_v9  ;;  %v1325_v40 = vpop.f32.mrb[50].mxu1  ;;  %v10891_v51 = vld [vmem:[%s16641_s5 + $0x50] sm:$0xff]  }
 0x397   :  { %v1938_v24 = vmax.f32 %v1322_v50, 0.0  ;;  %v1326_v12 = vadd.f32 %v1325_v40, %v13117_v45  ;;  %v1327_v7 = vpop.f32.mrb[51].mxu1  ;;  %4890 = vmatpush1.bf16.msra.mxu1 %v10891_v51 }
 0x398   :  { %v1939_v37 = vmax.f32 %v1324_v56, 0.0  ;;  %v1328_v4 = vadd.f32 %v1327_v7, %v13119_v9  ;;  %4891 = vmatprep.subr.bf16.mxu1 %v16916_v13 }
 0x399   :  { %v1942_v54 = vmax.f32 %v1326_v12, 0.0  ;;  %9065 = vmatmul.mubr.msk.bf16.gmra.mrb[156].mxu1 %vm301_vm0, %v17059_v11  ;;  %v17060_v12 = vld [vmem:[#allocation37_spill] sm:$0xff] }
 0x39a   :  { %3537 = vmatmul.mubr.bf16.gmra.mrb[200].mxu0 %v12822_v38  ;;  %v1943_v47 = vmax.f32 %v1328_v4, 0.0  ;;  %1599 = vmatprep.mubr.bf16.mxu1 %v16916_v13 }
 0x39b   :  { %3546 = vmatprep.mubr.bf16.mxu0 %v12839_v16  ;;  %v13311_v38 = vpack.c.bf16 %v1942_v54, %v1938_v24 }
 0x39c   :  { %v1331_v10 = vpop.f32.mrb[52].mxu1  ;;  %v13313_v42 = vpack.c.bf16 %v1943_v47, %v1939_v37 }
 0x39d   :  { %v1332_v16 = vadd.f32 %v1331_v10, %v13117_v45  ;;  %v1333_v2 = vpop.f32.mrb[53].mxu1 }
 0x39e   :  { %v1334_v21 = vadd.f32 %v1333_v2, %v13119_v9  ;;  %v1335_v32 = vpop.f32.mrb[54].mxu1 }
 0x39f   :  { %v1946_v59 = vmax.f32 %v1332_v16, 0.0  ;;  %v1336_v0 = vadd.f32 %v1335_v32, %v13117_v45  ;;  %v1337_v50 = vpop.f32.mrb[55].mxu1 }
 0x3a0   :  { %v1947_v56 = vmax.f32 %v1334_v21, 0.0  ;;  %v1338_v40 = vadd.f32 %v1337_v50, %v13119_v9 }
 0x3a1   :  { %v1950_v24 = vmax.f32 %v1336_v0, 0.0  ;;  %9066 = vmatmul.mubr.msk.bf16.gmra.mrb[160].mxu1 %vm301_vm0, %v17060_v12  ;;  %v17061_v0 = vld [vmem:[#allocation38_spill] sm:$0xff] }
 0x3a2   :  { %3547 = vmatmul.mubr.bf16.gmra.mrb[204].mxu0 %v12835_v60  ;;  %v1951_v60 = vmax.f32 %v1338_v40, 0.0  ;;  %1609 = vmatprep.mubr.bf16.mxu1 %v16916_v13 }
 0x3a3   :  { %3556 = vmatprep.mubr.bf16.mxu0 %v12855_v18  ;;  %v13327_v18 = vpack.c.bf16 %v1950_v24, %v1946_v59 }
 0x3a4   :  { %v1341_v7 = vpop.f32.mrb[56].mxu1  ;;  %v13330_v37 = vpack.c.bf16 %v1951_v60, %v1947_v56 }
 0x3a5   :  { %v1342_v4 = vadd.f32 %v1341_v7, %v13117_v45  ;;  %v1343_v54 = vpop.f32.mrb[57].mxu1 }
 0x3a6   :  { %v1344_v11 = vadd.f32 %v1343_v54, %v13119_v9  ;;  %v1345_v47 = vpop.f32.mrb[58].mxu1 }
 0x3a7   :  { %v1954_v10 = vmax.f32 %v1342_v4, 0.0  ;;  %v1346_v16 = vadd.f32 %v1345_v47, %v13117_v45  ;;  %v1347_v2 = vpop.f32.mrb[59].mxu1 }
 0x3a8   :  { %v1955_v21 = vmax.f32 %v1344_v11, 0.0  ;;  %v1348_v32 = vadd.f32 %v1347_v2, %v13119_v9 }
 0x3a9   :  { %v1958_v59 = vmax.f32 %v1346_v16, 0.0  ;;  %9067 = vmatmul.mubr.msk.bf16.gmra.mrb[164].mxu1 %vm301_vm0, %v17061_v0 }
 0x3aa   :  { %3557 = vmatmul.mubr.bf16.gmra.mrb[208].mxu0 %v12851_v52  ;;  %v1959_v50 = vmax.f32 %v1348_v32, 0.0  ;;  %1619 = vmatprep.mubr.bf16.mxu1 %v16916_v13 }
 0x3ab   :  { %3566 = vmatprep.mubr.bf16.mxu0 %v12875_v58  ;;  %v13341_v52 = vpack.c.bf16 %v1958_v59, %v1954_v10  ;;  %v17062_v10 = vld [vmem:[#allocation39_spill] sm:$0xff] }
 0x3ac   :  { %v1351_v51 = vpop.f32.mrb[60].mxu1  ;;  %v13343_v56 = vpack.c.bf16 %v1959_v50, %v1955_v21 }
 0x3ad   :  { %v1352_v58 = vadd.f32 %v1351_v51, %v13117_v45  ;;  %v1353_v40 = vpop.f32.mrb[61].mxu1 }
 0x3ae   :  { %v1354_v24 = vadd.f32 %v1353_v40, %v13119_v9  ;;  %v1355_v12 = vpop.f32.mrb[62].mxu1 }
 0x3af   :  { %v1962_v60 = vmax.f32 %v1352_v58, 0.0  ;;  %v1356_v7 = vadd.f32 %v1355_v12, %v13117_v45  ;;  %v1357_v4 = vpop.f32.mrb[63].mxu1 }
 0x3b0   :  { %v1963_v54 = vmax.f32 %v1354_v24, 0.0  ;;  %v1358_v11 = vadd.f32 %v1357_v4, %v13119_v9 }
 0x3b1   :  { %v1966_v47 = vmax.f32 %v1356_v7, 0.0  ;;  %9068 = vmatmul.mubr.msk.bf16.gmra.mrb[168].mxu1 %vm301_vm0, %v17062_v10 }
 0x3b2   :  { %3567 = vmatmul.mubr.bf16.gmra.mrb[212].mxu0 %v12871_v31  ;;  %v1967_v16 = vmax.f32 %v1358_v11, 0.0  ;;  %1629 = vmatprep.mubr.bf16.mxu1 %v16916_v13 }
 0x3b3   :  { %3576 = vmatprep.mubr.bf16.mxu0 %v12888_v19  ;;  %v13354_v31 = vpack.c.bf16 %v1966_v47, %v1962_v60  ;;  %v17063_v60 = vld [vmem:[#allocation40_spill] sm:$0xff] }
 0x3b4   :  { %v1361_v2 = vpop.f32.mrb[64].mxu1  ;;  %v13356_v21 = vpack.c.bf16 %v1967_v16, %v1963_v54 }
 0x3b5   :  { %v1362_v19 = vadd.f32 %v1361_v2, %v13117_v45  ;;  %v1363_v32 = vpop.f32.mrb[65].mxu1 }
 0x3b6   :  { %v1364_v59 = vadd.f32 %v1363_v32, %v13119_v9  ;;  %v1365_v0 = vpop.f32.mrb[66].mxu1  ;;  %v10892_v32 = vld [vmem:[%s16641_s5 + $0x58] sm:$0xff]  }
 0x3b7   :  { %v1970_v50 = vmax.f32 %v1362_v19, 0.0  ;;  %v1366_v51 = vadd.f32 %v1365_v0, %v13117_v45  ;;  %v1367_v58 = vpop.f32.mrb[67].mxu1  ;;  %4892 = vmatpush1.bf16.msra.mxu1 %v10892_v32 }
 0x3b8   :  { %v1971_v40 = vmax.f32 %v1364_v59, 0.0  ;;  %v1368_v24 = vadd.f32 %v1367_v58, %v13119_v9  ;;  %4893 = vmatprep.subr.bf16.mxu1 %v16916_v13 }
 0x3b9   :  { %v1974_v12 = vmax.f32 %v1366_v51, 0.0  ;;  %9069 = vmatmul.mubr.msk.bf16.gmra.mrb[172].mxu1 %vm301_vm0, %v17063_v60  ;;  %v17064_v51 = vld [vmem:[#allocation41_spill] sm:$0xff] }
 0x3ba   :  { %3577 = vmatmul.mubr.bf16.gmra.mrb[216].mxu0 %v12884_v23  ;;  %v1975_v7 = vmax.f32 %v1368_v24, 0.0  ;;  %1639 = vmatprep.mubr.bf16.mxu1 %v16916_v13 }
 0x3bb   :  { %3586 = vmatprep.mubr.bf16.mxu0 %v12901_v34  ;;  %v13367_v23 = vpack.c.bf16 %v1974_v12, %v1970_v50 }
 0x3bc   :  { %v1371_v4 = vpop.f32.mrb[68].mxu1  ;;  %v13369_v54 = vpack.c.bf16 %v1975_v7, %v1971_v40 }
 0x3bd   :  { %v1372_v34 = vadd.f32 %v1371_v4, %v13117_v45  ;;  %v1373_v11 = vpop.f32.mrb[69].mxu1  ;;  %v17065_v4 = vld [vmem:[#allocation2_spill] sm:$0xff] }
 0x3be   :  { %v1374_v47 = vadd.f32 %v1373_v11, %v13119_v9  ;;  %v1375_v10 = vpop.f32.mrb[70].mxu1 }
 0x3bf   :  { %v1978_v16 = vmax.f32 %v1372_v34, 0.0  ;;  %v1376_v2 = vadd.f32 %v1375_v10, %v13117_v45  ;;  %v1377_v19 = vpop.f32.mrb[71].mxu1 }
 0x3c0   :  { %v1979_v59 = vmax.f32 %v1374_v47, 0.0  ;;  %v1378_v0 = vadd.f32 %v1377_v19, %v13119_v9  ;;  %v17066_v19 = vld [vmem:[#allocation42_spill] sm:$0xff] }
 0x3c1   :  { %v1982_v50 = vmax.f32 %v1376_v2, 0.0  ;;  %9070 = vmatmul.mubr.msk.bf16.gmra.mrb[176].mxu1 %vm301_vm0, %v17064_v51 }
 0x3c2   :  { %3587 = vmatmul.mubr.bf16.gmra.mrb[220].mxu0 %v12897_v28  ;;  %v1983_v28 = vmax.f32 %v1378_v0, 0.0  ;;  %1649 = vmatprep.mubr.bf16.mxu1 %v16916_v13 }
 0x3c3   :  { %3596 = vmatprep.mubr.bf16.mxu0 %v12917_v61  ;;  %v13383_v61 = vpack.c.bf16 %v1982_v50, %v1978_v16 }
 0x3c4   :  { %v1381_v58 = vpop.f32.mrb[72].mxu1  ;;  %v13386_v40 = vpack.c.bf16 %v1983_v28, %v1979_v59  ;;  %v17067_v28 = vld [vmem:[#allocation44_spill] sm:$0xff] }
 0x3c5   :  { %v1382_v24 = vadd.f32 %v1381_v58, %v13117_v45  ;;  %v1383_v12 = vpop.f32.mrb[73].mxu1 }
 0x3c6   :  { %v1384_v60 = vadd.f32 %v1383_v12, %v13119_v9  ;;  %v1385_v7 = vpop.f32.mrb[74].mxu1  ;;  %v17068_v12 = vld [vmem:[#allocation47_spill] sm:$0xff] }
 0x3c7   :  { %v1986_v34 = vmax.f32 %v1382_v24, 0.0  ;;  %v1386_v11 = vadd.f32 %v1385_v7, %v13117_v45  ;;  %v1387_v47 = vpop.f32.mrb[75].mxu1 }
 0x3c8   :  { %v1987_v10 = vmax.f32 %v1384_v60, 0.0  ;;  %v1388_v16 = vadd.f32 %v1387_v47, %v13119_v9 }
 0x3c9   :  { %v1990_v2 = vmax.f32 %v1386_v11, 0.0  ;;  %9071 = vmatmul.mubr.msk.bf16.gmra.mrb[180].mxu1 %vm301_vm0, %v17066_v19 }
 0x3ca   :  { %3597 = vmatmul.mubr.bf16.gmra.mrb[224].mxu0 %v12913_v62  ;;  %v1991_v32 = vmax.f32 %v1388_v16, 0.0  ;;  %1659 = vmatprep.mubr.bf16.mxu1 %v16916_v13 }
 0x3cb   :  { %3606 = vmatprep.mubr.bf16.mxu0 %v17065_v4  ;;  %v13397_v62 = vpack.c.bf16 %v1990_v2, %v1986_v34 }
 0x3cc   :  { %v1391_v59 = vpop.f32.mrb[76].mxu1  ;;  %v13399_v0 = vpack.c.bf16 %v1991_v32, %v1987_v10  ;;  %v17069_v10 = vld [vmem:[#allocation45_spill] sm:$0xff] }
 0x3cd   :  { %v1392_v50 = vadd.f32 %v1391_v59, %v13117_v45  ;;  %v1393_v51 = vpop.f32.mrb[77].mxu1 }
 0x3ce   :  { %v1394_v58 = vadd.f32 %v1393_v51, %v13119_v9  ;;  %v1395_v24 = vpop.f32.mrb[78].mxu1  ;;  %v17070_v51 = vld [vmem:[#allocation43_spill] sm:$0xff] }
 0x3cf   :  { %v1994_v60 = vmax.f32 %v1392_v50, 0.0  ;;  %v1396_v7 = vadd.f32 %v1395_v24, %v13117_v45  ;;  %v1397_v4 = vpop.f32.mrb[79].mxu1  ;;  %v17071_v24 = vld [vmem:[#allocation46_spill] sm:$0xff] }
 0x3d0   :  { %v1995_v11 = vmax.f32 %v1394_v58, 0.0  ;;  %v1398_v34 = vadd.f32 %v1397_v4, %v13119_v9 }
 0x3d1   :  { %v1998_v47 = vmax.f32 %v1396_v7, 0.0  ;;  %9072 = vmatmul.mubr.msk.bf16.gmra.mrb[184].mxu1 %vm301_vm0, %v17069_v10 }
 0x3d2   :  { %3607 = vmatmul.mubr.bf16.gmra.mrb[228].mxu0 %v17067_v28  ;;  %v1999_v16 = vmax.f32 %v1398_v34, 0.0  ;;  %1669 = vmatprep.mubr.bf16.mxu1 %v16916_v13 }
 0x3d3   :  { %3616 = vmatprep.mubr.bf16.mxu0 %v17068_v12  ;;  %v13410_v2 = vpack.c.bf16 %v1998_v47, %v1994_v60 }
 0x3d4   :  { %v1401_v19 = vpop.f32.mrb[80].mxu1  ;;  %v13412_v32 = vpack.c.bf16 %v1999_v16, %v1995_v11  ;;  %v17072_v11 = vld [vmem:[#allocation48_spill] sm:$0xff] }
 0x3d5   :  { %v1402_v59 = vadd.f32 %v1401_v19, %v13117_v45  ;;  %v1403_v50 = vpop.f32.mrb[81].mxu1 }
 0x3d6   :  { %v1404_v28 = vadd.f32 %v1403_v50, %v13119_v9  ;;  %v1405_v58 = vpop.f32.mrb[82].mxu1 }
 0x3d7   :  { %v2002_v12 = vmax.f32 %v1402_v59, 0.0  ;;  %v1406_v7 = vadd.f32 %v1405_v58, %v13117_v45  ;;  %v1407_v4 = vpop.f32.mrb[83].mxu1  ;;  %v17074_v58 = vld [vmem:[#allocation3_spill] sm:$0xff] }
 0x3d8   :  { %v2003_v34 = vmax.f32 %v1404_v28, 0.0  ;;  %v1408_v60 = vadd.f32 %v1407_v4, %v13119_v9 }
 0x3d9   :  { %v2006_v47 = vmax.f32 %v1406_v7, 0.0  ;;  %9073 = vmatmul.mubr.msk.bf16.gmra.mrb[188].mxu1 %vm301_vm0, %v17072_v11  ;;  %v17075_v7 = vld [vmem:[#allocation4_spill] sm:$0xff] }
 0x3da   :  { %3617 = vmatmul.mubr.bf16.gmra.mrb[232].mxu0 %v17070_v51  ;;  %v2007_v10 = vmax.f32 %v1408_v60, 0.0  ;;  %1679 = vmatprep.mubr.bf16.mxu1 %v16916_v13 }
 0x3db   :  { %3626 = vmatprep.mubr.bf16.mxu0 %v17071_v24  ;;  %v13423_v16 = vpack.c.bf16 %v2006_v47, %v2002_v12  ;;  %v10893_v12 = vld [vmem:[%s16641_s5 + $0x60] sm:$0xff]  }
 0x3dc   :  { %v1411_v19 = vpop.f32.mrb[84].mxu1  ;;  %v13425_v50 = vpack.c.bf16 %v2007_v10, %v2003_v34  ;;  %4894 = vmatpush1.bf16.msra.mxu1 %v10893_v12 }
 0x3dd   :  { %17073 = vst [vmem:[#allocation5_spill] sm:$0xff] %v13423_v16  ;;  %v1412_v59 = vadd.f32 %v1411_v19, %v13117_v45  ;;  %v1413_v51 = vpop.f32.mrb[85].mxu1  ;;  %v17076_v19 = vld [vmem:[#allocation51_spill] sm:$0xff]  ;;  %4895 = vmatprep.subr.bf16.mxu1 %v16916_v13 }
 0x3de   :  { %v1414_v28 = vadd.f32 %v1413_v51, %v13119_v9  ;;  %v1415_v24 = vpop.f32.mrb[86].mxu1 }
 0x3df   :  { %v2010_v4 = vmax.f32 %v1412_v59, 0.0  ;;  %v1416_v60 = vadd.f32 %v1415_v24, %v13117_v45  ;;  %v1417_v11 = vpop.f32.mrb[87].mxu1 }
 0x3e0   :  { %v2011_v34 = vmax.f32 %v1414_v28, 0.0  ;;  %v1418_v47 = vadd.f32 %v1417_v11, %v13119_v9 }
 0x3e1   :  { %v2014_v10 = vmax.f32 %v1416_v60, 0.0  ;;  %9074 = vmatmul.mubr.msk.bf16.gmra.mrb[192].mxu1 %vm301_vm0, %v17076_v19  ;;  %v17080_v19 = vld [vmem:[#allocation53_spill] sm:$0xff] }
 0x3e2   :  { %3627 = vmatmul.mubr.bf16.gmra.mrb[236].mxu0 %v17074_v58  ;;  %v2015_v58 = vmax.f32 %v1418_v47, 0.0  ;;  %1689 = vmatprep.mubr.bf16.mxu1 %v16916_v13 }
 0x3e3   :  { %3636 = vmatprep.mubr.bf16.mxu0 %v17075_v7  ;;  %v13439_v51 = vpack.c.bf16 %v2014_v10, %v2010_v4 }
 0x3e4   :  { %v1421_v59 = vpop.f32.mrb[88].mxu1  ;;  %v13442_v24 = vpack.c.bf16 %v2015_v58, %v2011_v34  ;;  %v17081_v34 = vld [vmem:[#allocation54_spill] sm:$0xff] }
 0x3e5   :  { %17077 = vst [vmem:[#allocation52_spill] sm:$0xff] %v13439_v51  ;;  %v1422_v7 = vadd.f32 %v1421_v59, %v13117_v45  ;;  %v1423_v28 = vpop.f32.mrb[89].mxu1 }
 0x3e6   :  { %17078 = vst [vmem:[#allocation56_spill] sm:$0xff] %v13442_v24  ;;  %v1424_v60 = vadd.f32 %v1423_v28, %v13119_v9  ;;  %v1425_v11 = vpop.f32.mrb[90].mxu1 }
 0x3e7   :  { %v2018_v12 = vmax.f32 %v1422_v7, 0.0  ;;  %v1426_v47 = vadd.f32 %v1425_v11, %v13117_v45  ;;  %v1427_v4 = vpop.f32.mrb[91].mxu1  ;;  %v17082_v11 = vld [vmem:[#allocation49_spill] sm:$0xff] }
 0x3e8   :  { %v2019_v10 = vmax.f32 %v1424_v60, 0.0  ;;  %v1428_v51 = vadd.f32 %v1427_v4, %v13119_v9 }
 0x3e9   :  { %v2022_v16 = vmax.f32 %v1426_v47, 0.0  ;;  %9075 = vmatmul.mubr.msk.bf16.gmra.mrb[196].mxu1 %vm301_vm0, %v17081_v34 }
 0x3ea   :  { %3637 = vmatmul.mubr.bf16.gmra.mrb[240].mxu0 %v17079_v3  ;;  %v2023_v58 = vmax.f32 %v1428_v51, 0.0  ;;  %1699 = vmatprep.mubr.bf16.mxu1 %v16916_v13 }
 0x3eb   :  { %3646 = vmatprep.mubr.bf16.mxu0 %v17080_v19  ;;  %v13453_v3 = vpack.c.bf16 %v2022_v16, %v2018_v12 }
 0x3ec   :  { %v1431_v59 = vpop.f32.mrb[92].mxu1  ;;  %v13455_v28 = vpack.c.bf16 %v2023_v58, %v2019_v10  ;;  %v17083_v10 = vld [vmem:[#allocation57_spill] sm:$0xff] }
 0x3ed   :  { %v1432_v7 = vadd.f32 %v1431_v59, %v13117_v45  ;;  %v1433_v19 = vpop.f32.mrb[93].mxu1 }
 0x3ee   :  { %v1434_v60 = vadd.f32 %v1433_v19, %v13119_v9  ;;  %v1435_v4 = vpop.f32.mrb[94].mxu1 }
 0x3ef   :  { %v2026_v47 = vmax.f32 %v1432_v7, 0.0  ;;  %v1436_v51 = vadd.f32 %v1435_v4, %v13117_v45  ;;  %v1437_v34 = vpop.f32.mrb[95].mxu1 }
 0x3f0   :  { %v2027_v24 = vmax.f32 %v1434_v60, 0.0  ;;  %v1438_v16 = vadd.f32 %v1437_v34, %v13119_v9 }
 0x3f1   :  { %v2030_v12 = vmax.f32 %v1436_v51, 0.0  ;;  %9076 = vmatmul.mubr.msk.bf16.gmra.mrb[200].mxu1 %vm301_vm0, %v17083_v10 }
 0x3f2   :  { %3647 = vmatmul.mubr.bf16.gmra.mrb[244].mxu0 %v17082_v11  ;;  %v2031_v58 = vmax.f32 %v1438_v16, 0.0  ;;  %1709 = vmatprep.mubr.bf16.mxu1 %v16916_v13 }
 0x3f3   :  { %3656 = vmatprep.mubr.bf16.mxu0 %v13012_v63  ;;  %v13466_v59 = vpack.c.bf16 %v2030_v12, %v2026_v47 }
 0x3f4   :  { %v1441_v19 = vpop.f32.mrb[96].mxu1  ;;  %v13468_v11 = vpack.c.bf16 %v2031_v58, %v2027_v24  ;;  %v17084_v24 = vld [vmem:[#allocation60_spill] sm:$0xff] }
 0x3f5   :  { %v1442_v63 = vadd.f32 %v1441_v19, %v13117_v45  ;;  %v1443_v7 = vpop.f32.mrb[97].mxu1 }
 0x3f6   :  { %v1444_v60 = vadd.f32 %v1443_v7, %v13119_v9  ;;  %v1445_v4 = vpop.f32.mrb[98].mxu1 }
 0x3f7   :  { %v2034_v51 = vmax.f32 %v1442_v63, 0.0  ;;  %v1446_v34 = vadd.f32 %v1445_v4, %v13117_v45  ;;  %v1447_v16 = vpop.f32.mrb[99].mxu1 }
 0x3f8   :  { %v2035_v10 = vmax.f32 %v1444_v60, 0.0  ;;  %v1448_v47 = vadd.f32 %v1447_v16, %v13119_v9 }
 0x3f9   :  { %v2038_v12 = vmax.f32 %v1446_v34, 0.0  ;;  %9077 = vmatmul.mubr.msk.bf16.gmra.mrb[204].mxu1 %vm301_vm0, %v17084_v24 }
 0x3fa   :  { %3657 = vmatmul.mubr.bf16.gmra.mrb[248].mxu0 %v13008_v15  ;;  %v2039_v58 = vmax.f32 %v1448_v47, 0.0  ;;  %1719 = vmatprep.mubr.bf16.mxu1 %v16916_v13 }
 0x3fb   :  { %3666 = vmatprep.mubr.bf16.mxu0 %v13025_v55  ;;  %v13479_v15 = vpack.c.bf16 %v2038_v12, %v2034_v51  ;;  %v10894_v51 = vld [vmem:[%s16641_s5 + $0x68] sm:$0xff]  }
 0x3fc   :  { %v1451_v19 = vpop.f32.mrb[100].mxu1  ;;  %v13481_v7 = vpack.c.bf16 %v2039_v58, %v2035_v10  ;;  %v17085_v58 = vld [vmem:[#allocation63_spill] sm:$0xff]  ;;  %4896 = vmatpush1.bf16.msra.mxu1 %v10894_v51 }
 0x3fd   :  { %v1452_v55 = vadd.f32 %v1451_v19, %v13117_v45  ;;  %v1453_v63 = vpop.f32.mrb[101].mxu1  ;;  %4897 = vmatprep.subr.bf16.mxu1 %v16916_v13 }
 0x3fe   :  { %v1454_v60 = vadd.f32 %v1453_v63, %v13119_v9  ;;  %v1455_v4 = vpop.f32.mrb[102].mxu1 }
 0x3ff   :  { %v2042_v34 = vmax.f32 %v1452_v55, 0.0  ;;  %v1456_v16 = vadd.f32 %v1455_v4, %v13117_v45  ;;  %v1457_v47 = vpop.f32.mrb[103].mxu1 }
 0x400   :  { %v2043_v10 = vmax.f32 %v1454_v60, 0.0  ;;  %v1458_v12 = vadd.f32 %v1457_v47, %v13119_v9 }
 0x401   :  { %v2046_v24 = vmax.f32 %v1456_v16, 0.0  ;;  %9078 = vmatmul.mubr.msk.bf16.gmra.mrb[208].mxu1 %vm301_vm0, %v17085_v58 }
 0x402   :  { %3667 = vmatmul.mubr.bf16.gmra.mrb[252].mxu0 %v13021_v8  ;;  %v2047_v8 = vmax.f32 %v1458_v12, 0.0  ;;  %1729 = vmatprep.mubr.bf16.mxu1 %v16916_v13 }
 0x403   :  { %3709 = vmatprep.mubr.bf16.mxu0 %v13133_v14  ;;  %v13495_v14 = vpack.c.bf16 %v2046_v24, %v2042_v34 }
 0x404   :  { %v1461_v19 = vpop.f32.mrb[104].mxu1  ;;  %v13498_v55 = vpack.c.bf16 %v2047_v8, %v2043_v10  ;;  %v17086_v10 = vld [vmem:[#allocation66_spill] sm:$0xff] }
 0x405   :  { %v1462_v63 = vadd.f32 %v1461_v19, %v13117_v45  ;;  %v1463_v60 = vpop.f32.mrb[105].mxu1 }
 0x406   :  { %v1464_v4 = vadd.f32 %v1463_v60, %v13119_v9  ;;  %v1465_v16 = vpop.f32.mrb[106].mxu1 }
 0x407   :  { %v2050_v47 = vmax.f32 %v1462_v63, 0.0  ;;  %v1466_v51 = vadd.f32 %v1465_v16, %v13117_v45  ;;  %v1467_v34 = vpop.f32.mrb[107].mxu1 }
 0x408   :  { %v2051_v12 = vmax.f32 %v1464_v4, 0.0  ;;  %v1468_v24 = vadd.f32 %v1467_v34, %v13119_v9 }
 0x409   :  { %v2054_v58 = vmax.f32 %v1466_v51, 0.0  ;;  %9079 = vmatmul.mubr.msk.bf16.gmra.mrb[212].mxu1 %vm301_vm0, %v17086_v10 }
 0x40a   :  { %3710 = vmatmul.mubr.bf16.vlgmr.msra.gmra.mrb[0].mxu0 %v13131_v41  ;;  %v2055_v8 = vmax.f32 %v1468_v24, 0.0  ;;  %1739 = vmatprep.mubr.bf16.mxu1 %v16916_v13 }
 0x40b   :  { %3719 = vmatprep.mubr.bf16.mxu0 %v13150_v36  ;;  %v13509_v41 = vpack.c.bf16 %v2054_v58, %v2050_v47 }
 0x40c   :  { %v1471_v19 = vpop.f32.mrb[108].mxu1  ;;  %v13511_v60 = vpack.c.bf16 %v2055_v8, %v2051_v12  ;;  %v17087_v12 = vld [vmem:[#allocation69_spill] sm:$0xff] }
 0x40d   :  { %v1472_v36 = vadd.f32 %v1471_v19, %v13117_v45  ;;  %v1473_v63 = vpop.f32.mrb[109].mxu1 }
 0x40e   :  { %v1474_v4 = vadd.f32 %v1473_v63, %v13119_v9  ;;  %v1475_v16 = vpop.f32.mrb[110].mxu1 }
 0x40f   :  { %v2058_v51 = vmax.f32 %v1472_v36, 0.0  ;;  %v1476_v34 = vadd.f32 %v1475_v16, %v13117_v45  ;;  %v1477_v24 = vpop.f32.mrb[111].mxu1 }
 0x410   :  { %v2059_v10 = vmax.f32 %v1474_v4, 0.0  ;;  %v1478_v47 = vadd.f32 %v1477_v24, %v13119_v9 }
 0x411   :  { %v2062_v58 = vmax.f32 %v1476_v34, 0.0  ;;  %9080 = vmatmul.mubr.msk.bf16.gmra.mrb[216].mxu1 %vm301_vm0, %v17087_v12 }
 0x412   :  { %3720 = vmatmul.mubr.bf16.gmra.mrb[4].mxu0 %v13147_v5  ;;  %v2063_v8 = vmax.f32 %v1478_v47, 0.0  ;;  %1749 = vmatprep.mubr.bf16.mxu1 %v16916_v13 }
 0x413   :  { %3729 = vmatprep.mubr.bf16.mxu0 %v13169_v25  ;;  %v13522_v5 = vpack.c.bf16 %v2062_v58, %v2058_v51 }
 0x414   :  { %v1481_v19 = vpop.f32.mrb[112].mxu1  ;;  %v13524_v63 = vpack.c.bf16 %v2063_v8, %v2059_v10  ;;  %v17088_v10 = vld [vmem:[#allocation72_spill] sm:$0xff] }
 0x415   :  { %v1482_v25 = vadd.f32 %v1481_v19, %v13117_v45  ;;  %v1483_v36 = vpop.f32.mrb[113].mxu1 }
 0x416   :  { %v1484_v4 = vadd.f32 %v1483_v36, %v13119_v9  ;;  %v1485_v16 = vpop.f32.mrb[114].mxu1 }
 0x417   :  { %v2066_v34 = vmax.f32 %v1482_v25, 0.0  ;;  %v1486_v24 = vadd.f32 %v1485_v16, %v13117_v45  ;;  %v1487_v47 = vpop.f32.mrb[115].mxu1 }
 0x418   :  { %v2067_v12 = vmax.f32 %v1484_v4, 0.0  ;;  %v1488_v51 = vadd.f32 %v1487_v47, %v13119_v9 }
 0x419   :  { %v2070_v58 = vmax.f32 %v1486_v24, 0.0  ;;  %9081 = vmatmul.mubr.msk.bf16.gmra.mrb[220].mxu1 %vm301_vm0, %v17088_v10 }
 0x41a   :  { %3730 = vmatmul.mubr.bf16.gmra.mrb[8].mxu0 %v13167_v48  ;;  %v2071_v8 = vmax.f32 %v1488_v51, 0.0  ;;  %1759 = vmatprep.mubr.bf16.mxu1 %v16916_v13 }
 0x41b   :  { %3739 = vmatprep.mubr.bf16.mxu0 %v13182_v43  ;;  %v13535_v48 = vpack.c.bf16 %v2070_v58, %v2066_v34  ;;  %v10895_v34 = vld [vmem:[%s16641_s5 + $0x70] sm:$0xff]  }
 0x41c   :  { %v1491_v19 = vpop.f32.mrb[116].mxu1  ;;  %v13537_v36 = vpack.c.bf16 %v2071_v8, %v2067_v12  ;;  %v17089_v8 = vld [vmem:[#allocation75_spill] sm:$0xff]  ;;  %4898 = vmatpush1.bf16.msra.mxu1 %v10895_v34 }
 0x41d   :  { %v1492_v43 = vadd.f32 %v1491_v19, %v13117_v45  ;;  %v1493_v25 = vpop.f32.mrb[117].mxu1  ;;  %4899 = vmatprep.subr.bf16.mxu1 %v16916_v13 }
 0x41e   :  { %v1494_v4 = vadd.f32 %v1493_v25, %v13119_v9  ;;  %v1495_v16 = vpop.f32.mrb[118].mxu1 }
 0x41f   :  { %v2074_v24 = vmax.f32 %v1492_v43, 0.0  ;;  %v1496_v47 = vadd.f32 %v1495_v16, %v13117_v45  ;;  %v1497_v51 = vpop.f32.mrb[119].mxu1 }
 0x420   :  { %v2075_v12 = vmax.f32 %v1494_v4, 0.0  ;;  %v1498_v58 = vadd.f32 %v1497_v51, %v13119_v9 }
 0x421   :  { %v2078_v10 = vmax.f32 %v1496_v47, 0.0  ;;  %9082 = vmatmul.mubr.msk.bf16.gmra.mrb[224].mxu1 %vm301_vm0, %v17089_v8 }
 0x422   :  { %3740 = vmatmul.mubr.bf16.gmra.mrb[12].mxu0 %v13180_v39  ;;  %v2079_v39 = vmax.f32 %v1498_v58, 0.0  ;;  %1769 = vmatprep.mubr.bf16.mxu1 %v16916_v13 }
 0x423   :  { %3749 = vmatprep.mubr.bf16.mxu0 %v13195_v57  ;;  %v13551_v57 = vpack.c.bf16 %v2078_v10, %v2074_v24 }
 0x424   :  { %v1501_v19 = vpop.f32.mrb[120].mxu1  ;;  %v13554_v43 = vpack.c.bf16 %v2079_v39, %v2075_v12  ;;  %v17090_v12 = vld [vmem:[#allocation78_spill] sm:$0xff] }
 0x425   :  { %v1502_v25 = vadd.f32 %v1501_v19, %v13117_v45  ;;  %v1503_v4 = vpop.f32.mrb[121].mxu1 }
 0x426   :  { %v1504_v16 = vadd.f32 %v1503_v4, %v13119_v9  ;;  %v1505_v47 = vpop.f32.mrb[122].mxu1 }
 0x427   :  { %v2082_v51 = vmax.f32 %v1502_v25, 0.0  ;;  %v1506_v34 = vadd.f32 %v1505_v47, %v13117_v45  ;;  %v1507_v24 = vpop.f32.mrb[123].mxu1 }
 0x428   :  { %v2083_v58 = vmax.f32 %v1504_v16, 0.0  ;;  %v1508_v10 = vadd.f32 %v1507_v24, %v13119_v9 }
 0x429   :  { %v2086_v8 = vmax.f32 %v1506_v34, 0.0  ;;  %9083 = vmatmul.mubr.msk.bf16.gmra.mrb[228].mxu1 %vm301_vm0, %v17090_v12 }
 0x42a   :  { %3750 = vmatmul.mubr.bf16.gmra.mrb[16].mxu0 %v13193_v17  ;;  %v2087_v39 = vmax.f32 %v1508_v10, 0.0  ;;  %1779 = vmatprep.mubr.bf16.mxu1 %v16916_v13 }
 0x42b   :  { %3759 = vmatprep.mubr.bf16.mxu0 %v13212_v1  ;;  %v13565_v17 = vpack.c.bf16 %v2086_v8, %v2082_v51 }
 0x42c   :  { %v1511_v19 = vpop.f32.mrb[124].mxu1  ;;  %v13567_v4 = vpack.c.bf16 %v2087_v39, %v2083_v58  ;;  %v17091_v58 = vld [vmem:[#allocation81_spill] sm:$0xff] }
 0x42d   :  { %v1512_v1 = vadd.f32 %v1511_v19, %v13117_v45  ;;  %v1513_v25 = vpop.f32.mrb[125].mxu1 }
 0x42e   :  { %v1514_v16 = vadd.f32 %v1513_v25, %v13119_v9  ;;  %v1515_v47 = vpop.f32.mrb[126].mxu1 }
 0x42f   :  { %v2090_v34 = vmax.f32 %v1512_v1, 0.0  ;;  %v1516_v24 = vadd.f32 %v1515_v47, %v13117_v45  ;;  %v1517_v10 = vpop.f32.mrb[127].mxu1 }
 0x430   :  { %v2091_v12 = vmax.f32 %v1514_v16, 0.0  ;;  %v1518_v51 = vadd.f32 %v1517_v10, %v13119_v9 }
 0x431   :  { %v2094_v8 = vmax.f32 %v1516_v24, 0.0  ;;  %9084 = vmatmul.mubr.msk.bf16.gmra.mrb[232].mxu1 %vm301_vm0, %v17091_v58 }
 0x432   :  { %3760 = vmatmul.mubr.bf16.gmra.mrb[20].mxu0 %v13209_v35  ;;  %v2095_v39 = vmax.f32 %v1518_v51, 0.0  ;;  %1789 = vmatprep.mubr.bf16.mxu1 %v16916_v13 }
 0x433   :  { %3769 = vmatprep.mubr.bf16.mxu0 %v13231_v53  ;;  %v13578_v35 = vpack.c.bf16 %v2094_v8, %v2090_v34 }
 0x434   :  { %v1521_v19 = vpop.f32.mrb[128].mxu1  ;;  %v13580_v25 = vpack.c.bf16 %v2095_v39, %v2091_v12  ;;  %v17092_v12 = vld [vmem:[#allocation84_spill] sm:$0xff] }
 0x435   :  { %v1522_v53 = vadd.f32 %v1521_v19, %v13117_v45  ;;  %v1523_v1 = vpop.f32.mrb[129].mxu1 }
 0x436   :  { %v1524_v16 = vadd.f32 %v1523_v1, %v13119_v9  ;;  %v1525_v47 = vpop.f32.mrb[130].mxu1 }
 0x437   :  { %v2098_v24 = vmax.f32 %v1522_v53, 0.0  ;;  %v1526_v10 = vadd.f32 %v1525_v47, %v13117_v45  ;;  %v1527_v51 = vpop.f32.mrb[131].mxu1 }
 0x438   :  { %v2099_v58 = vmax.f32 %v1524_v16, 0.0  ;;  %v1528_v34 = vadd.f32 %v1527_v51, %v13119_v9 }
 0x439   :  { %v2102_v8 = vmax.f32 %v1526_v10, 0.0  ;;  %9085 = vmatmul.mubr.msk.bf16.gmra.mrb[236].mxu1 %vm301_vm0, %v17092_v12 }
 0x43a   :  { %3770 = vmatmul.mubr.bf16.gmra.mrb[24].mxu0 %v13229_v6  ;;  %v2103_v39 = vmax.f32 %v1528_v34, 0.0  ;;  %1799 = vmatprep.mubr.bf16.mxu1 %v16916_v13 }
 0x43b   :  { %3779 = vmatprep.mubr.bf16.mxu0 %v13244_v20  ;;  %v13591_v6 = vpack.c.bf16 %v2102_v8, %v2098_v24  ;;  %v10896_v24 = vld [vmem:[%s16641_s5 + $0x78] sm:$0xff]  }
 0x43c   :  { %v1531_v19 = vpop.f32.mrb[132].mxu1  ;;  %v13593_v1 = vpack.c.bf16 %v2103_v39, %v2099_v58  ;;  %v17093_v39 = vld [vmem:[#allocation87_spill] sm:$0xff]  ;;  %4900 = vmatpush1.bf16.msra.mxu1 %v10896_v24 }
 0x43d   :  { %v1532_v20 = vadd.f32 %v1531_v19, %v13117_v45  ;;  %v1533_v53 = vpop.f32.mrb[133].mxu1 }
 0x43e   :  { %v1534_v16 = vadd.f32 %v1533_v53, %v13119_v9  ;;  %v1535_v47 = vpop.f32.mrb[134].mxu1 }
 0x43f   :  { %v2106_v10 = vmax.f32 %v1532_v20, 0.0  ;;  %v1536_v51 = vadd.f32 %v1535_v47, %v13117_v45  ;;  %v1537_v34 = vpop.f32.mrb[135].mxu1 }
 0x440   :  { %v2107_v58 = vmax.f32 %v1534_v16, 0.0  ;;  %v1538_v8 = vadd.f32 %v1537_v34, %v13119_v9 }
 0x441   :  { %v2110_v12 = vmax.f32 %v1536_v51, 0.0  ;;  %9086 = vmatmul.mubr.msk.bf16.gmra.mrb[240].mxu1 %vm301_vm0, %v17093_v39 }
 0x442   :  { %3780 = vmatmul.mubr.bf16.gmra.mrb[28].mxu0 %v13242_v33  ;;  %v2111_v33 = vmax.f32 %v1538_v8, 0.0  ;;  %1809 = vmatprep.mubr.bf16.mxu1 %v16916_v13 }
 0x443   :  { %3789 = vmatprep.mubr.bf16.mxu0 %v13257_v29  ;;  %v13607_v29 = vpack.c.bf16 %v2110_v12, %v2106_v10 }
 0x444   :  { %v1541_v19 = vpop.f32.mrb[136].mxu1  ;;  %v13609_v20 = vpack.c.bf16 %v2111_v33, %v2107_v58  ;;  %v17094_v58 = vld [vmem:[#allocation90_spill] sm:$0xff] }
 0x445   :  { %v1542_v53 = vadd.f32 %v1541_v19, %v13117_v45  ;;  %v1543_v47 = vpop.f32.mrb[137].mxu1 }
 0x446   :  { %v1544_v16 = vadd.f32 %v1543_v47, %v13119_v9  ;;  %v1545_v51 = vpop.f32.mrb[138].mxu1 }
 0x447   :  { %v2114_v34 = vmax.f32 %v1542_v53, 0.0  ;;  %v1546_v24 = vadd.f32 %v1545_v51, %v13117_v45  ;;  %v1547_v8 = vpop.f32.mrb[139].mxu1 }
 0x448   :  { %v2115_v39 = vmax.f32 %v1544_v16, 0.0  ;;  %v1548_v10 = vadd.f32 %v1547_v8, %v13119_v9 }
 0x449   :  { %v2118_v12 = vmax.f32 %v1546_v24, 0.0  ;;  %9087 = vmatmul.mubr.msk.bf16.gmra.mrb[244].mxu1 %vm301_vm0, %v17094_v58 }
 0x44a   :  { %3790 = vmatmul.mubr.bf16.gmra.mrb[32].mxu0 %v13255_v49  ;;  %v2119_v33 = vmax.f32 %v1548_v10, 0.0  ;;  %1819 = vmatprep.mubr.bf16.mxu1 %v16916_v13 }
 0x44b   :  { %3799 = vmatprep.mubr.bf16.mxu0 %v13274_v26  ;;  %v13620_v49 = vpack.c.bf16 %v2118_v12, %v2114_v34 }
 0x44c   :  { %v1551_v19 = vpop.f32.mrb[140].mxu1  ;;  %v13622_v47 = vpack.c.bf16 %v2119_v33, %v2115_v39  ;;  %v17095_v39 = vld [vmem:[#allocation93_spill] sm:$0xff] }
 0x44d   :  { %v1552_v26 = vadd.f32 %v1551_v19, %v13117_v45  ;;  %v1553_v53 = vpop.f32.mrb[141].mxu1 }
 0x44e   :  { %v1554_v16 = vadd.f32 %v1553_v53, %v13119_v9  ;;  %v1555_v51 = vpop.f32.mrb[142].mxu1 }
 0x44f   :  { %v2122_v24 = vmax.f32 %v1552_v26, 0.0  ;;  %v1556_v8 = vadd.f32 %v1555_v51, %v13117_v45  ;;  %v1557_v10 = vpop.f32.mrb[143].mxu1 }
 0x450   :  { %v2123_v58 = vmax.f32 %v1554_v16, 0.0  ;;  %v1558_v34 = vadd.f32 %v1557_v10, %v13119_v9 }
 0x451   :  { %v2126_v12 = vmax.f32 %v1556_v8, 0.0  ;;  %9088 = vmatmul.mubr.msk.bf16.gmra.mrb[248].mxu1 %vm301_vm0, %v17095_v39 }
 0x452   :  { %3800 = vmatmul.mubr.bf16.gmra.mrb[36].mxu0 %v13271_v27  ;;  %v2127_v33 = vmax.f32 %v1558_v34, 0.0  ;;  %1829 = vmatprep.mubr.bf16.mxu1 %v16916_v13 }
 0x453   :  { %3809 = vmatprep.mubr.bf16.mxu0 %v13287_v22  ;;  %v13633_v27 = vpack.c.bf16 %v2126_v12, %v2122_v24 }
 0x454   :  { %v1561_v19 = vpop.f32.mrb[144].mxu1  ;;  %v13635_v53 = vpack.c.bf16 %v2127_v33, %v2123_v58  ;;  %v17096_v58 = vld [vmem:[#allocation94_spill] sm:$0xff] }
 0x455   :  { %v1562_v22 = vadd.f32 %v1561_v19, %v13117_v45  ;;  %v1563_v26 = vpop.f32.mrb[145].mxu1 }
 0x456   :  { %v1564_v16 = vadd.f32 %v1563_v26, %v13119_v9  ;;  %v1565_v51 = vpop.f32.mrb[146].mxu1 }
 0x457   :  { %v2130_v8 = vmax.f32 %v1562_v22, 0.0  ;;  %v1566_v10 = vadd.f32 %v1565_v51, %v13117_v45  ;;  %v1567_v34 = vpop.f32.mrb[147].mxu1 }
 0x458   :  { %v2131_v13 = vmax.f32 %v1564_v16, 0.0  ;;  %v1568_v24 = vadd.f32 %v1567_v34, %v13119_v9 }
 0x459   :  { %v2134_v12 = vmax.f32 %v1566_v10, 0.0  ;;  %9089 = vmatmul.mubr.msk.bf16.gmra.mrb[252].mxu1 %vm301_vm0, %v17096_v58 }
 0x45a   :  { %3810 = vmatmul.mubr.bf16.gmra.mrb[40].mxu0 %v13285_v46  ;;  %v2135_v39 = vmax.f32 %v1568_v24, 0.0 }
 0x45b   :  { %3819 = vmatprep.mubr.bf16.mxu0 %v13300_v30  ;;  %v13645_v33 = vpack.c.bf16 %v2134_v12, %v2130_v8 }
 0x45c   :  { %v1571_v46 = vpop.f32.mrb[148].mxu1  ;;  %v13647_v19 = vpack.c.bf16 %v2135_v39, %v2131_v13 }
 0x45d   :  { %17097 = vst [vmem:[#allocation6_spill] sm:$0xff] %v13645_v33  ;;  %v1573_v26 = vpop.f32.mrb[149].mxu1  ;;  %v1572_v16 = vadd.f32 %v1571_v46, %v13117_v45 }
 0x45e   :  { %v1575_v30 = vpop.f32.mrb[150].mxu1  ;;  %v1574_v51 = vadd.f32 %v1573_v26, %v13119_v9 }
 0x45f   :  { %v1577_v22 = vpop.f32.mrb[151].mxu1  ;;  %v1576_v10 = vadd.f32 %v1575_v30, %v13117_v45  ;;  %v2138_v8 = vmax.f32 %v1572_v16, 0.0 }
 0x460   :  { %v1578_v34 = vadd.f32 %v1577_v22, %v13119_v9  ;;  %v2139_v24 = vmax.f32 %v1574_v51, 0.0  ;;  %v13668_v51 = vld [vmem:[%s16642_s7] sm:$0xff]  }
 0x461   :  { %v2142_v12 = vmax.f32 %v1576_v10, 0.0  ;;  %9972 = vmatprep.subr.bf16.mxu1 %v13668_v51 }
 0x462   :  { %3820 = vmatmul.mubr.bf16.gmra.mrb[44].mxu0 %v13298_v44  ;;  %v2143_v13 = vmax.f32 %v1578_v34, 0.0 }
 0x463   :  { %3829 = vmatprep.mubr.bf16.mxu0 %v13313_v42  ;;  %v13655_v58 = vpack.c.bf16 %v2142_v12, %v2138_v8 }
 0x464   :  { %v1581_v39 = vpop.f32.mrb[152].mxu1  ;;  %v13657_v44 = vpack.c.bf16 %v2143_v13, %v2139_v24 }
 0x465   :  { %v1583_v33 = vpop.f32.mrb[153].mxu1  ;;  %v1582_v26 = vadd.f32 %v1581_v39, %v13117_v45 }
 0x466   :  { %v1585_v42 = vpop.f32.mrb[154].mxu1  ;;  %v1584_v30 = vadd.f32 %v1583_v33, %v13119_v9 }
 0x467   :  { %v1587_v46 = vpop.f32.mrb[155].mxu1  ;;  %v1586_v22 = vadd.f32 %v1585_v42, %v13117_v45  ;;  %v2146_v10 = vmax.f32 %v1582_v26, 0.0 }
 0x468   :  { %v1588_v16 = vadd.f32 %v1587_v46, %v13119_v9  ;;  %v2147_v34 = vmax.f32 %v1584_v30, 0.0 }
 0x46a   :  { %3830 = vmatmul.mubr.bf16.gmra.mrb[48].mxu0 %v13311_v38  ;;  %v2150_v38 = vmax.f32 %v1586_v22, 0.0  ;;  %v2151_v8 = vmax.f32 %v1588_v16, 0.0 }
 0x46b   :  { %3839 = vmatprep.mubr.bf16.mxu0 %v13330_v37 }
 0x46c   :  { %v1591_v37 = vpop.f32.mrb[156].mxu1  ;;  %v13671_v24 = vpack.c.bf16 %v2150_v38, %v2146_v10  ;;  %v13673_v33 = vpack.c.bf16 %v2151_v8, %v2147_v34 }
 0x46d   :  { %v1593_v12 = vpop.f32.mrb[157].mxu1  ;;  %v1592_v42 = vadd.f32 %v1591_v37, %v13117_v45 }
 0x46e   :  { %17098 = vst [vmem:[#allocation55_spill] sm:$0xff] %v13671_v24  ;;  %v1595_v13 = vpop.f32.mrb[158].mxu1  ;;  %v1594_v46 = vadd.f32 %v1593_v12, %v13119_v9 }
 0x46f   :  { %v1597_v39 = vpop.f32.mrb[159].mxu1  ;;  %v1596_v26 = vadd.f32 %v1595_v13, %v13117_v45  ;;  %v2154_v22 = vmax.f32 %v1592_v42, 0.0 }
 0x470   :  { %v1598_v30 = vadd.f32 %v1597_v39, %v13119_v9  ;;  %v2155_v16 = vmax.f32 %v1594_v46, 0.0 }
 0x471   :  { %v2158_v10 = vmax.f32 %v1596_v26, 0.0 }
 0x472   :  { %3840 = vmatmul.mubr.bf16.gmra.mrb[52].mxu0 %v13327_v18  ;;  %v2159_v38 = vmax.f32 %v1598_v30, 0.0 }
 0x473   :  { %3849 = vmatprep.mubr.bf16.mxu0 %v13343_v56  ;;  %v13681_v34 = vpack.c.bf16 %v2158_v10, %v2154_v22 }
 0x474   :  { %v1601_v8 = vpop.f32.mrb[160].mxu1  ;;  %v13683_v18 = vpack.c.bf16 %v2159_v38, %v2155_v16 }
 0x475   :  { %v1603_v24 = vpop.f32.mrb[161].mxu1  ;;  %v1602_v12 = vadd.f32 %v1601_v8, %v13117_v45 }
 0x476   :  { %v1605_v56 = vpop.f32.mrb[162].mxu1  ;;  %v1604_v13 = vadd.f32 %v1603_v24, %v13119_v9 }
 0x477   :  { %v1607_v37 = vpop.f32.mrb[163].mxu1  ;;  %v1606_v39 = vadd.f32 %v1605_v56, %v13117_v45  ;;  %v2162_v46 = vmax.f32 %v1602_v12, 0.0 }
 0x478   :  { %v1608_v42 = vadd.f32 %v1607_v37, %v13119_v9  ;;  %v2163_v26 = vmax.f32 %v1604_v13, 0.0 }
 0x479   :  { %v2166_v30 = vmax.f32 %v1606_v39, 0.0 }
 0x47a   :  { %3850 = vmatmul.mubr.bf16.gmra.mrb[56].mxu0 %v13341_v52  ;;  %v2167_v22 = vmax.f32 %v1608_v42, 0.0 }
 0x47b   :  { %3859 = vmatprep.mubr.bf16.mxu0 %v13356_v21  ;;  %v13691_v16 = vpack.c.bf16 %v2166_v30, %v2162_v46 }
 0x47c   :  { %v1611_v10 = vpop.f32.mrb[164].mxu1  ;;  %v13693_v52 = vpack.c.bf16 %v2167_v22, %v2163_v26 }
 0x47d   :  { %v1613_v38 = vpop.f32.mrb[165].mxu1  ;;  %v1612_v8 = vadd.f32 %v1611_v10, %v13117_v45 }
 0x47e   :  { %v1615_v21 = vpop.f32.mrb[166].mxu1  ;;  %v1614_v56 = vadd.f32 %v1613_v38, %v13119_v9 }
 0x47f   :  { %v1617_v24 = vpop.f32.mrb[167].mxu1  ;;  %v1616_v37 = vadd.f32 %v1615_v21, %v13117_v45  ;;  %v2170_v13 = vmax.f32 %v1612_v8, 0.0 }
 0x480   :  { %v1618_v12 = vadd.f32 %v1617_v24, %v13119_v9  ;;  %v2171_v39 = vmax.f32 %v1614_v56, 0.0 }
 0x481   :  { %v2174_v42 = vmax.f32 %v1616_v37, 0.0 }
 0x482   :  { %3860 = vmatmul.mubr.bf16.gmra.mrb[60].mxu0 %v13354_v31  ;;  %v2175_v46 = vmax.f32 %v1618_v12, 0.0 }
 0x483   :  { %3869 = vmatprep.mubr.bf16.mxu0 %v13369_v54  ;;  %v13701_v26 = vpack.c.bf16 %v2174_v42, %v2170_v13 }
 0x484   :  { %v1621_v30 = vpop.f32.mrb[168].mxu1  ;;  %v13703_v31 = vpack.c.bf16 %v2175_v46, %v2171_v39 }
 0x485   :  { %v1623_v22 = vpop.f32.mrb[169].mxu1  ;;  %v1622_v38 = vadd.f32 %v1621_v30, %v13117_v45 }
 0x486   :  { %v1625_v54 = vpop.f32.mrb[170].mxu1  ;;  %v1624_v21 = vadd.f32 %v1623_v22, %v13119_v9 }
 0x487   :  { %v1627_v10 = vpop.f32.mrb[171].mxu1  ;;  %v1626_v24 = vadd.f32 %v1625_v54, %v13117_v45  ;;  %v2178_v56 = vmax.f32 %v1622_v38, 0.0 }
 0x488   :  { %v1628_v8 = vadd.f32 %v1627_v10, %v13119_v9  ;;  %v2179_v37 = vmax.f32 %v1624_v21, 0.0 }
 0x489   :  { %v2182_v12 = vmax.f32 %v1626_v24, 0.0 }
 0x48a   :  { %3870 = vmatmul.mubr.bf16.gmra.mrb[64].mxu0 %v13367_v23  ;;  %v2183_v13 = vmax.f32 %v1628_v8, 0.0 }
 0x48b   :  { %3879 = vmatprep.mubr.bf16.mxu0 %v13386_v40  ;;  %v13711_v39 = vpack.c.bf16 %v2182_v12, %v2178_v56 }
 0x48c   :  { %v1631_v42 = vpop.f32.mrb[172].mxu1  ;;  %v13713_v23 = vpack.c.bf16 %v2183_v13, %v2179_v37 }
 0x48d   :  { %v1633_v46 = vpop.f32.mrb[173].mxu1  ;;  %v1632_v22 = vadd.f32 %v1631_v42, %v13117_v45 }
 0x48e   :  { %v1635_v40 = vpop.f32.mrb[174].mxu1  ;;  %v1634_v54 = vadd.f32 %v1633_v46, %v13119_v9 }
 0x48f   :  { %v1637_v30 = vpop.f32.mrb[175].mxu1  ;;  %v1636_v10 = vadd.f32 %v1635_v40, %v13117_v45  ;;  %v2186_v21 = vmax.f32 %v1632_v22, 0.0 }
 0x490   :  { %v1638_v38 = vadd.f32 %v1637_v30, %v13119_v9  ;;  %v2187_v24 = vmax.f32 %v1634_v54, 0.0 }
 0x491   :  { %v2190_v8 = vmax.f32 %v1636_v10, 0.0 }
 0x492   :  { %3880 = vmatmul.mubr.bf16.gmra.mrb[68].mxu0 %v13383_v61  ;;  %v2191_v56 = vmax.f32 %v1638_v38, 0.0 }
 0x493   :  { %3889 = vmatprep.mubr.bf16.mxu0 %v13399_v0  ;;  %v13721_v37 = vpack.c.bf16 %v2190_v8, %v2186_v21 }
 0x494   :  { %v1641_v12 = vpop.f32.mrb[176].mxu1  ;;  %v13723_v61 = vpack.c.bf16 %v2191_v56, %v2187_v24 }
 0x495   :  { %v1643_v13 = vpop.f32.mrb[177].mxu1  ;;  %v1642_v46 = vadd.f32 %v1641_v12, %v13117_v45 }
 0x496   :  { %v1645_v0 = vpop.f32.mrb[178].mxu1  ;;  %v1644_v40 = vadd.f32 %v1643_v13, %v13119_v9 }
 0x497   :  { %v1647_v42 = vpop.f32.mrb[179].mxu1  ;;  %v1646_v30 = vadd.f32 %v1645_v0, %v13117_v45  ;;  %v2194_v54 = vmax.f32 %v1642_v46, 0.0 }
 0x498   :  { %v1648_v22 = vadd.f32 %v1647_v42, %v13119_v9  ;;  %v2195_v10 = vmax.f32 %v1644_v40, 0.0 }
 0x499   :  { %v2198_v38 = vmax.f32 %v1646_v30, 0.0 }
 0x49a   :  { %3890 = vmatmul.mubr.bf16.gmra.mrb[72].mxu0 %v13397_v62  ;;  %v2199_v21 = vmax.f32 %v1648_v22, 0.0 }
 0x49b   :  { %3899 = vmatprep.mubr.bf16.mxu0 %v13412_v32  ;;  %v13731_v24 = vpack.c.bf16 %v2198_v38, %v2194_v54 }
 0x49c   :  { %v1651_v8 = vpop.f32.mrb[180].mxu1  ;;  %v13733_v62 = vpack.c.bf16 %v2199_v21, %v2195_v10 }
 0x49d   :  { %17099 = vst [vmem:[#allocation59_spill] sm:$0xff] %v13731_v24  ;;  %v1653_v56 = vpop.f32.mrb[181].mxu1  ;;  %v1652_v13 = vadd.f32 %v1651_v8, %v13117_v45  ;;  %v17103_v8 = vld [vmem:[#allocation56_spill] sm:$0xff] }
 0x49e   :  { %v1655_v32 = vpop.f32.mrb[182].mxu1  ;;  %v1654_v0 = vadd.f32 %v1653_v56, %v13119_v9 }
 0x49f   :  { %v1657_v12 = vpop.f32.mrb[183].mxu1  ;;  %v1656_v42 = vadd.f32 %v1655_v32, %v13117_v45  ;;  %v2202_v40 = vmax.f32 %v1652_v13, 0.0 }
 0x4a0   :  { %v1658_v46 = vadd.f32 %v1657_v12, %v13119_v9  ;;  %v2203_v30 = vmax.f32 %v1654_v0, 0.0 }
 0x4a1   :  { %v2206_v22 = vmax.f32 %v1656_v42, 0.0 }
 0x4a2   :  { %3900 = vmatmul.mubr.bf16.gmra.mrb[76].mxu0 %v13410_v2  ;;  %v2207_v54 = vmax.f32 %v1658_v46, 0.0 }
 0x4a3   :  { %3909 = vmatprep.mubr.bf16.mxu0 %v13425_v50  ;;  %v13741_v10 = vpack.c.bf16 %v2206_v22, %v2202_v40  ;;  %v17102_v50 = vld [vmem:[#allocation5_spill] sm:$0xff] }
 0x4a4   :  { %v1661_v38 = vpop.f32.mrb[184].mxu1  ;;  %v13743_v2 = vpack.c.bf16 %v2207_v54, %v2203_v30 }
 0x4a5   :  { %17100 = vst [vmem:[#allocation7_spill] sm:$0xff] %v13741_v10  ;;  %v1663_v21 = vpop.f32.mrb[185].mxu1  ;;  %v1662_v32 = vadd.f32 %v1661_v38, %v13117_v45 }
 0x4a6   :  { %17101 = vst [vmem:[#allocation58_spill] sm:$0xff] %v13743_v2  ;;  %v1665_v24 = vpop.f32.mrb[186].mxu1  ;;  %v1664_v12 = vadd.f32 %v1663_v21, %v13119_v9 }
 0x4a7   :  { %v1667_v56 = vpop.f32.mrb[187].mxu1  ;;  %v1666_v13 = vadd.f32 %v1665_v24, %v13117_v45  ;;  %v2210_v42 = vmax.f32 %v1662_v32, 0.0 }
 0x4a8   :  { %v1668_v0 = vadd.f32 %v1667_v56, %v13119_v9  ;;  %v2211_v46 = vmax.f32 %v1664_v12, 0.0 }
 0x4a9   :  { %v2214_v40 = vmax.f32 %v1666_v13, 0.0 }
 0x4aa   :  { %3910 = vmatmul.mubr.bf16.gmra.mrb[80].mxu0 %v17102_v50  ;;  %v2215_v30 = vmax.f32 %v1668_v0, 0.0 }
 0x4ab   :  { %3919 = vmatprep.mubr.bf16.mxu0 %v17103_v8  ;;  %v13751_v22 = vpack.c.bf16 %v2214_v40, %v2210_v42  ;;  %v17104_v8 = vld [vmem:[#allocation52_spill] sm:$0xff] }
 0x4ac   :  { %v1671_v54 = vpop.f32.mrb[188].mxu1  ;;  %v13753_v50 = vpack.c.bf16 %v2215_v30, %v2211_v46 }
 0x4ad   :  { %v1673_v10 = vpop.f32.mrb[189].mxu1  ;;  %v1672_v24 = vadd.f32 %v1671_v54, %v13117_v45 }
 0x4ae   :  { %v1675_v2 = vpop.f32.mrb[190].mxu1  ;;  %v1674_v21 = vadd.f32 %v1673_v10, %v13119_v9 }
 0x4af   :  { %v1677_v38 = vpop.f32.mrb[191].mxu1  ;;  %v1676_v56 = vadd.f32 %v1675_v2, %v13117_v45  ;;  %v2218_v12 = vmax.f32 %v1672_v24, 0.0 }
 0x4b0   :  { %v1678_v32 = vadd.f32 %v1677_v38, %v13119_v9  ;;  %v2219_v13 = vmax.f32 %v1674_v21, 0.0 }
 0x4b1   :  { %v2222_v0 = vmax.f32 %v1676_v56, 0.0 }
 0x4b2   :  { %3920 = vmatmul.mubr.bf16.gmra.mrb[84].mxu0 %v17104_v8  ;;  %v2223_v42 = vmax.f32 %v1678_v32, 0.0 }
 0x4b3   :  { %3929 = vmatprep.mubr.bf16.mxu0 %v13455_v28  ;;  %v13761_v46 = vpack.c.bf16 %v2222_v0, %v2218_v12 }
 0x4b4   :  { %v1681_v40 = vpop.f32.mrb[192].mxu1  ;;  %v13763_v30 = vpack.c.bf16 %v2223_v42, %v2219_v13 }
 0x4b5   :  { %v1683_v8 = vpop.f32.mrb[193].mxu1  ;;  %v1682_v2 = vadd.f32 %v1681_v40, %v13117_v45 }
 0x4b6   :  { %v1685_v28 = vpop.f32.mrb[194].mxu1  ;;  %v1684_v54 = vadd.f32 %v1683_v8, %v13119_v9 }
 0x4b7   :  { %v1687_v10 = vpop.f32.mrb[195].mxu1  ;;  %v1686_v38 = vadd.f32 %v1685_v28, %v13117_v45  ;;  %v2226_v21 = vmax.f32 %v1682_v2, 0.0 }
 0x4b8   :  { %v1688_v24 = vadd.f32 %v1687_v10, %v13119_v9  ;;  %v2227_v56 = vmax.f32 %v1684_v54, 0.0 }
 0x4b9   :  { %v2230_v32 = vmax.f32 %v1686_v38, 0.0 }
 0x4ba   :  { %3930 = vmatmul.mubr.bf16.gmra.mrb[88].mxu0 %v13453_v3  ;;  %v2231_v12 = vmax.f32 %v1688_v24, 0.0 }
 0x4bb   :  { %3939 = vmatprep.mubr.bf16.mxu0 %v13468_v11  ;;  %v13771_v13 = vpack.c.bf16 %v2230_v32, %v2226_v21 }
 0x4bc   :  { %v1691_v0 = vpop.f32.mrb[196].mxu1  ;;  %v13773_v3 = vpack.c.bf16 %v2231_v12, %v2227_v56 }
 0x4bd   :  { %v1693_v42 = vpop.f32.mrb[197].mxu1  ;;  %v1692_v8 = vadd.f32 %v1691_v0, %v13117_v45 }
 0x4be   :  { %v1695_v11 = vpop.f32.mrb[198].mxu1  ;;  %v1694_v28 = vadd.f32 %v1693_v42, %v13119_v9 }
 0x4bf   :  { %v1697_v40 = vpop.f32.mrb[199].mxu1  ;;  %v1696_v10 = vadd.f32 %v1695_v11, %v13117_v45  ;;  %v2234_v54 = vmax.f32 %v1692_v8, 0.0 }
 0x4c0   :  { %v1698_v2 = vadd.f32 %v1697_v40, %v13119_v9  ;;  %v2235_v38 = vmax.f32 %v1694_v28, 0.0 }
 0x4c1   :  { %v2238_v24 = vmax.f32 %v1696_v10, 0.0 }
 0x4c2   :  { %3940 = vmatmul.mubr.bf16.gmra.mrb[92].mxu0 %v13466_v59  ;;  %v2239_v21 = vmax.f32 %v1698_v2, 0.0 }
 0x4c3   :  { %3949 = vmatprep.mubr.bf16.mxu0 %v13481_v7  ;;  %v13781_v56 = vpack.c.bf16 %v2238_v24, %v2234_v54 }
 0x4c4   :  { %v1701_v32 = vpop.f32.mrb[200].mxu1  ;;  %v13783_v59 = vpack.c.bf16 %v2239_v21, %v2235_v38 }
 0x4c5   :  { %17105 = vst [vmem:[#allocation62_spill] sm:$0xff] %v13781_v56  ;;  %v1703_v12 = vpop.f32.mrb[201].mxu1  ;;  %v1702_v42 = vadd.f32 %v1701_v32, %v13117_v45 }
 0x4c6   :  { %17106 = vst [vmem:[#allocation8_spill] sm:$0xff] %v13783_v59  ;;  %v1705_v7 = vpop.f32.mrb[202].mxu1  ;;  %v1704_v11 = vadd.f32 %v1703_v12, %v13119_v9 }
 0x4c7   :  { %v1707_v0 = vpop.f32.mrb[203].mxu1  ;;  %v1706_v40 = vadd.f32 %v1705_v7, %v13117_v45  ;;  %v2242_v28 = vmax.f32 %v1702_v42, 0.0 }
 0x4c8   :  { %v1708_v8 = vadd.f32 %v1707_v0, %v13119_v9  ;;  %v2243_v10 = vmax.f32 %v1704_v11, 0.0 }
 0x4c9   :  { %v2246_v2 = vmax.f32 %v1706_v40, 0.0 }
 0x4ca   :  { %3950 = vmatmul.mubr.bf16.gmra.mrb[96].mxu0 %v13479_v15  ;;  %v2247_v54 = vmax.f32 %v1708_v8, 0.0 }
 0x4cb   :  { %3959 = vmatprep.mubr.bf16.mxu0 %v13498_v55  ;;  %v13791_v38 = vpack.c.bf16 %v2246_v2, %v2242_v28 }
 0x4cc   :  { %v1711_v24 = vpop.f32.mrb[204].mxu1  ;;  %v13793_v15 = vpack.c.bf16 %v2247_v54, %v2243_v10 }
 0x4cd   :  { %17107 = vst [vmem:[#allocation61_spill] sm:$0xff] %v13791_v38  ;;  %v1713_v21 = vpop.f32.mrb[205].mxu1  ;;  %v1712_v12 = vadd.f32 %v1711_v24, %v13117_v45  ;;  %v17111_v24 = vld [vmem:[#allocation22_spill] sm:$0xff] }
 0x4ce   :  { %17108 = vst [vmem:[#allocation65_spill] sm:$0xff] %v13793_v15  ;;  %v1715_v55 = vpop.f32.mrb[206].mxu1  ;;  %v1714_v7 = vadd.f32 %v1713_v21, %v13119_v9  ;;  %v17112_v21 = vsub.s32 0, %v17111_v24 }
 0x4cf   :  { %v1717_v32 = vpop.f32.mrb[207].mxu1  ;;  %v1716_v0 = vadd.f32 %v1715_v55, %v13117_v45  ;;  %v2250_v11 = vmax.f32 %v1712_v12, 0.0  ;;  %v17113_v12 = vsub.s32 1, %v17111_v24 }
 0x4d0   :  { %v1718_v42 = vadd.f32 %v1717_v32, %v13119_v9  ;;  %v2251_v40 = vmax.f32 %v1714_v7, 0.0 }
 0x4d1   :  { %v2254_v8 = vmax.f32 %v1716_v0, 0.0 }
 0x4d2   :  { %3960 = vmatmul.mubr.bf16.gmra.mrb[100].mxu0 %v13495_v14  ;;  %v2255_v28 = vmax.f32 %v1718_v42, 0.0  ;;  %v2672_v14 = vld [vmem:[%s16643_s4] sm:$0x3] }
 0x4d3   :  { %3969 = vmatprep.mubr.bf16.mxu0 %v13511_v60  ;;  %v13804_v10 = vpack.c.bf16 %v2254_v8, %v2250_v11  ;;  %v13811_v55 = vrot.slane %v2672_v14, %v17112_v21  ;;  %v13816_v7 = vrot.slane %v2672_v14, %v17113_v12 }
 0x4d4   :  { %v1721_v60 = vpop.f32.mrb[208].mxu1  ;;  %v13806_v2 = vpack.c.bf16 %v2255_v28, %v2251_v40 }
 0x4d5   :  { %17109 = vst [vmem:[#allocation9_spill] sm:$0xff] %v13804_v10  ;;  %v1723_v54 = vpop.f32.mrb[209].mxu1  ;;  %v1722_v42 = vadd.f32 %v1721_v60, %v13117_v45 }
 0x4d6   :  { %17110 = vst [vmem:[#allocation64_spill] sm:$0xff] %v13806_v2  ;;  %v1725_v32 = vpop.f32.mrb[210].mxu1  ;;  %v1724_v11 = vadd.f32 %v1723_v54, %v13119_v9 }
 0x4d7   :  { %v1727_v0 = vpop.f32.mrb[211].mxu1  ;;  %v1726_v40 = vadd.f32 %v1725_v32, %v13117_v45  ;;  %v2258_v10 = vmax.f32 %v1722_v42, 0.0 }
 0x4d8   :  { %v2259_v2 = vmax.f32 %v1724_v11, 0.0 }
 0x4da   :  { %3970 = vmatmul.mubr.bf16.gmra.mrb[104].mxu0 %v13509_v41  ;;  %v1728_v41 = vadd.f32 %v1727_v0, %v13119_v9 }
 0x4db   :  { %3979 = vmatprep.mubr.bf16.mxu0 %v13524_v63  ;;  %v2262_v63 = vmax.f32 %v1726_v40, 0.0 }
 0x4dc   :  { %v2263_v12 = vmax.f32 %v1728_v41, 0.0  ;;  %v1731_v54 = vpop.f32.mrb[212].mxu1 }
 0x4dd   :  { %v3711_v8 = vpop.f32.mrb[0].mxu0  ;;  %v13825_v15 = vpack.c.bf16 %v2262_v63, %v2258_v10  ;;  %v1733_v0 = vpop.f32.mrb[213].mxu1  ;;  %v1732_v10 = vadd.f32 %v1731_v54, %v13117_v45 }
 0x4de   :  { %v10260_v28 = vadd.f32 %v3711_v8, %v13811_v55  ;;  %v3713_v21 = vpop.f32.mrb[1].mxu0  ;;  %v13828_v56 = vpack.c.bf16 %v2263_v12, %v2259_v2  ;;  %v1735_v42 = vpop.f32.mrb[214].mxu1  ;;  %v1734_v63 = vadd.f32 %v1733_v0, %v13119_v9 }
 0x4df   :  { %v10261_v24 = vadd.f32 %v3713_v21, %v13816_v7  ;;  %v3715_v14 = vpop.f32.mrb[2].mxu0  ;;  %v1737_v41 = vpop.f32.mrb[215].mxu1 }
 0x4e0   :  { %v10262_v38 = vadd.f32 %v3715_v14, %v13811_v55  ;;  %v3717_v60 = vpop.f32.mrb[3].mxu0  ;;  %v4350_v8 = vmax.f32 %v10260_v28, 0.0  ;;  %v1736_v14 = vadd.f32 %v1735_v42, %v13117_v45  ;;  %v1738_v28 = vadd.f32 %v1737_v41, %v13119_v9 }
 0x4e1   :  { %v10263_v32 = vadd.f32 %v3717_v60, %v13816_v7  ;;  %v4351_v11 = vmax.f32 %v10261_v24, 0.0  ;;  %v10898_v24 = vld [vmem:[%s16642_s7 + $0x8] sm:$0xff]   ;;  %v2267_v12 = vmax.f32 %v1734_v63, 0.0 }
 0x4e2   :  { %v4352_v59 = vmax.f32 %v10262_v38, 0.0  ;;  %3980 = vmatmul.mubr.bf16.gmra.mrb[108].mxu0 %v13522_v5  ;;  %v2271_v0 = vmax.f32 %v1738_v28, 0.0 }
 0x4e3   :  { %v4353_v40 = vmax.f32 %v10263_v32, 0.0  ;;  %3989 = vmatprep.mubr.bf16.mxu0 %v13537_v36  ;;  %v2266_v36 = vmax.f32 %v1732_v10, 0.0 }
 0x4e4   :  { %v4606_v21 = vpack.c.bf16 %v4352_v59, %v4350_v8  ;;  %v2270_v59 = vmax.f32 %v1736_v14, 0.0  ;;  %v13846_v10 = vpack.c.bf16 %v2271_v0, %v2267_v12 }
 0x4e5   :  { %v4607_v60 = vpack.c.bf16 %v4353_v40, %v4351_v11  ;;  %v3721_v2 = vpop.f32.mrb[4].mxu0  ;;  %v1741_v40 = vpop.f32.mrb[216].mxu1 }
 0x4e6   :  { %v10264_v38 = vadd.f32 %v3721_v2, %v13811_v55  ;;  %v3723_v5 = vpop.f32.mrb[5].mxu0  ;;  %v13842_v11 = vpack.c.bf16 %v2270_v59, %v2266_v36  ;;  %v1743_v2 = vpop.f32.mrb[217].mxu1  ;;  %v1742_v59 = vadd.f32 %v1741_v40, %v13117_v45 }
 0x4e7   :  { %v10265_v54 = vadd.f32 %v3723_v5, %v13816_v7  ;;  %v3725_v32 = vpop.f32.mrb[6].mxu0  ;;  %4901 = vmatprep.mubr.bf16.mxu1 %v4607_v60  ;;  %v1745_v60 = vpop.f32.mrb[218].mxu1 }
 0x4e8   :  { %v10266_v8 = vadd.f32 %v3725_v32, %v13811_v55  ;;  %v3727_v42 = vpop.f32.mrb[7].mxu0  ;;  %4902 = vmatmul.mubr.bf16.vlgmr.msra.gmra.mrb[0].mxu1 %v4606_v21  ;;  %v4354_v63 = vmax.f32 %v10264_v38, 0.0  ;;  %v1747_v21 = vpop.f32.mrb[219].mxu1  ;;  %v1744_v32 = vadd.f32 %v1743_v2, %v13119_v9 }
 0x4e9   :  { %v10267_v41 = vadd.f32 %v3727_v42, %v13816_v7  ;;  %9973 = vmatpush3.bf16.msra.mxu1 %v13668_v51  ;;  %v4355_v28 = vmax.f32 %v10265_v54, 0.0  ;;  %v1746_v51 = vadd.f32 %v1745_v60, %v13117_v45  ;;  %v1748_v38 = vadd.f32 %v1747_v21, %v13119_v9 }
 0x4ea   :  { %v4356_v14 = vmax.f32 %v10266_v8, 0.0  ;;  %3990 = vmatmul.mubr.bf16.gmra.mrb[112].mxu0 %v13535_v48  ;;  %9974 = vmatprep.subr.bf16.mxu1 %v10898_v24  ;;  %v10899_v48 = vld [vmem:[%s16642_s7 + $0x10] sm:$0xff]   ;;  %v2274_v8 = vmax.f32 %v1742_v59, 0.0  ;;  %v2275_v42 = vmax.f32 %v1744_v32, 0.0 }
 0x4eb   :  { %v4357_v5 = vmax.f32 %v10267_v41, 0.0  ;;  %3999 = vmatprep.mubr.bf16.mxu0 %v13554_v43  ;;  %v2278_v41 = vmax.f32 %v1746_v51, 0.0 }
 0x4ec   :  { %v4608_v36 = vpack.c.bf16 %v4356_v14, %v4354_v63  ;;  %v2279_v63 = vmax.f32 %v1748_v38, 0.0 }
 0x4ed   :  { %v4609_v12 = vpack.c.bf16 %v4357_v5, %v4355_v28  ;;  %v3731_v0 = vpop.f32.mrb[8].mxu0  ;;  %9975 = vmatpush3.bf16.msra.mxu1 %v10898_v24  ;;  %v13860_v60 = vpack.c.bf16 %v2278_v41, %v2274_v8  ;;  %v1751_v28 = vpop.f32.mrb[220].mxu1 }
 0x4ee   :  { %v10268_v54 = vadd.f32 %v3731_v0, %v13811_v55  ;;  %v3733_v43 = vpop.f32.mrb[9].mxu0  ;;  %9976 = vmatprep.subr.bf16.mxu1 %v10899_v48  ;;  %v1753_v21 = vpop.f32.mrb[221].mxu1  ;;  %v13863_v59 = vpack.c.bf16 %v2279_v63, %v2275_v42  ;;  %v1752_v8 = vadd.f32 %v1751_v28, %v13117_v45 }
 0x4ef   :  { %v10269_v40 = vadd.f32 %v3733_v43, %v13816_v7  ;;  %v3735_v2 = vpop.f32.mrb[10].mxu0  ;;  %4909 = vmatprep.mubr.bf16.mxu1 %v4609_v12  ;;  %v1755_v12 = vpop.f32.mrb[222].mxu1  ;;  %v1754_v41 = vadd.f32 %v1753_v21, %v13119_v9 }
 0x4f0   :  { %v10270_v24 = vadd.f32 %v3735_v2, %v13811_v55  ;;  %v3737_v14 = vpop.f32.mrb[11].mxu0  ;;  %4910 = vmatmul.mubr.bf16.gmra.mrb[4].mxu1 %v4608_v36  ;;  %v4358_v32 = vmax.f32 %v10268_v54, 0.0  ;;  %v1757_v43 = vpop.f32.mrb[223].mxu1 }
 0x4f1   :  { %v10271_v5 = vadd.f32 %v3737_v14, %v13816_v7  ;;  %9977 = vmatpush3.bf16.msra.mxu1 %v10899_v48  ;;  %v4359_v0 = vmax.f32 %v10269_v40, 0.0  ;;  %v1756_v48 = vadd.f32 %v1755_v12, %v13117_v45  ;;  %v1758_v54 = vadd.f32 %v1757_v43, %v13119_v9 }
 0x4f2   :  { %v4360_v51 = vmax.f32 %v10270_v24, 0.0  ;;  %4000 = vmatmul.mubr.bf16.gmra.mrb[116].mxu0 %v13551_v57  ;;  %v2282_v24 = vmax.f32 %v1752_v8, 0.0  ;;  %v2283_v40 = vmax.f32 %v1754_v41, 0.0 }
 0x4f3   :  { %v4361_v38 = vmax.f32 %v10271_v5, 0.0  ;;  %4009 = vmatprep.mubr.bf16.mxu0 %v13567_v4  ;;  %v2286_v14 = vmax.f32 %v1756_v48, 0.0 }
 0x4f4   :  { %v4610_v36 = vpack.c.bf16 %v4360_v51, %v4358_v32  ;;  %v2287_v32 = vmax.f32 %v1758_v54, 0.0  ;;  %v1761_v12 = vpop.f32.mrb[224].mxu1 }
 0x4f5   :  { %v4611_v2 = vpack.c.bf16 %v4361_v38, %v4359_v0  ;;  %v3741_v42 = vpop.f32.mrb[12].mxu0  ;;  %v13874_v51 = vpack.c.bf16 %v2286_v14, %v2282_v24  ;;  %v1763_v38 = vpop.f32.mrb[225].mxu1 }
 0x4f6   :  { %v10272_v63 = vadd.f32 %v3741_v42, %v13811_v55  ;;  %v3743_v57 = vpop.f32.mrb[13].mxu0  ;;  %v13877_v43 = vpack.c.bf16 %v2287_v32, %v2283_v40  ;;  %v1765_v48 = vpop.f32.mrb[226].mxu1  ;;  %v1764_v24 = vadd.f32 %v1763_v38, %v13119_v9 }
 0x4f7   :  { %v10273_v4 = vadd.f32 %v3743_v57, %v13816_v7  ;;  %v3745_v5 = vpop.f32.mrb[14].mxu0  ;;  %4917 = vmatprep.mubr.bf16.mxu1 %v4611_v2  ;;  %v1767_v54 = vpop.f32.mrb[227].mxu1  ;;  %v1766_v14 = vadd.f32 %v1765_v48, %v13117_v45 }
 0x4f8   :  { %v10274_v28 = vadd.f32 %v3745_v5, %v13811_v55  ;;  %v3747_v21 = vpop.f32.mrb[15].mxu0  ;;  %4918 = vmatmul.mubr.bf16.gmra.mrb[8].mxu1 %v4610_v36  ;;  %v4362_v8 = vmax.f32 %v10272_v63, 0.0  ;;  %v1762_v36 = vadd.f32 %v1761_v12, %v13117_v45  ;;  %v1768_v63 = vadd.f32 %v1767_v54, %v13119_v9 }
 0x4f9   :  { %v10275_v0 = vadd.f32 %v3747_v21, %v13816_v7  ;;  %v4363_v42 = vmax.f32 %v10273_v4, 0.0  ;;  %v2291_v4 = vmax.f32 %v1764_v24, 0.0  ;;  %v2294_v21 = vmax.f32 %v1766_v14, 0.0 }
 0x4fa   :  { %v4364_v41 = vmax.f32 %v10274_v28, 0.0  ;;  %4010 = vmatmul.mubr.bf16.gmra.mrb[120].mxu0 %v13565_v17  ;;  %v2290_v28 = vmax.f32 %v1762_v36, 0.0 }
 0x4fb   :  { %v4365_v2 = vmax.f32 %v10275_v0, 0.0  ;;  %4019 = vmatprep.mubr.bf16.mxu0 %v13580_v25 }
 0x4fc   :  { %v4612_v57 = vpack.c.bf16 %v4364_v41, %v4362_v8  ;;  %v2295_v8 = vmax.f32 %v1768_v63, 0.0  ;;  %v13888_v41 = vpack.c.bf16 %v2294_v21, %v2290_v28  ;;  %v1771_v48 = vpop.f32.mrb[228].mxu1 }
 0x4fd   :  { %v4613_v5 = vpack.c.bf16 %v4365_v2, %v4363_v42  ;;  %v3751_v40 = vpop.f32.mrb[16].mxu0  ;;  %v1773_v2 = vpop.f32.mrb[229].mxu1 }
 0x4fe   :  { %v10276_v32 = vadd.f32 %v3751_v40, %v13811_v55  ;;  %v3753_v17 = vpop.f32.mrb[17].mxu0  ;;  %v13891_v54 = vpack.c.bf16 %v2295_v8, %v2291_v4  ;;  %v1775_v14 = vpop.f32.mrb[230].mxu1  ;;  %v1774_v28 = vadd.f32 %v1773_v2, %v13119_v9 }
 0x4ff   :  { %v10277_v25 = vadd.f32 %v3753_v17, %v13816_v7  ;;  %v3755_v0 = vpop.f32.mrb[18].mxu0  ;;  %4925 = vmatprep.mubr.bf16.mxu1 %v4613_v5  ;;  %v1777_v63 = vpop.f32.mrb[231].mxu1  ;;  %v1776_v21 = vadd.f32 %v1775_v14, %v13117_v45 }
 0x500   :  { %v10278_v12 = vadd.f32 %v3755_v0, %v13811_v55  ;;  %v3757_v38 = vpop.f32.mrb[19].mxu0  ;;  %4926 = vmatmul.mubr.bf16.gmra.mrb[12].mxu1 %v4612_v57  ;;  %v4366_v36 = vmax.f32 %v10276_v32, 0.0  ;;  %v1772_v57 = vadd.f32 %v1771_v48, %v13117_v45  ;;  %v1778_v32 = vadd.f32 %v1777_v63, %v13119_v9 }
 0x501   :  { %v10279_v42 = vadd.f32 %v3757_v38, %v13816_v7  ;;  %v4367_v40 = vmax.f32 %v10277_v25, 0.0  ;;  %v2299_v25 = vmax.f32 %v1774_v28, 0.0  ;;  %v2302_v38 = vmax.f32 %v1776_v21, 0.0 }
 0x502   :  { %v4368_v24 = vmax.f32 %v10278_v12, 0.0  ;;  %4020 = vmatmul.mubr.bf16.gmra.mrb[124].mxu0 %v13578_v35  ;;  %v2298_v12 = vmax.f32 %v1772_v57, 0.0 }
 0x503   :  { %v4369_v5 = vmax.f32 %v10279_v42, 0.0  ;;  %4029 = vmatprep.mubr.bf16.mxu0 %v13593_v1 }
 0x504   :  { %v4614_v17 = vpack.c.bf16 %v4368_v24, %v4366_v36  ;;  %v2303_v36 = vmax.f32 %v1778_v32, 0.0  ;;  %v13902_v24 = vpack.c.bf16 %v2302_v38, %v2298_v12  ;;  %v1781_v14 = vpop.f32.mrb[232].mxu1 }
 0x505   :  { %v4615_v0 = vpack.c.bf16 %v4369_v5, %v4367_v40  ;;  %v3761_v4 = vpop.f32.mrb[20].mxu0  ;;  %v1783_v5 = vpop.f32.mrb[233].mxu1 }
 0x506   :  { %v10280_v8 = vadd.f32 %v3761_v4, %v13811_v55  ;;  %v3763_v35 = vpop.f32.mrb[21].mxu0  ;;  %v13905_v63 = vpack.c.bf16 %v2303_v36, %v2299_v25  ;;  %v1785_v21 = vpop.f32.mrb[234].mxu1  ;;  %v1784_v12 = vadd.f32 %v1783_v5, %v13119_v9 }
 0x507   :  { %v10281_v1 = vadd.f32 %v3763_v35, %v13816_v7  ;;  %v3765_v42 = vpop.f32.mrb[22].mxu0  ;;  %4933 = vmatprep.mubr.bf16.mxu1 %v4615_v0  ;;  %v1787_v32 = vpop.f32.mrb[235].mxu1  ;;  %v1786_v38 = vadd.f32 %v1785_v21, %v13117_v45 }
 0x508   :  { %v10282_v48 = vadd.f32 %v3765_v42, %v13811_v55  ;;  %v3767_v2 = vpop.f32.mrb[23].mxu0  ;;  %4934 = vmatmul.mubr.bf16.gmra.mrb[16].mxu1 %v4614_v17  ;;  %v4370_v57 = vmax.f32 %v10280_v8, 0.0  ;;  %v1782_v17 = vadd.f32 %v1781_v14, %v13117_v45  ;;  %v1788_v8 = vadd.f32 %v1787_v32, %v13119_v9 }
 0x509   :  { %v10283_v40 = vadd.f32 %v3767_v2, %v13816_v7  ;;  %v4371_v4 = vmax.f32 %v10281_v1, 0.0  ;;  %v2307_v1 = vmax.f32 %v1784_v12, 0.0  ;;  %v2310_v2 = vmax.f32 %v1786_v38, 0.0 }
 0x50a   :  { %v4372_v28 = vmax.f32 %v10282_v48, 0.0  ;;  %4030 = vmatmul.mubr.bf16.gmra.mrb[128].mxu0 %v13591_v6  ;;  %v2306_v48 = vmax.f32 %v1782_v17, 0.0 }
 0x50b   :  { %v4373_v0 = vmax.f32 %v10283_v40, 0.0  ;;  %4039 = vmatprep.mubr.bf16.mxu0 %v13609_v20 }
 0x50c   :  { %v4616_v35 = vpack.c.bf16 %v4372_v28, %v4370_v57  ;;  %v2311_v57 = vmax.f32 %v1788_v8, 0.0  ;;  %v13916_v28 = vpack.c.bf16 %v2310_v2, %v2306_v48  ;;  %v1791_v21 = vpop.f32.mrb[236].mxu1 }
 0x50d   :  { %v4617_v42 = vpack.c.bf16 %v4373_v0, %v4371_v4  ;;  %v3771_v25 = vpop.f32.mrb[24].mxu0  ;;  %v1793_v0 = vpop.f32.mrb[237].mxu1 }
 0x50e   :  { %v10284_v36 = vadd.f32 %v3771_v25, %v13811_v55  ;;  %v3773_v6 = vpop.f32.mrb[25].mxu0  ;;  %v13919_v32 = vpack.c.bf16 %v2311_v57, %v2307_v1  ;;  %v1795_v38 = vpop.f32.mrb[238].mxu1  ;;  %v1794_v48 = vadd.f32 %v1793_v0, %v13119_v9 }
 0x50f   :  { %v10285_v20 = vadd.f32 %v3773_v6, %v13816_v7  ;;  %v3775_v40 = vpop.f32.mrb[26].mxu0  ;;  %4941 = vmatprep.mubr.bf16.mxu1 %v4617_v42  ;;  %v1797_v8 = vpop.f32.mrb[239].mxu1  ;;  %v1796_v2 = vadd.f32 %v1795_v38, %v13117_v45 }
 0x510   :  { %v10286_v14 = vadd.f32 %v3775_v40, %v13811_v55  ;;  %v3777_v5 = vpop.f32.mrb[27].mxu0  ;;  %4942 = vmatmul.mubr.bf16.gmra.mrb[20].mxu1 %v4616_v35  ;;  %v4374_v17 = vmax.f32 %v10284_v36, 0.0  ;;  %v1792_v35 = vadd.f32 %v1791_v21, %v13117_v45  ;;  %v1798_v36 = vadd.f32 %v1797_v8, %v13119_v9 }
 0x511   :  { %v10287_v4 = vadd.f32 %v3777_v5, %v13816_v7  ;;  %v4375_v25 = vmax.f32 %v10285_v20, 0.0  ;;  %v2315_v20 = vmax.f32 %v1794_v48, 0.0  ;;  %v2318_v5 = vmax.f32 %v1796_v2, 0.0 }
 0x512   :  { %v4376_v12 = vmax.f32 %v10286_v14, 0.0  ;;  %4040 = vmatmul.mubr.bf16.gmra.mrb[132].mxu0 %v13607_v29  ;;  %v2314_v14 = vmax.f32 %v1792_v35, 0.0 }
 0x513   :  { %v4377_v42 = vmax.f32 %v10287_v4, 0.0  ;;  %4049 = vmatprep.mubr.bf16.mxu0 %v13622_v47 }
 0x514   :  { %v4618_v6 = vpack.c.bf16 %v4376_v12, %v4374_v17  ;;  %v2319_v17 = vmax.f32 %v1798_v36, 0.0  ;;  %v13930_v12 = vpack.c.bf16 %v2318_v5, %v2314_v14  ;;  %v1801_v38 = vpop.f32.mrb[240].mxu1 }
 0x515   :  { %v4619_v40 = vpack.c.bf16 %v4377_v42, %v4375_v25  ;;  %v3781_v1 = vpop.f32.mrb[28].mxu0  ;;  %v1803_v42 = vpop.f32.mrb[241].mxu1 }
 0x516   :  { %v10288_v57 = vadd.f32 %v3781_v1, %v13811_v55  ;;  %v3783_v29 = vpop.f32.mrb[29].mxu0  ;;  %v13933_v8 = vpack.c.bf16 %v2319_v17, %v2315_v20  ;;  %v1805_v2 = vpop.f32.mrb[242].mxu1  ;;  %v1804_v14 = vadd.f32 %v1803_v42, %v13119_v9 }
 0x517   :  { %v10289_v47 = vadd.f32 %v3783_v29, %v13816_v7  ;;  %v3785_v4 = vpop.f32.mrb[30].mxu0  ;;  %4949 = vmatprep.mubr.bf16.mxu1 %v4619_v40  ;;  %v1807_v36 = vpop.f32.mrb[243].mxu1  ;;  %v1806_v5 = vadd.f32 %v1805_v2, %v13117_v45 }
 0x518   :  { %v10290_v21 = vadd.f32 %v3785_v4, %v13811_v55  ;;  %v3787_v0 = vpop.f32.mrb[31].mxu0  ;;  %4950 = vmatmul.mubr.bf16.gmra.mrb[24].mxu1 %v4618_v6  ;;  %v4378_v35 = vmax.f32 %v10288_v57, 0.0  ;;  %v1802_v6 = vadd.f32 %v1801_v38, %v13117_v45  ;;  %v1808_v57 = vadd.f32 %v1807_v36, %v13119_v9 }
 0x519   :  { %v10291_v25 = vadd.f32 %v3787_v0, %v13816_v7  ;;  %v4379_v1 = vmax.f32 %v10289_v47, 0.0  ;;  %v2323_v47 = vmax.f32 %v1804_v14, 0.0  ;;  %v2326_v0 = vmax.f32 %v1806_v5, 0.0 }
 0x51a   :  { %v4380_v48 = vmax.f32 %v10290_v21, 0.0  ;;  %4050 = vmatmul.mubr.bf16.gmra.mrb[136].mxu0 %v13620_v49  ;;  %v2322_v21 = vmax.f32 %v1802_v6, 0.0 }
 0x51b   :  { %v4381_v40 = vmax.f32 %v10291_v25, 0.0  ;;  %4059 = vmatprep.mubr.bf16.mxu0 %v13635_v53 }
 0x51c   :  { %v4620_v29 = vpack.c.bf16 %v4380_v48, %v4378_v35  ;;  %v2327_v35 = vmax.f32 %v1808_v57, 0.0  ;;  %v13944_v48 = vpack.c.bf16 %v2326_v0, %v2322_v21  ;;  %v1811_v2 = vpop.f32.mrb[244].mxu1 }
 0x51d   :  { %v4621_v4 = vpack.c.bf16 %v4381_v40, %v4379_v1  ;;  %v3791_v20 = vpop.f32.mrb[32].mxu0  ;;  %v1813_v40 = vpop.f32.mrb[245].mxu1 }
 0x51e   :  { %v10292_v17 = vadd.f32 %v3791_v20, %v13811_v55  ;;  %v3793_v49 = vpop.f32.mrb[33].mxu0  ;;  %v13947_v36 = vpack.c.bf16 %v2327_v35, %v2323_v47  ;;  %v1815_v5 = vpop.f32.mrb[246].mxu1  ;;  %v1814_v21 = vadd.f32 %v1813_v40, %v13119_v9 }
 0x51f   :  { %v10293_v53 = vadd.f32 %v3793_v49, %v13816_v7  ;;  %v3795_v25 = vpop.f32.mrb[34].mxu0  ;;  %4957 = vmatprep.mubr.bf16.mxu1 %v4621_v4  ;;  %v1817_v57 = vpop.f32.mrb[247].mxu1  ;;  %v1816_v0 = vadd.f32 %v1815_v5, %v13117_v45 }
 0x520   :  { %v10294_v38 = vadd.f32 %v3795_v25, %v13811_v55  ;;  %v3797_v42 = vpop.f32.mrb[35].mxu0  ;;  %4958 = vmatmul.mubr.bf16.gmra.mrb[28].mxu1 %v4620_v29  ;;  %v4382_v6 = vmax.f32 %v10292_v17, 0.0  ;;  %v1812_v29 = vadd.f32 %v1811_v2, %v13117_v45  ;;  %v1818_v17 = vadd.f32 %v1817_v57, %v13119_v9 }
 0x521   :  { %v10295_v1 = vadd.f32 %v3797_v42, %v13816_v7  ;;  %v4383_v20 = vmax.f32 %v10293_v53, 0.0  ;;  %v2331_v53 = vmax.f32 %v1814_v21, 0.0  ;;  %v2334_v42 = vmax.f32 %v1816_v0, 0.0  ;;  %v17114_v0 = vld [vmem:[#allocation6_spill] sm:$0xff] }
 0x522   :  { %v4384_v14 = vmax.f32 %v10294_v38, 0.0  ;;  %4060 = vmatmul.mubr.bf16.gmra.mrb[140].mxu0 %v13633_v27  ;;  %v2330_v38 = vmax.f32 %v1812_v29, 0.0 }
 0x523   :  { %v4385_v4 = vmax.f32 %v10295_v1, 0.0  ;;  %4069 = vmatprep.mubr.bf16.mxu0 %v13647_v19 }
 0x524   :  { %v4622_v49 = vpack.c.bf16 %v4384_v14, %v4382_v6  ;;  %v2335_v6 = vmax.f32 %v1818_v17, 0.0  ;;  %v13958_v14 = vpack.c.bf16 %v2334_v42, %v2330_v38  ;;  %v1821_v5 = vpop.f32.mrb[248].mxu1 }
 0x525   :  { %v4623_v25 = vpack.c.bf16 %v4385_v4, %v4383_v20  ;;  %v3801_v47 = vpop.f32.mrb[36].mxu0  ;;  %v1823_v4 = vpop.f32.mrb[249].mxu1 }
 0x526   :  { %v10296_v35 = vadd.f32 %v3801_v47, %v13811_v55  ;;  %v3803_v27 = vpop.f32.mrb[37].mxu0  ;;  %v13961_v57 = vpack.c.bf16 %v2335_v6, %v2331_v53  ;;  %v1825_v47 = vpop.f32.mrb[250].mxu1  ;;  %v1824_v38 = vadd.f32 %v1823_v4, %v13119_v9 }
 0x527   :  { %v10297_v19 = vadd.f32 %v3803_v27, %v13816_v7  ;;  %v3805_v1 = vpop.f32.mrb[38].mxu0  ;;  %4965 = vmatprep.mubr.bf16.mxu1 %v4623_v25  ;;  %v1827_v17 = vpop.f32.mrb[251].mxu1  ;;  %v1826_v42 = vadd.f32 %v1825_v47, %v13117_v45 }
 0x528   :  { %v10298_v2 = vadd.f32 %v3805_v1, %v13811_v55  ;;  %v3807_v40 = vpop.f32.mrb[39].mxu0  ;;  %4966 = vmatmul.mubr.bf16.gmra.mrb[32].mxu1 %v4622_v49  ;;  %v4386_v29 = vmax.f32 %v10296_v35, 0.0  ;;  %v1822_v49 = vadd.f32 %v1821_v5, %v13117_v45  ;;  %v10900_v35 = vld [vmem:[%s16642_s7 + $0x18] sm:$0xff]   ;;  %v1828_v6 = vadd.f32 %v1827_v17, %v13119_v9 }
 0x529   :  { %v10299_v20 = vadd.f32 %v3807_v40, %v13816_v7  ;;  %v4387_v27 = vmax.f32 %v10297_v19, 0.0  ;;  %9978 = vmatprep.subr.bf16.mxu1 %v10900_v35 }
 0x52a   :  { %v4388_v21 = vmax.f32 %v10298_v2, 0.0  ;;  %4070 = vmatmul.mubr.bf16.gmra.mrb[144].mxu0 %v17114_v0  ;;  %v2343_v4 = vmax.f32 %v1828_v6, 0.0  ;;  %9979 = vmatpush3.bf16.msra.mxu1 %v10900_v35 }
 0x52b   :  { %v4389_v25 = vmax.f32 %v10299_v20, 0.0  ;;  %4079 = vmatprep.mubr.bf16.mxu0 %v13657_v44  ;;  %v2338_v44 = vmax.f32 %v1822_v49, 0.0  ;;  %v2339_v20 = vmax.f32 %v1824_v38, 0.0 }
 0x52c   :  { %v4624_v1 = vpack.c.bf16 %v4388_v21, %v4386_v29  ;;  %v2342_v29 = vmax.f32 %v1826_v42, 0.0 }
 0x52d   :  { %v4625_v40 = vpack.c.bf16 %v4389_v25, %v4387_v27  ;;  %v3811_v53 = vpop.f32.mrb[40].mxu0  ;;  %v1831_v25 = vpop.f32.mrb[252].mxu1  ;;  %v13978_v49 = vpack.c.bf16 %v2343_v4, %v2339_v20 }
 0x52e   :  { %v10300_v19 = vadd.f32 %v3811_v53, %v13811_v55  ;;  %v3813_v2 = vpop.f32.mrb[41].mxu0  ;;  %v13975_v27 = vpack.c.bf16 %v2342_v29, %v2338_v44  ;;  %v1833_v53 = vpop.f32.mrb[253].mxu1  ;;  %v1832_v44 = vadd.f32 %v1831_v25, %v13117_v45 }
 0x52f   :  { %v10301_v5 = vadd.f32 %v3813_v2, %v13816_v7  ;;  %v3815_v21 = vpop.f32.mrb[42].mxu0  ;;  %4973 = vmatprep.mubr.bf16.mxu1 %v4625_v40  ;;  %v1835_v40 = vpop.f32.mrb[254].mxu1  ;;  %v1834_v29 = vadd.f32 %v1833_v53, %v13119_v9 }
 0x530   :  { %v10302_v0 = vadd.f32 %v3815_v21, %v13811_v55  ;;  %v3817_v47 = vpop.f32.mrb[43].mxu0  ;;  %4974 = vmatmul.mubr.bf16.gmra.mrb[36].mxu1 %v4624_v1  ;;  %17115 = vst [vmem:[#allocation68_spill] sm:$0xff] %v13975_v27  ;;  %v4390_v38 = vmax.f32 %v10300_v19, 0.0  ;;  %v1837_v21 = vpop.f32.mrb[255].mxu1  ;;  %v1836_v35 = vadd.f32 %v1835_v40, %v13117_v45 }
 0x531   :  { %v10303_v17 = vadd.f32 %v3817_v47, %v13816_v7  ;;  %v4391_v2 = vmax.f32 %v10301_v5, 0.0  ;;  %v1838_v19 = vadd.f32 %v1837_v21, %v13119_v9  ;;  %v2347_v5 = vmax.f32 %v1834_v29, 0.0 }
 0x532   :  { %v4392_v42 = vmax.f32 %v10302_v0, 0.0  ;;  %4080 = vmatmul.mubr.bf16.gmra.mrb[148].mxu0 %v13655_v58  ;;  %v2346_v0 = vmax.f32 %v1832_v44, 0.0 }
 0x533   :  { %v4393_v6 = vmax.f32 %v10303_v17, 0.0  ;;  %4089 = vmatprep.mubr.bf16.mxu0 %v13673_v33  ;;  %v2350_v17 = vmax.f32 %v1836_v35, 0.0 }
 0x534   :  { %v4626_v1 = vpack.c.bf16 %v4392_v42, %v4390_v38  ;;  %v2351_v38 = vmax.f32 %v1838_v19, 0.0 }
 0x535   :  { %v4627_v47 = vpack.c.bf16 %v4393_v6, %v4391_v2  ;;  %v3821_v20 = vpop.f32.mrb[44].mxu0  ;;  %v13989_v45 = vpack.c.bf16 %v2350_v17, %v2346_v0  ;;  %v17116_v6 = vld [vmem:[#allocation55_spill] sm:$0xff] }
 0x536   :  { %v10304_v4 = vadd.f32 %v3821_v20, %v13811_v55  ;;  %v3823_v58 = vpop.f32.mrb[45].mxu0  ;;  %v13992_v9 = vpack.c.bf16 %v2351_v38, %v2347_v5 }
 0x537   :  { %v10305_v33 = vadd.f32 %v3823_v58, %v13816_v7  ;;  %v3825_v27 = vpop.f32.mrb[46].mxu0  ;;  %4981 = vmatprep.mubr.bf16.mxu1 %v4627_v47 }
 0x538   :  { %v10306_v25 = vadd.f32 %v3825_v27, %v13811_v55  ;;  %v3827_v53 = vpop.f32.mrb[47].mxu0  ;;  %4982 = vmatmul.mubr.bf16.gmra.mrb[40].mxu1 %v4626_v1  ;;  %v4394_v40 = vmax.f32 %v10304_v4, 0.0 }
 0x539   :  { %v10307_v42 = vadd.f32 %v3827_v53, %v13816_v7  ;;  %v4395_v21 = vmax.f32 %v10305_v33, 0.0 }
 0x53a   :  { %v4396_v2 = vmax.f32 %v10306_v25, 0.0  ;;  %4090 = vmatmul.mubr.bf16.gmra.mrb[152].mxu0 %v17116_v6 }
 0x53b   :  { %v4397_v44 = vmax.f32 %v10307_v42, 0.0  ;;  %4099 = vmatprep.mubr.bf16.mxu0 %v13683_v18 }
 0x53c   :  { %v4628_v29 = vpack.c.bf16 %v4396_v2, %v4394_v40 }
 0x53d   :  { %v4629_v35 = vpack.c.bf16 %v4397_v44, %v4395_v21  ;;  %v3831_v47 = vpop.f32.mrb[48].mxu0 }
 0x53e   :  { %v10308_v27 = vadd.f32 %v3831_v47, %v13811_v55  ;;  %v3833_v1 = vpop.f32.mrb[49].mxu0 }
 0x53f   :  { %v10309_v20 = vadd.f32 %v3833_v1, %v13816_v7  ;;  %v3835_v19 = vpop.f32.mrb[50].mxu0  ;;  %4989 = vmatprep.mubr.bf16.mxu1 %v4629_v35 }
 0x540   :  { %v10310_v58 = vadd.f32 %v3835_v19, %v13811_v55  ;;  %v3837_v4 = vpop.f32.mrb[51].mxu0  ;;  %4990 = vmatmul.mubr.bf16.gmra.mrb[44].mxu1 %v4628_v29  ;;  %v4398_v5 = vmax.f32 %v10308_v27, 0.0 }
 0x541   :  { %v10311_v0 = vadd.f32 %v3837_v4, %v13816_v7  ;;  %v4399_v18 = vmax.f32 %v10309_v20, 0.0 }
 0x542   :  { %v4400_v17 = vmax.f32 %v10310_v58, 0.0  ;;  %4100 = vmatmul.mubr.bf16.gmra.mrb[156].mxu0 %v13681_v34 }
 0x543   :  { %v4401_v33 = vmax.f32 %v10311_v0, 0.0  ;;  %4109 = vmatprep.mubr.bf16.mxu0 %v13693_v52 }
 0x544   :  { %v4630_v38 = vpack.c.bf16 %v4400_v17, %v4398_v5 }
 0x545   :  { %v4631_v25 = vpack.c.bf16 %v4401_v33, %v4399_v18  ;;  %v3841_v53 = vpop.f32.mrb[52].mxu0 }
 0x546   :  { %v10312_v42 = vadd.f32 %v3841_v53, %v13811_v55  ;;  %v3843_v40 = vpop.f32.mrb[53].mxu0 }
 0x547   :  { %v10313_v2 = vadd.f32 %v3843_v40, %v13816_v7  ;;  %v3845_v6 = vpop.f32.mrb[54].mxu0  ;;  %4997 = vmatprep.mubr.bf16.mxu1 %v4631_v25 }
 0x548   :  { %v10314_v21 = vadd.f32 %v3845_v6, %v13811_v55  ;;  %v3847_v44 = vpop.f32.mrb[55].mxu0  ;;  %4998 = vmatmul.mubr.bf16.gmra.mrb[48].mxu1 %v4630_v38  ;;  %v4402_v29 = vmax.f32 %v10312_v42, 0.0 }
 0x549   :  { %v10315_v34 = vadd.f32 %v3847_v44, %v13816_v7  ;;  %v4403_v52 = vmax.f32 %v10313_v2, 0.0 }
 0x54a   :  { %v4404_v35 = vmax.f32 %v10314_v21, 0.0  ;;  %4110 = vmatmul.mubr.bf16.gmra.mrb[160].mxu0 %v13691_v16 }
 0x54b   :  { %v4405_v47 = vmax.f32 %v10315_v34, 0.0  ;;  %4119 = vmatprep.mubr.bf16.mxu0 %v13703_v31 }
 0x54c   :  { %v4632_v27 = vpack.c.bf16 %v4404_v35, %v4402_v29 }
 0x54d   :  { %v4633_v1 = vpack.c.bf16 %v4405_v47, %v4403_v52  ;;  %v3851_v20 = vpop.f32.mrb[56].mxu0 }
 0x54e   :  { %v10316_v19 = vadd.f32 %v3851_v20, %v13811_v55  ;;  %v3853_v58 = vpop.f32.mrb[57].mxu0 }
 0x54f   :  { %v10317_v4 = vadd.f32 %v3853_v58, %v13816_v7  ;;  %v3855_v0 = vpop.f32.mrb[58].mxu0  ;;  %5005 = vmatprep.mubr.bf16.mxu1 %v4633_v1 }
 0x550   :  { %v10318_v5 = vadd.f32 %v3855_v0, %v13811_v55  ;;  %v3857_v17 = vpop.f32.mrb[59].mxu0  ;;  %5006 = vmatmul.mubr.bf16.gmra.mrb[52].mxu1 %v4632_v27  ;;  %v4406_v18 = vmax.f32 %v10316_v19, 0.0 }
 0x551   :  { %v10319_v16 = vadd.f32 %v3857_v17, %v13816_v7  ;;  %v4407_v31 = vmax.f32 %v10317_v4, 0.0 }
 0x552   :  { %v4408_v33 = vmax.f32 %v10318_v5, 0.0  ;;  %4120 = vmatmul.mubr.bf16.gmra.mrb[164].mxu0 %v13701_v26 }
 0x553   :  { %v4409_v38 = vmax.f32 %v10319_v16, 0.0  ;;  %4129 = vmatprep.mubr.bf16.mxu0 %v13713_v23 }
 0x554   :  { %v4634_v25 = vpack.c.bf16 %v4408_v33, %v4406_v18 }
 0x555   :  { %v4635_v53 = vpack.c.bf16 %v4409_v38, %v4407_v31  ;;  %v3861_v42 = vpop.f32.mrb[60].mxu0 }
 0x556   :  { %v10320_v40 = vadd.f32 %v3861_v42, %v13811_v55  ;;  %v3863_v2 = vpop.f32.mrb[61].mxu0 }
 0x557   :  { %v10321_v6 = vadd.f32 %v3863_v2, %v13816_v7  ;;  %v3865_v21 = vpop.f32.mrb[62].mxu0  ;;  %5013 = vmatprep.mubr.bf16.mxu1 %v4635_v53 }
 0x558   :  { %v10322_v44 = vadd.f32 %v3865_v21, %v13811_v55  ;;  %v3867_v34 = vpop.f32.mrb[63].mxu0  ;;  %5014 = vmatmul.mubr.bf16.gmra.mrb[56].mxu1 %v4634_v25  ;;  %v4410_v29 = vmax.f32 %v10320_v40, 0.0 }
 0x559   :  { %v10323_v26 = vadd.f32 %v3867_v34, %v13816_v7  ;;  %v4411_v23 = vmax.f32 %v10321_v6, 0.0  ;;  %v17117_v34 = vld [vmem:[#allocation59_spill] sm:$0xff] }
 0x55a   :  { %v4412_v35 = vmax.f32 %v10322_v44, 0.0  ;;  %4130 = vmatmul.mubr.bf16.gmra.mrb[168].mxu0 %v13711_v39 }
 0x55b   :  { %v4413_v52 = vmax.f32 %v10323_v26, 0.0  ;;  %4139 = vmatprep.mubr.bf16.mxu0 %v13723_v61 }
 0x55c   :  { %v4636_v47 = vpack.c.bf16 %v4412_v35, %v4410_v29  ;;  %v17118_v29 = vld [vmem:[#allocation58_spill] sm:$0xff] }
 0x55d   :  { %v4637_v27 = vpack.c.bf16 %v4413_v52, %v4411_v23  ;;  %v3871_v1 = vpop.f32.mrb[64].mxu0 }
 0x55e   :  { %v10324_v20 = vadd.f32 %v3871_v1, %v13811_v55  ;;  %v3873_v19 = vpop.f32.mrb[65].mxu0 }
 0x55f   :  { %v10325_v58 = vadd.f32 %v3873_v19, %v13816_v7  ;;  %v3875_v4 = vpop.f32.mrb[66].mxu0  ;;  %5021 = vmatprep.mubr.bf16.mxu1 %v4637_v27 }
 0x560   :  { %v10326_v0 = vadd.f32 %v3875_v4, %v13811_v55  ;;  %v3877_v5 = vpop.f32.mrb[67].mxu0  ;;  %5022 = vmatmul.mubr.bf16.gmra.mrb[60].mxu1 %v4636_v47  ;;  %v4414_v17 = vmax.f32 %v10324_v20, 0.0  ;;  %v10901_v47 = vld [vmem:[%s16642_s7 + $0x20] sm:$0xff]  }
 0x561   :  { %v10327_v39 = vadd.f32 %v3877_v5, %v13816_v7  ;;  %v4415_v61 = vmax.f32 %v10325_v58, 0.0  ;;  %9980 = vmatprep.subr.bf16.mxu1 %v10901_v47 }
 0x562   :  { %v4416_v16 = vmax.f32 %v10326_v0, 0.0  ;;  %4140 = vmatmul.mubr.bf16.gmra.mrb[172].mxu0 %v13721_v37  ;;  %9981 = vmatpush3.bf16.msra.mxu1 %v10901_v47 }
 0x563   :  { %v4417_v18 = vmax.f32 %v10327_v39, 0.0  ;;  %4149 = vmatprep.mubr.bf16.mxu0 %v13733_v62 }
 0x564   :  { %v4638_v33 = vpack.c.bf16 %v4416_v16, %v4414_v17  ;;  %v17119_v17 = vld [vmem:[#allocation7_spill] sm:$0xff] }
 0x565   :  { %v4639_v31 = vpack.c.bf16 %v4417_v18, %v4415_v61  ;;  %v3881_v38 = vpop.f32.mrb[68].mxu0 }
 0x566   :  { %v10328_v25 = vadd.f32 %v3881_v38, %v13811_v55  ;;  %v3883_v53 = vpop.f32.mrb[69].mxu0 }
 0x567   :  { %v10329_v42 = vadd.f32 %v3883_v53, %v13816_v7  ;;  %v3885_v40 = vpop.f32.mrb[70].mxu0  ;;  %5029 = vmatprep.mubr.bf16.mxu1 %v4639_v31 }
 0x568   :  { %v10330_v2 = vadd.f32 %v3885_v40, %v13811_v55  ;;  %v3887_v6 = vpop.f32.mrb[71].mxu0  ;;  %5030 = vmatmul.mubr.bf16.gmra.mrb[64].mxu1 %v4638_v33  ;;  %v4418_v21 = vmax.f32 %v10328_v25, 0.0 }
 0x569   :  { %v10331_v37 = vadd.f32 %v3887_v6, %v13816_v7  ;;  %v4419_v62 = vmax.f32 %v10329_v42, 0.0 }
 0x56a   :  { %v4420_v44 = vmax.f32 %v10330_v2, 0.0  ;;  %4150 = vmatmul.mubr.bf16.gmra.mrb[176].mxu0 %v17117_v34 }
 0x56b   :  { %v4421_v26 = vmax.f32 %v10331_v37, 0.0  ;;  %4159 = vmatprep.mubr.bf16.mxu0 %v17118_v29 }
 0x56c   :  { %v4640_v35 = vpack.c.bf16 %v4420_v44, %v4418_v21 }
 0x56d   :  { %v4641_v23 = vpack.c.bf16 %v4421_v26, %v4419_v62  ;;  %v3891_v52 = vpop.f32.mrb[72].mxu0 }
 0x56e   :  { %v10332_v27 = vadd.f32 %v3891_v52, %v13811_v55  ;;  %v3893_v1 = vpop.f32.mrb[73].mxu0 }
 0x56f   :  { %v10333_v20 = vadd.f32 %v3893_v1, %v13816_v7  ;;  %v3895_v19 = vpop.f32.mrb[74].mxu0  ;;  %5037 = vmatprep.mubr.bf16.mxu1 %v4641_v23 }
 0x570   :  { %v10334_v58 = vadd.f32 %v3895_v19, %v13811_v55  ;;  %v3897_v4 = vpop.f32.mrb[75].mxu0  ;;  %5038 = vmatmul.mubr.bf16.gmra.mrb[68].mxu1 %v4640_v35  ;;  %v4422_v5 = vmax.f32 %v10332_v27, 0.0 }
 0x571   :  { %v10335_v0 = vadd.f32 %v3897_v4, %v13816_v7  ;;  %v4423_v16 = vmax.f32 %v10333_v20, 0.0 }
 0x572   :  { %v4424_v39 = vmax.f32 %v10334_v58, 0.0  ;;  %4160 = vmatmul.mubr.bf16.gmra.mrb[180].mxu0 %v17119_v17 }
 0x573   :  { %v4425_v61 = vmax.f32 %v10335_v0, 0.0  ;;  %4169 = vmatprep.mubr.bf16.mxu0 %v13753_v50 }
 0x574   :  { %v4642_v18 = vpack.c.bf16 %v4424_v39, %v4422_v5 }
 0x575   :  { %v4643_v33 = vpack.c.bf16 %v4425_v61, %v4423_v16  ;;  %v3901_v31 = vpop.f32.mrb[76].mxu0 }
 0x576   :  { %v10336_v38 = vadd.f32 %v3901_v31, %v13811_v55  ;;  %v3903_v25 = vpop.f32.mrb[77].mxu0 }
 0x577   :  { %v10337_v53 = vadd.f32 %v3903_v25, %v13816_v7  ;;  %v3905_v42 = vpop.f32.mrb[78].mxu0  ;;  %5045 = vmatprep.mubr.bf16.mxu1 %v4643_v33  ;;  %v17120_v25 = vld [vmem:[#allocation8_spill] sm:$0xff] }
 0x578   :  { %v10338_v40 = vadd.f32 %v3905_v42, %v13811_v55  ;;  %v3907_v2 = vpop.f32.mrb[79].mxu0  ;;  %5046 = vmatmul.mubr.bf16.gmra.mrb[72].mxu1 %v4642_v18  ;;  %v4426_v37 = vmax.f32 %v10336_v38, 0.0 }
 0x579   :  { %v10339_v6 = vadd.f32 %v3907_v2, %v13816_v7  ;;  %v4427_v50 = vmax.f32 %v10337_v53, 0.0 }
 0x57a   :  { %v4428_v21 = vmax.f32 %v10338_v40, 0.0  ;;  %4170 = vmatmul.mubr.bf16.gmra.mrb[184].mxu0 %v13751_v22 }
 0x57b   :  { %v4429_v44 = vmax.f32 %v10339_v6, 0.0  ;;  %4179 = vmatprep.mubr.bf16.mxu0 %v13763_v30 }
 0x57c   :  { %v4644_v34 = vpack.c.bf16 %v4428_v21, %v4426_v37 }
 0x57d   :  { %v4645_v62 = vpack.c.bf16 %v4429_v44, %v4427_v50  ;;  %v3911_v26 = vpop.f32.mrb[80].mxu0 }
 0x57e   :  { %v10340_v29 = vadd.f32 %v3911_v26, %v13811_v55  ;;  %v3913_v35 = vpop.f32.mrb[81].mxu0  ;;  %v17121_v26 = vld [vmem:[#allocation62_spill] sm:$0xff] }
 0x57f   :  { %v10341_v23 = vadd.f32 %v3913_v35, %v13816_v7  ;;  %v3915_v52 = vpop.f32.mrb[82].mxu0  ;;  %5053 = vmatprep.mubr.bf16.mxu1 %v4645_v62 }
 0x580   :  { %v10342_v47 = vadd.f32 %v3915_v52, %v13811_v55  ;;  %v3917_v27 = vpop.f32.mrb[83].mxu0  ;;  %5054 = vmatmul.mubr.bf16.gmra.mrb[76].mxu1 %v4644_v34  ;;  %v4430_v1 = vmax.f32 %v10340_v29, 0.0 }
 0x581   :  { %v10343_v22 = vadd.f32 %v3917_v27, %v13816_v7  ;;  %v4431_v30 = vmax.f32 %v10341_v23, 0.0  ;;  %v17122_v23 = vld [vmem:[#allocation65_spill] sm:$0xff] }
 0x582   :  { %v4432_v20 = vmax.f32 %v10342_v47, 0.0  ;;  %4180 = vmatmul.mubr.bf16.gmra.mrb[188].mxu0 %v13761_v46 }
 0x583   :  { %v4433_v19 = vmax.f32 %v10343_v22, 0.0  ;;  %4189 = vmatprep.mubr.bf16.mxu0 %v13773_v3 }
 0x584   :  { %v4646_v58 = vpack.c.bf16 %v4432_v20, %v4430_v1 }
 0x585   :  { %v4647_v4 = vpack.c.bf16 %v4433_v19, %v4431_v30  ;;  %v3921_v0 = vpop.f32.mrb[84].mxu0 }
 0x586   :  { %v10344_v5 = vadd.f32 %v3921_v0, %v13811_v55  ;;  %v3923_v39 = vpop.f32.mrb[85].mxu0 }
 0x587   :  { %v10345_v17 = vadd.f32 %v3923_v39, %v13816_v7  ;;  %v3925_v16 = vpop.f32.mrb[86].mxu0  ;;  %5061 = vmatprep.mubr.bf16.mxu1 %v4647_v4  ;;  %v17123_v39 = vld [vmem:[#allocation61_spill] sm:$0xff] }
 0x588   :  { %v10346_v61 = vadd.f32 %v3925_v16, %v13811_v55  ;;  %v3927_v18 = vpop.f32.mrb[87].mxu0  ;;  %5062 = vmatmul.mubr.bf16.gmra.mrb[80].mxu1 %v4646_v58  ;;  %v4434_v33 = vmax.f32 %v10344_v5, 0.0 }
 0x589   :  { %v10347_v46 = vadd.f32 %v3927_v18, %v13816_v7  ;;  %v4435_v3 = vmax.f32 %v10345_v17, 0.0 }
 0x58a   :  { %v4436_v31 = vmax.f32 %v10346_v61, 0.0  ;;  %4190 = vmatmul.mubr.bf16.gmra.mrb[192].mxu0 %v13771_v13  ;;  %v17124_v61 = vld [vmem:[#allocation64_spill] sm:$0xff] }
 0x58b   :  { %v4437_v38 = vmax.f32 %v10347_v46, 0.0  ;;  %4199 = vmatprep.mubr.bf16.mxu0 %v17120_v25 }
 0x58c   :  { %v4648_v53 = vpack.c.bf16 %v4436_v31, %v4434_v33 }
 0x58d   :  { %v4649_v42 = vpack.c.bf16 %v4437_v38, %v4435_v3  ;;  %v3931_v40 = vpop.f32.mrb[88].mxu0 }
 0x58e   :  { %v10348_v2 = vadd.f32 %v3931_v40, %v13811_v55  ;;  %v3933_v6 = vpop.f32.mrb[89].mxu0 }
 0x58f   :  { %v10349_v37 = vadd.f32 %v3933_v6, %v13816_v7  ;;  %v3935_v21 = vpop.f32.mrb[90].mxu0  ;;  %5069 = vmatprep.mubr.bf16.mxu1 %v4649_v42 }
 0x590   :  { %v10350_v50 = vadd.f32 %v3935_v21, %v13811_v55  ;;  %v3937_v44 = vpop.f32.mrb[91].mxu0  ;;  %5070 = vmatmul.mubr.bf16.gmra.mrb[84].mxu1 %v4648_v53  ;;  %v4438_v34 = vmax.f32 %v10348_v2, 0.0 }
 0x591   :  { %v10351_v13 = vadd.f32 %v3937_v44, %v13816_v7  ;;  %v4439_v29 = vmax.f32 %v10349_v37, 0.0  ;;  %v17125_v37 = vld [vmem:[#allocation9_spill] sm:$0xff] }
 0x592   :  { %v4440_v62 = vmax.f32 %v10350_v50, 0.0  ;;  %4200 = vmatmul.mubr.bf16.gmra.mrb[196].mxu0 %v17121_v26 }
 0x593   :  { %v4441_v35 = vmax.f32 %v10351_v13, 0.0  ;;  %4209 = vmatprep.mubr.bf16.mxu0 %v17122_v23 }
 0x594   :  { %v4650_v52 = vpack.c.bf16 %v4440_v62, %v4438_v34 }
 0x595   :  { %v4651_v47 = vpack.c.bf16 %v4441_v35, %v4439_v29  ;;  %v3941_v27 = vpop.f32.mrb[92].mxu0 }
 0x596   :  { %v10352_v22 = vadd.f32 %v3941_v27, %v13811_v55  ;;  %v3943_v1 = vpop.f32.mrb[93].mxu0 }
 0x597   :  { %v10353_v20 = vadd.f32 %v3943_v1, %v13816_v7  ;;  %v3945_v30 = vpop.f32.mrb[94].mxu0  ;;  %5077 = vmatprep.mubr.bf16.mxu1 %v4651_v47 }
 0x598   :  { %v10354_v19 = vadd.f32 %v3945_v30, %v13811_v55  ;;  %v3947_v58 = vpop.f32.mrb[95].mxu0  ;;  %5078 = vmatmul.mubr.bf16.gmra.mrb[88].mxu1 %v4650_v52  ;;  %v4442_v0 = vmax.f32 %v10352_v22, 0.0 }
 0x599   :  { %v10355_v4 = vadd.f32 %v3947_v58, %v13816_v7  ;;  %v4443_v17 = vmax.f32 %v10353_v20, 0.0  ;;  %v10902_v58 = vld [vmem:[%s16642_s7 + $0x28] sm:$0xff]  }
 0x59a   :  { %v4444_v5 = vmax.f32 %v10354_v19, 0.0  ;;  %4210 = vmatmul.mubr.bf16.gmra.mrb[200].mxu0 %v17123_v39  ;;  %9982 = vmatprep.subr.bf16.mxu1 %v10902_v58 }
 0x59b   :  { %v4445_v16 = vmax.f32 %v10355_v4, 0.0  ;;  %4219 = vmatprep.mubr.bf16.mxu0 %v17124_v61  ;;  %9983 = vmatpush3.bf16.msra.mxu1 %v10902_v58 }
 0x59c   :  { %v4652_v18 = vpack.c.bf16 %v4444_v5, %v4442_v0 }
 0x59d   :  { %v4653_v46 = vpack.c.bf16 %v4445_v16, %v4443_v17  ;;  %v3951_v33 = vpop.f32.mrb[96].mxu0 }
 0x59e   :  { %v10356_v31 = vadd.f32 %v3951_v33, %v13811_v55  ;;  %v3953_v3 = vpop.f32.mrb[97].mxu0 }
 0x59f   :  { %v10357_v38 = vadd.f32 %v3953_v3, %v13816_v7  ;;  %v3955_v25 = vpop.f32.mrb[98].mxu0  ;;  %5085 = vmatprep.mubr.bf16.mxu1 %v4653_v46 }
 0x5a0   :  { %v10358_v53 = vadd.f32 %v3955_v25, %v13811_v55  ;;  %v3957_v42 = vpop.f32.mrb[99].mxu0  ;;  %5086 = vmatmul.mubr.bf16.gmra.mrb[92].mxu1 %v4652_v18  ;;  %v4446_v2 = vmax.f32 %v10356_v31, 0.0 }
 0x5a1   :  { %v10359_v40 = vadd.f32 %v3957_v42, %v13816_v7  ;;  %v4447_v21 = vmax.f32 %v10357_v38, 0.0 }
 0x5a2   :  { %v4448_v6 = vmax.f32 %v10358_v53, 0.0  ;;  %4220 = vmatmul.mubr.bf16.gmra.mrb[204].mxu0 %v17125_v37 }
 0x5a3   :  { %v4449_v50 = vmax.f32 %v10359_v40, 0.0  ;;  %4229 = vmatprep.mubr.bf16.mxu0 %v13828_v56 }
 0x5a4   :  { %v4654_v44 = vpack.c.bf16 %v4448_v6, %v4446_v2 }
 0x5a5   :  { %v4655_v13 = vpack.c.bf16 %v4449_v50, %v4447_v21  ;;  %v3961_v34 = vpop.f32.mrb[100].mxu0 }
 0x5a6   :  { %v10360_v62 = vadd.f32 %v3961_v34, %v13811_v55  ;;  %v3963_v26 = vpop.f32.mrb[101].mxu0 }
 0x5a7   :  { %v10361_v29 = vadd.f32 %v3963_v26, %v13816_v7  ;;  %v3965_v35 = vpop.f32.mrb[102].mxu0  ;;  %5093 = vmatprep.mubr.bf16.mxu1 %v4655_v13 }
 0x5a8   :  { %v10362_v23 = vadd.f32 %v3965_v35, %v13811_v55  ;;  %v3967_v52 = vpop.f32.mrb[103].mxu0  ;;  %5094 = vmatmul.mubr.bf16.gmra.mrb[96].mxu1 %v4654_v44  ;;  %v4450_v27 = vmax.f32 %v10360_v62, 0.0 }
 0x5a9   :  { %v10363_v47 = vadd.f32 %v3967_v52, %v13816_v7  ;;  %v4451_v56 = vmax.f32 %v10361_v29, 0.0 }
 0x5aa   :  { %v4452_v22 = vmax.f32 %v10362_v23, 0.0  ;;  %4230 = vmatmul.mubr.bf16.gmra.mrb[208].mxu0 %v13825_v15 }
 0x5ab   :  { %v4453_v1 = vmax.f32 %v10363_v47, 0.0  ;;  %4239 = vmatprep.mubr.bf16.mxu0 %v13846_v10 }
 0x5ac   :  { %v4656_v20 = vpack.c.bf16 %v4452_v22, %v4450_v27 }
 0x5ad   :  { %v4657_v30 = vpack.c.bf16 %v4453_v1, %v4451_v56  ;;  %v3971_v19 = vpop.f32.mrb[104].mxu0 }
 0x5ae   :  { %v10364_v4 = vadd.f32 %v3971_v19, %v13811_v55  ;;  %v3973_v0 = vpop.f32.mrb[105].mxu0 }
 0x5af   :  { %v10365_v5 = vadd.f32 %v3973_v0, %v13816_v7  ;;  %v3975_v39 = vpop.f32.mrb[106].mxu0  ;;  %5101 = vmatprep.mubr.bf16.mxu1 %v4657_v30 }
 0x5b0   :  { %v10366_v15 = vadd.f32 %v3975_v39, %v13811_v55  ;;  %v3977_v17 = vpop.f32.mrb[107].mxu0  ;;  %5102 = vmatmul.mubr.bf16.gmra.mrb[100].mxu1 %v4656_v20  ;;  %v4454_v16 = vmax.f32 %v10364_v4, 0.0 }
 0x5b1   :  { %v10367_v10 = vadd.f32 %v3977_v17, %v13816_v7  ;;  %v4455_v18 = vmax.f32 %v10365_v5, 0.0 }
 0x5b2   :  { %v4456_v61 = vmax.f32 %v10366_v15, 0.0  ;;  %4240 = vmatmul.mubr.bf16.gmra.mrb[212].mxu0 %v13842_v11 }
 0x5b3   :  { %v4457_v46 = vmax.f32 %v10367_v10, 0.0  ;;  %4249 = vmatprep.mubr.bf16.mxu0 %v13863_v59  ;;  %v14099_v59 = vld [vmem:[%s16644_s6] ss:$0 sm:$0xff] }
 0x5b4   :  { %v4658_v33 = vpack.c.bf16 %v4456_v61, %v4454_v16 }
 0x5b5   :  { %v4659_v31 = vpack.c.bf16 %v4457_v46, %v4455_v18  ;;  %v3981_v3 = vpop.f32.mrb[108].mxu0 }
 0x5b6   :  { %v10368_v38 = vadd.f32 %v3981_v3, %v13811_v55  ;;  %v3983_v25 = vpop.f32.mrb[109].mxu0 }
 0x5b7   :  { %v10369_v53 = vadd.f32 %v3983_v25, %v13816_v7  ;;  %v3985_v42 = vpop.f32.mrb[110].mxu0  ;;  %5109 = vmatprep.mubr.bf16.mxu1 %v4659_v31 }
 0x5b8   :  { %v10370_v40 = vadd.f32 %v3985_v42, %v13811_v55  ;;  %v3987_v2 = vpop.f32.mrb[111].mxu0  ;;  %5110 = vmatmul.mubr.bf16.gmra.mrb[104].mxu1 %v4658_v33  ;;  %v4458_v6 = vmax.f32 %v10368_v38, 0.0 }
 0x5b9   :  { %v10371_v11 = vadd.f32 %v3987_v2, %v13816_v7  ;;  %v4459_v21 = vmax.f32 %v10369_v53, 0.0 }
 0x5ba   :  { %v4460_v37 = vmax.f32 %v10370_v40, 0.0  ;;  %4250 = vmatmul.mubr.bf16.gmra.mrb[216].mxu0 %v13860_v60 }
 0x5bb   :  { %v4461_v50 = vmax.f32 %v10371_v11, 0.0  ;;  %4259 = vmatprep.mubr.bf16.mxu0 %v13877_v43  ;;  %v4903_v44 = vpop.f32.mrb[0].mxu1 }
 0x5bc   :  { %v4660_v13 = vpack.c.bf16 %v4460_v37, %v4458_v6  ;;  %v4904_v34 = vadd.f32 %v14099_v59, %v4903_v44  ;;  %v4905_v62 = vpop.f32.mrb[1].mxu1 }
 0x5bd   :  { %v4661_v26 = vpack.c.bf16 %v4461_v50, %v4459_v21  ;;  %v3991_v29 = vpop.f32.mrb[112].mxu0  ;;  %v4906_v35 = vpop.f32.mrb[2].mxu1 }
 0x5be   :  { %v10372_v23 = vadd.f32 %v3991_v29, %v13811_v55  ;;  %v4907_v52 = vadd.f32 %v14099_v59, %v4906_v35  ;;  %v3993_v47 = vpop.f32.mrb[113].mxu0  ;;  %v4908_v27 = vpop.f32.mrb[3].mxu1  ;;  %v5414_v56 = vmax.f32 %v4904_v34, 0.0 }
 0x5bf   :  { %v10373_v60 = vadd.f32 %v3993_v47, %v13816_v7  ;;  %v3995_v22 = vpop.f32.mrb[114].mxu0  ;;  %5117 = vmatprep.mubr.bf16.mxu1 %v4661_v26 }
 0x5c0   :  { %v5415_v43 = vmax.f32 %v4907_v52, 0.0  ;;  %v10374_v1 = vadd.f32 %v3995_v22, %v13811_v55  ;;  %v3997_v20 = vpop.f32.mrb[115].mxu0  ;;  %5118 = vmatmul.mubr.bf16.gmra.mrb[108].mxu1 %v4660_v13  ;;  %v4462_v19 = vmax.f32 %v10372_v23, 0.0 }
 0x5c1   :  { %v10375_v30 = vadd.f32 %v3997_v20, %v13816_v7  ;;  %v4463_v0 = vmax.f32 %v10373_v60, 0.0 }
 0x5c2   :  { %v4464_v58 = vmax.f32 %v10374_v1, 0.0  ;;  %4260 = vmatmul.mubr.bf16.gmra.mrb[220].mxu0 %v13874_v51  ;;  %v14110_v4 = vpack.c.bf16 %v5415_v43, %v5414_v56 }
 0x5c3   :  { %v4465_v5 = vmax.f32 %v10375_v30, 0.0  ;;  %4269 = vmatprep.mubr.bf16.mxu0 %v13891_v54  ;;  %v4911_v39 = vpop.f32.mrb[4].mxu1 }
 0x5c4   :  { %v4662_v15 = vpack.c.bf16 %v4464_v58, %v4462_v19  ;;  %v4912_v17 = vadd.f32 %v14099_v59, %v4911_v39  ;;  %v4913_v10 = vpop.f32.mrb[5].mxu1 }
 0x5c5   :  { %v4663_v16 = vpack.c.bf16 %v4465_v5, %v4463_v0  ;;  %v4001_v61 = vpop.f32.mrb[116].mxu0  ;;  %v4914_v18 = vpop.f32.mrb[6].mxu1 }
 0x5c6   :  { %v10376_v46 = vadd.f32 %v4001_v61, %v13811_v55  ;;  %v4915_v33 = vadd.f32 %v14099_v59, %v4914_v18  ;;  %v4003_v31 = vpop.f32.mrb[117].mxu0  ;;  %v4916_v51 = vpop.f32.mrb[7].mxu1  ;;  %v5416_v25 = vmax.f32 %v4912_v17, 0.0 }
 0x5c7   :  { %v10377_v3 = vadd.f32 %v4003_v31, %v13816_v7  ;;  %v4005_v38 = vpop.f32.mrb[118].mxu0  ;;  %5125 = vmatprep.mubr.bf16.mxu1 %v4663_v16 }
 0x5c8   :  { %v5417_v54 = vmax.f32 %v4915_v33, 0.0  ;;  %v10378_v53 = vadd.f32 %v4005_v38, %v13811_v55  ;;  %v4007_v42 = vpop.f32.mrb[119].mxu0  ;;  %5126 = vmatmul.mubr.bf16.gmra.mrb[112].mxu1 %v4662_v15  ;;  %v4466_v2 = vmax.f32 %v10376_v46, 0.0 }
 0x5c9   :  { %v10379_v40 = vadd.f32 %v4007_v42, %v13816_v7  ;;  %v4467_v37 = vmax.f32 %v10377_v3, 0.0 }
 0x5ca   :  { %v14119_v11 = vpack.c.bf16 %v5417_v54, %v5416_v25  ;;  %v4468_v6 = vmax.f32 %v10378_v53, 0.0  ;;  %4270 = vmatmul.mubr.bf16.gmra.mrb[224].mxu0 %v13888_v41 }
 0x5cb   :  { %v4469_v21 = vmax.f32 %v10379_v40, 0.0  ;;  %4279 = vmatprep.mubr.bf16.mxu0 %v13905_v63  ;;  %v4919_v50 = vpop.f32.mrb[8].mxu1 }
 0x5cc   :  { %v4664_v44 = vpack.c.bf16 %v4468_v6, %v4466_v2  ;;  %v4920_v13 = vadd.f32 %v14099_v59, %v4919_v50  ;;  %v4921_v34 = vpop.f32.mrb[9].mxu1 }
 0x5cd   :  { %v4665_v62 = vpack.c.bf16 %v4469_v21, %v4467_v37  ;;  %v4011_v26 = vpop.f32.mrb[120].mxu0  ;;  %v4922_v29 = vpop.f32.mrb[10].mxu1 }
 0x5ce   :  { %v10380_v35 = vadd.f32 %v4011_v26, %v13811_v55  ;;  %v4923_v23 = vadd.f32 %v14099_v59, %v4922_v29  ;;  %v4013_v52 = vpop.f32.mrb[121].mxu0  ;;  %v4924_v47 = vpop.f32.mrb[11].mxu1  ;;  %v5418_v60 = vmax.f32 %v4920_v13, 0.0 }
 0x5cf   :  { %v10381_v41 = vadd.f32 %v4013_v52, %v13816_v7  ;;  %v4015_v27 = vpop.f32.mrb[122].mxu0  ;;  %5133 = vmatprep.mubr.bf16.mxu1 %v4665_v62 }
 0x5d0   :  { %v5419_v63 = vmax.f32 %v4923_v23, 0.0  ;;  %v10382_v22 = vadd.f32 %v4015_v27, %v13811_v55  ;;  %v4017_v56 = vpop.f32.mrb[123].mxu0  ;;  %5134 = vmatmul.mubr.bf16.gmra.mrb[116].mxu1 %v4664_v44  ;;  %v4470_v1 = vmax.f32 %v10380_v35, 0.0 }
 0x5d1   :  { %v10383_v43 = vadd.f32 %v4017_v56, %v13816_v7  ;;  %v4471_v19 = vmax.f32 %v10381_v41, 0.0 }
 0x5d2   :  { %v4472_v20 = vmax.f32 %v10382_v22, 0.0  ;;  %4280 = vmatmul.mubr.bf16.gmra.mrb[228].mxu0 %v13902_v24  ;;  %v14130_v30 = vpack.c.bf16 %v5419_v63, %v5418_v60 }
 0x5d3   :  { %v4473_v58 = vmax.f32 %v10383_v43, 0.0  ;;  %4289 = vmatprep.mubr.bf16.mxu0 %v13919_v32  ;;  %v4927_v0 = vpop.f32.mrb[12].mxu1 }
 0x5d4   :  { %v4666_v5 = vpack.c.bf16 %v4472_v20, %v4470_v1  ;;  %v4928_v39 = vadd.f32 %v14099_v59, %v4927_v0  ;;  %v4929_v15 = vpop.f32.mrb[13].mxu1 }
 0x5d5   :  { %v4667_v17 = vpack.c.bf16 %v4473_v58, %v4471_v19  ;;  %v4021_v10 = vpop.f32.mrb[124].mxu0  ;;  %v4930_v16 = vpop.f32.mrb[14].mxu1 }
 0x5d6   :  { %v10384_v61 = vadd.f32 %v4021_v10, %v13811_v55  ;;  %v4931_v18 = vadd.f32 %v14099_v59, %v4930_v16  ;;  %v4023_v46 = vpop.f32.mrb[125].mxu0  ;;  %v4932_v24 = vpop.f32.mrb[15].mxu1  ;;  %v5420_v51 = vmax.f32 %v4928_v39, 0.0 }
 0x5d7   :  { %v10385_v33 = vadd.f32 %v4023_v46, %v13816_v7  ;;  %v4025_v31 = vpop.f32.mrb[126].mxu0  ;;  %5141 = vmatprep.mubr.bf16.mxu1 %v4667_v17 }
 0x5d8   :  { %v5421_v32 = vmax.f32 %v4931_v18, 0.0  ;;  %v10386_v3 = vadd.f32 %v4025_v31, %v13811_v55  ;;  %v4027_v38 = vpop.f32.mrb[127].mxu0  ;;  %5142 = vmatmul.mubr.bf16.gmra.mrb[120].mxu1 %v4666_v5  ;;  %v4474_v54 = vmax.f32 %v10384_v61, 0.0 }
 0x5d9   :  { %v10387_v25 = vadd.f32 %v4027_v38, %v13816_v7  ;;  %v4475_v40 = vmax.f32 %v10385_v33, 0.0 }
 0x5da   :  { %v14139_v53 = vpack.c.bf16 %v5421_v32, %v5420_v51  ;;  %v4476_v42 = vmax.f32 %v10386_v3, 0.0  ;;  %4290 = vmatmul.mubr.bf16.gmra.mrb[232].mxu0 %v13916_v28 }
 0x5db   :  { %v4477_v2 = vmax.f32 %v10387_v25, 0.0  ;;  %4299 = vmatprep.mubr.bf16.mxu0 %v13933_v8  ;;  %v4935_v6 = vpop.f32.mrb[16].mxu1 }
 0x5dc   :  { %v4668_v37 = vpack.c.bf16 %v4476_v42, %v4474_v54  ;;  %v4936_v21 = vadd.f32 %v14099_v59, %v4935_v6  ;;  %v4937_v50 = vpop.f32.mrb[17].mxu1 }
 0x5dd   :  { %v4669_v44 = vpack.c.bf16 %v4477_v2, %v4475_v40  ;;  %v4031_v13 = vpop.f32.mrb[128].mxu0  ;;  %v4938_v34 = vpop.f32.mrb[18].mxu1 }
 0x5de   :  { %v10388_v62 = vadd.f32 %v4031_v13, %v13811_v55  ;;  %v4939_v26 = vadd.f32 %v14099_v59, %v4938_v34  ;;  %v4033_v29 = vpop.f32.mrb[129].mxu0  ;;  %v4940_v35 = vpop.f32.mrb[19].mxu1  ;;  %v5422_v52 = vmax.f32 %v4936_v21, 0.0  ;;  %v10903_v21 = vld [vmem:[%s16642_s7 + $0x30] sm:$0xff]  }
 0x5df   :  { %v10389_v28 = vadd.f32 %v4033_v29, %v13816_v7  ;;  %v4035_v23 = vpop.f32.mrb[130].mxu0  ;;  %5149 = vmatprep.mubr.bf16.mxu1 %v4669_v44  ;;  %9984 = vmatprep.subr.bf16.mxu1 %v10903_v21 }
 0x5e0   :  { %v5423_v8 = vmax.f32 %v4939_v26, 0.0  ;;  %v10390_v47 = vadd.f32 %v4035_v23, %v13811_v55  ;;  %v4037_v41 = vpop.f32.mrb[131].mxu0  ;;  %5150 = vmatmul.mubr.bf16.gmra.mrb[124].mxu1 %v4668_v37  ;;  %v4478_v60 = vmax.f32 %v10388_v62, 0.0 }
 0x5e1   :  { %v10391_v27 = vadd.f32 %v4037_v41, %v13816_v7  ;;  %v4479_v56 = vmax.f32 %v10389_v28, 0.0  ;;  %9985 = vmatpush3.bf16.msra.mxu1 %v10903_v21 }
 0x5e2   :  { %v4480_v63 = vmax.f32 %v10390_v47, 0.0  ;;  %4300 = vmatmul.mubr.bf16.gmra.mrb[236].mxu0 %v13930_v12  ;;  %v14150_v22 = vpack.c.bf16 %v5423_v8, %v5422_v52 }
 0x5e3   :  { %v4481_v43 = vmax.f32 %v10391_v27, 0.0  ;;  %4309 = vmatprep.mubr.bf16.mxu0 %v13947_v36  ;;  %v4943_v1 = vpop.f32.mrb[20].mxu1 }
 0x5e4   :  { %v4670_v20 = vpack.c.bf16 %v4480_v63, %v4478_v60  ;;  %v4944_v19 = vadd.f32 %v14099_v59, %v4943_v1  ;;  %v4945_v58 = vpop.f32.mrb[21].mxu1 }
 0x5e5   :  { %v4671_v0 = vpack.c.bf16 %v4481_v43, %v4479_v56  ;;  %v4041_v5 = vpop.f32.mrb[132].mxu0  ;;  %v4946_v39 = vpop.f32.mrb[22].mxu1 }
 0x5e6   :  { %v10392_v15 = vadd.f32 %v4041_v5, %v13811_v55  ;;  %v4947_v17 = vadd.f32 %v14099_v59, %v4946_v39  ;;  %v4043_v10 = vpop.f32.mrb[133].mxu0  ;;  %v4948_v12 = vpop.f32.mrb[23].mxu1  ;;  %v5424_v18 = vmax.f32 %v4944_v19, 0.0 }
 0x5e7   :  { %v10393_v16 = vadd.f32 %v4043_v10, %v13816_v7  ;;  %v4045_v61 = vpop.f32.mrb[134].mxu0  ;;  %5157 = vmatprep.mubr.bf16.mxu1 %v4671_v0 }
 0x5e8   :  { %v5425_v36 = vmax.f32 %v4947_v17, 0.0  ;;  %v10394_v46 = vadd.f32 %v4045_v61, %v13811_v55  ;;  %v4047_v24 = vpop.f32.mrb[135].mxu0  ;;  %5158 = vmatmul.mubr.bf16.gmra.mrb[128].mxu1 %v4670_v20  ;;  %v4482_v31 = vmax.f32 %v10392_v15, 0.0 }
 0x5e9   :  { %v10395_v33 = vadd.f32 %v4047_v24, %v13816_v7  ;;  %v4483_v3 = vmax.f32 %v10393_v16, 0.0 }
 0x5ea   :  { %v14159_v51 = vpack.c.bf16 %v5425_v36, %v5424_v18  ;;  %v4484_v32 = vmax.f32 %v10394_v46, 0.0  ;;  %4310 = vmatmul.mubr.bf16.gmra.mrb[240].mxu0 %v13944_v48  ;;  %v17126_v36 = vld [vmem:[#allocation68_spill] sm:$0xff] }
 0x5eb   :  { %v4485_v38 = vmax.f32 %v10395_v33, 0.0  ;;  %4319 = vmatprep.mubr.bf16.mxu0 %v13961_v57  ;;  %v4951_v25 = vpop.f32.mrb[24].mxu1 }
 0x5ec   :  { %v4672_v54 = vpack.c.bf16 %v4484_v32, %v4482_v31  ;;  %v4952_v42 = vadd.f32 %v14099_v59, %v4951_v25  ;;  %v4953_v40 = vpop.f32.mrb[25].mxu1 }
 0x5ed   :  { %v4673_v2 = vpack.c.bf16 %v4485_v38, %v4483_v3  ;;  %v4051_v6 = vpop.f32.mrb[136].mxu0  ;;  %v4954_v37 = vpop.f32.mrb[26].mxu1 }
 0x5ee   :  { %v10396_v50 = vadd.f32 %v4051_v6, %v13811_v55  ;;  %v4955_v48 = vadd.f32 %v14099_v59, %v4954_v37  ;;  %v4053_v44 = vpop.f32.mrb[137].mxu0  ;;  %v4956_v13 = vpop.f32.mrb[27].mxu1  ;;  %v5426_v62 = vmax.f32 %v4952_v42, 0.0 }
 0x5ef   :  { %v10397_v57 = vadd.f32 %v4053_v44, %v13816_v7  ;;  %v4055_v34 = vpop.f32.mrb[138].mxu0  ;;  %5165 = vmatprep.mubr.bf16.mxu1 %v4673_v2 }
 0x5f0   :  { %v5427_v26 = vmax.f32 %v4955_v48, 0.0  ;;  %v10398_v29 = vadd.f32 %v4055_v34, %v13811_v55  ;;  %v4057_v35 = vpop.f32.mrb[139].mxu0  ;;  %5166 = vmatmul.mubr.bf16.gmra.mrb[132].mxu1 %v4672_v54  ;;  %v4486_v23 = vmax.f32 %v10396_v50, 0.0 }
 0x5f1   :  { %v10399_v28 = vadd.f32 %v4057_v35, %v13816_v7  ;;  %v4487_v47 = vmax.f32 %v10397_v57, 0.0 }
 0x5f2   :  { %v4488_v52 = vmax.f32 %v10398_v29, 0.0  ;;  %4320 = vmatmul.mubr.bf16.gmra.mrb[244].mxu0 %v13958_v14  ;;  %v14173_v8 = vpack.c.bf16 %v5427_v26, %v5426_v62 }
 0x5f3   :  { %v4489_v41 = vmax.f32 %v10399_v28, 0.0  ;;  %4329 = vmatprep.mubr.bf16.mxu0 %v13978_v49  ;;  %v4959_v27 = vpop.f32.mrb[28].mxu1 }
 0x5f4   :  { %v4674_v60 = vpack.c.bf16 %v4488_v52, %v4486_v23  ;;  %v4960_v63 = vadd.f32 %v14099_v59, %v4959_v27  ;;  %v4961_v56 = vpop.f32.mrb[29].mxu1 }
 0x5f5   :  { %v4675_v43 = vpack.c.bf16 %v4489_v41, %v4487_v47  ;;  %v4061_v1 = vpop.f32.mrb[140].mxu0  ;;  %v4962_v20 = vpop.f32.mrb[30].mxu1 }
 0x5f6   :  { %v10400_v19 = vadd.f32 %v4061_v1, %v13811_v55  ;;  %v4963_v58 = vadd.f32 %v14099_v59, %v4962_v20  ;;  %v4063_v0 = vpop.f32.mrb[141].mxu0  ;;  %v4964_v14 = vpop.f32.mrb[31].mxu1  ;;  %v5428_v15 = vmax.f32 %v4960_v63, 0.0 }
 0x5f7   :  { %v10401_v5 = vadd.f32 %v4063_v0, %v13816_v7  ;;  %v4065_v39 = vpop.f32.mrb[142].mxu0  ;;  %5173 = vmatprep.mubr.bf16.mxu1 %v4675_v43 }
 0x5f8   :  { %v5429_v49 = vmax.f32 %v4963_v58, 0.0  ;;  %v10402_v17 = vadd.f32 %v4065_v39, %v13811_v55  ;;  %v4067_v10 = vpop.f32.mrb[143].mxu0  ;;  %5174 = vmatmul.mubr.bf16.gmra.mrb[136].mxu1 %v4674_v60  ;;  %v4490_v16 = vmax.f32 %v10400_v19, 0.0 }
 0x5f9   :  { %v10403_v12 = vadd.f32 %v4067_v10, %v13816_v7  ;;  %v4491_v46 = vmax.f32 %v10401_v5, 0.0 }
 0x5fa   :  { %v14182_v61 = vpack.c.bf16 %v5429_v49, %v5428_v15  ;;  %v4492_v18 = vmax.f32 %v10402_v17, 0.0  ;;  %4330 = vmatmul.mubr.bf16.gmra.mrb[248].mxu0 %v17126_v36 }
 0x5fb   :  { %v4493_v24 = vmax.f32 %v10403_v12, 0.0  ;;  %4339 = vmatprep.mubr.bf16.mxu0 %v13992_v9  ;;  %v4967_v33 = vpop.f32.mrb[32].mxu1 }
 0x5fc   :  { %v4676_v31 = vpack.c.bf16 %v4492_v18, %v4490_v16  ;;  %v4968_v32 = vadd.f32 %v14099_v59, %v4967_v33  ;;  %v4969_v3 = vpop.f32.mrb[33].mxu1 }
 0x5fd   :  { %v4677_v38 = vpack.c.bf16 %v4493_v24, %v4491_v46  ;;  %v4071_v25 = vpop.f32.mrb[144].mxu0  ;;  %v4970_v54 = vpop.f32.mrb[34].mxu1 }
 0x5fe   :  { %v10404_v42 = vadd.f32 %v4071_v25, %v13811_v55  ;;  %v4971_v40 = vadd.f32 %v14099_v59, %v4970_v54  ;;  %v4073_v2 = vpop.f32.mrb[145].mxu0  ;;  %v4972_v6 = vpop.f32.mrb[35].mxu1  ;;  %v5430_v50 = vmax.f32 %v4968_v32, 0.0 }
 0x5ff   :  { %v10405_v37 = vadd.f32 %v4073_v2, %v13816_v7  ;;  %v4075_v21 = vpop.f32.mrb[146].mxu0  ;;  %5181 = vmatprep.mubr.bf16.mxu1 %v4677_v38 }
 0x600   :  { %v5431_v9 = vmax.f32 %v4971_v40, 0.0  ;;  %v10406_v48 = vadd.f32 %v4075_v21, %v13811_v55  ;;  %v4077_v44 = vpop.f32.mrb[147].mxu0  ;;  %5182 = vmatmul.mubr.bf16.gmra.mrb[140].mxu1 %v4676_v31  ;;  %v4494_v57 = vmax.f32 %v10404_v42, 0.0 }
 0x601   :  { %v10407_v13 = vadd.f32 %v4077_v44, %v13816_v7  ;;  %v4495_v26 = vmax.f32 %v10405_v37, 0.0 }
 0x602   :  { %v4496_v34 = vmax.f32 %v10406_v48, 0.0  ;;  %4340 = vmatmul.mubr.bf16.gmra.mrb[252].mxu0 %v13989_v45  ;;  %v14193_v62 = vpack.c.bf16 %v5431_v9, %v5430_v50 }
 0x603   :  { %v4497_v29 = vmax.f32 %v10407_v13, 0.0  ;;  %v4975_v35 = vpop.f32.mrb[36].mxu1 }
 0x604   :  { %v4678_v28 = vpack.c.bf16 %v4496_v34, %v4494_v57  ;;  %v4976_v23 = vadd.f32 %v14099_v59, %v4975_v35  ;;  %v4977_v52 = vpop.f32.mrb[37].mxu1 }
 0x605   :  { %v4679_v47 = vpack.c.bf16 %v4497_v29, %v4495_v26  ;;  %v4081_v41 = vpop.f32.mrb[148].mxu0  ;;  %v4978_v27 = vpop.f32.mrb[38].mxu1 }
 0x606   :  { %v10408_v60 = vadd.f32 %v4081_v41, %v13811_v55  ;;  %v4979_v63 = vadd.f32 %v14099_v59, %v4978_v27  ;;  %v4083_v56 = vpop.f32.mrb[149].mxu0  ;;  %v4980_v43 = vpop.f32.mrb[39].mxu1  ;;  %v5432_v20 = vmax.f32 %v4976_v23, 0.0 }
 0x607   :  { %v10409_v45 = vadd.f32 %v4083_v56, %v13816_v7  ;;  %v4085_v1 = vpop.f32.mrb[150].mxu0  ;;  %5189 = vmatprep.mubr.bf16.mxu1 %v4679_v47 }
 0x608   :  { %v5433_v19 = vmax.f32 %v4979_v63, 0.0  ;;  %v10410_v58 = vadd.f32 %v4085_v1, %v13811_v55  ;;  %v4087_v0 = vpop.f32.mrb[151].mxu0  ;;  %5190 = vmatmul.mubr.bf16.gmra.mrb[144].mxu1 %v4678_v28  ;;  %v4498_v5 = vmax.f32 %v10408_v60, 0.0 }
 0x609   :  { %v10411_v14 = vadd.f32 %v4087_v0, %v13816_v7  ;;  %v4499_v49 = vmax.f32 %v10409_v45, 0.0 }
 0x60a   :  { %v14201_v39 = vpack.c.bf16 %v5433_v19, %v5432_v20  ;;  %v4500_v15 = vmax.f32 %v10410_v58, 0.0 }
 0x60b   :  { %v4501_v17 = vmax.f32 %v10411_v14, 0.0  ;;  %v4983_v10 = vpop.f32.mrb[40].mxu1 }
 0x60c   :  { %v4680_v12 = vpack.c.bf16 %v4500_v15, %v4498_v5  ;;  %v4984_v16 = vadd.f32 %v14099_v59, %v4983_v10  ;;  %v4985_v18 = vpop.f32.mrb[41].mxu1 }
 0x60d   :  { %v4681_v36 = vpack.c.bf16 %v4501_v17, %v4499_v49  ;;  %v4091_v46 = vpop.f32.mrb[152].mxu0  ;;  %v4986_v24 = vpop.f32.mrb[42].mxu1 }
 0x60e   :  { %v10412_v33 = vadd.f32 %v4091_v46, %v13811_v55  ;;  %v4987_v31 = vadd.f32 %v14099_v59, %v4986_v24  ;;  %v4093_v32 = vpop.f32.mrb[153].mxu0  ;;  %v4988_v3 = vpop.f32.mrb[43].mxu1  ;;  %v5434_v54 = vmax.f32 %v4984_v16, 0.0 }
 0x60f   :  { %v10413_v38 = vadd.f32 %v4093_v32, %v13816_v7  ;;  %v4095_v25 = vpop.f32.mrb[154].mxu0  ;;  %5197 = vmatprep.mubr.bf16.mxu1 %v4681_v36 }
 0x610   :  { %v5435_v42 = vmax.f32 %v4987_v31, 0.0  ;;  %v10414_v40 = vadd.f32 %v4095_v25, %v13811_v55  ;;  %v4097_v2 = vpop.f32.mrb[155].mxu0  ;;  %5198 = vmatmul.mubr.bf16.gmra.mrb[148].mxu1 %v4680_v12  ;;  %v4502_v37 = vmax.f32 %v10412_v33, 0.0 }
 0x611   :  { %v10415_v6 = vadd.f32 %v4097_v2, %v13816_v7  ;;  %v4503_v9 = vmax.f32 %v10413_v38, 0.0 }
 0x612   :  { %v4504_v21 = vmax.f32 %v10414_v40, 0.0  ;;  %v14209_v50 = vpack.c.bf16 %v5435_v42, %v5434_v54 }
 0x613   :  { %v4505_v48 = vmax.f32 %v10415_v6, 0.0  ;;  %v4991_v44 = vpop.f32.mrb[44].mxu1 }
 0x614   :  { %v4682_v13 = vpack.c.bf16 %v4504_v21, %v4502_v37  ;;  %v4992_v57 = vadd.f32 %v14099_v59, %v4991_v44  ;;  %v4993_v34 = vpop.f32.mrb[45].mxu1 }
 0x615   :  { %v4683_v26 = vpack.c.bf16 %v4505_v48, %v4503_v9  ;;  %v4101_v29 = vpop.f32.mrb[156].mxu0  ;;  %v4994_v35 = vpop.f32.mrb[46].mxu1 }
 0x616   :  { %v10416_v28 = vadd.f32 %v4101_v29, %v13811_v55  ;;  %v4995_v23 = vadd.f32 %v14099_v59, %v4994_v35  ;;  %v4103_v52 = vpop.f32.mrb[157].mxu0  ;;  %v4996_v47 = vpop.f32.mrb[47].mxu1  ;;  %v5436_v60 = vmax.f32 %v4992_v57, 0.0 }
 0x617   :  { %v10417_v41 = vadd.f32 %v4103_v52, %v13816_v7  ;;  %v4105_v27 = vpop.f32.mrb[158].mxu0  ;;  %5205 = vmatprep.mubr.bf16.mxu1 %v4683_v26 }
 0x618   :  { %v5437_v63 = vmax.f32 %v4995_v23, 0.0  ;;  %v10418_v56 = vadd.f32 %v4105_v27, %v13811_v55  ;;  %v4107_v43 = vpop.f32.mrb[159].mxu0  ;;  %5206 = vmatmul.mubr.bf16.gmra.mrb[152].mxu1 %v4682_v13  ;;  %v4506_v1 = vmax.f32 %v10416_v28, 0.0 }
 0x619   :  { %v10419_v45 = vadd.f32 %v4107_v43, %v13816_v7  ;;  %v4507_v58 = vmax.f32 %v10417_v41, 0.0 }
 0x61a   :  { %v14217_v20 = vpack.c.bf16 %v5437_v63, %v5436_v60  ;;  %v4508_v19 = vmax.f32 %v10418_v56, 0.0 }
 0x61b   :  { %v4509_v0 = vmax.f32 %v10419_v45, 0.0  ;;  %v4999_v14 = vpop.f32.mrb[48].mxu1 }
 0x61c   :  { %v4684_v5 = vpack.c.bf16 %v4508_v19, %v4506_v1  ;;  %v5000_v15 = vadd.f32 %v14099_v59, %v4999_v14  ;;  %v5001_v49 = vpop.f32.mrb[49].mxu1 }
 0x61d   :  { %v4685_v17 = vpack.c.bf16 %v4509_v0, %v4507_v58  ;;  %v4111_v10 = vpop.f32.mrb[160].mxu0  ;;  %v5002_v12 = vpop.f32.mrb[50].mxu1 }
 0x61e   :  { %v10420_v16 = vadd.f32 %v4111_v10, %v13811_v55  ;;  %v5003_v18 = vadd.f32 %v14099_v59, %v5002_v12  ;;  %v4113_v36 = vpop.f32.mrb[161].mxu0  ;;  %v5004_v46 = vpop.f32.mrb[51].mxu1  ;;  %v5438_v31 = vmax.f32 %v5000_v15, 0.0 }
 0x61f   :  { %v10421_v24 = vadd.f32 %v4113_v36, %v13816_v7  ;;  %v4115_v33 = vpop.f32.mrb[162].mxu0  ;;  %5213 = vmatprep.mubr.bf16.mxu1 %v4685_v17  ;;  %v10904_v17 = vld [vmem:[%s16642_s7 + $0x38] sm:$0xff]  }
 0x620   :  { %v5439_v32 = vmax.f32 %v5003_v18, 0.0  ;;  %v10422_v3 = vadd.f32 %v4115_v33, %v13811_v55  ;;  %v4117_v38 = vpop.f32.mrb[163].mxu0  ;;  %5214 = vmatmul.mubr.bf16.gmra.mrb[156].mxu1 %v4684_v5  ;;  %v4510_v54 = vmax.f32 %v10420_v16, 0.0  ;;  %9986 = vmatprep.subr.bf16.mxu1 %v10904_v17 }
 0x621   :  { %v10423_v25 = vadd.f32 %v4117_v38, %v13816_v7  ;;  %v4511_v2 = vmax.f32 %v10421_v24, 0.0  ;;  %9987 = vmatpush3.bf16.msra.mxu1 %v10904_v17 }
 0x622   :  { %v4512_v42 = vmax.f32 %v10422_v3, 0.0  ;;  %v14225_v40 = vpack.c.bf16 %v5439_v32, %v5438_v31 }
 0x623   :  { %v4513_v6 = vmax.f32 %v10423_v25, 0.0  ;;  %v5007_v37 = vpop.f32.mrb[52].mxu1 }
 0x624   :  { %v4686_v21 = vpack.c.bf16 %v4512_v42, %v4510_v54  ;;  %v5008_v9 = vadd.f32 %v14099_v59, %v5007_v37  ;;  %v5009_v48 = vpop.f32.mrb[53].mxu1 }
 0x625   :  { %v4687_v44 = vpack.c.bf16 %v4513_v6, %v4511_v2  ;;  %v4121_v13 = vpop.f32.mrb[164].mxu0  ;;  %v5010_v57 = vpop.f32.mrb[54].mxu1 }
 0x626   :  { %v10424_v34 = vadd.f32 %v4121_v13, %v13811_v55  ;;  %v5011_v26 = vadd.f32 %v14099_v59, %v5010_v57  ;;  %v4123_v29 = vpop.f32.mrb[165].mxu0  ;;  %v5012_v35 = vpop.f32.mrb[55].mxu1  ;;  %v5440_v52 = vmax.f32 %v5008_v9, 0.0 }
 0x627   :  { %v10425_v28 = vadd.f32 %v4123_v29, %v13816_v7  ;;  %v4125_v23 = vpop.f32.mrb[166].mxu0  ;;  %5221 = vmatprep.mubr.bf16.mxu1 %v4687_v44 }
 0x628   :  { %v5441_v47 = vmax.f32 %v5011_v26, 0.0  ;;  %v10426_v41 = vadd.f32 %v4125_v23, %v13811_v55  ;;  %v4127_v27 = vpop.f32.mrb[167].mxu0  ;;  %5222 = vmatmul.mubr.bf16.gmra.mrb[160].mxu1 %v4686_v21  ;;  %v4514_v63 = vmax.f32 %v10424_v34, 0.0 }
 0x629   :  { %v10427_v60 = vadd.f32 %v4127_v27, %v13816_v7  ;;  %v4515_v45 = vmax.f32 %v10425_v28, 0.0 }
 0x62a   :  { %v14233_v56 = vpack.c.bf16 %v5441_v47, %v5440_v52  ;;  %v4516_v43 = vmax.f32 %v10426_v41, 0.0 }
 0x62b   :  { %v4517_v1 = vmax.f32 %v10427_v60, 0.0  ;;  %v5015_v19 = vpop.f32.mrb[56].mxu1 }
 0x62c   :  { %v4688_v58 = vpack.c.bf16 %v4516_v43, %v4514_v63  ;;  %v5016_v0 = vadd.f32 %v14099_v59, %v5015_v19  ;;  %v5017_v14 = vpop.f32.mrb[57].mxu1 }
 0x62d   :  { %v4689_v5 = vpack.c.bf16 %v4517_v1, %v4515_v45  ;;  %v4131_v15 = vpop.f32.mrb[168].mxu0  ;;  %v5018_v49 = vpop.f32.mrb[58].mxu1 }
 0x62e   :  { %v10428_v10 = vadd.f32 %v4131_v15, %v13811_v55  ;;  %v5019_v12 = vadd.f32 %v14099_v59, %v5018_v49  ;;  %v4133_v16 = vpop.f32.mrb[169].mxu0  ;;  %v5020_v18 = vpop.f32.mrb[59].mxu1  ;;  %v5442_v24 = vmax.f32 %v5016_v0, 0.0 }
 0x62f   :  { %v10429_v36 = vadd.f32 %v4133_v16, %v13816_v7  ;;  %v4135_v46 = vpop.f32.mrb[170].mxu0  ;;  %5229 = vmatprep.mubr.bf16.mxu1 %v4689_v5 }
 0x630   :  { %v5443_v33 = vmax.f32 %v5019_v12, 0.0  ;;  %v10430_v31 = vadd.f32 %v4135_v46, %v13811_v55  ;;  %v4137_v32 = vpop.f32.mrb[171].mxu0  ;;  %5230 = vmatmul.mubr.bf16.gmra.mrb[164].mxu1 %v4688_v58  ;;  %v4518_v38 = vmax.f32 %v10428_v10, 0.0 }
 0x631   :  { %v10431_v3 = vadd.f32 %v4137_v32, %v13816_v7  ;;  %v4519_v42 = vmax.f32 %v10429_v36, 0.0 }
 0x632   :  { %v4520_v25 = vmax.f32 %v10430_v31, 0.0  ;;  %v14244_v54 = vpack.c.bf16 %v5443_v33, %v5442_v24 }
 0x633   :  { %v4521_v2 = vmax.f32 %v10431_v3, 0.0  ;;  %v5023_v6 = vpop.f32.mrb[60].mxu1 }
 0x634   :  { %v4690_v37 = vpack.c.bf16 %v4520_v25, %v4518_v38  ;;  %v5024_v21 = vadd.f32 %v14099_v59, %v5023_v6  ;;  %v5025_v9 = vpop.f32.mrb[61].mxu1 }
 0x635   :  { %v4691_v48 = vpack.c.bf16 %v4521_v2, %v4519_v42  ;;  %v4141_v44 = vpop.f32.mrb[172].mxu0  ;;  %v5026_v13 = vpop.f32.mrb[62].mxu1 }
 0x636   :  { %v10432_v57 = vadd.f32 %v4141_v44, %v13811_v55  ;;  %v5027_v34 = vadd.f32 %v14099_v59, %v5026_v13  ;;  %v4143_v26 = vpop.f32.mrb[173].mxu0  ;;  %v5028_v29 = vpop.f32.mrb[63].mxu1  ;;  %v5444_v23 = vmax.f32 %v5024_v21, 0.0 }
 0x637   :  { %v10433_v35 = vadd.f32 %v4143_v26, %v13816_v7  ;;  %v4145_v28 = vpop.f32.mrb[174].mxu0  ;;  %5237 = vmatprep.mubr.bf16.mxu1 %v4691_v48 }
 0x638   :  { %v5445_v52 = vmax.f32 %v5027_v34, 0.0  ;;  %v10434_v47 = vadd.f32 %v4145_v28, %v13811_v55  ;;  %v4147_v41 = vpop.f32.mrb[175].mxu0  ;;  %5238 = vmatmul.mubr.bf16.gmra.mrb[168].mxu1 %v4690_v37  ;;  %v4522_v60 = vmax.f32 %v10432_v57, 0.0 }
 0x639   :  { %v10435_v27 = vadd.f32 %v4147_v41, %v13816_v7  ;;  %v4523_v45 = vmax.f32 %v10433_v35, 0.0 }
 0x63a   :  { %v14252_v63 = vpack.c.bf16 %v5445_v52, %v5444_v23  ;;  %v4524_v43 = vmax.f32 %v10434_v47, 0.0 }
 0x63b   :  { %v4525_v1 = vmax.f32 %v10435_v27, 0.0  ;;  %v5031_v19 = vpop.f32.mrb[64].mxu1 }
 0x63c   :  { %v4692_v58 = vpack.c.bf16 %v4524_v43, %v4522_v60  ;;  %v5032_v0 = vadd.f32 %v14099_v59, %v5031_v19  ;;  %v5033_v14 = vpop.f32.mrb[65].mxu1 }
 0x63d   :  { %v4693_v5 = vpack.c.bf16 %v4525_v1, %v4523_v45  ;;  %v4151_v15 = vpop.f32.mrb[176].mxu0  ;;  %v5034_v49 = vpop.f32.mrb[66].mxu1 }
 0x63e   :  { %v10436_v17 = vadd.f32 %v4151_v15, %v13811_v55  ;;  %v5035_v10 = vadd.f32 %v14099_v59, %v5034_v49  ;;  %v4153_v12 = vpop.f32.mrb[177].mxu0  ;;  %v5036_v16 = vpop.f32.mrb[67].mxu1  ;;  %v5446_v46 = vmax.f32 %v5032_v0, 0.0 }
 0x63f   :  { %v10437_v18 = vadd.f32 %v4153_v12, %v13816_v7  ;;  %v4155_v36 = vpop.f32.mrb[178].mxu0  ;;  %5245 = vmatprep.mubr.bf16.mxu1 %v4693_v5 }
 0x640   :  { %v5447_v24 = vmax.f32 %v5035_v10, 0.0  ;;  %v10438_v33 = vadd.f32 %v4155_v36, %v13811_v55  ;;  %v4157_v31 = vpop.f32.mrb[179].mxu0  ;;  %5246 = vmatmul.mubr.bf16.gmra.mrb[172].mxu1 %v4692_v58  ;;  %v4526_v3 = vmax.f32 %v10436_v17, 0.0 }
 0x641   :  { %v10439_v32 = vadd.f32 %v4157_v31, %v13816_v7  ;;  %v4527_v42 = vmax.f32 %v10437_v18, 0.0 }
 0x642   :  { %v4528_v38 = vmax.f32 %v10438_v33, 0.0  ;;  %v14260_v25 = vpack.c.bf16 %v5447_v24, %v5446_v46 }
 0x643   :  { %v4529_v2 = vmax.f32 %v10439_v32, 0.0  ;;  %v5039_v6 = vpop.f32.mrb[68].mxu1 }
 0x644   :  { %v4694_v37 = vpack.c.bf16 %v4528_v38, %v4526_v3  ;;  %v5040_v21 = vadd.f32 %v14099_v59, %v5039_v6  ;;  %v5041_v9 = vpop.f32.mrb[69].mxu1 }
 0x645   :  { %v4695_v48 = vpack.c.bf16 %v4529_v2, %v4527_v42  ;;  %v4161_v44 = vpop.f32.mrb[180].mxu0  ;;  %v5042_v13 = vpop.f32.mrb[70].mxu1 }
 0x646   :  { %v10440_v57 = vadd.f32 %v4161_v44, %v13811_v55  ;;  %v5043_v34 = vadd.f32 %v14099_v59, %v5042_v13  ;;  %v4163_v26 = vpop.f32.mrb[181].mxu0  ;;  %v5044_v29 = vpop.f32.mrb[71].mxu1  ;;  %v5448_v23 = vmax.f32 %v5040_v21, 0.0 }
 0x647   :  { %v10441_v35 = vadd.f32 %v4163_v26, %v13816_v7  ;;  %v4165_v28 = vpop.f32.mrb[182].mxu0  ;;  %5253 = vmatprep.mubr.bf16.mxu1 %v4695_v48  ;;  %v14283_v29 = vld [vmem:[%s16644_s6] ss:$0 sm:$0xff] }
 0x648   :  { %v5449_v52 = vmax.f32 %v5043_v34, 0.0  ;;  %v10442_v47 = vadd.f32 %v4165_v28, %v13811_v55  ;;  %v4167_v41 = vpop.f32.mrb[183].mxu0  ;;  %5254 = vmatmul.mubr.bf16.gmra.mrb[176].mxu1 %v4694_v37  ;;  %v4530_v60 = vmax.f32 %v10440_v57, 0.0 }
 0x649   :  { %v10443_v27 = vadd.f32 %v4167_v41, %v13816_v7  ;;  %v4531_v1 = vmax.f32 %v10441_v35, 0.0 }
 0x64a   :  { %v14268_v43 = vpack.c.bf16 %v5449_v52, %v5448_v23  ;;  %v4532_v45 = vmax.f32 %v10442_v47, 0.0 }
 0x64b   :  { %v4533_v19 = vmax.f32 %v10443_v27, 0.0  ;;  %v5047_v58 = vpop.f32.mrb[72].mxu1 }
 0x64c   :  { %v4696_v0 = vpack.c.bf16 %v4532_v45, %v4530_v60  ;;  %v5048_v14 = vadd.f32 %v14099_v59, %v5047_v58  ;;  %v5049_v5 = vpop.f32.mrb[73].mxu1 }
 0x64d   :  { %v4697_v15 = vpack.c.bf16 %v4533_v19, %v4531_v1  ;;  %v4171_v49 = vpop.f32.mrb[184].mxu0  ;;  %v5050_v17 = vpop.f32.mrb[74].mxu1 }
 0x64e   :  { %v10444_v10 = vadd.f32 %v4171_v49, %v13811_v55  ;;  %v5051_v12 = vadd.f32 %v14099_v59, %v5050_v17  ;;  %v4173_v16 = vpop.f32.mrb[185].mxu0  ;;  %v5052_v18 = vpop.f32.mrb[75].mxu1  ;;  %v5450_v24 = vmax.f32 %v5048_v14, 0.0 }
 0x64f   :  { %v10445_v36 = vadd.f32 %v4173_v16, %v13816_v7  ;;  %v4175_v46 = vpop.f32.mrb[186].mxu0  ;;  %5261 = vmatprep.mubr.bf16.mxu1 %v4697_v15 }
 0x650   :  { %v5451_v33 = vmax.f32 %v5051_v12, 0.0  ;;  %v10446_v31 = vadd.f32 %v4175_v46, %v13811_v55  ;;  %v4177_v32 = vpop.f32.mrb[187].mxu0  ;;  %5262 = vmatmul.mubr.bf16.gmra.mrb[180].mxu1 %v4696_v0  ;;  %v4534_v38 = vmax.f32 %v10444_v10, 0.0 }
 0x651   :  { %v10447_v3 = vadd.f32 %v4177_v32, %v13816_v7  ;;  %v4535_v6 = vmax.f32 %v10445_v36, 0.0 }
 0x652   :  { %v4536_v42 = vmax.f32 %v10446_v31, 0.0  ;;  %v14276_v2 = vpack.c.bf16 %v5451_v33, %v5450_v24 }
 0x653   :  { %v4537_v37 = vmax.f32 %v10447_v3, 0.0  ;;  %v5055_v21 = vpop.f32.mrb[76].mxu1 }
 0x654   :  { %v4698_v9 = vpack.c.bf16 %v4536_v42, %v4534_v38  ;;  %v5056_v48 = vadd.f32 %v14099_v59, %v5055_v21  ;;  %v5057_v44 = vpop.f32.mrb[77].mxu1 }
 0x655   :  { %v4699_v13 = vpack.c.bf16 %v4537_v37, %v4535_v6  ;;  %v4181_v57 = vpop.f32.mrb[188].mxu0  ;;  %v5058_v34 = vpop.f32.mrb[78].mxu1 }
 0x656   :  { %v10448_v26 = vadd.f32 %v4181_v57, %v13811_v55  ;;  %v5059_v35 = vadd.f32 %v14283_v29, %v5058_v34  ;;  %v4183_v28 = vpop.f32.mrb[189].mxu0  ;;  %v5060_v23 = vpop.f32.mrb[79].mxu1  ;;  %v5452_v59 = vmax.f32 %v5056_v48, 0.0 }
 0x657   :  { %v10449_v52 = vadd.f32 %v4183_v28, %v13816_v7  ;;  %v4185_v47 = vpop.f32.mrb[190].mxu0  ;;  %5269 = vmatprep.mubr.bf16.mxu1 %v4699_v13 }
 0x658   :  { %v5453_v41 = vmax.f32 %v5059_v35, 0.0  ;;  %v10450_v27 = vadd.f32 %v4185_v47, %v13811_v55  ;;  %v4187_v60 = vpop.f32.mrb[191].mxu0  ;;  %5270 = vmatmul.mubr.bf16.gmra.mrb[184].mxu1 %v4698_v9  ;;  %v4538_v1 = vmax.f32 %v10448_v26, 0.0 }
 0x659   :  { %v10451_v45 = vadd.f32 %v4187_v60, %v13816_v7  ;;  %v4539_v0 = vmax.f32 %v10449_v52, 0.0 }
 0x65a   :  { %v14289_v19 = vpack.c.bf16 %v5453_v41, %v5452_v59  ;;  %v4540_v58 = vmax.f32 %v10450_v27, 0.0 }
 0x65b   :  { %v4541_v14 = vmax.f32 %v10451_v45, 0.0  ;;  %v5063_v5 = vpop.f32.mrb[80].mxu1 }
 0x65c   :  { %v4700_v15 = vpack.c.bf16 %v4540_v58, %v4538_v1  ;;  %v5064_v49 = vadd.f32 %v14283_v29, %v5063_v5  ;;  %v5065_v17 = vpop.f32.mrb[81].mxu1 }
 0x65d   :  { %v4701_v10 = vpack.c.bf16 %v4541_v14, %v4539_v0  ;;  %v4191_v12 = vpop.f32.mrb[192].mxu0  ;;  %v5066_v16 = vpop.f32.mrb[82].mxu1 }
 0x65e   :  { %v10452_v18 = vadd.f32 %v4191_v12, %v13811_v55  ;;  %v5067_v36 = vadd.f32 %v14283_v29, %v5066_v16  ;;  %v4193_v46 = vpop.f32.mrb[193].mxu0  ;;  %v5068_v24 = vpop.f32.mrb[83].mxu1  ;;  %v5454_v32 = vmax.f32 %v5064_v49, 0.0 }
 0x65f   :  { %v10453_v33 = vadd.f32 %v4193_v46, %v13816_v7  ;;  %v4195_v31 = vpop.f32.mrb[194].mxu0  ;;  %5277 = vmatprep.mubr.bf16.mxu1 %v4701_v10  ;;  %v14311_v46 = vld [vmem:[%s16645_s9] sm:$0xff]  }
 0x660   :  { %v5455_v3 = vmax.f32 %v5067_v36, 0.0  ;;  %v10454_v38 = vadd.f32 %v4195_v31, %v13811_v55  ;;  %v4197_v42 = vpop.f32.mrb[195].mxu0  ;;  %5278 = vmatmul.mubr.bf16.gmra.mrb[188].mxu1 %v4700_v15  ;;  %v4542_v37 = vmax.f32 %v10452_v18, 0.0  ;;  %10116 = vmatprep.subr.bf16.mxu1 %v14311_v46 }
 0x661   :  { %v10455_v6 = vadd.f32 %v4197_v42, %v13816_v7  ;;  %v4543_v48 = vmax.f32 %v10453_v33, 0.0 }
 0x662   :  { %v4544_v21 = vmax.f32 %v10454_v38, 0.0  ;;  %v14297_v9 = vpack.c.bf16 %v5455_v3, %v5454_v32 }
 0x663   :  { %v4545_v44 = vmax.f32 %v10455_v6, 0.0  ;;  %v5071_v13 = vpop.f32.mrb[84].mxu1 }
 0x664   :  { %v4702_v57 = vpack.c.bf16 %v4544_v21, %v4542_v37  ;;  %v5072_v34 = vadd.f32 %v14283_v29, %v5071_v13  ;;  %v5073_v26 = vpop.f32.mrb[85].mxu1 }
 0x665   :  { %v4703_v35 = vpack.c.bf16 %v4545_v44, %v4543_v48  ;;  %v4201_v28 = vpop.f32.mrb[196].mxu0  ;;  %v5074_v23 = vpop.f32.mrb[86].mxu1 }
 0x666   :  { %v10456_v52 = vadd.f32 %v4201_v28, %v13811_v55  ;;  %v5075_v47 = vadd.f32 %v14283_v29, %v5074_v23  ;;  %v4203_v59 = vpop.f32.mrb[197].mxu0  ;;  %v5076_v41 = vpop.f32.mrb[87].mxu1  ;;  %v5456_v45 = vmax.f32 %v5072_v34, 0.0 }
 0x667   :  { %v10457_v27 = vadd.f32 %v4203_v59, %v13816_v7  ;;  %v4205_v60 = vpop.f32.mrb[198].mxu0  ;;  %5285 = vmatprep.mubr.bf16.mxu1 %v4703_v35 }
 0x668   :  { %v5457_v1 = vmax.f32 %v5075_v47, 0.0  ;;  %v10458_v58 = vadd.f32 %v4205_v60, %v13811_v55  ;;  %v4207_v0 = vpop.f32.mrb[199].mxu0  ;;  %5286 = vmatmul.mubr.bf16.gmra.mrb[192].mxu1 %v4702_v57  ;;  %v4546_v5 = vmax.f32 %v10456_v52, 0.0 }
 0x669   :  { %v10459_v14 = vadd.f32 %v4207_v0, %v13816_v7  ;;  %v4547_v49 = vmax.f32 %v10457_v27, 0.0 }
 0x66a   :  { %v14305_v15 = vpack.c.bf16 %v5457_v1, %v5456_v45  ;;  %v4548_v17 = vmax.f32 %v10458_v58, 0.0 }
 0x66b   :  { %v4549_v10 = vmax.f32 %v10459_v14, 0.0  ;;  %v5079_v12 = vpop.f32.mrb[88].mxu1 }
 0x66c   :  { %v4704_v16 = vpack.c.bf16 %v4548_v17, %v4546_v5  ;;  %v5080_v18 = vadd.f32 %v14283_v29, %v5079_v12  ;;  %v5081_v36 = vpop.f32.mrb[89].mxu1 }
 0x66d   :  { %v4705_v24 = vpack.c.bf16 %v4549_v10, %v4547_v49  ;;  %v4211_v33 = vpop.f32.mrb[200].mxu0  ;;  %v5082_v31 = vpop.f32.mrb[90].mxu1 }
 0x66e   :  { %v10460_v32 = vadd.f32 %v4211_v33, %v13811_v55  ;;  %v5083_v3 = vadd.f32 %v14283_v29, %v5082_v31  ;;  %v4213_v38 = vpop.f32.mrb[201].mxu0  ;;  %v5084_v42 = vpop.f32.mrb[91].mxu1  ;;  %v5458_v21 = vmax.f32 %v5080_v18, 0.0 }
 0x66f   :  { %v10461_v6 = vadd.f32 %v4213_v38, %v13816_v7  ;;  %v4215_v37 = vpop.f32.mrb[202].mxu0  ;;  %5293 = vmatprep.mubr.bf16.mxu1 %v4705_v24 }
 0x670   :  { %v5459_v48 = vmax.f32 %v5083_v3, 0.0  ;;  %v10462_v44 = vadd.f32 %v4215_v37, %v13811_v55  ;;  %v4217_v13 = vpop.f32.mrb[203].mxu0  ;;  %5294 = vmatmul.mubr.bf16.gmra.mrb[196].mxu1 %v4704_v16  ;;  %v4550_v57 = vmax.f32 %v10460_v32, 0.0 }
 0x671   :  { %v10463_v34 = vadd.f32 %v4217_v13, %v13816_v7  ;;  %v4551_v26 = vmax.f32 %v10461_v6, 0.0 }
 0x672   :  { %v4552_v35 = vmax.f32 %v10462_v44, 0.0  ;;  %v14319_v28 = vpack.c.bf16 %v5459_v48, %v5458_v21 }
 0x673   :  { %v4553_v23 = vmax.f32 %v10463_v34, 0.0  ;;  %v5087_v52 = vpop.f32.mrb[92].mxu1 }
 0x674   :  { %v4706_v47 = vpack.c.bf16 %v4552_v35, %v4550_v57  ;;  %v5088_v59 = vadd.f32 %v14283_v29, %v5087_v52  ;;  %v5089_v41 = vpop.f32.mrb[93].mxu1 }
 0x675   :  { %v4707_v27 = vpack.c.bf16 %v4553_v23, %v4551_v26  ;;  %v4221_v60 = vpop.f32.mrb[204].mxu0  ;;  %v5090_v45 = vpop.f32.mrb[94].mxu1 }
 0x676   :  { %v10464_v1 = vadd.f32 %v4221_v60, %v13811_v55  ;;  %v5091_v58 = vadd.f32 %v14283_v29, %v5090_v45  ;;  %v4223_v0 = vpop.f32.mrb[205].mxu0  ;;  %v5092_v14 = vpop.f32.mrb[95].mxu1  ;;  %v5460_v17 = vmax.f32 %v5088_v59, 0.0 }
 0x677   :  { %v10465_v5 = vadd.f32 %v4223_v0, %v13816_v7  ;;  %v4225_v49 = vpop.f32.mrb[206].mxu0  ;;  %5301 = vmatprep.mubr.bf16.mxu1 %v4707_v27 }
 0x678   :  { %v5461_v10 = vmax.f32 %v5091_v58, 0.0  ;;  %v10466_v12 = vadd.f32 %v4225_v49, %v13811_v55  ;;  %v4227_v16 = vpop.f32.mrb[207].mxu0  ;;  %5302 = vmatmul.mubr.bf16.gmra.mrb[200].mxu1 %v4706_v47  ;;  %v4554_v36 = vmax.f32 %v10464_v1, 0.0 }
 0x679   :  { %v10467_v18 = vadd.f32 %v4227_v16, %v13816_v7  ;;  %v4555_v31 = vmax.f32 %v10465_v5, 0.0 }
 0x67a   :  { %v14327_v24 = vpack.c.bf16 %v5461_v10, %v5460_v17  ;;  %v4556_v33 = vmax.f32 %v10466_v12, 0.0 }
 0x67b   :  { %v4557_v32 = vmax.f32 %v10467_v18, 0.0  ;;  %v5095_v3 = vpop.f32.mrb[96].mxu1 }
 0x67c   :  { %v4708_v38 = vpack.c.bf16 %v4556_v33, %v4554_v36  ;;  %v5096_v42 = vadd.f32 %v14283_v29, %v5095_v3  ;;  %v5097_v6 = vpop.f32.mrb[97].mxu1 }
 0x67d   :  { %v4709_v37 = vpack.c.bf16 %v4557_v32, %v4555_v31  ;;  %v4231_v21 = vpop.f32.mrb[208].mxu0  ;;  %v5098_v48 = vpop.f32.mrb[98].mxu1 }
 0x67e   :  { %v10468_v44 = vadd.f32 %v4231_v21, %v13811_v55  ;;  %v5099_v13 = vadd.f32 %v14283_v29, %v5098_v48  ;;  %v4233_v57 = vpop.f32.mrb[209].mxu0  ;;  %v5100_v34 = vpop.f32.mrb[99].mxu1  ;;  %v5462_v23 = vmax.f32 %v5096_v42, 0.0 }
 0x67f   :  { %v10469_v26 = vadd.f32 %v4233_v57, %v13816_v7  ;;  %v4235_v35 = vpop.f32.mrb[210].mxu0  ;;  %5309 = vmatprep.mubr.bf16.mxu1 %v4709_v37 }
 0x680   :  { %v5463_v52 = vmax.f32 %v5099_v13, 0.0  ;;  %v10470_v47 = vadd.f32 %v4235_v35, %v13811_v55  ;;  %v4237_v59 = vpop.f32.mrb[211].mxu0  ;;  %5310 = vmatmul.mubr.bf16.gmra.mrb[204].mxu1 %v4708_v38  ;;  %v4558_v27 = vmax.f32 %v10468_v44, 0.0 }
 0x681   :  { %v10471_v41 = vadd.f32 %v4237_v59, %v13816_v7  ;;  %v4559_v1 = vmax.f32 %v10469_v26, 0.0 }
 0x682   :  { %v4560_v60 = vmax.f32 %v10470_v47, 0.0  ;;  %v14335_v45 = vpack.c.bf16 %v5463_v52, %v5462_v23 }
 0x683   :  { %v4561_v58 = vmax.f32 %v10471_v41, 0.0  ;;  %v5103_v0 = vpop.f32.mrb[100].mxu1 }
 0x684   :  { %v4710_v14 = vpack.c.bf16 %v4560_v60, %v4558_v27  ;;  %v5104_v5 = vadd.f32 %v14283_v29, %v5103_v0  ;;  %v5105_v49 = vpop.f32.mrb[101].mxu1 }
 0x685   :  { %v4711_v17 = vpack.c.bf16 %v4561_v58, %v4559_v1  ;;  %v4241_v10 = vpop.f32.mrb[212].mxu0  ;;  %v5106_v12 = vpop.f32.mrb[102].mxu1 }
 0x686   :  { %v10472_v16 = vadd.f32 %v4241_v10, %v13811_v55  ;;  %v5107_v18 = vadd.f32 %v14283_v29, %v5106_v12  ;;  %v4243_v36 = vpop.f32.mrb[213].mxu0  ;;  %v5108_v33 = vpop.f32.mrb[103].mxu1  ;;  %v5464_v3 = vmax.f32 %v5104_v5, 0.0 }
 0x687   :  { %v10473_v31 = vadd.f32 %v4243_v36, %v13816_v7  ;;  %v4245_v32 = vpop.f32.mrb[214].mxu0  ;;  %5317 = vmatprep.mubr.bf16.mxu1 %v4711_v17 }
 0x688   :  { %v5465_v38 = vmax.f32 %v5107_v18, 0.0  ;;  %v10474_v42 = vadd.f32 %v4245_v32, %v13811_v55  ;;  %v4247_v6 = vpop.f32.mrb[215].mxu0  ;;  %5318 = vmatmul.mubr.bf16.gmra.mrb[208].mxu1 %v4710_v14  ;;  %v4562_v21 = vmax.f32 %v10472_v16, 0.0 }
 0x689   :  { %v10475_v37 = vadd.f32 %v4247_v6, %v13816_v7  ;;  %v4563_v13 = vmax.f32 %v10473_v31, 0.0 }
 0x68a   :  { %v14343_v48 = vpack.c.bf16 %v5465_v38, %v5464_v3  ;;  %v4564_v44 = vmax.f32 %v10474_v42, 0.0 }
 0x68b   :  { %v4565_v57 = vmax.f32 %v10475_v37, 0.0  ;;  %v5111_v34 = vpop.f32.mrb[104].mxu1 }
 0x68c   :  { %v4712_v26 = vpack.c.bf16 %v4564_v44, %v4562_v21  ;;  %v5112_v35 = vadd.f32 %v14283_v29, %v5111_v34  ;;  %v5113_v23 = vpop.f32.mrb[105].mxu1 }
 0x68d   :  { %v4713_v52 = vpack.c.bf16 %v4565_v57, %v4563_v13  ;;  %v4251_v47 = vpop.f32.mrb[216].mxu0  ;;  %v5114_v59 = vpop.f32.mrb[106].mxu1 }
 0x68e   :  { %v10476_v41 = vadd.f32 %v4251_v47, %v13811_v55  ;;  %v5115_v27 = vadd.f32 %v14283_v29, %v5114_v59  ;;  %v4253_v60 = vpop.f32.mrb[217].mxu0  ;;  %v5116_v1 = vpop.f32.mrb[107].mxu1  ;;  %v5466_v14 = vmax.f32 %v5112_v35, 0.0 }
 0x68f   :  { %v10477_v58 = vadd.f32 %v4253_v60, %v13816_v7  ;;  %v4255_v0 = vpop.f32.mrb[218].mxu0  ;;  %5325 = vmatprep.mubr.bf16.mxu1 %v4713_v52 }
 0x690   :  { %v5467_v5 = vmax.f32 %v5115_v27, 0.0  ;;  %v10478_v49 = vadd.f32 %v4255_v0, %v13811_v55  ;;  %v4257_v17 = vpop.f32.mrb[219].mxu0  ;;  %5326 = vmatmul.mubr.bf16.gmra.mrb[212].mxu1 %v4712_v26  ;;  %v4566_v12 = vmax.f32 %v10476_v41, 0.0 }
 0x691   :  { %v10479_v10 = vadd.f32 %v4257_v17, %v13816_v7  ;;  %v4567_v36 = vmax.f32 %v10477_v58, 0.0 }
 0x692   :  { %v4568_v16 = vmax.f32 %v10478_v49, 0.0  ;;  %v14351_v18 = vpack.c.bf16 %v5467_v5, %v5466_v14 }
 0x693   :  { %v4569_v33 = vmax.f32 %v10479_v10, 0.0  ;;  %v5119_v31 = vpop.f32.mrb[108].mxu1 }
 0x694   :  { %v4714_v32 = vpack.c.bf16 %v4568_v16, %v4566_v12  ;;  %v5120_v3 = vadd.f32 %v14283_v29, %v5119_v31  ;;  %v5121_v38 = vpop.f32.mrb[109].mxu1 }
 0x695   :  { %v4715_v42 = vpack.c.bf16 %v4569_v33, %v4567_v36  ;;  %v4261_v6 = vpop.f32.mrb[220].mxu0  ;;  %v5122_v37 = vpop.f32.mrb[110].mxu1 }
 0x696   :  { %v10480_v21 = vadd.f32 %v4261_v6, %v13811_v55  ;;  %v5123_v44 = vadd.f32 %v14283_v29, %v5122_v37  ;;  %v4263_v13 = vpop.f32.mrb[221].mxu0  ;;  %v5124_v57 = vpop.f32.mrb[111].mxu1  ;;  %v5468_v35 = vmax.f32 %v5120_v3, 0.0 }
 0x697   :  { %v10481_v34 = vadd.f32 %v4263_v13, %v13816_v7  ;;  %v4265_v26 = vpop.f32.mrb[222].mxu0  ;;  %5333 = vmatprep.mubr.bf16.mxu1 %v4715_v42 }
 0x698   :  { %v5469_v23 = vmax.f32 %v5123_v44, 0.0  ;;  %v10482_v52 = vadd.f32 %v4265_v26, %v13811_v55  ;;  %v4267_v47 = vpop.f32.mrb[223].mxu0  ;;  %5334 = vmatmul.mubr.bf16.gmra.mrb[216].mxu1 %v4714_v32  ;;  %v4570_v41 = vmax.f32 %v10480_v21, 0.0 }
 0x699   :  { %v10483_v59 = vadd.f32 %v4267_v47, %v13816_v7  ;;  %v4571_v1 = vmax.f32 %v10481_v34, 0.0 }
 0x69a   :  { %v14359_v27 = vpack.c.bf16 %v5469_v23, %v5468_v35  ;;  %v4572_v60 = vmax.f32 %v10482_v52, 0.0 }
 0x69b   :  { %v4573_v58 = vmax.f32 %v10483_v59, 0.0  ;;  %v5127_v0 = vpop.f32.mrb[112].mxu1 }
 0x69c   :  { %v4716_v14 = vpack.c.bf16 %v4572_v60, %v4570_v41  ;;  %v5128_v5 = vadd.f32 %v14283_v29, %v5127_v0  ;;  %v5129_v49 = vpop.f32.mrb[113].mxu1 }
 0x69d   :  { %v4717_v17 = vpack.c.bf16 %v4573_v58, %v4571_v1  ;;  %v4271_v10 = vpop.f32.mrb[224].mxu0  ;;  %v5130_v12 = vpop.f32.mrb[114].mxu1 }
 0x69e   :  { %v10484_v16 = vadd.f32 %v4271_v10, %v13811_v55  ;;  %v5131_v36 = vadd.f32 %v14283_v29, %v5130_v12  ;;  %v4273_v33 = vpop.f32.mrb[225].mxu0  ;;  %v5132_v31 = vpop.f32.mrb[115].mxu1  ;;  %v5470_v38 = vmax.f32 %v5128_v5, 0.0 }
 0x69f   :  { %v10485_v32 = vadd.f32 %v4273_v33, %v13816_v7  ;;  %v4275_v3 = vpop.f32.mrb[226].mxu0  ;;  %5341 = vmatprep.mubr.bf16.mxu1 %v4717_v17 }
 0x6a0   :  { %v5471_v42 = vmax.f32 %v5131_v36, 0.0  ;;  %v10486_v6 = vadd.f32 %v4275_v3, %v13811_v55  ;;  %v4277_v37 = vpop.f32.mrb[227].mxu0  ;;  %5342 = vmatmul.mubr.bf16.gmra.mrb[220].mxu1 %v4716_v14  ;;  %v4574_v44 = vmax.f32 %v10484_v16, 0.0 }
 0x6a1   :  { %v10487_v21 = vadd.f32 %v4277_v37, %v13816_v7  ;;  %v4575_v34 = vmax.f32 %v10485_v32, 0.0 }
 0x6a2   :  { %v4576_v13 = vmax.f32 %v10486_v6, 0.0  ;;  %v14367_v57 = vpack.c.bf16 %v5471_v42, %v5470_v38 }
 0x6a3   :  { %v4577_v26 = vmax.f32 %v10487_v21, 0.0  ;;  %v5135_v35 = vpop.f32.mrb[116].mxu1 }
 0x6a4   :  { %v4718_v23 = vpack.c.bf16 %v4576_v13, %v4574_v44  ;;  %v5136_v52 = vadd.f32 %v14283_v29, %v5135_v35  ;;  %v5137_v47 = vpop.f32.mrb[117].mxu1 }
 0x6a5   :  { %v4719_v59 = vpack.c.bf16 %v4577_v26, %v4575_v34  ;;  %v4281_v41 = vpop.f32.mrb[228].mxu0  ;;  %v5138_v60 = vpop.f32.mrb[118].mxu1 }
 0x6a6   :  { %v10488_v1 = vadd.f32 %v4281_v41, %v13811_v55  ;;  %v5139_v58 = vadd.f32 %v14283_v29, %v5138_v60  ;;  %v4283_v0 = vpop.f32.mrb[229].mxu0  ;;  %v5140_v14 = vpop.f32.mrb[119].mxu1  ;;  %v5472_v17 = vmax.f32 %v5136_v52, 0.0 }
 0x6a7   :  { %v10489_v5 = vadd.f32 %v4283_v0, %v13816_v7  ;;  %v4285_v49 = vpop.f32.mrb[230].mxu0  ;;  %5349 = vmatprep.mubr.bf16.mxu1 %v4719_v59 }
 0x6a8   :  { %v5473_v10 = vmax.f32 %v5139_v58, 0.0  ;;  %v10490_v12 = vadd.f32 %v4285_v49, %v13811_v55  ;;  %v4287_v16 = vpop.f32.mrb[231].mxu0  ;;  %5350 = vmatmul.mubr.bf16.gmra.mrb[224].mxu1 %v4718_v23  ;;  %v4578_v33 = vmax.f32 %v10488_v1, 0.0 }
 0x6a9   :  { %v10491_v36 = vadd.f32 %v4287_v16, %v13816_v7  ;;  %v4579_v3 = vmax.f32 %v10489_v5, 0.0 }
 0x6aa   :  { %v14375_v31 = vpack.c.bf16 %v5473_v10, %v5472_v17  ;;  %v4580_v32 = vmax.f32 %v10490_v12, 0.0 }
 0x6ab   :  { %v4581_v38 = vmax.f32 %v10491_v36, 0.0  ;;  %v5143_v42 = vpop.f32.mrb[120].mxu1 }
 0x6ac   :  { %v4720_v6 = vpack.c.bf16 %v4580_v32, %v4578_v33  ;;  %v5144_v37 = vadd.f32 %v14283_v29, %v5143_v42  ;;  %v5145_v21 = vpop.f32.mrb[121].mxu1 }
 0x6ad   :  { %v4721_v44 = vpack.c.bf16 %v4581_v38, %v4579_v3  ;;  %v4291_v13 = vpop.f32.mrb[232].mxu0  ;;  %v5146_v34 = vpop.f32.mrb[122].mxu1 }
 0x6ae   :  { %v10492_v26 = vadd.f32 %v4291_v13, %v13811_v55  ;;  %v5147_v35 = vadd.f32 %v14283_v29, %v5146_v34  ;;  %v4293_v23 = vpop.f32.mrb[233].mxu0  ;;  %v5148_v52 = vpop.f32.mrb[123].mxu1  ;;  %v5474_v41 = vmax.f32 %v5144_v37, 0.0 }
 0x6af   :  { %v10493_v47 = vadd.f32 %v4293_v23, %v13816_v7  ;;  %v4295_v59 = vpop.f32.mrb[234].mxu0  ;;  %5357 = vmatprep.mubr.bf16.mxu1 %v4721_v44 }
 0x6b0   :  { %v5475_v60 = vmax.f32 %v5147_v35, 0.0  ;;  %v10494_v1 = vadd.f32 %v4295_v59, %v13811_v55  ;;  %v4297_v58 = vpop.f32.mrb[235].mxu0  ;;  %5358 = vmatmul.mubr.bf16.gmra.mrb[228].mxu1 %v4720_v6  ;;  %v4582_v14 = vmax.f32 %v10492_v26, 0.0 }
 0x6b1   :  { %v10495_v0 = vadd.f32 %v4297_v58, %v13816_v7  ;;  %v4583_v17 = vmax.f32 %v10493_v47, 0.0 }
 0x6b2   :  { %v4584_v5 = vmax.f32 %v10494_v1, 0.0  ;;  %v14383_v49 = vpack.c.bf16 %v5475_v60, %v5474_v41 }
 0x6b3   :  { %v4585_v10 = vmax.f32 %v10495_v0, 0.0  ;;  %v5151_v12 = vpop.f32.mrb[124].mxu1 }
 0x6b4   :  { %v4722_v16 = vpack.c.bf16 %v4584_v5, %v4582_v14  ;;  %v5152_v36 = vadd.f32 %v14283_v29, %v5151_v12  ;;  %v5153_v33 = vpop.f32.mrb[125].mxu1 }
 0x6b5   :  { %v4723_v32 = vpack.c.bf16 %v4585_v10, %v4583_v17  ;;  %v4301_v3 = vpop.f32.mrb[236].mxu0  ;;  %v5154_v38 = vpop.f32.mrb[126].mxu1 }
 0x6b6   :  { %v10496_v42 = vadd.f32 %v4301_v3, %v13811_v55  ;;  %v5155_v6 = vadd.f32 %v14283_v29, %v5154_v38  ;;  %v4303_v37 = vpop.f32.mrb[237].mxu0  ;;  %v5156_v21 = vpop.f32.mrb[127].mxu1  ;;  %v5476_v34 = vmax.f32 %v5152_v36, 0.0 }
 0x6b7   :  { %v10497_v44 = vadd.f32 %v4303_v37, %v13816_v7  ;;  %v4305_v13 = vpop.f32.mrb[238].mxu0  ;;  %5365 = vmatprep.mubr.bf16.mxu1 %v4723_v32 }
 0x6b8   :  { %v5477_v26 = vmax.f32 %v5155_v6, 0.0  ;;  %v10498_v35 = vadd.f32 %v4305_v13, %v13811_v55  ;;  %v4307_v23 = vpop.f32.mrb[239].mxu0  ;;  %5366 = vmatmul.mubr.bf16.gmra.mrb[232].mxu1 %v4722_v16  ;;  %v4586_v47 = vmax.f32 %v10496_v42, 0.0 }
 0x6b9   :  { %v10499_v52 = vadd.f32 %v4307_v23, %v13816_v7  ;;  %v4587_v60 = vmax.f32 %v10497_v44, 0.0 }
 0x6ba   :  { %v14391_v59 = vpack.c.bf16 %v5477_v26, %v5476_v34  ;;  %v4588_v41 = vmax.f32 %v10498_v35, 0.0 }
 0x6bb   :  { %v4589_v1 = vmax.f32 %v10499_v52, 0.0  ;;  %v5159_v58 = vpop.f32.mrb[128].mxu1 }
 0x6bc   :  { %v4724_v0 = vpack.c.bf16 %v4588_v41, %v4586_v47  ;;  %v5160_v14 = vadd.f32 %v14283_v29, %v5159_v58  ;;  %v5161_v5 = vpop.f32.mrb[129].mxu1 }
 0x6bd   :  { %v4725_v17 = vpack.c.bf16 %v4589_v1, %v4587_v60  ;;  %v4311_v10 = vpop.f32.mrb[240].mxu0  ;;  %v5162_v12 = vpop.f32.mrb[130].mxu1 }
 0x6be   :  { %v10500_v36 = vadd.f32 %v4311_v10, %v13811_v55  ;;  %v5163_v16 = vadd.f32 %v14283_v29, %v5162_v12  ;;  %v4313_v33 = vpop.f32.mrb[241].mxu0  ;;  %v5164_v32 = vpop.f32.mrb[131].mxu1  ;;  %v5478_v42 = vmax.f32 %v5160_v14, 0.0 }
 0x6bf   :  { %v10501_v3 = vadd.f32 %v4313_v33, %v13816_v7  ;;  %v4315_v38 = vpop.f32.mrb[242].mxu0  ;;  %5373 = vmatprep.mubr.bf16.mxu1 %v4725_v17 }
 0x6c0   :  { %v5479_v6 = vmax.f32 %v5163_v16, 0.0  ;;  %v10502_v37 = vadd.f32 %v4315_v38, %v13811_v55  ;;  %v4317_v21 = vpop.f32.mrb[243].mxu0  ;;  %5374 = vmatmul.mubr.bf16.gmra.mrb[236].mxu1 %v4724_v0  ;;  %v4590_v13 = vmax.f32 %v10500_v36, 0.0 }
 0x6c1   :  { %v10503_v44 = vadd.f32 %v4317_v21, %v13816_v7  ;;  %v4591_v35 = vmax.f32 %v10501_v3, 0.0 }
 0x6c2   :  { %v4592_v34 = vmax.f32 %v10502_v37, 0.0  ;;  %v14399_v26 = vpack.c.bf16 %v5479_v6, %v5478_v42 }
 0x6c3   :  { %v4593_v23 = vmax.f32 %v10503_v44, 0.0  ;;  %v5167_v52 = vpop.f32.mrb[132].mxu1 }
 0x6c4   :  { %v4726_v47 = vpack.c.bf16 %v4592_v34, %v4590_v13  ;;  %v5168_v41 = vadd.f32 %v14283_v29, %v5167_v52  ;;  %v5169_v60 = vpop.f32.mrb[133].mxu1 }
 0x6c5   :  { %v4727_v1 = vpack.c.bf16 %v4593_v23, %v4591_v35  ;;  %v4321_v58 = vpop.f32.mrb[244].mxu0  ;;  %v5170_v14 = vpop.f32.mrb[134].mxu1 }
 0x6c6   :  { %v10504_v5 = vadd.f32 %v4321_v58, %v13811_v55  ;;  %v5171_v0 = vadd.f32 %v14283_v29, %v5170_v14  ;;  %v4323_v17 = vpop.f32.mrb[245].mxu0  ;;  %v5172_v10 = vpop.f32.mrb[135].mxu1  ;;  %v5480_v16 = vmax.f32 %v5168_v41, 0.0 }
 0x6c7   :  { %v10505_v12 = vadd.f32 %v4323_v17, %v13816_v7  ;;  %v4325_v36 = vpop.f32.mrb[246].mxu0  ;;  %5381 = vmatprep.mubr.bf16.mxu1 %v4727_v1 }
 0x6c8   :  { %v5481_v33 = vmax.f32 %v5171_v0, 0.0  ;;  %v10506_v32 = vadd.f32 %v4325_v36, %v13811_v55  ;;  %v4327_v3 = vpop.f32.mrb[247].mxu0  ;;  %5382 = vmatmul.mubr.bf16.gmra.mrb[240].mxu1 %v4726_v47  ;;  %v4594_v42 = vmax.f32 %v10504_v5, 0.0 }
 0x6c9   :  { %v10507_v38 = vadd.f32 %v4327_v3, %v13816_v7  ;;  %v4595_v21 = vmax.f32 %v10505_v12, 0.0 }
 0x6ca   :  { %v14407_v6 = vpack.c.bf16 %v5481_v33, %v5480_v16  ;;  %v4596_v37 = vmax.f32 %v10506_v32, 0.0 }
 0x6cb   :  { %v4597_v44 = vmax.f32 %v10507_v38, 0.0  ;;  %v5175_v13 = vpop.f32.mrb[136].mxu1 }
 0x6cc   :  { %v4728_v34 = vpack.c.bf16 %v4596_v37, %v4594_v42  ;;  %v5176_v35 = vadd.f32 %v14283_v29, %v5175_v13  ;;  %v5177_v23 = vpop.f32.mrb[137].mxu1 }
 0x6cd   :  { %v4729_v52 = vpack.c.bf16 %v4597_v44, %v4595_v21  ;;  %v4331_v41 = vpop.f32.mrb[248].mxu0  ;;  %v5178_v60 = vpop.f32.mrb[138].mxu1 }
 0x6ce   :  { %v10508_v1 = vadd.f32 %v4331_v41, %v13811_v55  ;;  %v5179_v47 = vadd.f32 %v14283_v29, %v5178_v60  ;;  %v4333_v58 = vpop.f32.mrb[249].mxu0  ;;  %v5180_v14 = vpop.f32.mrb[139].mxu1  ;;  %v5482_v17 = vmax.f32 %v5176_v35, 0.0 }
 0x6cf   :  { %v10509_v5 = vadd.f32 %v4333_v58, %v13816_v7  ;;  %v4335_v0 = vpop.f32.mrb[250].mxu0  ;;  %5389 = vmatprep.mubr.bf16.mxu1 %v4729_v52 }
 0x6d0   :  { %v5483_v10 = vmax.f32 %v5179_v47, 0.0  ;;  %v10510_v12 = vadd.f32 %v4335_v0, %v13811_v55  ;;  %v4337_v36 = vpop.f32.mrb[251].mxu0  ;;  %5390 = vmatmul.mubr.bf16.gmra.mrb[244].mxu1 %v4728_v34  ;;  %v4598_v33 = vmax.f32 %v10508_v1, 0.0 }
 0x6d1   :  { %v10511_v16 = vadd.f32 %v4337_v36, %v13816_v7  ;;  %v4599_v38 = vmax.f32 %v10509_v5, 0.0 }
 0x6d2   :  { %v4600_v32 = vmax.f32 %v10510_v12, 0.0  ;;  %v14415_v3 = vpack.c.bf16 %v5483_v10, %v5482_v17 }
 0x6d3   :  { %v4601_v42 = vmax.f32 %v10511_v16, 0.0  ;;  %v5183_v37 = vpop.f32.mrb[140].mxu1 }
 0x6d4   :  { %v4730_v21 = vpack.c.bf16 %v4600_v32, %v4598_v33  ;;  %v5184_v44 = vadd.f32 %v14283_v29, %v5183_v37  ;;  %v5185_v13 = vpop.f32.mrb[141].mxu1 }
 0x6d5   :  { %v4731_v23 = vpack.c.bf16 %v4601_v42, %v4599_v38  ;;  %v4341_v35 = vpop.f32.mrb[252].mxu0  ;;  %v5186_v52 = vpop.f32.mrb[142].mxu1 }
 0x6d6   :  { %v10512_v41 = vadd.f32 %v4341_v35, %v13811_v55  ;;  %v5187_v34 = vadd.f32 %v14283_v29, %v5186_v52  ;;  %v4343_v60 = vpop.f32.mrb[253].mxu0  ;;  %v5188_v47 = vpop.f32.mrb[143].mxu1  ;;  %v5484_v14 = vmax.f32 %v5184_v44, 0.0 }
 0x6d7   :  { %v10513_v1 = vadd.f32 %v4343_v60, %v13816_v7  ;;  %v4345_v58 = vpop.f32.mrb[254].mxu0  ;;  %5397 = vmatprep.mubr.bf16.mxu1 %v4731_v23 }
 0x6d8   :  { %v5485_v5 = vmax.f32 %v5187_v34, 0.0  ;;  %v10514_v0 = vadd.f32 %v4345_v58, %v13811_v55  ;;  %v4347_v17 = vpop.f32.mrb[255].mxu0  ;;  %5398 = vmatmul.mubr.bf16.gmra.mrb[248].mxu1 %v4730_v21  ;;  %v4602_v12 = vmax.f32 %v10512_v41, 0.0 }
 0x6d9   :  { %v10515_v10 = vadd.f32 %v4347_v17, %v13816_v7  ;;  %v4603_v33 = vmax.f32 %v10513_v1, 0.0  ;;  %v10907_v17 = vld [vmem:[%s16645_s9 + $0x10] sm:$0xff]  }
 0x6da   :  { %v14423_v36 = vpack.c.bf16 %v5485_v5, %v5484_v14  ;;  %v4604_v16 = vmax.f32 %v10514_v0, 0.0  ;;  %v10906_v14 = vld [vmem:[%s16645_s9 + $0x8] sm:$0xff]  }
 0x6db   :  { %v4605_v32 = vmax.f32 %v10515_v10, 0.0  ;;  %v5191_v38 = vpop.f32.mrb[144].mxu1 }
 0x6dc   :  { %v4732_v42 = vpack.c.bf16 %v4604_v16, %v4602_v12  ;;  %v5192_v37 = vadd.f32 %v14283_v29, %v5191_v38  ;;  %v5193_v13 = vpop.f32.mrb[145].mxu1 }
 0x6dd   :  { %v4733_v23 = vpack.c.bf16 %v4605_v32, %v4603_v33  ;;  %v5194_v44 = vpop.f32.mrb[146].mxu1 }
 0x6de   :  { %v5195_v35 = vadd.f32 %v14283_v29, %v5194_v44  ;;  %v5196_v55 = vpop.f32.mrb[147].mxu1  ;;  %v5486_v21 = vmax.f32 %v5192_v37, 0.0 }
 0x6df   :  { %5405 = vmatprep.mubr.bf16.mxu1 %v4733_v23 }
 0x6e0   :  { %v5487_v52 = vmax.f32 %v5195_v35, 0.0  ;;  %5406 = vmatmul.mubr.bf16.gmra.mrb[252].mxu1 %v4732_v42  ;;  %v10909_v42 = vld [vmem:[%s16645_s9 + $0x20] sm:$0xff]  }
 0x6e1   :  { %9988 = vmatprep.mubr.bf16.mxu1 %v14110_v4 }
 0x6e2   :  { %v14428_v7 = vpack.c.bf16 %v5487_v52, %v5486_v21 }
 0x6e3   :  { %v5199_v41 = vpop.f32.mrb[148].mxu1 }
 0x6e4   :  { %v5200_v34 = vadd.f32 %v14283_v29, %v5199_v41  ;;  %v5201_v60 = vpop.f32.mrb[149].mxu1 }
 0x6e5   :  { %v5202_v47 = vpop.f32.mrb[150].mxu1 }
 0x6e6   :  { %v5203_v1 = vadd.f32 %v14283_v29, %v5202_v47  ;;  %v5204_v58 = vpop.f32.mrb[151].mxu1  ;;  %v5488_v5 = vmax.f32 %v5200_v34, 0.0 }
 0x6e8   :  { %v5489_v0 = vmax.f32 %v5203_v1, 0.0  ;;  %9989 = vmatmul.mubr.bf16.vlgmr.msra.gmra.mrb[0].mxu1 %v14119_v11 }
 0x6e9   :  { %9992 = vmatprep.mubr.bf16.mxu1 %v14130_v30  ;;  %10117 = vmatpush3.bf16.msra.mxu1 %v14311_v46  ;;  %v10908_v30 = vld [vmem:[%s16645_s9 + $0x18] sm:$0xff]  }
 0x6ea   :  { %v14438_v4 = vpack.c.bf16 %v5489_v0, %v5488_v5  ;;  %10118 = vmatprep.subr.bf16.mxu1 %v10906_v14 }
 0x6eb   :  { %v5207_v10 = vpop.f32.mrb[152].mxu1 }
 0x6ec   :  { %v5208_v12 = vadd.f32 %v14283_v29, %v5207_v10  ;;  %v5209_v16 = vpop.f32.mrb[153].mxu1 }
 0x6ed   :  { %v5210_v33 = vpop.f32.mrb[154].mxu1  ;;  %10119 = vmatpush3.bf16.msra.mxu1 %v10906_v14 }
 0x6ee   :  { %v5211_v32 = vadd.f32 %v14283_v29, %v5210_v33  ;;  %v5212_v11 = vpop.f32.mrb[155].mxu1  ;;  %10120 = vmatprep.subr.bf16.mxu1 %v10907_v17  ;;  %v5490_v46 = vmax.f32 %v5208_v12, 0.0 }
 0x6f0   :  { %v5491_v38 = vmax.f32 %v5211_v32, 0.0  ;;  %9993 = vmatmul.mubr.bf16.gmra.mrb[4].mxu1 %v14139_v53 }
 0x6f1   :  { %9996 = vmatprep.mubr.bf16.mxu1 %v14150_v22  ;;  %10121 = vmatpush3.bf16.msra.mxu1 %v10907_v17 }
 0x6f2   :  { %10122 = vmatprep.subr.bf16.mxu1 %v10908_v30  ;;  %v14453_v37 = vpack.c.bf16 %v5491_v38, %v5490_v46 }
 0x6f3   :  { %v5215_v13 = vpop.f32.mrb[156].mxu1 }
 0x6f4   :  { %v5216_v23 = vadd.f32 %v14283_v29, %v5215_v13  ;;  %v5217_v44 = vpop.f32.mrb[157].mxu1 }
 0x6f5   :  { %v5218_v35 = vpop.f32.mrb[158].mxu1  ;;  %10123 = vmatpush3.bf16.msra.mxu1 %v10908_v30  ;;  %v14479_v30 = vld [vmem:[%s16644_s6] ss:$0 sm:$0xff] }
 0x6f6   :  { %v5219_v55 = vadd.f32 %v14283_v29, %v5218_v35  ;;  %v5220_v21 = vpop.f32.mrb[159].mxu1  ;;  %10124 = vmatprep.subr.bf16.mxu1 %v10909_v42  ;;  %v5492_v53 = vmax.f32 %v5216_v23, 0.0 }
 0x6f8   :  { %v5493_v22 = vmax.f32 %v5219_v55, 0.0  ;;  %9997 = vmatmul.mubr.bf16.gmra.mrb[8].mxu1 %v14159_v51 }
 0x6f9   :  { %10000 = vmatprep.mubr.bf16.mxu1 %v14173_v8  ;;  %10125 = vmatpush3.bf16.msra.mxu1 %v10909_v42 }
 0x6fa   :  { %v14459_v52 = vpack.c.bf16 %v5493_v22, %v5492_v53 }
 0x6fb   :  { %v5223_v41 = vpop.f32.mrb[160].mxu1 }
 0x6fc   :  { %v5224_v34 = vadd.f32 %v14283_v29, %v5223_v41  ;;  %v5225_v60 = vpop.f32.mrb[161].mxu1 }
 0x6fd   :  { %v5226_v47 = vpop.f32.mrb[162].mxu1 }
 0x6fe   :  { %v5227_v1 = vadd.f32 %v14283_v29, %v5226_v47  ;;  %v5228_v58 = vpop.f32.mrb[163].mxu1  ;;  %v5494_v14 = vmax.f32 %v5224_v34, 0.0 }
 0x700   :  { %v5495_v5 = vmax.f32 %v5227_v1, 0.0  ;;  %10001 = vmatmul.mubr.bf16.gmra.mrb[12].mxu1 %v14182_v61  ;;  %v10910_v61 = vld [vmem:[%s16645_s9 + $0x28] sm:$0xff]  }
 0x701   :  { %10004 = vmatprep.mubr.bf16.mxu1 %v14193_v62  ;;  %10126 = vmatprep.subr.bf16.mxu1 %v10910_v61 }
 0x702   :  { %v14465_v51 = vpack.c.bf16 %v5495_v5, %v5494_v14  ;;  %10127 = vmatpush3.bf16.msra.mxu1 %v10910_v61 }
 0x703   :  { %v5231_v8 = vpop.f32.mrb[164].mxu1 }
 0x704   :  { %v5232_v0 = vadd.f32 %v14283_v29, %v5231_v8  ;;  %v5233_v17 = vpop.f32.mrb[165].mxu1 }
 0x705   :  { %v5234_v10 = vpop.f32.mrb[166].mxu1 }
 0x706   :  { %v5235_v12 = vadd.f32 %v14283_v29, %v5234_v10  ;;  %v5236_v16 = vpop.f32.mrb[167].mxu1  ;;  %v5496_v33 = vmax.f32 %v5232_v0, 0.0 }
 0x708   :  { %v5497_v32 = vmax.f32 %v5235_v12, 0.0  ;;  %10005 = vmatmul.mubr.bf16.gmra.mrb[16].mxu1 %v14201_v39 }
 0x709   :  { %10008 = vmatprep.mubr.bf16.mxu1 %v14209_v50 }
 0x70a   :  { %v14471_v11 = vpack.c.bf16 %v5497_v32, %v5496_v33 }
 0x70b   :  { %v5239_v62 = vpop.f32.mrb[168].mxu1 }
 0x70c   :  { %v5240_v29 = vadd.f32 %v14479_v30, %v5239_v62  ;;  %v5241_v46 = vpop.f32.mrb[169].mxu1 }
 0x70d   :  { %v5242_v38 = vpop.f32.mrb[170].mxu1 }
 0x70e   :  { %v5243_v39 = vadd.f32 %v14479_v30, %v5242_v38  ;;  %v5244_v50 = vpop.f32.mrb[171].mxu1  ;;  %v5498_v42 = vmax.f32 %v5240_v29, 0.0 }
 0x710   :  { %v5499_v13 = vmax.f32 %v5243_v39, 0.0  ;;  %10009 = vmatmul.mubr.bf16.gmra.mrb[20].mxu1 %v14217_v20 }
 0x711   :  { %10012 = vmatprep.mubr.bf16.mxu1 %v14225_v40 }
 0x712   :  { %v14485_v23 = vpack.c.bf16 %v5499_v13, %v5498_v42 }
 0x713   :  { %v5247_v44 = vpop.f32.mrb[172].mxu1 }
 0x714   :  { %v5248_v35 = vadd.f32 %v14479_v30, %v5247_v44  ;;  %v5249_v55 = vpop.f32.mrb[173].mxu1 }
 0x715   :  { %v5250_v21 = vpop.f32.mrb[174].mxu1 }
 0x716   :  { %v5251_v53 = vadd.f32 %v14479_v30, %v5250_v21  ;;  %v5252_v22 = vpop.f32.mrb[175].mxu1  ;;  %v5500_v41 = vmax.f32 %v5248_v35, 0.0 }
 0x718   :  { %v5501_v34 = vmax.f32 %v5251_v53, 0.0  ;;  %10013 = vmatmul.mubr.bf16.gmra.mrb[24].mxu1 %v14233_v56 }
 0x719   :  { %10016 = vmatprep.mubr.bf16.mxu1 %v14244_v54 }
 0x71a   :  { %v14491_v60 = vpack.c.bf16 %v5501_v34, %v5500_v41 }
 0x71b   :  { %v5255_v20 = vpop.f32.mrb[176].mxu1 }
 0x71c   :  { %v5256_v40 = vadd.f32 %v14479_v30, %v5255_v20  ;;  %v5257_v47 = vpop.f32.mrb[177].mxu1 }
 0x71d   :  { %v5258_v1 = vpop.f32.mrb[178].mxu1 }
 0x71e   :  { %v5259_v58 = vadd.f32 %v14479_v30, %v5258_v1  ;;  %v5260_v14 = vpop.f32.mrb[179].mxu1  ;;  %v5502_v5 = vmax.f32 %v5256_v40, 0.0 }
 0x720   :  { %v5503_v8 = vmax.f32 %v5259_v58, 0.0  ;;  %10017 = vmatmul.mubr.bf16.gmra.mrb[28].mxu1 %v14252_v63  ;;  %v10911_v63 = vld [vmem:[%s16645_s9 + $0x30] sm:$0xff]  }
 0x721   :  { %10020 = vmatprep.mubr.bf16.mxu1 %v14260_v25  ;;  %10128 = vmatprep.subr.bf16.mxu1 %v10911_v63 }
 0x722   :  { %v14497_v0 = vpack.c.bf16 %v5503_v8, %v5502_v5  ;;  %10129 = vmatpush3.bf16.msra.mxu1 %v10911_v63 }
 0x723   :  { %v5263_v56 = vpop.f32.mrb[180].mxu1 }
 0x724   :  { %v5264_v54 = vadd.f32 %v14479_v30, %v5263_v56  ;;  %v5265_v17 = vpop.f32.mrb[181].mxu1 }
 0x725   :  { %v5266_v10 = vpop.f32.mrb[182].mxu1 }
 0x726   :  { %v5267_v12 = vadd.f32 %v14479_v30, %v5266_v10  ;;  %v5268_v16 = vpop.f32.mrb[183].mxu1  ;;  %v5504_v33 = vmax.f32 %v5264_v54, 0.0 }
 0x728   :  { %v5505_v32 = vmax.f32 %v5267_v12, 0.0  ;;  %10021 = vmatmul.mubr.bf16.gmra.mrb[32].mxu1 %v14268_v43 }
 0x729   :  { %10024 = vmatprep.mubr.bf16.mxu1 %v14276_v2 }
 0x72a   :  { %v14503_v61 = vpack.c.bf16 %v5505_v32, %v5504_v33 }
 0x72b   :  { %v5271_v25 = vpop.f32.mrb[184].mxu1 }
 0x72c   :  { %v5272_v62 = vadd.f32 %v14479_v30, %v5271_v25  ;;  %v5273_v29 = vpop.f32.mrb[185].mxu1 }
 0x72d   :  { %v5274_v46 = vpop.f32.mrb[186].mxu1 }
 0x72e   :  { %v5275_v38 = vadd.f32 %v14479_v30, %v5274_v46  ;;  %v5276_v39 = vpop.f32.mrb[187].mxu1  ;;  %v5506_v50 = vmax.f32 %v5272_v62, 0.0 }
 0x730   :  { %v5507_v43 = vmax.f32 %v5275_v38, 0.0  ;;  %10025 = vmatmul.mubr.bf16.gmra.mrb[36].mxu1 %v14289_v19 }
 0x731   :  { %10028 = vmatprep.mubr.bf16.mxu1 %v14297_v9 }
 0x732   :  { %v14512_v2 = vpack.c.bf16 %v5507_v43, %v5506_v50 }
 0x733   :  { %v5279_v42 = vpop.f32.mrb[188].mxu1 }
 0x734   :  { %v5280_v13 = vadd.f32 %v14479_v30, %v5279_v42  ;;  %v5281_v44 = vpop.f32.mrb[189].mxu1 }
 0x735   :  { %v5282_v35 = vpop.f32.mrb[190].mxu1 }
 0x736   :  { %v5283_v55 = vadd.f32 %v14479_v30, %v5282_v35  ;;  %v5284_v21 = vpop.f32.mrb[191].mxu1  ;;  %v5508_v53 = vmax.f32 %v5280_v13, 0.0 }
 0x738   :  { %v5509_v22 = vmax.f32 %v5283_v55, 0.0  ;;  %10029 = vmatmul.mubr.bf16.gmra.mrb[40].mxu1 %v14305_v15 }
 0x739   :  { %10032 = vmatprep.mubr.bf16.mxu1 %v14319_v28 }
 0x73a   :  { %v14518_v41 = vpack.c.bf16 %v5509_v22, %v5508_v53 }
 0x73b   :  { %v5287_v19 = vpop.f32.mrb[192].mxu1 }
 0x73c   :  { %v5288_v9 = vadd.f32 %v14479_v30, %v5287_v19  ;;  %v5289_v34 = vpop.f32.mrb[193].mxu1 }
 0x73d   :  { %v5290_v20 = vpop.f32.mrb[194].mxu1 }
 0x73e   :  { %v5291_v40 = vadd.f32 %v14479_v30, %v5290_v20  ;;  %v5292_v47 = vpop.f32.mrb[195].mxu1  ;;  %v5510_v1 = vmax.f32 %v5288_v9, 0.0 }
 0x740   :  { %v5511_v58 = vmax.f32 %v5291_v40, 0.0  ;;  %10033 = vmatmul.mubr.bf16.gmra.mrb[44].mxu1 %v14327_v24 }
 0x741   :  { %10036 = vmatprep.mubr.bf16.mxu1 %v14335_v45  ;;  %v10912_v45 = vld [vmem:[%s16645_s9 + $0x38] sm:$0xff]  }
 0x742   :  { %v14524_v14 = vpack.c.bf16 %v5511_v58, %v5510_v1  ;;  %10130 = vmatprep.subr.bf16.mxu1 %v10912_v45 }
 0x743   :  { %v5295_v15 = vpop.f32.mrb[196].mxu1  ;;  %10131 = vmatpush3.bf16.msra.mxu1 %v10912_v45 }
 0x744   :  { %v5296_v28 = vadd.f32 %v14479_v30, %v5295_v15  ;;  %v5297_v5 = vpop.f32.mrb[197].mxu1 }
 0x745   :  { %v5298_v8 = vpop.f32.mrb[198].mxu1 }
 0x746   :  { %v5299_v56 = vadd.f32 %v14479_v30, %v5298_v8  ;;  %v5300_v54 = vpop.f32.mrb[199].mxu1  ;;  %v5512_v17 = vmax.f32 %v5296_v28, 0.0 }
 0x748   :  { %v5513_v10 = vmax.f32 %v5299_v56, 0.0  ;;  %10037 = vmatmul.mubr.bf16.gmra.mrb[48].mxu1 %v14343_v48 }
 0x749   :  { %10040 = vmatprep.mubr.bf16.mxu1 %v14351_v18 }
 0x74a   :  { %v14530_v12 = vpack.c.bf16 %v5513_v10, %v5512_v17 }
 0x74b   :  { %v5303_v24 = vpop.f32.mrb[200].mxu1 }
 0x74c   :  { %v5304_v16 = vadd.f32 %v14479_v30, %v5303_v24  ;;  %v5305_v33 = vpop.f32.mrb[201].mxu1 }
 0x74d   :  { %v5306_v32 = vpop.f32.mrb[202].mxu1 }
 0x74e   :  { %v5307_v63 = vadd.f32 %v14479_v30, %v5306_v32  ;;  %v5308_v25 = vpop.f32.mrb[203].mxu1  ;;  %v5514_v62 = vmax.f32 %v5304_v16, 0.0 }
 0x750   :  { %v5515_v48 = vmax.f32 %v5307_v63, 0.0  ;;  %10041 = vmatmul.mubr.bf16.gmra.mrb[52].mxu1 %v14359_v27 }
 0x751   :  { %10044 = vmatprep.mubr.bf16.mxu1 %v14367_v57 }
 0x752   :  { %v14539_v18 = vpack.c.bf16 %v5515_v48, %v5514_v62 }
 0x753   :  { %v5311_v29 = vpop.f32.mrb[204].mxu1 }
 0x754   :  { %v5312_v46 = vadd.f32 %v14479_v30, %v5311_v29  ;;  %v5313_v38 = vpop.f32.mrb[205].mxu1 }
 0x755   :  { %v5314_v39 = vpop.f32.mrb[206].mxu1 }
 0x756   :  { %v5315_v50 = vadd.f32 %v14479_v30, %v5314_v39  ;;  %v5316_v43 = vpop.f32.mrb[207].mxu1  ;;  %v5516_v42 = vmax.f32 %v5312_v46, 0.0 }
 0x758   :  { %v5517_v13 = vmax.f32 %v5315_v50, 0.0  ;;  %10045 = vmatmul.mubr.bf16.gmra.mrb[56].mxu1 %v14375_v31 }
 0x759   :  { %10048 = vmatprep.mubr.bf16.mxu1 %v14383_v49 }
 0x75a   :  { %v14545_v44 = vpack.c.bf16 %v5517_v13, %v5516_v42 }
 0x75b   :  { %v5319_v27 = vpop.f32.mrb[208].mxu1 }
 0x75c   :  { %v5320_v57 = vadd.f32 %v14479_v30, %v5319_v27  ;;  %v5321_v35 = vpop.f32.mrb[209].mxu1 }
 0x75d   :  { %v5322_v55 = vpop.f32.mrb[210].mxu1 }
 0x75e   :  { %v5323_v21 = vadd.f32 %v14479_v30, %v5322_v55  ;;  %v5324_v53 = vpop.f32.mrb[211].mxu1  ;;  %v5518_v22 = vmax.f32 %v5320_v57, 0.0 }
 0x760   :  { %v5519_v19 = vmax.f32 %v5323_v21, 0.0  ;;  %10049 = vmatmul.mubr.bf16.gmra.mrb[60].mxu1 %v14391_v59 }
 0x761   :  { %10052 = vmatprep.mubr.bf16.mxu1 %v14399_v26 }
 0x762   :  { %v14551_v9 = vpack.c.bf16 %v5519_v19, %v5518_v22 }
 0x763   :  { %v5327_v31 = vpop.f32.mrb[212].mxu1 }
 0x764   :  { %v5328_v49 = vadd.f32 %v14479_v30, %v5327_v31  ;;  %v5329_v34 = vpop.f32.mrb[213].mxu1 }
 0x765   :  { %v5330_v20 = vpop.f32.mrb[214].mxu1 }
 0x766   :  { %v5331_v40 = vadd.f32 %v14479_v30, %v5330_v20  ;;  %v5332_v47 = vpop.f32.mrb[215].mxu1  ;;  %v5520_v1 = vmax.f32 %v5328_v49, 0.0 }
 0x768   :  { %v5521_v58 = vmax.f32 %v5331_v40, 0.0  ;;  %10053 = vmatmul.mubr.bf16.gmra.mrb[64].mxu1 %v14407_v6 }
 0x769   :  { %10056 = vmatprep.mubr.bf16.mxu1 %v14415_v3 }
 0x76a   :  { %v14557_v15 = vpack.c.bf16 %v5521_v58, %v5520_v1 }
 0x76b   :  { %v5335_v59 = vpop.f32.mrb[216].mxu1 }
 0x76c   :  { %v5336_v26 = vadd.f32 %v14479_v30, %v5335_v59  ;;  %v5337_v28 = vpop.f32.mrb[217].mxu1 }
 0x76d   :  { %v5338_v5 = vpop.f32.mrb[218].mxu1 }
 0x76e   :  { %v5339_v8 = vadd.f32 %v14479_v30, %v5338_v5  ;;  %v5340_v56 = vpop.f32.mrb[219].mxu1  ;;  %v5522_v54 = vmax.f32 %v5336_v26, 0.0 }
 0x770   :  { %v5523_v17 = vmax.f32 %v5339_v8, 0.0  ;;  %10057 = vmatmul.mubr.bf16.gmra.mrb[68].mxu1 %v14423_v36 }
 0x771   :  { %10060 = vmatprep.mubr.bf16.mxu1 %v14428_v7 }
 0x772   :  { %v14563_v10 = vpack.c.bf16 %v5523_v17, %v5522_v54 }
 0x773   :  { %v5343_v6 = vpop.f32.mrb[220].mxu1 }
 0x774   :  { %v5344_v3 = vadd.f32 %v14479_v30, %v5343_v6  ;;  %v5345_v24 = vpop.f32.mrb[221].mxu1 }
 0x775   :  { %v5346_v45 = vpop.f32.mrb[222].mxu1 }
 0x776   :  { %v5347_v16 = vadd.f32 %v14479_v30, %v5346_v45  ;;  %v5348_v33 = vpop.f32.mrb[223].mxu1  ;;  %v5524_v32 = vmax.f32 %v5344_v3, 0.0 }
 0x778   :  { %v5525_v63 = vmax.f32 %v5347_v16, 0.0  ;;  %10061 = vmatmul.mubr.bf16.gmra.mrb[72].mxu1 %v14438_v4 }
 0x779   :  { %10064 = vmatprep.mubr.bf16.mxu1 %v14453_v37 }
 0x77a   :  { %v14569_v25 = vpack.c.bf16 %v5525_v63, %v5524_v32 }
 0x77b   :  { %v5351_v36 = vpop.f32.mrb[224].mxu1 }
 0x77c   :  { %v5352_v7 = vadd.f32 %v14479_v30, %v5351_v36  ;;  %v5353_v62 = vpop.f32.mrb[225].mxu1 }
 0x77d   :  { %v5354_v48 = vpop.f32.mrb[226].mxu1 }
 0x77e   :  { %v5355_v29 = vadd.f32 %v14479_v30, %v5354_v48  ;;  %v5356_v46 = vpop.f32.mrb[227].mxu1  ;;  %v5526_v38 = vmax.f32 %v5352_v7, 0.0 }
 0x780   :  { %v5527_v39 = vmax.f32 %v5355_v29, 0.0  ;;  %10065 = vmatmul.mubr.bf16.gmra.mrb[76].mxu1 %v14459_v52 }
 0x781   :  { %10068 = vmatprep.mubr.bf16.mxu1 %v14465_v51 }
 0x782   :  { %v14575_v50 = vpack.c.bf16 %v5527_v39, %v5526_v38 }
 0x783   :  { %v5359_v4 = vpop.f32.mrb[228].mxu1 }
 0x784   :  { %v5360_v37 = vadd.f32 %v14479_v30, %v5359_v4  ;;  %v5361_v43 = vpop.f32.mrb[229].mxu1 }
 0x785   :  { %v5362_v42 = vpop.f32.mrb[230].mxu1 }
 0x786   :  { %v5363_v13 = vadd.f32 %v14479_v30, %v5362_v42  ;;  %v5364_v27 = vpop.f32.mrb[231].mxu1  ;;  %v5528_v57 = vmax.f32 %v5360_v37, 0.0 }
 0x788   :  { %v5529_v35 = vmax.f32 %v5363_v13, 0.0  ;;  %10069 = vmatmul.mubr.bf16.gmra.mrb[80].mxu1 %v14471_v11 }
 0x789   :  { %10072 = vmatprep.mubr.bf16.mxu1 %v14485_v23 }
 0x78a   :  { %v14581_v55 = vpack.c.bf16 %v5529_v35, %v5528_v57 }
 0x78b   :  { %v5367_v52 = vpop.f32.mrb[232].mxu1 }
 0x78c   :  { %v5368_v51 = vadd.f32 %v14479_v30, %v5367_v52  ;;  %v5369_v21 = vpop.f32.mrb[233].mxu1 }
 0x78d   :  { %v5370_v53 = vpop.f32.mrb[234].mxu1 }
 0x78e   :  { %v5371_v22 = vadd.f32 %v14479_v30, %v5370_v53  ;;  %v5372_v19 = vpop.f32.mrb[235].mxu1  ;;  %v5530_v31 = vmax.f32 %v5368_v51, 0.0 }
 0x790   :  { %v5531_v49 = vmax.f32 %v5371_v22, 0.0  ;;  %10073 = vmatmul.mubr.bf16.gmra.mrb[84].mxu1 %v14491_v60 }
 0x791   :  { %10076 = vmatprep.mubr.bf16.mxu1 %v14497_v0 }
 0x792   :  { %v14587_v34 = vpack.c.bf16 %v5531_v49, %v5530_v31 }
 0x793   :  { %v5375_v11 = vpop.f32.mrb[236].mxu1 }
 0x794   :  { %v5376_v23 = vadd.f32 %v14479_v30, %v5375_v11  ;;  %v5377_v20 = vpop.f32.mrb[237].mxu1 }
 0x795   :  { %v5378_v40 = vpop.f32.mrb[238].mxu1 }
 0x796   :  { %v5379_v47 = vadd.f32 %v14479_v30, %v5378_v40  ;;  %v5380_v1 = vpop.f32.mrb[239].mxu1  ;;  %v5532_v58 = vmax.f32 %v5376_v23, 0.0 }
 0x798   :  { %v5533_v59 = vmax.f32 %v5379_v47, 0.0  ;;  %10077 = vmatmul.mubr.bf16.gmra.mrb[88].mxu1 %v14503_v61 }
 0x799   :  { %10080 = vmatprep.mubr.bf16.mxu1 %v14512_v2 }
 0x79a   :  { %v14593_v26 = vpack.c.bf16 %v5533_v59, %v5532_v58 }
 0x79b   :  { %v5383_v60 = vpop.f32.mrb[240].mxu1 }
 0x79c   :  { %v5384_v0 = vadd.f32 %v14479_v30, %v5383_v60  ;;  %v5385_v28 = vpop.f32.mrb[241].mxu1 }
 0x79d   :  { %v5386_v5 = vpop.f32.mrb[242].mxu1 }
 0x79e   :  { %v5387_v8 = vadd.f32 %v14479_v30, %v5386_v5  ;;  %v5388_v56 = vpop.f32.mrb[243].mxu1  ;;  %v5534_v54 = vmax.f32 %v5384_v0, 0.0 }
 0x7a0   :  { %v5535_v17 = vmax.f32 %v5387_v8, 0.0  ;;  %10081 = vmatmul.mubr.bf16.gmra.mrb[92].mxu1 %v14518_v41 }
 0x7a1   :  { %10084 = vmatprep.mubr.bf16.mxu1 %v14524_v14 }
 0x7a2   :  { %v14599_v6 = vpack.c.bf16 %v5535_v17, %v5534_v54 }
 0x7a3   :  { %v5391_v61 = vpop.f32.mrb[244].mxu1 }
 0x7a4   :  { %v5392_v2 = vadd.f32 %v14479_v30, %v5391_v61  ;;  %v5393_v3 = vpop.f32.mrb[245].mxu1 }
 0x7a5   :  { %v5394_v24 = vpop.f32.mrb[246].mxu1 }
 0x7a6   :  { %v5395_v45 = vadd.f32 %v14479_v30, %v5394_v24  ;;  %v5396_v16 = vpop.f32.mrb[247].mxu1  ;;  %v5536_v33 = vmax.f32 %v5392_v2, 0.0 }
 0x7a8   :  { %v5537_v32 = vmax.f32 %v5395_v45, 0.0  ;;  %10085 = vmatmul.mubr.bf16.gmra.mrb[96].mxu1 %v14530_v12 }
 0x7a9   :  { %10088 = vmatprep.mubr.bf16.mxu1 %v14539_v18 }
 0x7aa   :  { %v14605_v63 = vpack.c.bf16 %v5537_v32, %v5536_v33 }
 0x7ab   :  { %v5399_v41 = vpop.f32.mrb[248].mxu1 }
 0x7ac   :  { %v5400_v14 = vadd.f32 %v14479_v30, %v5399_v41  ;;  %v5401_v36 = vpop.f32.mrb[249].mxu1 }
 0x7ad   :  { %v5402_v7 = vpop.f32.mrb[250].mxu1 }
 0x7ae   :  { %v5403_v62 = vadd.f32 %v14479_v30, %v5402_v7  ;;  %v5404_v48 = vpop.f32.mrb[251].mxu1  ;;  %v5538_v29 = vmax.f32 %v5400_v14, 0.0 }
 0x7b0   :  { %v5539_v46 = vmax.f32 %v5403_v62, 0.0  ;;  %10089 = vmatmul.mubr.bf16.gmra.mrb[100].mxu1 %v14545_v44  ;;  %v14620_v44 = vld [vmem:[%s16646_s8] ss:$0 sm:$0xff] }
 0x7b1   :  { %10092 = vmatprep.mubr.bf16.mxu1 %v14551_v9 }
 0x7b2   :  { %v14611_v38 = vpack.c.bf16 %v5539_v46, %v5538_v29 }
 0x7b3   :  { %v5407_v12 = vpop.f32.mrb[252].mxu1 }
 0x7b4   :  { %v5408_v18 = vadd.f32 %v14479_v30, %v5407_v12  ;;  %v5409_v39 = vpop.f32.mrb[253].mxu1 }
 0x7b5   :  { %v5410_v4 = vpop.f32.mrb[254].mxu1 }
 0x7b6   :  { %v5411_v37 = vadd.f32 %v14479_v30, %v5410_v4  ;;  %v5412_v43 = vpop.f32.mrb[255].mxu1  ;;  %v5540_v42 = vmax.f32 %v5408_v18, 0.0 }
 0x7b8   :  { %v5541_v13 = vmax.f32 %v5411_v37, 0.0  ;;  %10093 = vmatmul.mubr.bf16.gmra.mrb[104].mxu1 %v14557_v15 }
 0x7b9   :  { %10096 = vmatprep.mubr.bf16.mxu1 %v14563_v10 }
 0x7ba   :  { %v14622_v9 = vpack.c.bf16 %v5541_v13, %v5540_v42 }
 0x7bb   :  { %v9990_v27 = vpop.f32.mrb[0].mxu1 }
 0x7bc   :  { %v5720_v57 = vadd.f32 %v9990_v27, %v14620_v44  ;;  %v5711_v35 = vpop.f32.mrb[1].mxu1 }
 0x7bd   :  { %v5712_v30 = vadd.f32 %v14620_v44, %v5711_v35  ;;  %v9991_v52 = vpop.f32.mrb[2].mxu1 }
 0x7be   :  { %v5723_v51 = vadd.f32 %v9991_v52, %v14620_v44  ;;  %v5714_v21 = vpop.f32.mrb[3].mxu1  ;;  %v6224_v10 = vmax.f32 %v5720_v57, 0.0 }
 0x7bf   :  { %v5715_v15 = vadd.f32 %v14620_v44, %v5714_v21  ;;  %v6222_v22 = vmax.f32 %v5712_v30, 0.0 }
 0x7c0   :  { %v6225_v53 = vmax.f32 %v5723_v51, 0.0  ;;  %10097 = vmatmul.mubr.bf16.gmra.mrb[108].mxu1 %v14569_v25 }
 0x7c1   :  { %v6223_v19 = vmax.f32 %v5715_v15, 0.0  ;;  %10100 = vmatprep.mubr.bf16.mxu1 %v14575_v50 }
 0x7c2   :  { %v14630_v31 = vpack.c.bf16 %v6225_v53, %v6224_v10 }
 0x7c3   :  { %v6350_v49 = vpack.c.bf16 %v6223_v19, %v6222_v22  ;;  %v9994_v11 = vpop.f32.mrb[4].mxu1 }
 0x7c4   :  { %v5736_v23 = vadd.f32 %v9994_v11, %v14620_v44  ;;  %v5727_v20 = vpop.f32.mrb[5].mxu1 }
 0x7c5   :  { %v5728_v40 = vadd.f32 %v14620_v44, %v5727_v20  ;;  %v9995_v47 = vpop.f32.mrb[6].mxu1 }
 0x7c6   :  { %v5739_v1 = vadd.f32 %v9995_v47, %v14620_v44  ;;  %v5730_v58 = vpop.f32.mrb[7].mxu1  ;;  %v6228_v25 = vmax.f32 %v5736_v23, 0.0 }
 0x7c7   :  { %v5731_v59 = vadd.f32 %v14620_v44, %v5730_v58  ;;  %v6226_v50 = vmax.f32 %v5728_v40, 0.0 }
 0x7c8   :  { %v6229_v60 = vmax.f32 %v5739_v1, 0.0  ;;  %10101 = vmatmul.mubr.bf16.gmra.mrb[112].mxu1 %v14581_v55 }
 0x7c9   :  { %v6227_v0 = vmax.f32 %v5731_v59, 0.0  ;;  %10104 = vmatprep.mubr.bf16.mxu1 %v14587_v34 }
 0x7ca   :  { %v14638_v28 = vpack.c.bf16 %v6229_v60, %v6228_v25 }
 0x7cb   :  { %v6352_v5 = vpack.c.bf16 %v6227_v0, %v6226_v50  ;;  %v9998_v8 = vpop.f32.mrb[8].mxu1 }
 0x7cc   :  { %v5752_v56 = vadd.f32 %v9998_v8, %v14620_v44  ;;  %v5743_v54 = vpop.f32.mrb[9].mxu1 }
 0x7cd   :  { %v5744_v17 = vadd.f32 %v14620_v44, %v5743_v54  ;;  %v9999_v61 = vpop.f32.mrb[10].mxu1 }
 0x7ce   :  { %v5755_v2 = vadd.f32 %v9999_v61, %v14620_v44  ;;  %v5746_v3 = vpop.f32.mrb[11].mxu1  ;;  %v6232_v55 = vmax.f32 %v5752_v56, 0.0 }
 0x7cf   :  { %v5747_v24 = vadd.f32 %v14620_v44, %v5746_v3  ;;  %v6230_v34 = vmax.f32 %v5744_v17, 0.0 }
 0x7d0   :  { %v6233_v45 = vmax.f32 %v5755_v2, 0.0  ;;  %10105 = vmatmul.mubr.bf16.gmra.mrb[116].mxu1 %v14593_v26 }
 0x7d1   :  { %v6231_v16 = vmax.f32 %v5747_v24, 0.0  ;;  %10108 = vmatprep.mubr.bf16.mxu1 %v14599_v6 }
 0x7d2   :  { %v14646_v33 = vpack.c.bf16 %v6233_v45, %v6232_v55 }
 0x7d3   :  { %v6354_v32 = vpack.c.bf16 %v6231_v16, %v6230_v34  ;;  %v10002_v41 = vpop.f32.mrb[12].mxu1 }
 0x7d4   :  { %v5768_v14 = vadd.f32 %v10002_v41, %v14620_v44  ;;  %v5759_v36 = vpop.f32.mrb[13].mxu1 }
 0x7d5   :  { %v5760_v7 = vadd.f32 %v14620_v44, %v5759_v36  ;;  %v10003_v62 = vpop.f32.mrb[14].mxu1 }
 0x7d6   :  { %v5771_v48 = vadd.f32 %v10003_v62, %v14620_v44  ;;  %v5762_v29 = vpop.f32.mrb[15].mxu1  ;;  %v6236_v26 = vmax.f32 %v5768_v14, 0.0 }
 0x7d7   :  { %v5763_v46 = vadd.f32 %v14620_v44, %v5762_v29  ;;  %v6234_v6 = vmax.f32 %v5760_v7, 0.0 }
 0x7d8   :  { %v6237_v12 = vmax.f32 %v5771_v48, 0.0  ;;  %10109 = vmatmul.mubr.bf16.gmra.mrb[120].mxu1 %v14605_v63 }
 0x7d9   :  { %v6235_v18 = vmax.f32 %v5763_v46, 0.0  ;;  %10112 = vmatprep.mubr.bf16.mxu1 %v14611_v38 }
 0x7da   :  { %v14654_v39 = vpack.c.bf16 %v6237_v12, %v6236_v26 }
 0x7db   :  { %v6356_v4 = vpack.c.bf16 %v6235_v18, %v6234_v6  ;;  %v10006_v37 = vpop.f32.mrb[16].mxu1 }
 0x7dc   :  { %v5784_v43 = vadd.f32 %v10006_v37, %v14620_v44  ;;  %v5775_v42 = vpop.f32.mrb[17].mxu1 }
 0x7dd   :  { %v5776_v13 = vadd.f32 %v14620_v44, %v5775_v42  ;;  %v10007_v27 = vpop.f32.mrb[18].mxu1 }
 0x7de   :  { %v5787_v57 = vadd.f32 %v10007_v27, %v14620_v44  ;;  %v5778_v35 = vpop.f32.mrb[19].mxu1  ;;  %v6240_v63 = vmax.f32 %v5784_v43, 0.0 }
 0x7df   :  { %v5779_v30 = vadd.f32 %v14620_v44, %v5778_v35  ;;  %v6238_v38 = vmax.f32 %v5776_v13, 0.0 }
 0x7e0   :  { %v6241_v52 = vmax.f32 %v5787_v57, 0.0  ;;  %10113 = vmatmul.mubr.bf16.gmra.mrb[124].mxu1 %v14622_v9 }
 0x7e1   :  { %v6239_v51 = vmax.f32 %v5779_v30, 0.0  ;;  %10132 = vmatprep.mubr.bf16.mxu1 %v6350_v49 }
 0x7e2   :  { %v14661_v21 = vpack.c.bf16 %v6241_v52, %v6240_v63 }
 0x7e3   :  { %v6358_v15 = vpack.c.bf16 %v6239_v51, %v6238_v38  ;;  %v10010_v10 = vpop.f32.mrb[20].mxu1 }
 0x7e4   :  { %v5800_v53 = vadd.f32 %v10010_v10, %v14620_v44  ;;  %v5791_v22 = vpop.f32.mrb[21].mxu1 }
 0x7e5   :  { %v5792_v19 = vadd.f32 %v14620_v44, %v5791_v22  ;;  %v10011_v11 = vpop.f32.mrb[22].mxu1 }
 0x7e6   :  { %v5803_v23 = vadd.f32 %v10011_v11, %v14620_v44  ;;  %v5794_v20 = vpop.f32.mrb[23].mxu1  ;;  %v6244_v47 = vmax.f32 %v5800_v53, 0.0 }
 0x7e7   :  { %v5795_v40 = vadd.f32 %v14620_v44, %v5794_v20  ;;  %v6242_v49 = vmax.f32 %v5792_v19, 0.0 }
 0x7e8   :  { %v6245_v9 = vmax.f32 %v5803_v23, 0.0  ;;  %10133 = vmatmul.mubr.bf16.vlgmr.msra.gmra.mrb[128].mxu1 %v14630_v31 }
 0x7e9   :  { %v6243_v1 = vmax.f32 %v5795_v40, 0.0  ;;  %10136 = vmatprep.mubr.bf16.mxu1 %v6352_v5 }
 0x7ea   :  { %v14668_v58 = vpack.c.bf16 %v6245_v9, %v6244_v47 }
 0x7eb   :  { %v6360_v59 = vpack.c.bf16 %v6243_v1, %v6242_v49  ;;  %v10014_v25 = vpop.f32.mrb[24].mxu1 }
 0x7ec   :  { %v5816_v60 = vadd.f32 %v10014_v25, %v14620_v44  ;;  %v5807_v50 = vpop.f32.mrb[25].mxu1 }
 0x7ed   :  { %v5808_v0 = vadd.f32 %v14620_v44, %v5807_v50  ;;  %v10015_v8 = vpop.f32.mrb[26].mxu1 }
 0x7ee   :  { %v5819_v56 = vadd.f32 %v10015_v8, %v14620_v44  ;;  %v5810_v54 = vpop.f32.mrb[27].mxu1  ;;  %v6248_v61 = vmax.f32 %v5816_v60, 0.0 }
 0x7ef   :  { %v5811_v17 = vadd.f32 %v14620_v44, %v5810_v54  ;;  %v6246_v5 = vmax.f32 %v5808_v0, 0.0 }
 0x7f0   :  { %v6249_v31 = vmax.f32 %v5819_v56, 0.0  ;;  %10137 = vmatmul.mubr.bf16.gmra.mrb[132].mxu1 %v14638_v28 }
 0x7f1   :  { %v6247_v2 = vmax.f32 %v5811_v17, 0.0  ;;  %10140 = vmatprep.mubr.bf16.mxu1 %v6354_v32 }
 0x7f2   :  { %v14675_v3 = vpack.c.bf16 %v6249_v31, %v6248_v61 }
 0x7f3   :  { %v6362_v24 = vpack.c.bf16 %v6247_v2, %v6246_v5  ;;  %v10018_v55 = vpop.f32.mrb[28].mxu1 }
 0x7f4   :  { %v5832_v45 = vadd.f32 %v10018_v55, %v14620_v44  ;;  %v5823_v34 = vpop.f32.mrb[29].mxu1 }
 0x7f5   :  { %v5824_v16 = vadd.f32 %v14620_v44, %v5823_v34  ;;  %v10019_v41 = vpop.f32.mrb[30].mxu1 }
 0x7f6   :  { %v5835_v14 = vadd.f32 %v10019_v41, %v14620_v44  ;;  %v5826_v36 = vpop.f32.mrb[31].mxu1  ;;  %v6252_v62 = vmax.f32 %v5832_v45, 0.0 }
 0x7f7   :  { %v5827_v7 = vadd.f32 %v14620_v44, %v5826_v36  ;;  %v6250_v32 = vmax.f32 %v5824_v16, 0.0 }
 0x7f8   :  { %v6253_v28 = vmax.f32 %v5835_v14, 0.0  ;;  %10141 = vmatmul.mubr.bf16.gmra.mrb[136].mxu1 %v14646_v33 }
 0x7f9   :  { %v6251_v48 = vmax.f32 %v5827_v7, 0.0  ;;  %10144 = vmatprep.mubr.bf16.mxu1 %v6356_v4 }
 0x7fa   :  { %v14682_v29 = vpack.c.bf16 %v6253_v28, %v6252_v62 }
 0x7fb   :  { %v6364_v46 = vpack.c.bf16 %v6251_v48, %v6250_v32  ;;  %v10022_v26 = vpop.f32.mrb[32].mxu1 }
 0x7fc   :  { %v5848_v12 = vadd.f32 %v10022_v26, %v14620_v44  ;;  %v5839_v6 = vpop.f32.mrb[33].mxu1 }
 0x7fd   :  { %v5840_v18 = vadd.f32 %v14620_v44, %v5839_v6  ;;  %v10023_v37 = vpop.f32.mrb[34].mxu1 }
 0x7fe   :  { %v5851_v43 = vadd.f32 %v10023_v37, %v14620_v44  ;;  %v5842_v42 = vpop.f32.mrb[35].mxu1  ;;  %v6256_v27 = vmax.f32 %v5848_v12, 0.0 }
 0x7ff   :  { %v5843_v13 = vadd.f32 %v14620_v44, %v5842_v42  ;;  %v6254_v4 = vmax.f32 %v5840_v18, 0.0 }
 0x800   :  { %v6257_v33 = vmax.f32 %v5851_v43, 0.0  ;;  %10145 = vmatmul.mubr.bf16.gmra.mrb[140].mxu1 %v14654_v39 }
 0x801   :  { %v6255_v57 = vmax.f32 %v5843_v13, 0.0  ;;  %10148 = vmatprep.mubr.bf16.mxu1 %v6358_v15 }
 0x802   :  { %v14689_v35 = vpack.c.bf16 %v6257_v33, %v6256_v27 }
 0x803   :  { %v6366_v30 = vpack.c.bf16 %v6255_v57, %v6254_v4  ;;  %v10026_v63 = vpop.f32.mrb[36].mxu1 }
 0x804   :  { %v5864_v52 = vadd.f32 %v10026_v63, %v14620_v44  ;;  %v5855_v38 = vpop.f32.mrb[37].mxu1 }
 0x805   :  { %v5856_v51 = vadd.f32 %v14620_v44, %v5855_v38  ;;  %v10027_v10 = vpop.f32.mrb[38].mxu1 }
 0x806   :  { %v5867_v53 = vadd.f32 %v10027_v10, %v14620_v44  ;;  %v5858_v22 = vpop.f32.mrb[39].mxu1  ;;  %v6260_v11 = vmax.f32 %v5864_v52, 0.0 }
 0x807   :  { %v5859_v19 = vadd.f32 %v14620_v44, %v5858_v22  ;;  %v6258_v15 = vmax.f32 %v5856_v51, 0.0 }
 0x808   :  { %v6261_v39 = vmax.f32 %v5867_v53, 0.0  ;;  %10149 = vmatmul.mubr.bf16.gmra.mrb[144].mxu1 %v14661_v21 }
 0x809   :  { %v6259_v23 = vmax.f32 %v5859_v19, 0.0  ;;  %10152 = vmatprep.mubr.bf16.mxu1 %v6360_v59 }
 0x80a   :  { %v14696_v20 = vpack.c.bf16 %v6261_v39, %v6260_v11 }
 0x80b   :  { %v6368_v40 = vpack.c.bf16 %v6259_v23, %v6258_v15  ;;  %v10030_v47 = vpop.f32.mrb[40].mxu1 }
 0x80c   :  { %v5880_v9 = vadd.f32 %v10030_v47, %v14620_v44  ;;  %v5871_v49 = vpop.f32.mrb[41].mxu1 }
 0x80d   :  { %v5872_v1 = vadd.f32 %v14620_v44, %v5871_v49  ;;  %v10031_v25 = vpop.f32.mrb[42].mxu1 }
 0x80e   :  { %v5883_v60 = vadd.f32 %v10031_v25, %v14620_v44  ;;  %v5874_v50 = vpop.f32.mrb[43].mxu1  ;;  %v6264_v8 = vmax.f32 %v5880_v9, 0.0 }
 0x80f   :  { %v5875_v0 = vadd.f32 %v14620_v44, %v5874_v50  ;;  %v6262_v59 = vmax.f32 %v5872_v1, 0.0 }
 0x810   :  { %v6265_v21 = vmax.f32 %v5883_v60, 0.0  ;;  %10153 = vmatmul.mubr.bf16.gmra.mrb[148].mxu1 %v14668_v58 }
 0x811   :  { %v6263_v56 = vmax.f32 %v5875_v0, 0.0  ;;  %10156 = vmatprep.mubr.bf16.mxu1 %v6362_v24 }
 0x812   :  { %v14703_v54 = vpack.c.bf16 %v6265_v21, %v6264_v8 }
 0x813   :  { %v6370_v17 = vpack.c.bf16 %v6263_v56, %v6262_v59  ;;  %v10034_v61 = vpop.f32.mrb[44].mxu1 }
 0x814   :  { %v5896_v31 = vadd.f32 %v10034_v61, %v14620_v44  ;;  %v5887_v5 = vpop.f32.mrb[45].mxu1 }
 0x815   :  { %v5888_v2 = vadd.f32 %v14620_v44, %v5887_v5  ;;  %v10035_v55 = vpop.f32.mrb[46].mxu1 }
 0x816   :  { %v5899_v45 = vadd.f32 %v10035_v55, %v14620_v44  ;;  %v5890_v34 = vpop.f32.mrb[47].mxu1  ;;  %v6268_v41 = vmax.f32 %v5896_v31, 0.0 }
 0x817   :  { %v5891_v16 = vadd.f32 %v14620_v44, %v5890_v34  ;;  %v6266_v24 = vmax.f32 %v5888_v2, 0.0 }
 0x818   :  { %v6269_v58 = vmax.f32 %v5899_v45, 0.0  ;;  %10157 = vmatmul.mubr.bf16.gmra.mrb[152].mxu1 %v14675_v3 }
 0x819   :  { %v6267_v14 = vmax.f32 %v5891_v16, 0.0  ;;  %10160 = vmatprep.mubr.bf16.mxu1 %v6364_v46 }
 0x81a   :  { %v14710_v36 = vpack.c.bf16 %v6269_v58, %v6268_v41 }
 0x81b   :  { %v6372_v7 = vpack.c.bf16 %v6267_v14, %v6266_v24  ;;  %v10038_v62 = vpop.f32.mrb[48].mxu1 }
 0x81c   :  { %v5912_v28 = vadd.f32 %v10038_v62, %v14620_v44  ;;  %v5903_v32 = vpop.f32.mrb[49].mxu1 }
 0x81d   :  { %v5904_v48 = vadd.f32 %v14620_v44, %v5903_v32  ;;  %v10039_v26 = vpop.f32.mrb[50].mxu1 }
 0x81e   :  { %v5915_v12 = vadd.f32 %v10039_v26, %v14620_v44  ;;  %v5906_v6 = vpop.f32.mrb[51].mxu1  ;;  %v6272_v37 = vmax.f32 %v5912_v28, 0.0 }
 0x81f   :  { %v5907_v18 = vadd.f32 %v14620_v44, %v5906_v6  ;;  %v6270_v46 = vmax.f32 %v5904_v48, 0.0 }
 0x820   :  { %v6273_v3 = vmax.f32 %v5915_v12, 0.0  ;;  %10161 = vmatmul.mubr.bf16.gmra.mrb[156].mxu1 %v14682_v29 }
 0x821   :  { %v6271_v43 = vmax.f32 %v5907_v18, 0.0  ;;  %10164 = vmatprep.mubr.bf16.mxu1 %v6366_v30 }
 0x822   :  { %v14717_v42 = vpack.c.bf16 %v6273_v3, %v6272_v37 }
 0x823   :  { %v6374_v13 = vpack.c.bf16 %v6271_v43, %v6270_v46  ;;  %v10042_v27 = vpop.f32.mrb[52].mxu1 }
 0x824   :  { %v5928_v33 = vadd.f32 %v10042_v27, %v14620_v44  ;;  %v5919_v4 = vpop.f32.mrb[53].mxu1 }
 0x825   :  { %v5920_v57 = vadd.f32 %v14620_v44, %v5919_v4  ;;  %v10043_v63 = vpop.f32.mrb[54].mxu1 }
 0x826   :  { %v5931_v52 = vadd.f32 %v10043_v63, %v14620_v44  ;;  %v5922_v38 = vpop.f32.mrb[55].mxu1  ;;  %v6276_v10 = vmax.f32 %v5928_v33, 0.0 }
 0x827   :  { %v5923_v51 = vadd.f32 %v14620_v44, %v5922_v38  ;;  %v6274_v30 = vmax.f32 %v5920_v57, 0.0 }
 0x828   :  { %v6277_v29 = vmax.f32 %v5931_v52, 0.0  ;;  %10165 = vmatmul.mubr.bf16.gmra.mrb[160].mxu1 %v14689_v35 }
 0x829   :  { %v6275_v53 = vmax.f32 %v5923_v51, 0.0  ;;  %10168 = vmatprep.mubr.bf16.mxu1 %v6368_v40 }
 0x82a   :  { %v14724_v22 = vpack.c.bf16 %v6277_v29, %v6276_v10 }
 0x82b   :  { %v6376_v19 = vpack.c.bf16 %v6275_v53, %v6274_v30  ;;  %v10046_v11 = vpop.f32.mrb[56].mxu1 }
 0x82c   :  { %v5944_v39 = vadd.f32 %v10046_v11, %v14620_v44  ;;  %v5935_v15 = vpop.f32.mrb[57].mxu1 }
 0x82d   :  { %v5936_v23 = vadd.f32 %v14620_v44, %v5935_v15  ;;  %v10047_v47 = vpop.f32.mrb[58].mxu1 }
 0x82e   :  { %v5947_v9 = vadd.f32 %v10047_v47, %v14620_v44  ;;  %v5938_v49 = vpop.f32.mrb[59].mxu1  ;;  %v6280_v25 = vmax.f32 %v5944_v39, 0.0 }
 0x82f   :  { %v5939_v1 = vadd.f32 %v14620_v44, %v5938_v49  ;;  %v6278_v40 = vmax.f32 %v5936_v23, 0.0 }
 0x830   :  { %v6281_v35 = vmax.f32 %v5947_v9, 0.0  ;;  %10169 = vmatmul.mubr.bf16.gmra.mrb[164].mxu1 %v14696_v20 }
 0x831   :  { %v6279_v60 = vmax.f32 %v5939_v1, 0.0  ;;  %10172 = vmatprep.mubr.bf16.mxu1 %v6370_v17 }
 0x832   :  { %v14731_v50 = vpack.c.bf16 %v6281_v35, %v6280_v25 }
 0x833   :  { %v6378_v0 = vpack.c.bf16 %v6279_v60, %v6278_v40  ;;  %v10050_v8 = vpop.f32.mrb[60].mxu1 }
 0x834   :  { %v5960_v21 = vadd.f32 %v10050_v8, %v14620_v44  ;;  %v5951_v59 = vpop.f32.mrb[61].mxu1 }
 0x835   :  { %v5952_v56 = vadd.f32 %v14620_v44, %v5951_v59  ;;  %v10051_v61 = vpop.f32.mrb[62].mxu1 }
 0x836   :  { %v5963_v31 = vadd.f32 %v10051_v61, %v14620_v44  ;;  %v5954_v5 = vpop.f32.mrb[63].mxu1  ;;  %v6284_v55 = vmax.f32 %v5960_v21, 0.0 }
 0x837   :  { %v5955_v2 = vadd.f32 %v14620_v44, %v5954_v5  ;;  %v6282_v17 = vmax.f32 %v5952_v56, 0.0 }
 0x838   :  { %v6285_v20 = vmax.f32 %v5963_v31, 0.0  ;;  %10173 = vmatmul.mubr.bf16.gmra.mrb[168].mxu1 %v14703_v54 }
 0x839   :  { %v6283_v45 = vmax.f32 %v5955_v2, 0.0  ;;  %10176 = vmatprep.mubr.bf16.mxu1 %v6372_v7 }
 0x83a   :  { %v14738_v34 = vpack.c.bf16 %v6285_v20, %v6284_v55 }
 0x83b   :  { %v6380_v16 = vpack.c.bf16 %v6283_v45, %v6282_v17  ;;  %v10054_v41 = vpop.f32.mrb[64].mxu1 }
 0x83c   :  { %v5976_v58 = vadd.f32 %v10054_v41, %v14620_v44  ;;  %v5967_v24 = vpop.f32.mrb[65].mxu1 }
 0x83d   :  { %v5968_v14 = vadd.f32 %v14620_v44, %v5967_v24  ;;  %v10055_v62 = vpop.f32.mrb[66].mxu1 }
 0x83e   :  { %v5979_v28 = vadd.f32 %v10055_v62, %v14620_v44  ;;  %v5970_v32 = vpop.f32.mrb[67].mxu1  ;;  %v6288_v26 = vmax.f32 %v5976_v58, 0.0 }
 0x83f   :  { %v5971_v48 = vadd.f32 %v14620_v44, %v5970_v32  ;;  %v6286_v7 = vmax.f32 %v5968_v14, 0.0 }
 0x840   :  { %v6289_v54 = vmax.f32 %v5979_v28, 0.0  ;;  %10177 = vmatmul.mubr.bf16.gmra.mrb[172].mxu1 %v14710_v36 }
 0x841   :  { %v6287_v12 = vmax.f32 %v5971_v48, 0.0  ;;  %10180 = vmatprep.mubr.bf16.mxu1 %v6374_v13 }
 0x842   :  { %v14745_v6 = vpack.c.bf16 %v6289_v54, %v6288_v26 }
 0x843   :  { %v6382_v18 = vpack.c.bf16 %v6287_v12, %v6286_v7  ;;  %v10058_v37 = vpop.f32.mrb[68].mxu1 }
 0x844   :  { %v5992_v3 = vadd.f32 %v10058_v37, %v14620_v44  ;;  %v5983_v46 = vpop.f32.mrb[69].mxu1 }
 0x845   :  { %v5984_v43 = vadd.f32 %v14620_v44, %v5983_v46  ;;  %v10059_v27 = vpop.f32.mrb[70].mxu1 }
 0x846   :  { %v5995_v33 = vadd.f32 %v10059_v27, %v14620_v44  ;;  %v5986_v4 = vpop.f32.mrb[71].mxu1  ;;  %v6292_v63 = vmax.f32 %v5992_v3, 0.0 }
 0x847   :  { %v5987_v57 = vadd.f32 %v14620_v44, %v5986_v4  ;;  %v6290_v13 = vmax.f32 %v5984_v43, 0.0 }
 0x848   :  { %v6293_v36 = vmax.f32 %v5995_v33, 0.0  ;;  %10181 = vmatmul.mubr.bf16.gmra.mrb[176].mxu1 %v14717_v42 }
 0x849   :  { %v6291_v52 = vmax.f32 %v5987_v57, 0.0  ;;  %10184 = vmatprep.mubr.bf16.mxu1 %v6376_v19 }
 0x84a   :  { %v14752_v38 = vpack.c.bf16 %v6293_v36, %v6292_v63 }
 0x84b   :  { %v6384_v51 = vpack.c.bf16 %v6291_v52, %v6290_v13  ;;  %v10062_v10 = vpop.f32.mrb[72].mxu1 }
 0x84c   :  { %v6008_v29 = vadd.f32 %v10062_v10, %v14620_v44  ;;  %v5999_v30 = vpop.f32.mrb[73].mxu1 }
 0x84d   :  { %v6000_v53 = vadd.f32 %v14620_v44, %v5999_v30  ;;  %v10063_v11 = vpop.f32.mrb[74].mxu1 }
 0x84e   :  { %v6011_v39 = vadd.f32 %v10063_v11, %v14620_v44  ;;  %v6002_v15 = vpop.f32.mrb[75].mxu1  ;;  %v6296_v47 = vmax.f32 %v6008_v29, 0.0 }
 0x84f   :  { %v6003_v23 = vadd.f32 %v14620_v44, %v6002_v15  ;;  %v6294_v19 = vmax.f32 %v6000_v53, 0.0 }
 0x850   :  { %v6297_v42 = vmax.f32 %v6011_v39, 0.0  ;;  %10185 = vmatmul.mubr.bf16.gmra.mrb[180].mxu1 %v14724_v22 }
 0x851   :  { %v6295_v9 = vmax.f32 %v6003_v23, 0.0  ;;  %10188 = vmatprep.mubr.bf16.mxu1 %v6378_v0 }
 0x852   :  { %v14759_v49 = vpack.c.bf16 %v6297_v42, %v6296_v47 }
 0x853   :  { %v6386_v1 = vpack.c.bf16 %v6295_v9, %v6294_v19  ;;  %v10066_v25 = vpop.f32.mrb[76].mxu1 }
 0x854   :  { %v6024_v35 = vadd.f32 %v10066_v25, %v14620_v44  ;;  %v6015_v40 = vpop.f32.mrb[77].mxu1 }
 0x855   :  { %v6016_v60 = vadd.f32 %v14620_v44, %v6015_v40  ;;  %v10067_v8 = vpop.f32.mrb[78].mxu1 }
 0x856   :  { %v6027_v21 = vadd.f32 %v10067_v8, %v14620_v44  ;;  %v6018_v59 = vpop.f32.mrb[79].mxu1  ;;  %v6300_v61 = vmax.f32 %v6024_v35, 0.0 }
 0x857   :  { %v6019_v56 = vadd.f32 %v14620_v44, %v6018_v59  ;;  %v6298_v0 = vmax.f32 %v6016_v60, 0.0 }
 0x858   :  { %v6301_v22 = vmax.f32 %v6027_v21, 0.0  ;;  %10189 = vmatmul.mubr.bf16.gmra.mrb[184].mxu1 %v14731_v50 }
 0x859   :  { %v6299_v31 = vmax.f32 %v6019_v56, 0.0  ;;  %10192 = vmatprep.mubr.bf16.mxu1 %v6380_v16 }
 0x85a   :  { %v14766_v5 = vpack.c.bf16 %v6301_v22, %v6300_v61 }
 0x85b   :  { %v6388_v2 = vpack.c.bf16 %v6299_v31, %v6298_v0  ;;  %v10070_v55 = vpop.f32.mrb[80].mxu1 }
 0x85c   :  { %v6040_v20 = vadd.f32 %v10070_v55, %v14620_v44  ;;  %v6031_v17 = vpop.f32.mrb[81].mxu1 }
 0x85d   :  { %v6032_v45 = vadd.f32 %v14620_v44, %v6031_v17  ;;  %v10071_v41 = vpop.f32.mrb[82].mxu1 }
 0x85e   :  { %v6043_v58 = vadd.f32 %v10071_v41, %v14620_v44  ;;  %v6034_v24 = vpop.f32.mrb[83].mxu1  ;;  %v6304_v62 = vmax.f32 %v6040_v20, 0.0 }
 0x85f   :  { %v6035_v14 = vadd.f32 %v14620_v44, %v6034_v24  ;;  %v6302_v16 = vmax.f32 %v6032_v45, 0.0 }
 0x860   :  { %v6305_v50 = vmax.f32 %v6043_v58, 0.0  ;;  %10193 = vmatmul.mubr.bf16.gmra.mrb[188].mxu1 %v14738_v34 }
 0x861   :  { %v6303_v28 = vmax.f32 %v6035_v14, 0.0  ;;  %10196 = vmatprep.mubr.bf16.mxu1 %v6382_v18 }
 0x862   :  { %v14773_v32 = vpack.c.bf16 %v6305_v50, %v6304_v62 }
 0x863   :  { %v6390_v48 = vpack.c.bf16 %v6303_v28, %v6302_v16  ;;  %v10074_v26 = vpop.f32.mrb[84].mxu1 }
 0x864   :  { %v6056_v54 = vadd.f32 %v10074_v26, %v14620_v44  ;;  %v6047_v7 = vpop.f32.mrb[85].mxu1 }
 0x865   :  { %v6048_v12 = vadd.f32 %v14620_v44, %v6047_v7  ;;  %v10075_v37 = vpop.f32.mrb[86].mxu1 }
 0x866   :  { %v6059_v3 = vadd.f32 %v10075_v37, %v14620_v44  ;;  %v6050_v46 = vpop.f32.mrb[87].mxu1  ;;  %v6308_v27 = vmax.f32 %v6056_v54, 0.0 }
 0x867   :  { %v6051_v43 = vadd.f32 %v14620_v44, %v6050_v46  ;;  %v6306_v18 = vmax.f32 %v6048_v12, 0.0 }
 0x868   :  { %v6309_v34 = vmax.f32 %v6059_v3, 0.0  ;;  %10197 = vmatmul.mubr.bf16.gmra.mrb[192].mxu1 %v14745_v6 }
 0x869   :  { %v6307_v33 = vmax.f32 %v6051_v43, 0.0  ;;  %10200 = vmatprep.mubr.bf16.mxu1 %v6384_v51 }
 0x86a   :  { %v14780_v4 = vpack.c.bf16 %v6309_v34, %v6308_v27 }
 0x86b   :  { %v6392_v57 = vpack.c.bf16 %v6307_v33, %v6306_v18  ;;  %v10078_v63 = vpop.f32.mrb[88].mxu1 }
 0x86c   :  { %v6072_v36 = vadd.f32 %v10078_v63, %v14620_v44  ;;  %v6063_v13 = vpop.f32.mrb[89].mxu1 }
 0x86d   :  { %v6064_v52 = vadd.f32 %v14620_v44, %v6063_v13  ;;  %v10079_v10 = vpop.f32.mrb[90].mxu1 }
 0x86e   :  { %v6075_v29 = vadd.f32 %v10079_v10, %v14620_v44  ;;  %v6066_v30 = vpop.f32.mrb[91].mxu1  ;;  %v6312_v11 = vmax.f32 %v6072_v36, 0.0 }
 0x86f   :  { %v6067_v53 = vadd.f32 %v14620_v44, %v6066_v30  ;;  %v6310_v51 = vmax.f32 %v6064_v52, 0.0 }
 0x870   :  { %v6313_v6 = vmax.f32 %v6075_v29, 0.0  ;;  %10201 = vmatmul.mubr.bf16.gmra.mrb[196].mxu1 %v14752_v38 }
 0x871   :  { %v6311_v39 = vmax.f32 %v6067_v53, 0.0  ;;  %10204 = vmatprep.mubr.bf16.mxu1 %v6386_v1 }
 0x872   :  { %v14787_v15 = vpack.c.bf16 %v6313_v6, %v6312_v11 }
 0x873   :  { %v6394_v23 = vpack.c.bf16 %v6311_v39, %v6310_v51  ;;  %v10082_v47 = vpop.f32.mrb[92].mxu1 }
 0x874   :  { %v6088_v42 = vadd.f32 %v10082_v47, %v14620_v44  ;;  %v6079_v19 = vpop.f32.mrb[93].mxu1 }
 0x875   :  { %v6080_v9 = vadd.f32 %v14620_v44, %v6079_v19  ;;  %v10083_v25 = vpop.f32.mrb[94].mxu1 }
 0x876   :  { %v6091_v35 = vadd.f32 %v10083_v25, %v14620_v44  ;;  %v6082_v40 = vpop.f32.mrb[95].mxu1  ;;  %v6316_v8 = vmax.f32 %v6088_v42, 0.0 }
 0x877   :  { %v6083_v60 = vadd.f32 %v14620_v44, %v6082_v40  ;;  %v6314_v1 = vmax.f32 %v6080_v9, 0.0 }
 0x878   :  { %v6317_v38 = vmax.f32 %v6091_v35, 0.0  ;;  %10205 = vmatmul.mubr.bf16.gmra.mrb[200].mxu1 %v14759_v49 }
 0x879   :  { %v6315_v21 = vmax.f32 %v6083_v60, 0.0  ;;  %10208 = vmatprep.mubr.bf16.mxu1 %v6388_v2 }
 0x87a   :  { %v14794_v59 = vpack.c.bf16 %v6317_v38, %v6316_v8 }
 0x87b   :  { %v6396_v56 = vpack.c.bf16 %v6315_v21, %v6314_v1  ;;  %v10086_v61 = vpop.f32.mrb[96].mxu1 }
 0x87c   :  { %v6104_v22 = vadd.f32 %v10086_v61, %v14620_v44  ;;  %v6095_v0 = vpop.f32.mrb[97].mxu1 }
 0x87d   :  { %v6096_v31 = vadd.f32 %v14620_v44, %v6095_v0  ;;  %v10087_v55 = vpop.f32.mrb[98].mxu1 }
 0x87e   :  { %v6107_v20 = vadd.f32 %v10087_v55, %v14620_v44  ;;  %v6098_v17 = vpop.f32.mrb[99].mxu1  ;;  %v6320_v41 = vmax.f32 %v6104_v22, 0.0 }
 0x87f   :  { %v6099_v45 = vadd.f32 %v14620_v44, %v6098_v17  ;;  %v6318_v2 = vmax.f32 %v6096_v31, 0.0 }
 0x880   :  { %v6321_v49 = vmax.f32 %v6107_v20, 0.0  ;;  %10209 = vmatmul.mubr.bf16.gmra.mrb[204].mxu1 %v14766_v5 }
 0x881   :  { %v6319_v58 = vmax.f32 %v6099_v45, 0.0  ;;  %10212 = vmatprep.mubr.bf16.mxu1 %v6390_v48 }
 0x882   :  { %v14801_v24 = vpack.c.bf16 %v6321_v49, %v6320_v41 }
 0x883   :  { %v6398_v14 = vpack.c.bf16 %v6319_v58, %v6318_v2  ;;  %v10090_v62 = vpop.f32.mrb[100].mxu1 }
 0x884   :  { %v6120_v50 = vadd.f32 %v10090_v62, %v14620_v44  ;;  %v6111_v16 = vpop.f32.mrb[101].mxu1 }
 0x885   :  { %v6112_v28 = vadd.f32 %v14620_v44, %v6111_v16  ;;  %v10091_v26 = vpop.f32.mrb[102].mxu1 }
 0x886   :  { %v6123_v54 = vadd.f32 %v10091_v26, %v14620_v44  ;;  %v6114_v7 = vpop.f32.mrb[103].mxu1  ;;  %v6324_v37 = vmax.f32 %v6120_v50, 0.0 }
 0x887   :  { %v6115_v12 = vadd.f32 %v14620_v44, %v6114_v7  ;;  %v6322_v48 = vmax.f32 %v6112_v28, 0.0 }
 0x888   :  { %v6325_v5 = vmax.f32 %v6123_v54, 0.0  ;;  %10213 = vmatmul.mubr.bf16.gmra.mrb[208].mxu1 %v14773_v32 }
 0x889   :  { %v6323_v3 = vmax.f32 %v6115_v12, 0.0  ;;  %10216 = vmatprep.mubr.bf16.mxu1 %v6392_v57 }
 0x88a   :  { %v14808_v46 = vpack.c.bf16 %v6325_v5, %v6324_v37 }
 0x88b   :  { %v6400_v43 = vpack.c.bf16 %v6323_v3, %v6322_v48  ;;  %v10094_v27 = vpop.f32.mrb[104].mxu1 }
 0x88c   :  { %v6136_v34 = vadd.f32 %v10094_v27, %v14620_v44  ;;  %v6127_v18 = vpop.f32.mrb[105].mxu1 }
 0x88d   :  { %v6128_v33 = vadd.f32 %v14620_v44, %v6127_v18  ;;  %v10095_v63 = vpop.f32.mrb[106].mxu1 }
 0x88e   :  { %v6139_v36 = vadd.f32 %v10095_v63, %v14620_v44  ;;  %v6130_v13 = vpop.f32.mrb[107].mxu1  ;;  %v6328_v10 = vmax.f32 %v6136_v34, 0.0 }
 0x88f   :  { %v6131_v52 = vadd.f32 %v14620_v44, %v6130_v13  ;;  %v6326_v57 = vmax.f32 %v6128_v33, 0.0 }
 0x890   :  { %v6329_v32 = vmax.f32 %v6139_v36, 0.0  ;;  %10217 = vmatmul.mubr.bf16.gmra.mrb[212].mxu1 %v14780_v4 }
 0x891   :  { %v6327_v29 = vmax.f32 %v6131_v52, 0.0  ;;  %10220 = vmatprep.mubr.bf16.mxu1 %v6394_v23 }
 0x892   :  { %v14815_v30 = vpack.c.bf16 %v6329_v32, %v6328_v10 }
 0x893   :  { %v6402_v53 = vpack.c.bf16 %v6327_v29, %v6326_v57  ;;  %v10098_v11 = vpop.f32.mrb[108].mxu1 }
 0x894   :  { %v6152_v6 = vadd.f32 %v10098_v11, %v14620_v44  ;;  %v6143_v51 = vpop.f32.mrb[109].mxu1 }
 0x895   :  { %v6144_v39 = vadd.f32 %v14620_v44, %v6143_v51  ;;  %v10099_v47 = vpop.f32.mrb[110].mxu1 }
 0x896   :  { %v6155_v42 = vadd.f32 %v10099_v47, %v14620_v44  ;;  %v6146_v19 = vpop.f32.mrb[111].mxu1  ;;  %v6332_v25 = vmax.f32 %v6152_v6, 0.0 }
 0x897   :  { %v6147_v9 = vadd.f32 %v14620_v44, %v6146_v19  ;;  %v6330_v23 = vmax.f32 %v6144_v39, 0.0  ;;  %v14853_v19 = vld [vmem:[%s16647_s10] ss:$0 sm:$0xff] }
 0x898   :  { %v6333_v4 = vmax.f32 %v6155_v42, 0.0  ;;  %10221 = vmatmul.mubr.bf16.gmra.mrb[216].mxu1 %v14787_v15 }
 0x899   :  { %v6331_v35 = vmax.f32 %v6147_v9, 0.0  ;;  %10224 = vmatprep.mubr.bf16.mxu1 %v6396_v56 }
 0x89a   :  { %v14822_v40 = vpack.c.bf16 %v6333_v4, %v6332_v25 }
 0x89b   :  { %v6404_v60 = vpack.c.bf16 %v6331_v35, %v6330_v23  ;;  %v10102_v8 = vpop.f32.mrb[112].mxu1 }
 0x89c   :  { %v6168_v38 = vadd.f32 %v10102_v8, %v14620_v44  ;;  %v6159_v1 = vpop.f32.mrb[113].mxu1 }
 0x89d   :  { %v6160_v21 = vadd.f32 %v14620_v44, %v6159_v1  ;;  %v10103_v61 = vpop.f32.mrb[114].mxu1 }
 0x89e   :  { %v6171_v22 = vadd.f32 %v10103_v61, %v14620_v44  ;;  %v6162_v0 = vpop.f32.mrb[115].mxu1  ;;  %v6336_v55 = vmax.f32 %v6168_v38, 0.0 }
 0x89f   :  { %v6163_v31 = vadd.f32 %v14620_v44, %v6162_v0  ;;  %v6334_v56 = vmax.f32 %v6160_v21, 0.0 }
 0x8a0   :  { %v6337_v15 = vmax.f32 %v6171_v22, 0.0  ;;  %10225 = vmatmul.mubr.bf16.gmra.mrb[220].mxu1 %v14794_v59 }
 0x8a1   :  { %v6335_v20 = vmax.f32 %v6163_v31, 0.0  ;;  %10228 = vmatprep.mubr.bf16.mxu1 %v6398_v14 }
 0x8a2   :  { %v14829_v17 = vpack.c.bf16 %v6337_v15, %v6336_v55 }
 0x8a3   :  { %v6406_v45 = vpack.c.bf16 %v6335_v20, %v6334_v56  ;;  %v10106_v41 = vpop.f32.mrb[116].mxu1 }
 0x8a4   :  { %v6184_v49 = vadd.f32 %v10106_v41, %v14620_v44  ;;  %v6175_v2 = vpop.f32.mrb[117].mxu1 }
 0x8a5   :  { %v6176_v58 = vadd.f32 %v14620_v44, %v6175_v2  ;;  %v10107_v62 = vpop.f32.mrb[118].mxu1 }
 0x8a6   :  { %v6187_v50 = vadd.f32 %v10107_v62, %v14620_v44  ;;  %v6178_v16 = vpop.f32.mrb[119].mxu1  ;;  %v6340_v26 = vmax.f32 %v6184_v49, 0.0 }
 0x8a7   :  { %v6179_v28 = vadd.f32 %v14620_v44, %v6178_v16  ;;  %v6338_v14 = vmax.f32 %v6176_v58, 0.0 }
 0x8a8   :  { %v6341_v59 = vmax.f32 %v6187_v50, 0.0  ;;  %10229 = vmatmul.mubr.bf16.gmra.mrb[224].mxu1 %v14801_v24 }
 0x8a9   :  { %v6339_v54 = vmax.f32 %v6179_v28, 0.0  ;;  %10232 = vmatprep.mubr.bf16.mxu1 %v6400_v43 }
 0x8aa   :  { %v14836_v7 = vpack.c.bf16 %v6341_v59, %v6340_v26 }
 0x8ab   :  { %v6408_v12 = vpack.c.bf16 %v6339_v54, %v6338_v14  ;;  %v10110_v37 = vpop.f32.mrb[120].mxu1 }
 0x8ac   :  { %v6200_v5 = vadd.f32 %v10110_v37, %v14620_v44  ;;  %v6191_v48 = vpop.f32.mrb[121].mxu1 }
 0x8ad   :  { %v6192_v3 = vadd.f32 %v14620_v44, %v6191_v48  ;;  %v10111_v27 = vpop.f32.mrb[122].mxu1 }
 0x8ae   :  { %v6203_v34 = vadd.f32 %v10111_v27, %v14620_v44  ;;  %v6194_v18 = vpop.f32.mrb[123].mxu1  ;;  %v6344_v63 = vmax.f32 %v6200_v5, 0.0 }
 0x8af   :  { %v6195_v33 = vadd.f32 %v14620_v44, %v6194_v18  ;;  %v6342_v43 = vmax.f32 %v6192_v3, 0.0 }
 0x8b0   :  { %v6345_v24 = vmax.f32 %v6203_v34, 0.0  ;;  %10233 = vmatmul.mubr.bf16.gmra.mrb[228].mxu1 %v14808_v46 }
 0x8b1   :  { %v6343_v36 = vmax.f32 %v6195_v33, 0.0  ;;  %10236 = vmatprep.mubr.bf16.mxu1 %v6402_v53 }
 0x8b2   :  { %v14843_v13 = vpack.c.bf16 %v6345_v24, %v6344_v63 }
 0x8b3   :  { %v6410_v52 = vpack.c.bf16 %v6343_v36, %v6342_v43  ;;  %v10114_v10 = vpop.f32.mrb[124].mxu1 }
 0x8b4   :  { %v6216_v32 = vadd.f32 %v10114_v10, %v14620_v44  ;;  %v6207_v57 = vpop.f32.mrb[125].mxu1 }
 0x8b5   :  { %v6208_v29 = vadd.f32 %v14620_v44, %v6207_v57  ;;  %v10115_v11 = vpop.f32.mrb[126].mxu1 }
 0x8b6   :  { %v6219_v6 = vadd.f32 %v10115_v11, %v14620_v44  ;;  %v6210_v51 = vpop.f32.mrb[127].mxu1  ;;  %v6348_v47 = vmax.f32 %v6216_v32, 0.0 }
 0x8b7   :  { %v6211_v39 = vadd.f32 %v14620_v44, %v6210_v51  ;;  %v6346_v53 = vmax.f32 %v6208_v29, 0.0 }
 0x8b8   :  { %v6349_v46 = vmax.f32 %v6219_v6, 0.0  ;;  %10237 = vmatmul.mubr.bf16.gmra.mrb[232].mxu1 %v14815_v30 }
 0x8b9   :  { %v6347_v42 = vmax.f32 %v6211_v39, 0.0  ;;  %10240 = vmatprep.mubr.bf16.mxu1 %v6404_v60 }
 0x8ba   :  { %v14855_v9 = vpack.c.bf16 %v6349_v46, %v6348_v47 }
 0x8bb   :  { %v6412_v25 = vpack.c.bf16 %v6347_v42, %v6346_v53  ;;  %v10134_v4 = vpop.f32.mrb[128].mxu1 }
 0x8bc   :  { %v14858_v23 = vadd.f32 %v10134_v4, %v14853_v19  ;;  %v6519_v44 = vpop.f32.mrb[129].mxu1 }
 0x8bd   :  { %v14861_v35 = vadd.f32 %v14853_v19, %v6519_v44  ;;  %v10135_v30 = vpop.f32.mrb[130].mxu1 }
 0x8be   :  { %7034 = vmax.xlane.f32.xlu1 %v14858_v23  ;;  %v6522_v60 = vpop.f32.mrb[131].mxu1  ;;  %v14866_v8 = vadd.f32 %v10135_v30, %v14853_v19 }
 0x8bf   :  { %7030 = vmax.xlane.f32.xlu0 %v14861_v35  ;;  %v14870_v38 = vadd.f32 %v14853_v19, %v6522_v60 }
 0x8c0   :  { %10241 = vmatmul.mubr.bf16.gmra.mrb[236].mxu1 %v14822_v40 }
 0x8c1   :  { %10244 = vmatprep.mubr.bf16.mxu1 %v6406_v45 }
 0x8c2   :  { %7036 = vmax.xlane.f32.xlu1 %v14866_v8 }
 0x8c3   :  { %v10138_v1 = vpop.f32.mrb[132].mxu1  ;;  %7032 = vmax.xlane.f32.xlu0 %v14870_v38 }
 0x8c4   :  { %v14875_v21 = vadd.f32 %v10138_v1, %v14853_v19  ;;  %v6535_v61 = vpop.f32.mrb[133].mxu1 }
 0x8c5   :  { %v10139_v22 = vpop.f32.mrb[134].mxu1  ;;  %v14884_v40 = vadd.f32 %v14853_v19, %v6535_v61 }
 0x8c6   :  { %v14878_v0 = vadd.f32 %v10139_v22, %v14853_v19  ;;  %v6538_v31 = vpop.f32.mrb[135].mxu1 }
 0x8c7   :  { %7042 = vmax.xlane.f32.xlu0 %v14875_v21  ;;  %v14887_v55 = vadd.f32 %v14853_v19, %v6538_v31 }
 0x8c8   :  { %10245 = vmatmul.mubr.bf16.gmra.mrb[240].mxu1 %v14829_v17  ;;  %7044 = vmax.xlane.f32.xlu1 %v14878_v0 }
 0x8c9   :  { %10248 = vmatprep.mubr.bf16.mxu1 %v6408_v12 }
 0x8cb   :  { %v10142_v15 = vpop.f32.mrb[136].mxu1  ;;  %7038 = vmax.xlane.f32.xlu0 %v14884_v40 }
 0x8cc   :  { %v14891_v56 = vadd.f32 %v10142_v15, %v14853_v19  ;;  %v6551_v20 = vpop.f32.mrb[137].mxu1  ;;  %7040 = vmax.xlane.f32.xlu1 %v14887_v55 }
 0x8cd   :  { %v10143_v45 = vpop.f32.mrb[138].mxu1  ;;  %v14901_v49 = vadd.f32 %v14853_v19, %v6551_v20 }
 0x8ce   :  { %v14895_v17 = vadd.f32 %v10143_v45, %v14853_v19  ;;  %v6554_v41 = vpop.f32.mrb[139].mxu1 }
 0x8cf   :  { %7050 = vmax.xlane.f32.xlu0 %v14891_v56  ;;  %v14904_v2 = vadd.f32 %v14853_v19, %v6554_v41 }
 0x8d0   :  { %10249 = vmatmul.mubr.bf16.gmra.mrb[244].mxu1 %v14836_v7  ;;  %7052 = vmax.xlane.f32.xlu1 %v14895_v17 }
 0x8d1   :  { %10252 = vmatprep.mubr.bf16.mxu1 %v6410_v52 }
 0x8d3   :  { %v10146_v58 = vpop.f32.mrb[140].mxu1  ;;  %7046 = vmax.xlane.f32.xlu0 %v14901_v49 }
 0x8d4   :  { %v14908_v62 = vadd.f32 %v10146_v58, %v14853_v19  ;;  %v6567_v50 = vpop.f32.mrb[141].mxu1  ;;  %7048 = vmax.xlane.f32.xlu1 %v14904_v2 }
 0x8d5   :  { %v10147_v16 = vpop.f32.mrb[142].mxu1  ;;  %v14918_v59 = vadd.f32 %v14853_v19, %v6567_v50 }
 0x8d6   :  { %v14912_v28 = vadd.f32 %v10147_v16, %v14853_v19  ;;  %v6570_v26 = vpop.f32.mrb[143].mxu1 }
 0x8d7   :  { %7058 = vmax.xlane.f32.xlu0 %v14908_v62  ;;  %v14921_v14 = vadd.f32 %v14853_v19, %v6570_v26 }
 0x8d8   :  { %10253 = vmatmul.mubr.bf16.gmra.mrb[248].mxu1 %v14843_v13  ;;  %7060 = vmax.xlane.f32.xlu1 %v14912_v28 }
 0x8d9   :  { %10256 = vmatprep.mubr.bf16.mxu1 %v6412_v25 }
 0x8db   :  { %v10150_v54 = vpop.f32.mrb[144].mxu1  ;;  %7054 = vmax.xlane.f32.xlu0 %v14918_v59 }
 0x8dc   :  { %v14925_v7 = vadd.f32 %v10150_v54, %v14853_v19  ;;  %v6583_v12 = vpop.f32.mrb[145].mxu1  ;;  %7056 = vmax.xlane.f32.xlu1 %v14921_v14 }
 0x8dd   :  { %v10151_v37 = vpop.f32.mrb[146].mxu1  ;;  %v14935_v3 = vadd.f32 %v14853_v19, %v6583_v12 }
 0x8de   :  { %v14929_v5 = vadd.f32 %v10151_v37, %v14853_v19  ;;  %v6586_v48 = vpop.f32.mrb[147].mxu1 }
 0x8df   :  { %7066 = vmax.xlane.f32.xlu0 %v14925_v7  ;;  %v14938_v27 = vadd.f32 %v14853_v19, %v6586_v48 }
 0x8e0   :  { %10257 = vmatmul.mubr.bf16.gmra.mrb[252].mxu1 %v14855_v9  ;;  %7068 = vmax.xlane.f32.xlu1 %v14929_v5 }
 0x8e3   :  { %v10154_v34 = vpop.f32.mrb[148].mxu1  ;;  %7062 = vmax.xlane.f32.xlu0 %v14935_v3 }
 0x8e4   :  { %v14942_v18 = vadd.f32 %v10154_v34, %v14853_v19  ;;  %v6599_v33 = vpop.f32.mrb[149].mxu1  ;;  %7064 = vmax.xlane.f32.xlu1 %v14938_v27 }
 0x8e5   :  { %v10155_v63 = vpop.f32.mrb[150].mxu1  ;;  %v14951_v36 = vadd.f32 %v14853_v19, %v6599_v33 }
 0x8e6   :  { %v14946_v24 = vadd.f32 %v10155_v63, %v14853_v19  ;;  %v6602_v43 = vpop.f32.mrb[151].mxu1 }
 0x8e7   :  { %7074 = vmax.xlane.f32.xlu0 %v14942_v18  ;;  %v14954_v13 = vadd.f32 %v14853_v19, %v6602_v43 }
 0x8e8   :  { %7076 = vmax.xlane.f32.xlu1 %v14946_v24 }
 0x8eb   :  { %v10158_v52 = vpop.f32.mrb[152].mxu1  ;;  %7070 = vmax.xlane.f32.xlu0 %v14951_v36 }
 0x8ec   :  { %v14958_v10 = vadd.f32 %v10158_v52, %v14853_v19  ;;  %v6615_v32 = vpop.f32.mrb[153].mxu1  ;;  %7072 = vmax.xlane.f32.xlu1 %v14954_v13 }
 0x8ed   :  { %v10159_v57 = vpop.f32.mrb[154].mxu1  ;;  %v14967_v6 = vadd.f32 %v14853_v19, %v6615_v32 }
 0x8ee   :  { %v14962_v29 = vadd.f32 %v10159_v57, %v14853_v19  ;;  %v6618_v11 = vpop.f32.mrb[155].mxu1 }
 0x8ef   :  { %7082 = vmax.xlane.f32.xlu0 %v14958_v10  ;;  %v14970_v51 = vadd.f32 %v14853_v19, %v6618_v11 }
 0x8f0   :  { %7084 = vmax.xlane.f32.xlu1 %v14962_v29 }
 0x8f3   :  { %v10162_v39 = vpop.f32.mrb[156].mxu1  ;;  %7078 = vmax.xlane.f32.xlu0 %v14967_v6 }
 0x8f4   :  { %v14974_v47 = vadd.f32 %v10162_v39, %v14853_v19  ;;  %v6631_v46 = vpop.f32.mrb[157].mxu1  ;;  %7080 = vmax.xlane.f32.xlu1 %v14970_v51 }
 0x8f5   :  { %v10163_v53 = vpop.f32.mrb[158].mxu1  ;;  %v14983_v25 = vadd.f32 %v14853_v19, %v6631_v46 }
 0x8f6   :  { %v14978_v42 = vadd.f32 %v10163_v53, %v14853_v19  ;;  %v6634_v9 = vpop.f32.mrb[159].mxu1 }
 0x8f7   :  { %7090 = vmax.xlane.f32.xlu0 %v14974_v47  ;;  %v14986_v4 = vadd.f32 %v14853_v19, %v6634_v9 }
 0x8f8   :  { %7092 = vmax.xlane.f32.xlu1 %v14978_v42 }
 0x8fb   :  { %v10166_v44 = vpop.f32.mrb[160].mxu1  ;;  %7086 = vmax.xlane.f32.xlu0 %v14983_v25 }
 0x8fc   :  { %v14990_v30 = vadd.f32 %v10166_v44, %v14853_v19  ;;  %v6647_v60 = vpop.f32.mrb[161].mxu1  ;;  %7088 = vmax.xlane.f32.xlu1 %v14986_v4 }
 0x8fd   :  { %v10167_v1 = vpop.f32.mrb[162].mxu1  ;;  %v14999_v31 = vadd.f32 %v14853_v19, %v6647_v60 }
 0x8fe   :  { %v14994_v61 = vadd.f32 %v10167_v1, %v14853_v19  ;;  %v6650_v22 = vpop.f32.mrb[163].mxu1 }
 0x8ff   :  { %7098 = vmax.xlane.f32.xlu0 %v14990_v30  ;;  %v15002_v15 = vadd.f32 %v14853_v19, %v6650_v22 }
 0x900   :  { %7100 = vmax.xlane.f32.xlu1 %v14994_v61 }
 0x903   :  { %v10170_v20 = vpop.f32.mrb[164].mxu1  ;;  %7094 = vmax.xlane.f32.xlu0 %v14999_v31 }
 0x904   :  { %v15006_v45 = vadd.f32 %v10170_v20, %v14853_v19  ;;  %v6663_v41 = vpop.f32.mrb[165].mxu1  ;;  %7096 = vmax.xlane.f32.xlu1 %v15002_v15 }
 0x905   :  { %v10171_v58 = vpop.f32.mrb[166].mxu1  ;;  %v15015_v26 = vadd.f32 %v14853_v19, %v6663_v41 }
 0x906   :  { %v15010_v50 = vadd.f32 %v10171_v58, %v14853_v19  ;;  %v6666_v16 = vpop.f32.mrb[167].mxu1 }
 0x907   :  { %7106 = vmax.xlane.f32.xlu0 %v15006_v45  ;;  %17128 = vst [vmem:[#allocation67_spill] sm:$0xff] %v15015_v26  ;;  %v15018_v54 = vadd.f32 %v14853_v19, %v6666_v16 }
 0x908   :  { %17127 = vst [vmem:[#allocation10_spill] sm:$0xff] %v15010_v50  ;;  %7108 = vmax.xlane.f32.xlu1 %v15010_v50 }
 0x909   :  { %17129 = vst [vmem:[#allocation71_spill] sm:$0xff] %v15018_v54 }
 0x90b   :  { %v10174_v12 = vpop.f32.mrb[168].mxu1  ;;  %7102 = vmax.xlane.f32.xlu0 %v15015_v26 }
 0x90c   :  { %v15022_v37 = vadd.f32 %v10174_v12, %v14853_v19  ;;  %v6679_v48 = vpop.f32.mrb[169].mxu1  ;;  %7104 = vmax.xlane.f32.xlu1 %v15018_v54 }
 0x90d   :  { %v10175_v34 = vpop.f32.mrb[170].mxu1  ;;  %v15031_v43 = vadd.f32 %v14853_v19, %v6679_v48 }
 0x90e   :  { %17130 = vst [vmem:[#allocation11_spill] sm:$0xff] %v15022_v37  ;;  %v15026_v33 = vadd.f32 %v10175_v34, %v14853_v19  ;;  %v6682_v63 = vpop.f32.mrb[171].mxu1 }
 0x90f   :  { %7114 = vmax.xlane.f32.xlu0 %v15022_v37  ;;  %17132 = vst [vmem:[#allocation74_spill] sm:$0xff] %v15031_v43  ;;  %v15034_v52 = vadd.f32 %v14853_v19, %v6682_v63 }
 0x910   :  { %17131 = vst [vmem:[#allocation70_spill] sm:$0xff] %v15026_v33  ;;  %7116 = vmax.xlane.f32.xlu1 %v15026_v33 }
 0x911   :  { %17133 = vst [vmem:[#allocation12_spill] sm:$0xff] %v15034_v52 }
 0x913   :  { %v10178_v32 = vpop.f32.mrb[172].mxu1  ;;  %7110 = vmax.xlane.f32.xlu0 %v15031_v43 }
 0x914   :  { %v15038_v57 = vadd.f32 %v10178_v32, %v14853_v19  ;;  %v6695_v11 = vpop.f32.mrb[173].mxu1  ;;  %7112 = vmax.xlane.f32.xlu1 %v15034_v52 }
 0x915   :  { %v10179_v39 = vpop.f32.mrb[174].mxu1  ;;  %v15047_v9 = vadd.f32 %v14853_v19, %v6695_v11 }
 0x916   :  { %17134 = vst [vmem:[#allocation73_spill] sm:$0xff] %v15038_v57  ;;  %v15042_v46 = vadd.f32 %v10179_v39, %v14853_v19  ;;  %v6698_v53 = vpop.f32.mrb[175].mxu1 }
 0x917   :  { %7122 = vmax.xlane.f32.xlu0 %v15038_v57  ;;  %17136 = vst [vmem:[#allocation13_spill] sm:$0xff] %v15047_v9  ;;  %v15050_v44 = vadd.f32 %v14853_v19, %v6698_v53 }
 0x918   :  { %17135 = vst [vmem:[#allocation77_spill] sm:$0xff] %v15042_v46  ;;  %7124 = vmax.xlane.f32.xlu1 %v15042_v46 }
 0x919   :  { %17137 = vst [vmem:[#allocation76_spill] sm:$0xff] %v15050_v44 }
 0x91b   :  { %v10182_v60 = vpop.f32.mrb[176].mxu1  ;;  %7118 = vmax.xlane.f32.xlu0 %v15047_v9 }
 0x91c   :  { %v15054_v1 = vadd.f32 %v10182_v60, %v14853_v19  ;;  %v6711_v22 = vpop.f32.mrb[177].mxu1  ;;  %7120 = vmax.xlane.f32.xlu1 %v15050_v44 }
 0x91d   :  { %v10183_v20 = vpop.f32.mrb[178].mxu1  ;;  %v15063_v16 = vadd.f32 %v14853_v19, %v6711_v22 }
 0x91e   :  { %17138 = vst [vmem:[#allocation80_spill] sm:$0xff] %v15054_v1  ;;  %v15058_v41 = vadd.f32 %v10183_v20, %v14853_v19  ;;  %v6714_v58 = vpop.f32.mrb[179].mxu1 }
 0x91f   :  { %7130 = vmax.xlane.f32.xlu0 %v15054_v1  ;;  %17140 = vst [vmem:[#allocation79_spill] sm:$0xff] %v15063_v16  ;;  %v15066_v12 = vadd.f32 %v14853_v19, %v6714_v58 }
 0x920   :  { %17139 = vst [vmem:[#allocation14_spill] sm:$0xff] %v15058_v41  ;;  %7132 = vmax.xlane.f32.xlu1 %v15058_v41 }
 0x921   :  { %17141 = vst [vmem:[#allocation83_spill] sm:$0xff] %v15066_v12 }
 0x923   :  { %v10186_v48 = vpop.f32.mrb[180].mxu1  ;;  %7126 = vmax.xlane.f32.xlu0 %v15063_v16 }
 0x924   :  { %v15070_v34 = vadd.f32 %v10186_v48, %v14853_v19  ;;  %v6727_v63 = vpop.f32.mrb[181].mxu1  ;;  %7128 = vmax.xlane.f32.xlu1 %v15066_v12 }
 0x925   :  { %v10187_v32 = vpop.f32.mrb[182].mxu1  ;;  %v15079_v53 = vadd.f32 %v14853_v19, %v6727_v63 }
 0x926   :  { %17142 = vst [vmem:[#allocation15_spill] sm:$0xff] %v15070_v34  ;;  %v15074_v11 = vadd.f32 %v10187_v32, %v14853_v19  ;;  %v6730_v39 = vpop.f32.mrb[183].mxu1 }
 0x927   :  { %7138 = vmax.xlane.f32.xlu0 %v15070_v34  ;;  %17144 = vst [vmem:[#allocation86_spill] sm:$0xff] %v15079_v53  ;;  %v15082_v60 = vadd.f32 %v14853_v19, %v6730_v39 }
 0x928   :  { %17143 = vst [vmem:[#allocation82_spill] sm:$0xff] %v15074_v11  ;;  %7140 = vmax.xlane.f32.xlu1 %v15074_v11 }
 0x929   :  { %17145 = vst [vmem:[#allocation16_spill] sm:$0xff] %v15082_v60 }
 0x92b   :  { %v10190_v22 = vpop.f32.mrb[184].mxu1  ;;  %7134 = vmax.xlane.f32.xlu0 %v15079_v53 }
 0x92c   :  { %v15086_v20 = vadd.f32 %v10190_v22, %v14853_v19  ;;  %v6743_v58 = vpop.f32.mrb[185].mxu1  ;;  %7136 = vmax.xlane.f32.xlu1 %v15082_v60 }
 0x92d   :  { %v10191_v48 = vpop.f32.mrb[186].mxu1  ;;  %v15095_v63 = vadd.f32 %v14853_v19, %v6743_v58 }
 0x92e   :  { %17146 = vst [vmem:[#allocation85_spill] sm:$0xff] %v15086_v20  ;;  %v15090_v32 = vadd.f32 %v10191_v48, %v14853_v19  ;;  %v6746_v11 = vpop.f32.mrb[187].mxu1 }
 0x92f   :  { %7146 = vmax.xlane.f32.xlu0 %v15086_v20  ;;  %17148 = vst [vmem:[#allocation17_spill] sm:$0xff] %v15095_v63  ;;  %v15098_v39 = vadd.f32 %v14853_v19, %v6746_v11 }
 0x930   :  { %17147 = vst [vmem:[#allocation89_spill] sm:$0xff] %v15090_v32  ;;  %7148 = vmax.xlane.f32.xlu1 %v15090_v32 }
 0x931   :  { %17149 = vst [vmem:[#allocation88_spill] sm:$0xff] %v15098_v39 }
 0x933   :  { %v10194_v22 = vpop.f32.mrb[188].mxu1  ;;  %7142 = vmax.xlane.f32.xlu0 %v15095_v63 }
 0x934   :  { %v15102_v60 = vadd.f32 %v10194_v22, %v14853_v19  ;;  %v6759_v53 = vpop.f32.mrb[189].mxu1  ;;  %7144 = vmax.xlane.f32.xlu1 %v15098_v39 }
 0x935   :  { %v10195_v48 = vpop.f32.mrb[190].mxu1  ;;  %v15111_v11 = vadd.f32 %v14853_v19, %v6759_v53 }
 0x936   :  { %17150 = vst [vmem:[#allocation92_spill] sm:$0xff] %v15102_v60  ;;  %v15106_v20 = vadd.f32 %v10195_v48, %v14853_v19  ;;  %v6762_v32 = vpop.f32.mrb[191].mxu1 }
 0x937   :  { %7154 = vmax.xlane.f32.xlu0 %v15102_v60  ;;  %17152 = vst [vmem:[#allocation91_spill] sm:$0xff] %v15111_v11  ;;  %v15114_v58 = vadd.f32 %v14853_v19, %v6762_v32 }
 0x938   :  { %17151 = vst [vmem:[#allocation18_spill] sm:$0xff] %v15106_v20  ;;  %7156 = vmax.xlane.f32.xlu1 %v15106_v20 }
 0x939   :  { %17153 = vst [vmem:[#allocation19_spill] sm:$0xff] %v15114_v58 }
 0x93b   :  { %v10198_v22 = vpop.f32.mrb[192].mxu1  ;;  %7150 = vmax.xlane.f32.xlu0 %v15111_v11 }
 0x93c   :  { %v15118_v39 = vadd.f32 %v10198_v22, %v14853_v19  ;;  %v6775_v63 = vpop.f32.mrb[193].mxu1  ;;  %7152 = vmax.xlane.f32.xlu1 %v15114_v58 }
 0x93d   :  { %v10199_v48 = vpop.f32.mrb[194].mxu1  ;;  %v15127_v53 = vadd.f32 %v14853_v19, %v6775_v63 }
 0x93e   :  { %17154 = vst [vmem:[#allocation20_spill] sm:$0xff] %v15118_v39  ;;  %v15122_v60 = vadd.f32 %v10199_v48, %v14853_v19  ;;  %v6778_v20 = vpop.f32.mrb[195].mxu1 }
 0x93f   :  { %7162 = vmax.xlane.f32.xlu0 %v15118_v39  ;;  %17156 = vst [vmem:[#allocation23_spill] sm:$0xff] %v15127_v53  ;;  %v15130_v32 = vadd.f32 %v14853_v19, %v6778_v20 }
 0x940   :  { %17155 = vst [vmem:[#allocation21_spill] sm:$0xff] %v15122_v60  ;;  %7164 = vmax.xlane.f32.xlu1 %v15122_v60 }
 0x941   :  { %17157 = vst [vmem:[#allocation24_spill] sm:$0xff] %v15130_v32 }
 0x943   :  { %v10202_v22 = vpop.f32.mrb[196].mxu1  ;;  %7158 = vmax.xlane.f32.xlu0 %v15127_v53 }
 0x944   :  { %v15134_v58 = vadd.f32 %v10202_v22, %v14853_v19  ;;  %v6791_v11 = vpop.f32.mrb[197].mxu1  ;;  %7160 = vmax.xlane.f32.xlu1 %v15130_v32 }
 0x945   :  { %v10203_v48 = vpop.f32.mrb[198].mxu1  ;;  %v15143_v20 = vadd.f32 %v14853_v19, %v6791_v11 }
 0x946   :  { %17158 = vst [vmem:[#allocation25_spill] sm:$0xff] %v15134_v58  ;;  %v15138_v39 = vadd.f32 %v10203_v48, %v14853_v19  ;;  %v6794_v60 = vpop.f32.mrb[199].mxu1 }
 0x947   :  { %7170 = vmax.xlane.f32.xlu0 %v15134_v58  ;;  %17160 = vst [vmem:[#allocation27_spill] sm:$0xff] %v15143_v20  ;;  %v15146_v63 = vadd.f32 %v14853_v19, %v6794_v60 }
 0x948   :  { %17159 = vst [vmem:[#allocation26_spill] sm:$0xff] %v15138_v39  ;;  %7172 = vmax.xlane.f32.xlu1 %v15138_v39 }
 0x949   :  { %17161 = vst [vmem:[#allocation28_spill] sm:$0xff] %v15146_v63 }
 0x94b   :  { %v7035_v22 = vpop.xlane.xlu1 %7034  ;;  %v10206_v53 = vpop.f32.mrb[200].mxu1  ;;  %7166 = vmax.xlane.f32.xlu0 %v15143_v20 }
 0x94c   :  { %v15150_v32 = vsub.f32 %v14858_v23, %v7035_v22  ;;  %v15153_v48 = vadd.f32 %v10206_v53, %v14853_v19  ;;  %v6807_v34 = vpop.f32.mrb[201].mxu1  ;;  %7168 = vmax.xlane.f32.xlu1 %v15146_v63  ;;  %v7031_v39 = vpop.xlane.xlu0 %7030 }
 0x94d   :  { %v10207_v58 = vpop.f32.mrb[202].mxu1  ;;  %v15162_v23 = vsub.f32 %v14861_v35, %v7031_v39  ;;  %v15169_v63 = vadd.f32 %v14853_v19, %v6807_v34 }
 0x94e   :  { %17162 = vst [vmem:[#allocation29_spill] sm:$0xff] %v15150_v32  ;;  %17163 = vst [vmem:[#allocation30_spill] sm:$0xff] %v15153_v48  ;;  %v15157_v11 = vadd.f32 %v10207_v58, %v14853_v19  ;;  %v6810_v60 = vpop.f32.mrb[203].mxu1  ;;  %v7418_v12 = vmul.f32 1.442695, %v15150_v32 }
 0x94f   :  { %v7037_v16 = vpop.xlane.xlu1 %7036  ;;  %7178 = vmax.xlane.f32.xlu0 %v15153_v48  ;;  %17165 = vst [vmem:[#allocation32_spill] sm:$0xff] %v15162_v23  ;;  %17167 = vst [vmem:[#allocation34_spill] sm:$0xff] %v15169_v63  ;;  %v15175_v20 = vadd.f32 %v14853_v19, %v6810_v60 }
 0x950   :  { %17164 = vst [vmem:[#allocation31_spill] sm:$0xff] %v15157_v11  ;;  %v15165_v53 = vsub.f32 %v14866_v8, %v7037_v16  ;;  %7180 = vmax.xlane.f32.xlu1 %v15157_v11  ;;  %v7033_v22 = vpop.xlane.xlu0 %7032  ;;  %10913 = vpow2.f32 %v7418_v12  ;;  %v7414_v8 = vmul.f32 1.442695, %v15162_v23 }
 0x951   :  { %v15172_v58 = vsub.f32 %v14870_v38, %v7033_v22  ;;  %17169 = vst [vmem:[#allocation36_spill] sm:$0xff] %v15175_v20 }
 0x952   :  { %17166 = vst [vmem:[#allocation33_spill] sm:$0xff] %v15165_v53  ;;  %v7420_v48 = vmul.f32 1.442695, %v15165_v53 }
 0x953   :  { %17168 = vst [vmem:[#allocation35_spill] sm:$0xff] %v15172_v58  ;;  %v10210_v35 = vpop.f32.mrb[204].mxu1  ;;  %7174 = vmax.xlane.f32.xlu0 %v15169_v63  ;;  %v7416_v39 = vmul.f32 1.442695, %v15172_v58 }
 0x954   :  { %10915 = vpow2.f32 %v7420_v48  ;;  %v15181_v16 = vadd.f32 %v10210_v35, %v14853_v19  ;;  %v6823_v34 = vpop.f32.mrb[205].mxu1  ;;  %7176 = vmax.xlane.f32.xlu1 %v15175_v20  ;;  %v7043_v38 = vpop.xlane.xlu0 %7042 }
 0x955   :  { %v7045_v60 = vpop.xlane.xlu1 %7044  ;;  %v10211_v22 = vpop.f32.mrb[206].mxu1  ;;  %10917 = vpow2.f32 %v7414_v8  ;;  %v15191_v35 = vadd.f32 %v14853_v19, %v6823_v34 }
 0x956   :  { %17170 = vst [vmem:[#allocation37_spill] sm:$0xff] %v15181_v16  ;;  %v15186_v11 = vadd.f32 %v10211_v22, %v14853_v19  ;;  %v6826_v12 = vpop.f32.mrb[207].mxu1  ;;  %10919 = vpow2.f32 %v7416_v39  ;;  %v15198_v22 = vsub.f32 %v14875_v21, %v7043_v38  ;;  %v15202_v39 = vsub.f32 %v14878_v0, %v7045_v60 }
 0x957   :  { %7186 = vmax.xlane.f32.xlu0 %v15181_v16  ;;  %17172 = vst [vmem:[#allocation39_spill] sm:$0xff] %v15191_v35  ;;  %v15194_v63 = vadd.f32 %v14853_v19, %v6826_v12 }
 0x958   :  { %17171 = vst [vmem:[#allocation38_spill] sm:$0xff] %v15186_v11  ;;  %7188 = vmax.xlane.f32.xlu1 %v15186_v11  ;;  %v7039_v48 = vpop.xlane.xlu0 %7038  ;;  %17174 = vst [vmem:[#allocation41_spill] sm:$0xff] %v15198_v22  ;;  %v7426_v12 = vmul.f32 1.442695, %v15198_v22  ;;  %v7428_v38 = vmul.f32 1.442695, %v15202_v39 }
 0x959   :  { %v7041_v20 = vpop.xlane.xlu1 %7040  ;;  %17173 = vst [vmem:[#allocation40_spill] sm:$0xff] %v15194_v63  ;;  %17175 = vst [vmem:[#allocation2_spill] sm:$0xff] %v15202_v39 }
 0x95a   :  { %v10914_v11 = vpop.eup %10913  ;;  %10921 = vpow2.f32 %v7426_v12 }
 0x95b   :  { %v10214_v41 = vpop.f32.mrb[208].mxu1  ;;  %7182 = vmax.xlane.f32.xlu0 %v15191_v35  ;;  %v15206_v35 = vsub.f32 %v14884_v40, %v7039_v48  ;;  %10923 = vpow2.f32 %v7428_v38 }
 0x95c   :  { %v6839_v1 = vpop.f32.mrb[209].mxu1  ;;  %7184 = vmax.xlane.f32.xlu1 %v15194_v63  ;;  %v7051_v8 = vpop.xlane.xlu0 %7050  ;;  %v15210_v63 = vsub.f32 %v14887_v55, %v7041_v20 }
 0x95d   :  { %v10215_v34 = vpop.f32.mrb[210].mxu1  ;;  %v7053_v16 = vpop.xlane.xlu1 %7052  ;;  %17176 = vst [vmem:[#allocation42_spill] sm:$0xff] %v15206_v35  ;;  %v15225_v38 = vadd.f32 %v14853_v19, %v6839_v1 }
 0x95e   :  { %v10916_v44 = vpop.eup %10915  ;;  %v6842_v9 = vpop.f32.mrb[211].mxu1  ;;  %17177 = vst [vmem:[#allocation44_spill] sm:$0xff] %v15210_v63  ;;  %v7424_v40 = vmul.f32 1.442695, %v15210_v63  ;;  %v15218_v20 = vadd.f32 %v10215_v34, %v14853_v19  ;;  %v15236_v34 = vsub.f32 %v14891_v56, %v7051_v8  ;;  %v15244_v1 = vsub.f32 %v14895_v17, %v7053_v16 }
 0x95f   :  { %7674 = vadd.xlane.f32.xlu0 %v10914_v11  ;;  %v10918_v0 = vpop.eup %10917  ;;  %v7422_v11 = vmul.f32 1.442695, %v15206_v35  ;;  %17180 = vst [vmem:[#allocation43_spill] sm:$0xff] %v15225_v38 }
 0x960   :  { %7676 = vadd.xlane.f32.xlu1 %v10916_v44  ;;  %v7047_v21 = vpop.xlane.xlu0 %7046  ;;  %v10920_v60 = vpop.eup %10919  ;;  %v15215_v44 = vadd.f32 %v10214_v41, %v14853_v19  ;;  %17179 = vst [vmem:[#allocation45_spill] sm:$0xff] %v15218_v20  ;;  %v15230_v41 = vadd.f32 %v14853_v19, %v6842_v9  ;;  %17182 = vst [vmem:[#allocation48_spill] sm:$0xff] %v15236_v34  ;;  %v7434_v56 = vmul.f32 1.442695, %v15236_v34  ;;  %v7436_v17 = vmul.f32 1.442695, %v15244_v1 }
 0x961   :  { %v7049_v58 = vpop.xlane.xlu1 %7048  ;;  %10925 = vpow2.f32 %v7422_v11  ;;  %17183 = vst [vmem:[#allocation3_spill] sm:$0xff] %v15244_v1  ;;  %v15254_v8 = vsub.f32 %v14901_v49, %v7047_v21 }
 0x962   :  { %17178 = vst [vmem:[#allocation47_spill] sm:$0xff] %v15215_v44  ;;  %10927 = vpow2.f32 %v7424_v40  ;;  %17181 = vst [vmem:[#allocation46_spill] sm:$0xff] %v15230_v41  ;;  %v15260_v16 = vsub.f32 %v14904_v2, %v7049_v58 }
 0x963   :  { %v10218_v23 = vpop.f32.mrb[212].mxu1  ;;  %7670 = vadd.xlane.f32.xlu0 %v10918_v0  ;;  %17184 = vst [vmem:[#allocation4_spill] sm:$0xff] %v15254_v8  ;;  %10929 = vpow2.f32 %v7434_v56 }
 0x964   :  { %v6855_v53 = vpop.f32.mrb[213].mxu1  ;;  %7672 = vadd.xlane.f32.xlu1 %v10920_v60  ;;  %v7059_v22 = vpop.xlane.xlu0 %7058  ;;  %17185 = vst [vmem:[#allocation51_spill] sm:$0xff] %v15260_v16  ;;  %10931 = vpow2.f32 %v7436_v17  ;;  %v15273_v2 = vadd.f32 %v10218_v23, %v14853_v19 }
 0x965   :  { %v10219_v48 = vpop.f32.mrb[214].mxu1  ;;  %v7061_v55 = vpop.xlane.xlu1 %7060  ;;  %v15289_v23 = vadd.f32 %v14853_v19, %v6855_v53 }
 0x966   :  { %v6858_v39 = vpop.f32.mrb[215].mxu1  ;;  %17186 = vst [vmem:[#allocation50_spill] sm:$0xff] %v15273_v2  ;;  %v15308_v53 = vsub.f32 %v14912_v28, %v7061_v55 }
 0x967   :  { %7194 = vmax.xlane.f32.xlu0 %v15215_v44  ;;  %v10922_v44 = vpop.eup %10921  ;;  %17188 = vst [vmem:[#allocation54_spill] sm:$0xff] %v15289_v23 }
 0x968   :  { %7196 = vmax.xlane.f32.xlu1 %v15218_v20  ;;  %v15222_v12 = vpop.xlane.xlu0 %7054  ;;  %17191 = vst [vmem:[#allocation60_spill] sm:$0xff] %v15308_v53  ;;  %v7444_v28 = vmul.f32 1.442695, %v15308_v53 }
 0x969   :  { %v15227_v0 = vpop.xlane.xlu1 %7056 }
 0x96a   :  { %v15326_v55 = vsub.f32 %v14921_v14, %v15227_v0 }
 0x96b   :  { %v15232_v60 = vpop.f32.mrb[216].mxu1  ;;  %7190 = vmax.xlane.f32.xlu0 %v15225_v38  ;;  %v10924_v38 = vpop.eup %10923 }
 0x96c   :  { %v15238_v11 = vpop.f32.mrb[217].mxu1  ;;  %7192 = vmax.xlane.f32.xlu1 %v15230_v41  ;;  %v15241_v40 = vpop.xlane.xlu0 %7066  ;;  %17193 = vst [vmem:[#allocation66_spill] sm:$0xff] %v15326_v55  ;;  %v7440_v53 = vmul.f32 1.442695, %v15326_v55  ;;  %v15340_v14 = vadd.f32 %v15232_v60, %v14853_v19 }
 0x96d   :  { %v15246_v20 = vpop.f32.mrb[218].mxu1  ;;  %v15248_v9 = vpop.xlane.xlu1 %7068  ;;  %v15358_v60 = vadd.f32 %v14853_v19, %v15238_v11 }
 0x96e   :  { %v15250_v63 = vpop.f32.mrb[219].mxu1  ;;  %v10926_v46 = vpop.eup %10925  ;;  %17194 = vst [vmem:[#allocation69_spill] sm:$0xff] %v15340_v14 }
 0x96f   :  { %7682 = vadd.xlane.f32.xlu0 %v10922_v44  ;;  %v10928_v32 = vpop.eup %10927  ;;  %v7430_v44 = vmul.f32 1.442695, %v15254_v8  ;;  %17196 = vst [vmem:[#allocation75_spill] sm:$0xff] %v15358_v60 }
 0x970   :  { %7684 = vadd.xlane.f32.xlu1 %v10924_v38  ;;  %v15256_v41 = vpop.xlane.xlu0 %7062  ;;  %v7432_v38 = vmul.f32 1.442695, %v15260_v16  ;;  %v15294_v16 = vadd.f32 %v14853_v19, %v6858_v39  ;;  %v10930_v8 = vpop.eup %10929 }
 0x971   :  { %v15262_v35 = vpop.xlane.xlu1 %7064  ;;  %10933 = vpow2.f32 %v7430_v44 }
 0x972   :  { %10935 = vpow2.f32 %v7432_v38  ;;  %17189 = vst [vmem:[#allocation49_spill] sm:$0xff] %v15294_v16 }
 0x973   :  { %v15264_v57 = vpop.f32.mrb[220].mxu1  ;;  %7678 = vadd.xlane.f32.xlu0 %v10926_v46  ;;  %v15280_v46 = vadd.f32 %v10219_v48, %v14853_v19 }
 0x974   :  { %v15267_v49 = vpop.f32.mrb[221].mxu1  ;;  %7680 = vadd.xlane.f32.xlu1 %v10928_v32  ;;  %v15269_v21 = vpop.xlane.xlu0 %7074 }
 0x975   :  { %v15275_v58 = vpop.f32.mrb[222].mxu1  ;;  %v15277_v1 = vpop.xlane.xlu1 %7076  ;;  %17187 = vst [vmem:[#allocation53_spill] sm:$0xff] %v15280_v46 }
 0x976   :  { %v15282_v56 = vpop.f32.mrb[223].mxu1 }
 0x977   :  { %7202 = vmax.xlane.f32.xlu0 %v15273_v2  ;;  %v15300_v2 = vsub.f32 %v14908_v62, %v7059_v22  ;;  %v15319_v22 = vsub.f32 %v14918_v59, %v15222_v12 }
 0x978   :  { %7204 = vmax.xlane.f32.xlu1 %v15280_v46  ;;  %v15286_v32 = vpop.xlane.xlu0 %7070 }
 0x979   :  { %v15291_v17 = vpop.xlane.xlu1 %7072  ;;  %17190 = vst [vmem:[#allocation57_spill] sm:$0xff] %v15300_v2  ;;  %v7442_v62 = vmul.f32 1.442695, %v15300_v2  ;;  %17192 = vst [vmem:[#allocation63_spill] sm:$0xff] %v15319_v22  ;;  %v7438_v59 = vmul.f32 1.442695, %v15319_v22 }
 0x97b   :  { %v15296_v48 = vpop.f32.mrb[224].mxu1  ;;  %7198 = vmax.xlane.f32.xlu0 %v15289_v23  ;;  %v10932_v23 = vpop.eup %10931  ;;  %10937 = vpow2.f32 %v7442_v62 }
 0x97c   :  { %v15302_v44 = vpop.f32.mrb[225].mxu1  ;;  %7200 = vmax.xlane.f32.xlu1 %v15294_v16  ;;  %v15305_v38 = vpop.xlane.xlu0 %7082  ;;  %10939 = vpow2.f32 %v7444_v28 }
 0x97d   :  { %v15310_v46 = vpop.f32.mrb[226].mxu1  ;;  %v15312_v39 = vpop.xlane.xlu1 %7084  ;;  %10941 = vpow2.f32 %v7438_v59  ;;  %v15371_v59 = vsub.f32 %v14925_v7, %v15241_v40  ;;  %v15391_v40 = vsub.f32 %v14935_v3, %v15256_v41 }
 0x97e   :  { %v15314_v34 = vpop.f32.mrb[227].mxu1  ;;  %v10934_v43 = vpop.eup %10933  ;;  %10943 = vpow2.f32 %v7440_v53  ;;  %v15380_v53 = vsub.f32 %v14929_v5, %v15248_v9  ;;  %v15398_v9 = vsub.f32 %v14938_v27, %v15262_v35  ;;  %v15412_v27 = vadd.f32 %v15264_v57, %v14853_v19 }
 0x97f   :  { %7690 = vadd.xlane.f32.xlu0 %v10930_v8  ;;  %v10936_v33 = vpop.eup %10935  ;;  %17198 = vst [vmem:[#allocation81_spill] sm:$0xff] %v15371_v59  ;;  %v7450_v7 = vmul.f32 1.442695, %v15371_v59  ;;  %17200 = vst [vmem:[#allocation87_spill] sm:$0xff] %v15391_v40  ;;  %v7446_v3 = vmul.f32 1.442695, %v15391_v40  ;;  %v15430_v57 = vadd.f32 %v14853_v19, %v15267_v49 }
 0x980   :  { %7692 = vadd.xlane.f32.xlu1 %v10932_v23  ;;  %v15321_v16 = vpop.xlane.xlu0 %7078  ;;  %17199 = vst [vmem:[#allocation84_spill] sm:$0xff] %v15380_v53  ;;  %v7452_v5 = vmul.f32 1.442695, %v15380_v53  ;;  %17201 = vst [vmem:[#allocation90_spill] sm:$0xff] %v15398_v9  ;;  %v7448_v53 = vmul.f32 1.442695, %v15398_v9 }
 0x981   :  { %v15328_v52 = vpop.xlane.xlu1 %7080  ;;  %10945 = vpow2.f32 %v7450_v7  ;;  %17202 = vst [vmem:[#allocation93_spill] sm:$0xff] %v15412_v27  ;;  %17204 = vst [vmem:[#allocation5_spill] sm:$0xff] %v15430_v57 }
 0x982   :  { %10947 = vpow2.f32 %v7452_v5 }
 0x983   :  { %v15330_v8 = vpop.f32.mrb[228].mxu1  ;;  %7686 = vadd.xlane.f32.xlu0 %v10934_v43  ;;  %v15348_v43 = vadd.f32 %v15246_v20, %v14853_v19  ;;  %v15364_v20 = vadd.f32 %v14853_v19, %v15250_v63  ;;  %10949 = vpow2.f32 %v7446_v3  ;;  %v15443_v3 = vsub.f32 %v14942_v18, %v15269_v21 }
 0x984   :  { %v15333_v12 = vpop.f32.mrb[229].mxu1  ;;  %7688 = vadd.xlane.f32.xlu1 %v10936_v33  ;;  %v15335_v23 = vpop.xlane.xlu0 %7090  ;;  %10951 = vpow2.f32 %v7448_v53  ;;  %v15452_v53 = vsub.f32 %v14946_v24, %v15277_v1  ;;  %v15463_v21 = vsub.f32 %v14951_v36, %v15286_v32  ;;  %v15470_v1 = vsub.f32 %v14954_v13, %v15291_v17 }
 0x985   :  { %v15342_v0 = vpop.f32.mrb[230].mxu1  ;;  %v15344_v2 = vpop.xlane.xlu1 %7092  ;;  %17195 = vst [vmem:[#allocation72_spill] sm:$0xff] %v15348_v43  ;;  %17197 = vst [vmem:[#allocation78_spill] sm:$0xff] %v15364_v20  ;;  %v7458_v18 = vmul.f32 1.442695, %v15443_v3  ;;  %v15484_v13 = vadd.f32 %v15296_v48, %v14853_v19  ;;  %v15502_v48 = vadd.f32 %v14853_v19, %v15302_v44 }
 0x986   :  { %v15350_v62 = vpop.f32.mrb[231].mxu1  ;;  %v10938_v22 = vpop.eup %10937  ;;  %17207 = vst [vmem:[#allocation22_spill] sm:$0xff] %v15443_v3  ;;  %17209 = vst [vmem:[#allocation55_spill] sm:$0xff] %v15452_v53  ;;  %v7460_v24 = vmul.f32 1.442695, %v15452_v53 }
 0x987   :  { %7210 = vmax.xlane.f32.xlu0 %v15340_v14  ;;  %v10940_v37 = vpop.eup %10939  ;;  %17212 = vst [vmem:[#allocation7_spill] sm:$0xff] %v15463_v21  ;;  %17213 = vst [vmem:[#allocation8_spill] sm:$0xff] %v15470_v1  ;;  %10953 = vpow2.f32 %v7458_v18  ;;  %v7454_v36 = vmul.f32 1.442695, %v15463_v21  ;;  %v7456_v53 = vmul.f32 1.442695, %v15470_v1 }
 0x988   :  { %7212 = vmax.xlane.f32.xlu1 %v15348_v43  ;;  %v15354_v33 = vpop.xlane.xlu0 %7086  ;;  %v10942_v26 = vpop.eup %10941  ;;  %10955 = vpow2.f32 %v7460_v24  ;;  %17214 = vst [vmem:[#allocation62_spill] sm:$0xff] %v15484_v13  ;;  %17216 = vst [vmem:[#allocation61_spill] sm:$0xff] %v15502_v48 }
 0x989   :  { %v15360_v28 = vpop.xlane.xlu1 %7088  ;;  %v10944_v50 = vpop.eup %10943  ;;  %10957 = vpow2.f32 %v7454_v36  ;;  %v15515_v36 = vsub.f32 %v14958_v10, %v15305_v38  ;;  %v15535_v38 = vsub.f32 %v14967_v6, %v15321_v16 }
 0x98a   :  { %10959 = vpow2.f32 %v7456_v53  ;;  %v15524_v53 = vsub.f32 %v14962_v29, %v15312_v39  ;;  %v15542_v39 = vsub.f32 %v14970_v51, %v15328_v52  ;;  %v15557_v51 = vld [vmem:[%s16647_s10] ss:$0 sm:$0xff] }
 0x98b   :  { %v15366_v55 = vpop.f32.mrb[232].mxu1  ;;  %7206 = vmax.xlane.f32.xlu0 %v15358_v60  ;;  %v10946_v40 = vpop.eup %10945  ;;  %17218 = vst [vmem:[#allocation9_spill] sm:$0xff] %v15515_v36  ;;  %v7466_v10 = vmul.f32 1.442695, %v15515_v36  ;;  %17223 = vst [vmem:[#allocation98_spill] sm:$0xff] %v15535_v38  ;;  %v15561_v52 = vadd.f32 %v15557_v51, %v15330_v8  ;;  %v15579_v8 = vadd.f32 %v15557_v51, %v15333_v12 }
 0x98c   :  { %v15373_v43 = vpop.f32.mrb[233].mxu1  ;;  %7208 = vmax.xlane.f32.xlu1 %v15364_v20  ;;  %v15376_v11 = vpop.xlane.xlu0 %7098  ;;  %17220 = vst [vmem:[#allocation95_spill] sm:$0xff] %v15524_v53  ;;  %v7468_v29 = vmul.f32 1.442695, %v15524_v53  ;;  %17224 = vst [vmem:[#allocation99_spill] sm:$0xff] %v15542_v39  ;;  %v15597_v12 = vsub.f32 %v14978_v42, %v15344_v2  ;;  %v15611_v42 = vsub.f32 %v14986_v4, %v15360_v28 }
 0x98d   :  { %v15382_v63 = vpop.f32.mrb[234].mxu1  ;;  %v15384_v14 = vpop.xlane.xlu1 %7100  ;;  %10961 = vpow2.f32 %v7466_v10  ;;  %v7462_v6 = vmul.f32 1.442695, %v15535_v38  ;;  %v7464_v53 = vmul.f32 1.442695, %v15542_v39  ;;  %17225 = vst [vmem:[#allocation100_spill] sm:$0xff] %v15561_v52 }
 0x98e   :  { %v15386_v60 = vpop.f32.mrb[235].mxu1  ;;  %10963 = vpow2.f32 %v7468_v29  ;;  %17227 = vst [vmem:[#allocation102_spill] sm:$0xff] %v15579_v8  ;;  %17230 = vst [vmem:[#allocation105_spill] sm:$0xff] %v15597_v12  ;;  %v15627_v28 = vadd.f32 %v15557_v51, %v15382_v63  ;;  %v15646_v63 = vsub.f32 %v14990_v30, %v15376_v11 }
 0x98f   :  { %7698 = vadd.xlane.f32.xlu0 %v10938_v22  ;;  %10965 = vpow2.f32 %v7462_v6  ;;  %v15590_v6 = vsub.f32 %v14974_v47, %v15335_v23  ;;  %v7476_v23 = vmul.f32 1.442695, %v15597_v12  ;;  %17233 = vst [vmem:[#allocation108_spill] sm:$0xff] %v15611_v42 }
 0x990   :  { %7700 = vadd.xlane.f32.xlu1 %v10940_v37  ;;  %v15393_v20 = vpop.xlane.xlu0 %7094  ;;  %10967 = vpow2.f32 %v7464_v53  ;;  %17235 = vst [vmem:[#allocation110_spill] sm:$0xff] %v15627_v28  ;;  %17238 = vst [vmem:[#allocation113_spill] sm:$0xff] %v15646_v63 }
 0x991   :  { %v15400_v54 = vpop.xlane.xlu1 %7096  ;;  %17229 = vst [vmem:[#allocation104_spill] sm:$0xff] %v15590_v6 }
 0x993   :  { %v15402_v22 = vpop.f32.mrb[236].mxu1  ;;  %7694 = vadd.xlane.f32.xlu0 %v10942_v26  ;;  %v15420_v26 = vadd.f32 %v15275_v58, %v14853_v19  ;;  %v15436_v58 = vadd.f32 %v14853_v19, %v15282_v56 }
 0x994   :  { %v15405_v41 = vpop.f32.mrb[237].mxu1  ;;  %7696 = vadd.xlane.f32.xlu1 %v10944_v50  ;;  %v15407_v37 = vpop.xlane.xlu0 %7106 }
 0x995   :  { %v15414_v35 = vpop.f32.mrb[238].mxu1  ;;  %v15416_v59 = vpop.xlane.xlu1 %7108  ;;  %17203 = vst [vmem:[#allocation94_spill] sm:$0xff] %v15420_v26  ;;  %17205 = vst [vmem:[#allocation56_spill] sm:$0xff] %v15436_v58 }
 0x996   :  { %v15422_v7 = vpop.f32.mrb[239].mxu1 }
 0x997   :  { %7218 = vmax.xlane.f32.xlu0 %v15412_v27 }
 0x998   :  { %7220 = vmax.xlane.f32.xlu1 %v15420_v26  ;;  %v15426_v50 = vpop.xlane.xlu0 %7102 }
 0x999   :  { %v15432_v5 = vpop.xlane.xlu1 %7104 }
 0x99b   :  { %v15438_v9 = vpop.f32.mrb[240].mxu1  ;;  %7214 = vmax.xlane.f32.xlu0 %v15430_v57 }
 0x99c   :  { %17206 = vst [vmem:[#allocation52_spill] sm:$0xff] %v15438_v9  ;;  %v15445_v26 = vpop.f32.mrb[241].mxu1  ;;  %7216 = vmax.xlane.f32.xlu1 %v15436_v58  ;;  %v15448_v49 = vpop.xlane.xlu0 %7114 }
 0x99d   :  { %17208 = vst [vmem:[#allocation6_spill] sm:$0xff] %v15448_v49  ;;  %v15454_v56 = vpop.f32.mrb[242].mxu1  ;;  %v15456_v27 = vpop.xlane.xlu1 %7116 }
 0x99e   :  { %17210 = vst [vmem:[#allocation59_spill] sm:$0xff] %v15456_v27  ;;  %v15458_v57 = vpop.f32.mrb[243].mxu1  ;;  %v10948_v9 = vpop.eup %10947 }
 0x99f   :  { %17211 = vst [vmem:[#allocation58_spill] sm:$0xff] %v15458_v57  ;;  %7706 = vadd.xlane.f32.xlu0 %v10946_v40  ;;  %v10950_v49 = vpop.eup %10949 }
 0x9a0   :  { %7708 = vadd.xlane.f32.xlu1 %v10948_v9  ;;  %v15465_v58 = vpop.xlane.xlu0 %7110  ;;  %v10952_v57 = vpop.eup %10951 }
 0x9a1   :  { %v15472_v27 = vpop.xlane.xlu1 %7112 }
 0x9a3   :  { %v15474_v40 = vpop.f32.mrb[244].mxu1  ;;  %7702 = vadd.xlane.f32.xlu0 %v10950_v49  ;;  %v15492_v49 = vadd.f32 %v15310_v46, %v14853_v19  ;;  %v15508_v46 = vadd.f32 %v14853_v19, %v15314_v34 }
 0x9a4   :  { %v15477_v32 = vpop.f32.mrb[245].mxu1  ;;  %7704 = vadd.xlane.f32.xlu1 %v10952_v57  ;;  %v15479_v9 = vpop.xlane.xlu0 %7122 }
 0x9a5   :  { %v15486_v17 = vpop.f32.mrb[246].mxu1  ;;  %v15488_v3 = vpop.xlane.xlu1 %7124  ;;  %17215 = vst [vmem:[#allocation65_spill] sm:$0xff] %v15492_v49  ;;  %17217 = vst [vmem:[#allocation64_spill] sm:$0xff] %v15508_v46 }
 0x9a6   :  { %v15494_v18 = vpop.f32.mrb[247].mxu1 }
 0x9a7   :  { %7226 = vmax.xlane.f32.xlu0 %v15484_v13  ;;  %v10954_v13 = vpop.eup %10953 }
 0x9a8   :  { %7228 = vmax.xlane.f32.xlu1 %v15492_v49  ;;  %v15498_v57 = vpop.xlane.xlu0 %7118  ;;  %v10956_v21 = vpop.eup %10955 }
 0x9a9   :  { %v15504_v24 = vpop.xlane.xlu1 %7120 }
 0x9ab   :  { %v15510_v1 = vpop.f32.mrb[248].mxu1  ;;  %7222 = vmax.xlane.f32.xlu0 %v15502_v48 }
 0x9ac   :  { %v15517_v49 = vpop.f32.mrb[249].mxu1  ;;  %7224 = vmax.xlane.f32.xlu1 %v15508_v46  ;;  %v15520_v44 = vpop.xlane.xlu0 %7130 }
 0x9ad   :  { %17219 = vst [vmem:[#allocation68_spill] sm:$0xff] %v15520_v44  ;;  %v15526_v19 = vpop.f32.mrb[250].mxu1  ;;  %v15528_v34 = vpop.xlane.xlu1 %7132 }
 0x9ae   :  { %17221 = vst [vmem:[#allocation96_spill] sm:$0xff] %v15528_v34  ;;  %v15530_v48 = vpop.f32.mrb[251].mxu1  ;;  %v10958_v44 = vpop.eup %10957 }
 0x9af   :  { %17222 = vst [vmem:[#allocation97_spill] sm:$0xff] %v15530_v48  ;;  %7714 = vadd.xlane.f32.xlu0 %v10954_v13  ;;  %v10960_v48 = vpop.eup %10959 }
 0x9b0   :  { %7716 = vadd.xlane.f32.xlu1 %v10956_v21  ;;  %v15537_v46 = vpop.xlane.xlu0 %7126 }
 0x9b1   :  { %v15544_v34 = vpop.xlane.xlu1 %7128 }
 0x9b3   :  { %v15546_v13 = vpop.f32.mrb[252].mxu1  ;;  %7710 = vadd.xlane.f32.xlu0 %v10958_v44 }
 0x9b4   :  { %v15549_v16 = vpop.f32.mrb[253].mxu1  ;;  %7712 = vadd.xlane.f32.xlu1 %v10960_v48  ;;  %v15551_v21 = vpop.xlane.xlu0 %7138  ;;  %v15569_v48 = vadd.f32 %v15557_v51, %v15342_v0  ;;  %v15585_v0 = vadd.f32 %v15557_v51, %v15350_v62  ;;  %v7474_v62 = vmul.f32 1.442695, %v15590_v6  ;;  %v17281_v6 = vld [vmem:[#allocation32_spill] sm:$0xff] }
 0x9b5   :  { %v15563_v44 = vpop.f32.mrb[254].mxu1  ;;  %v15565_v10 = vpop.xlane.xlu1 %7140 }
 0x9b6   :  { %17226 = vst [vmem:[#allocation101_spill] sm:$0xff] %v15569_v48  ;;  %v15571_v29 = vpop.f32.mrb[255].mxu1  ;;  %17228 = vst [vmem:[#allocation103_spill] sm:$0xff] %v15585_v0  ;;  %10969 = vpow2.f32 %v7474_v62  ;;  %v15641_v62 = vadd.f32 %v15557_v51, %v15386_v60  ;;  %v7482_v60 = vmul.f32 1.442695, %v15646_v63 }
 0x9b7   :  { %7234 = vmax.xlane.f32.xlu0 %v15561_v52  ;;  %v10962_v52 = vpop.eup %10961  ;;  %10971 = vpow2.f32 %v7476_v23 }
 0x9b8   :  { %7236 = vmax.xlane.f32.xlu1 %v15569_v48  ;;  %v15575_v39 = vpop.xlane.xlu0 %7134  ;;  %v10964_v36 = vpop.eup %10963  ;;  %17237 = vst [vmem:[#allocation112_spill] sm:$0xff] %v15641_v62 }
 0x9b9   :  { %v15581_v38 = vpop.xlane.xlu1 %7136 }
 0x9bb   :  { %7230 = vmax.xlane.f32.xlu0 %v15579_v8  ;;  %v15604_v8 = vsub.f32 %v14983_v25, %v15354_v33  ;;  %v7472_v33 = vmul.f32 1.442695, %v15611_v42 }
 0x9bc   :  { %7232 = vmax.xlane.f32.xlu1 %v15585_v0  ;;  %v15593_v48 = vpop.xlane.xlu0 %7146  ;;  %v10966_v0 = vpop.eup %10965 }
 0x9bd   :  { %v15599_v53 = vpop.xlane.xlu1 %7148  ;;  %17232 = vst [vmem:[#allocation107_spill] sm:$0xff] %v15604_v8 }
 0x9be   :  { %17231 = vst [vmem:[#allocation106_spill] sm:$0xff] %v15599_v53  ;;  %v10968_v53 = vpop.eup %10967 }
 0x9bf   :  { %7722 = vadd.xlane.f32.xlu0 %v10962_v52  ;;  %v7470_v52 = vmul.f32 1.442695, %v15604_v8 }
 0x9c0   :  { %7724 = vadd.xlane.f32.xlu1 %v10964_v36  ;;  %v15606_v47 = vpop.xlane.xlu0 %7142  ;;  %v15621_v36 = vadd.f32 %v15557_v51, %v15366_v55 }
 0x9c1   :  { %v15613_v2 = vpop.xlane.xlu1 %7144  ;;  %10973 = vpow2.f32 %v7470_v52 }
 0x9c2   :  { %17234 = vst [vmem:[#allocation109_spill] sm:$0xff] %v15621_v36  ;;  %10975 = vpow2.f32 %v7472_v33  ;;  %v10970_v33 = vpop.eup %10969 }
 0x9c3   :  { %7718 = vadd.xlane.f32.xlu0 %v10966_v0  ;;  %10977 = vpow2.f32 %v7482_v60  ;;  %v15697_v60 = vadd.f32 %v15557_v51, %v15422_v7 }
 0x9c4   :  { %7720 = vadd.xlane.f32.xlu1 %v10968_v53  ;;  %v15616_v25 = vpop.xlane.xlu0 %7154  ;;  %v15635_v53 = vadd.f32 %v15557_v51, %v15373_v43  ;;  %v15653_v43 = vsub.f32 %v14994_v61, %v15384_v14  ;;  %v15667_v61 = vsub.f32 %v15002_v15, %v15400_v54  ;;  %v15683_v54 = vadd.f32 %v15557_v51, %v15414_v35 }
 0x9c5   :  { %v15623_v4 = vpop.xlane.xlu1 %7156  ;;  %17245 = vst [vmem:[#allocation120_spill] sm:$0xff] %v15697_v60  ;;  %v15702_v35 = vsub.f32 %v15006_v45, %v15407_v37 }
 0x9c6   :  { %17236 = vst [vmem:[#allocation111_spill] sm:$0xff] %v15635_v53  ;;  %17239 = vst [vmem:[#allocation114_spill] sm:$0xff] %v15653_v43  ;;  %v7484_v11 = vmul.f32 1.442695, %v15653_v43 }
 0x9c7   :  { %7242 = vmax.xlane.f32.xlu0 %v15621_v36  ;;  %17241 = vst [vmem:[#allocation116_spill] sm:$0xff] %v15667_v61  ;;  %17243 = vst [vmem:[#allocation118_spill] sm:$0xff] %v15683_v54  ;;  %v7490_v7 = vmul.f32 1.442695, %v15702_v35 }
 0x9c8   :  { %7244 = vmax.xlane.f32.xlu1 %v15627_v28  ;;  %v15631_v0 = vpop.xlane.xlu0 %7150  ;;  %v10972_v28 = vpop.eup %10971  ;;  %10979 = vpow2.f32 %v7484_v11  ;;  %17246 = vst [vmem:[#allocation121_spill] sm:$0xff] %v15702_v35 }
 0x9c9   :  { %v15637_v55 = vpop.xlane.xlu1 %7152 }
 0x9cb   :  { %7238 = vmax.xlane.f32.xlu0 %v15635_v53  ;;  %v15660_v53 = vsub.f32 %v14999_v31, %v15393_v20  ;;  %v7480_v20 = vmul.f32 1.442695, %v15667_v61 }
 0x9cc   :  { %7240 = vmax.xlane.f32.xlu1 %v15641_v62  ;;  %v15649_v23 = vpop.xlane.xlu0 %7162  ;;  %v10974_v62 = vpop.eup %10973 }
 0x9cd   :  { %v15655_v52 = vpop.xlane.xlu1 %7164  ;;  %17240 = vst [vmem:[#allocation115_spill] sm:$0xff] %v15660_v53  ;;  %v10976_v36 = vpop.eup %10975 }
 0x9cf   :  { %7730 = vadd.xlane.f32.xlu0 %v10970_v33  ;;  %v7478_v33 = vmul.f32 1.442695, %v15660_v53 }
 0x9d0   :  { %7732 = vadd.xlane.f32.xlu1 %v10972_v28  ;;  %v15662_v30 = vpop.xlane.xlu0 %7158  ;;  %v15677_v28 = vadd.f32 %v15557_v51, %v15402_v22 }
 0x9d1   :  { %v15669_v14 = vpop.xlane.xlu1 %7160  ;;  %10981 = vpow2.f32 %v7478_v33  ;;  %v17247_v33 = vld [vmem:[#allocation10_spill] sm:$0xff] }
 0x9d2   :  { %17242 = vst [vmem:[#allocation117_spill] sm:$0xff] %v15677_v28  ;;  %10983 = vpow2.f32 %v7480_v20 }
 0x9d3   :  { %7726 = vadd.xlane.f32.xlu0 %v10974_v62  ;;  %v15691_v62 = vadd.f32 %v15557_v51, %v15405_v41  ;;  %v15709_v41 = vsub.f32 %v17247_v33, %v15416_v59  ;;  %10985 = vpow2.f32 %v7490_v7 }
 0x9d4   :  { %7728 = vadd.xlane.f32.xlu1 %v10976_v36  ;;  %v15672_v31 = vpop.xlane.xlu0 %7170 }
 0x9d5   :  { %v15679_v15 = vpop.xlane.xlu1 %7172  ;;  %17244 = vst [vmem:[#allocation119_spill] sm:$0xff] %v15691_v62  ;;  %17248 = vst [vmem:[#allocation10_spill] sm:$0xff] %v15709_v41  ;;  %v7492_v37 = vmul.f32 1.442695, %v15709_v41 }
 0x9d7   :  { %7250 = vmax.xlane.f32.xlu0 %v15677_v28  ;;  %10987 = vpow2.f32 %v7492_v37  ;;  %v17257_v37 = vld [vmem:[#allocation58_spill] sm:$0xff] }
 0x9d8   :  { %7252 = vmax.xlane.f32.xlu1 %v15683_v54  ;;  %v15687_v36 = vpop.xlane.xlu0 %7166  ;;  %v10978_v54 = vpop.eup %10977 }
 0x9d9   :  { %v15693_v22 = vpop.xlane.xlu1 %7168  ;;  %v10980_v28 = vpop.eup %10979 }
 0x9db   :  { %7246 = vmax.xlane.f32.xlu0 %v15691_v62  ;;  %v17249_v62 = vld [vmem:[#allocation67_spill] sm:$0xff]  ;;  %v10982_v53 = vpop.eup %10981 }
 0x9dc   :  { %7248 = vmax.xlane.f32.xlu1 %v15697_v60  ;;  %v15705_v11 = vpop.xlane.xlu0 %7178  ;;  %v15716_v61 = vsub.f32 %v17249_v62, %v15426_v50  ;;  %v17251_v60 = vld [vmem:[#allocation71_spill] sm:$0xff]  ;;  %v10984_v43 = vpop.eup %10983  ;;  %v17253_v62 = vld [vmem:[#allocation52_spill] sm:$0xff] }
 0x9dd   :  { %v15711_v20 = vpop.xlane.xlu1 %7180  ;;  %v15723_v59 = vsub.f32 %v17251_v60, %v15432_v5  ;;  %v15733_v41 = vadd.f32 %v15557_v51, %v17253_v62  ;;  %v15739_v60 = vadd.f32 %v15557_v51, %v15454_v56  ;;  %v15753_v62 = vadd.f32 %v15557_v51, %v17257_v37  ;;  %v17259_v56 = vld [vmem:[#allocation6_spill] sm:$0xff] }
 0x9de   :  { %17250 = vst [vmem:[#allocation67_spill] sm:$0xff] %v15716_v61 }
 0x9df   :  { %7738 = vadd.xlane.f32.xlu0 %v10978_v54  ;;  %17252 = vst [vmem:[#allocation71_spill] sm:$0xff] %v15723_v59  ;;  %v7486_v54 = vmul.f32 1.442695, %v15716_v61  ;;  %17254 = vst [vmem:[#allocation52_spill] sm:$0xff] %v15733_v41 }
 0x9e0   :  { %7740 = vadd.xlane.f32.xlu1 %v10980_v28  ;;  %v15718_v45 = vpop.xlane.xlu0 %7174  ;;  %v7488_v28 = vmul.f32 1.442695, %v15723_v59  ;;  %17255 = vst [vmem:[#allocation122_spill] sm:$0xff] %v15739_v60  ;;  %17258 = vst [vmem:[#allocation58_spill] sm:$0xff] %v15753_v62  ;;  %v17260_v59 = vld [vmem:[#allocation11_spill] sm:$0xff] }
 0x9e1   :  { %v15725_v33 = vpop.xlane.xlu1 %7176  ;;  %10989 = vpow2.f32 %v7486_v54  ;;  %v15758_v54 = vsub.f32 %v17260_v59, %v17259_v56 }
 0x9e2   :  { %10991 = vpow2.f32 %v7488_v28  ;;  %v17262_v28 = vld [vmem:[#allocation59_spill] sm:$0xff] }
 0x9e3   :  { %7734 = vadd.xlane.f32.xlu0 %v10982_v53  ;;  %17261 = vst [vmem:[#allocation6_spill] sm:$0xff] %v15758_v54  ;;  %v7498_v37 = vmul.f32 1.442695, %v15758_v54 }
 0x9e4   :  { %7736 = vadd.xlane.f32.xlu1 %v10984_v43  ;;  %v15728_v50 = vpop.xlane.xlu0 %7186  ;;  %v15747_v43 = vadd.f32 %v15557_v51, %v15445_v26 }
 0x9e5   :  { %v15735_v5 = vpop.xlane.xlu1 %7188 }
 0x9e6   :  { %17256 = vst [vmem:[#allocation123_spill] sm:$0xff] %v15747_v43 }
 0x9e7   :  { %7258 = vmax.xlane.f32.xlu0 %v15733_v41  ;;  %v10986_v41 = vpop.eup %10985 }
 0x9e8   :  { %7260 = vmax.xlane.f32.xlu1 %v15739_v60  ;;  %v15743_v53 = vpop.xlane.xlu0 %7182  ;;  %v17263_v60 = vld [vmem:[#allocation70_spill] sm:$0xff]  ;;  %v10988_v63 = vpop.eup %10987 }
 0x9e9   :  { %v15749_v7 = vpop.xlane.xlu1 %7184  ;;  %v15763_v35 = vsub.f32 %v17263_v60, %v17262_v28 }
 0x9eb   :  { %7254 = vmax.xlane.f32.xlu0 %v15747_v43  ;;  %17264 = vst [vmem:[#allocation11_spill] sm:$0xff] %v15763_v35  ;;  %v17265_v43 = vld [vmem:[#allocation74_spill] sm:$0xff]  ;;  %v7500_v56 = vmul.f32 1.442695, %v15763_v35  ;;  %v10990_v8 = vpop.eup %10989 }
 0x9ec   :  { %7256 = vmax.xlane.f32.xlu1 %v15753_v62  ;;  %v7675_v61 = vpop.xlane.xlu0 %7674  ;;  %v15768_v42 = vsub.f32 %v17265_v43, %v15465_v58  ;;  %v17267_v62 = vld [vmem:[#allocation12_spill] sm:$0xff]  ;;  %v15781_v43 = vadd.f32 %v15557_v51, %v15474_v40 }
 0x9ed   :  { %v7677_v26 = vpop.xlane.xlu1 %7676  ;;  %10993 = vlog2.f32 %v7675_v61  ;;  %v15773_v60 = vsub.f32 %v17267_v62, %v15472_v27  ;;  %v10992_v61 = vpop.eup %10991  ;;  %v15787_v62 = vadd.f32 %v15557_v51, %v15486_v17  ;;  %v15801_v17 = vadd.f32 %v15557_v51, %v15494_v18 }
 0x9ee   :  { %17266 = vst [vmem:[#allocation59_spill] sm:$0xff] %v15768_v42  ;;  %10995 = vlog2.f32 %v7677_v26  ;;  %17269 = vst [vmem:[#allocation74_spill] sm:$0xff] %v15781_v43 }
 0x9ef   :  { %7746 = vadd.xlane.f32.xlu0 %v10986_v41  ;;  %17268 = vst [vmem:[#allocation70_spill] sm:$0xff] %v15773_v60  ;;  %v7494_v41 = vmul.f32 1.442695, %v15768_v42  ;;  %17271 = vst [vmem:[#allocation124_spill] sm:$0xff] %v15787_v62  ;;  %v17277_v42 = vld [vmem:[#allocation29_spill] sm:$0xff] }
 0x9f0   :  { %7748 = vadd.xlane.f32.xlu1 %v10988_v63  ;;  %v7671_v59 = vpop.xlane.xlu0 %7670  ;;  %v7496_v63 = vmul.f32 1.442695, %v15773_v60  ;;  %v17275_v60 = vld [vmem:[#allocation73_spill] sm:$0xff] }
 0x9f1   :  { %10997 = vlog2.f32 %v7671_v59  ;;  %v7673_v28 = vpop.xlane.xlu1 %7672 }
 0x9f2   :  { %10999 = vlog2.f32 %v7673_v28 }
 0x9f3   :  { %7742 = vadd.xlane.f32.xlu0 %v10990_v8  ;;  %11001 = vpow2.f32 %v7498_v37  ;;  %v15795_v37 = vadd.f32 %v15557_v51, %v15477_v32 }
 0x9f4   :  { %7744 = vadd.xlane.f32.xlu1 %v10992_v61  ;;  %v15776_v58 = vpop.xlane.xlu0 %7194  ;;  %11003 = vpow2.f32 %v7500_v56 }
 0x9f5   :  { %v15783_v27 = vpop.xlane.xlu1 %7196  ;;  %11005 = vpow2.f32 %v7494_v41  ;;  %17273 = vst [vmem:[#allocation126_spill] sm:$0xff] %v15795_v37 }
 0x9f6   :  { %17270 = vst [vmem:[#allocation12_spill] sm:$0xff] %v15783_v27  ;;  %11007 = vpow2.f32 %v7496_v63  ;;  %v15806_v63 = vsub.f32 %v17275_v60, %v15479_v9  ;;  %v17282_v60 = vld [vmem:[#allocation35_spill] sm:$0xff] }
 0x9f7   :  { %7266 = vmax.xlane.f32.xlu0 %v15781_v43  ;;  %v10994_v26 = vpop.eup %10993 }
 0x9f8   :  { %7268 = vmax.xlane.f32.xlu1 %v15787_v62  ;;  %v15791_v8 = vpop.xlane.xlu0 %7190  ;;  %v10996_v59 = vpop.eup %10995  ;;  %v7931_v56 = vmul.f32 0.6931472, %v10994_v26  ;;  %17276 = vst [vmem:[#allocation73_spill] sm:$0xff] %v15806_v63  ;;  %v17278_v62 = vld [vmem:[#allocation77_spill] sm:$0xff] }
 0x9f9   :  { %17272 = vst [vmem:[#allocation125_spill] sm:$0xff] %v15791_v8  ;;  %v15797_v40 = vpop.xlane.xlu1 %7192  ;;  %v7933_v61 = vmul.f32 0.6931472, %v10996_v59  ;;  %v15812_v18 = vsub.f32 %v17278_v62, %v15488_v3  ;;  %v17280_v26 = vld [vmem:[#allocation33_spill] sm:$0xff] }
 0x9fa   :  { %17274 = vst [vmem:[#allocation127_spill] sm:$0xff] %v15797_v40  ;;  %v8184_v32 = vsub.f32 %v17277_v42, %v7931_v56  ;;  %v7506_v42 = vmul.f32 1.442695, %v15806_v63  ;;  %v17283_v56 = vld [vmem:[#allocation13_spill] sm:$0xff]  ;;  %v17297_v63 = vld [vmem:[#allocation42_spill] sm:$0xff] }
 0x9fb   :  { %v10998_v28 = vpop.eup %10997  ;;  %7262 = vmax.xlane.f32.xlu0 %v15795_v37  ;;  %17279 = vst [vmem:[#allocation29_spill] sm:$0xff] %v15812_v18  ;;  %v8185_v43 = vsub.f32 %v17280_v26, %v7933_v61  ;;  %v7508_v62 = vmul.f32 1.442695, %v15812_v18  ;;  %v17285_v61 = vld [vmem:[#allocation76_spill] sm:$0xff]  ;;  %v15853_v26 = vadd.f32 %v15557_v51, %v15517_v49 }
 0x9fc   :  { %v11000_v41 = vpop.eup %10999  ;;  %v7927_v35 = vmul.f32 0.6931472, %v10998_v28  ;;  %7264 = vmax.xlane.f32.xlu1 %v15801_v17  ;;  %v7683_v54 = vpop.xlane.xlu0 %7682  ;;  %v15820_v28 = vsub.f32 %v17283_v56, %v15498_v57 }
 0x9fd   :  { %v7929_v59 = vmul.f32 0.6931472, %v11000_v41  ;;  %v7685_v12 = vpop.xlane.xlu1 %7684  ;;  %v11002_v37 = vpop.eup %11001  ;;  %v9453_v9 = vpack.c.bf16 %v8185_v43, %v8184_v32  ;;  %11009 = vlog2.f32 %v7683_v54  ;;  %17289 = vst [vmem:[#allocation13_spill] sm:$0xff] %v15853_v26 }
 0x9fe   :  { %v8182_v40 = vsub.f32 %v17281_v6, %v7927_v35  ;;  %v11004_v8 = vpop.eup %11003  ;;  %17284 = vst [vmem:[#allocation77_spill] sm:$0xff] %v15820_v28  ;;  %11011 = vlog2.f32 %v7685_v12  ;;  %v15825_v6 = vsub.f32 %v17285_v61, %v15504_v24  ;;  %v7502_v12 = vmul.f32 1.442695, %v15820_v28  ;;  %v17292_v61 = vld [vmem:[#allocation80_spill] sm:$0xff] }
 0x9ff   :  { %v8183_v27 = vsub.f32 %v17282_v60, %v7929_v59  ;;  %7754 = vadd.xlane.f32.xlu0 %v11002_v37  ;;  %9765 = vst [vmem:[%s16648_s11 + $0x8] sm:$0xff] %v9453_v9   ;;  %v11006_v43 = vpop.eup %11005  ;;  %v17290_v9 = vld [vmem:[#allocation97_spill] sm:$0xff] }
 0xa00   :  { %7756 = vadd.xlane.f32.xlu1 %v11004_v8  ;;  %v7679_v3 = vpop.xlane.xlu0 %7678  ;;  %17286 = vst [vmem:[#allocation33_spill] sm:$0xff] %v15825_v6  ;;  %v11008_v57 = vpop.eup %11007  ;;  %v7504_v8 = vmul.f32 1.442695, %v15825_v6 }
 0xa01   :  { %v9448_v35 = vpack.c.bf16 %v8183_v27, %v8182_v40  ;;  %11013 = vlog2.f32 %v7679_v3  ;;  %v7681_v54 = vpop.xlane.xlu1 %7680  ;;  %v15839_v27 = vadd.f32 %v15557_v51, %v15510_v1  ;;  %v15845_v40 = vadd.f32 %v15557_v51, %v15526_v19 }
 0xa02   :  { %11015 = vlog2.f32 %v7681_v54  ;;  %v15859_v19 = vadd.f32 %v15557_v51, %v17290_v9  ;;  %v17293_v54 = vld [vmem:[#allocation41_spill] sm:$0xff] }
 0xa03   :  { %9449 = vst [vmem:[%s16648_s11] sm:$0xff] %v9448_v35   ;;  %7750 = vadd.xlane.f32.xlu0 %v11006_v43  ;;  %11017 = vpow2.f32 %v7506_v42  ;;  %17287 = vst [vmem:[#allocation32_spill] sm:$0xff] %v15839_v27 }
 0xa04   :  { %7752 = vadd.xlane.f32.xlu1 %v11008_v57  ;;  %v15834_v24 = vpop.xlane.xlu0 %7202  ;;  %11019 = vpow2.f32 %v7508_v62  ;;  %17288 = vst [vmem:[#allocation35_spill] sm:$0xff] %v15845_v40  ;;  %v17291_v62 = vld [vmem:[#allocation68_spill] sm:$0xff] }
 0xa05   :  { %v15841_v37 = vpop.xlane.xlu1 %7204  ;;  %11021 = vpow2.f32 %v7502_v12  ;;  %v15864_v35 = vsub.f32 %v17292_v61, %v17291_v62  ;;  %v17294_v12 = vld [vmem:[#allocation96_spill] sm:$0xff] }
 0xa06   :  { %11023 = vpow2.f32 %v7504_v8  ;;  %v17295_v8 = vld [vmem:[#allocation14_spill] sm:$0xff]  ;;  %v17298_v61 = vld [vmem:[#allocation44_spill] sm:$0xff] }
 0xa07   :  { %7274 = vmax.xlane.f32.xlu0 %v15839_v27  ;;  %v11010_v32 = vpop.eup %11009  ;;  %v15870_v9 = vsub.f32 %v17295_v8, %v17294_v12  ;;  %v17300_v12 = vld [vmem:[#allocation83_spill] sm:$0xff]  ;;  %v17305_v8 = vld [vmem:[#allocation86_spill] sm:$0xff] }
 0xa08   :  { %7276 = vmax.xlane.f32.xlu1 %v15845_v40  ;;  %v15849_v41 = vpop.xlane.xlu0 %7198  ;;  %v11012_v59 = vpop.eup %11011  ;;  %v7939_v60 = vmul.f32 0.6931472, %v11010_v32  ;;  %v17296_v32 = vld [vmem:[#allocation2_spill] sm:$0xff] }
 0xa09   :  { %v15855_v1 = vpop.xlane.xlu1 %7200  ;;  %v7941_v56 = vmul.f32 0.6931472, %v11012_v59 }
 0xa0a   :  { %v8188_v49 = vsub.f32 %v17293_v54, %v7939_v60  ;;  %v7514_v60 = vmul.f32 1.442695, %v15864_v35 }
 0xa0b   :  { %v11014_v42 = vpop.eup %11013  ;;  %7270 = vmax.xlane.f32.xlu0 %v15853_v26  ;;  %v8189_v6 = vsub.f32 %v17296_v32, %v7941_v56  ;;  %v15909_v32 = vsub.f32 %v17305_v8, %v15575_v39 }
 0xa0c   :  { %v11016_v3 = vpop.eup %11015  ;;  %v7935_v43 = vmul.f32 0.6931472, %v11014_v42  ;;  %7272 = vmax.xlane.f32.xlu1 %v15859_v19  ;;  %v7691_v57 = vpop.xlane.xlu0 %7690  ;;  %v17299_v42 = vld [vmem:[#allocation79_spill] sm:$0xff] }
 0xa0d   :  { %v7937_v59 = vmul.f32 0.6931472, %v11016_v3  ;;  %v7693_v28 = vpop.xlane.xlu1 %7692  ;;  %v11018_v18 = vpop.eup %11017  ;;  %v9463_v62 = vpack.c.bf16 %v8189_v6, %v8188_v49  ;;  %11025 = vlog2.f32 %v7691_v57  ;;  %v15878_v54 = vsub.f32 %v17299_v42, %v15537_v46  ;;  %17306 = vst [vmem:[#allocation68_spill] sm:$0xff] %v15909_v32 }
 0xa0e   :  { %v8186_v26 = vsub.f32 %v17297_v63, %v7935_v43  ;;  %v11020_v40 = vpop.eup %11019  ;;  %11027 = vlog2.f32 %v7693_v28  ;;  %v7516_v3 = vmul.f32 1.442695, %v15870_v9  ;;  %v15883_v63 = vsub.f32 %v17300_v12, %v15544_v34  ;;  %v17301_v28 = vld [vmem:[#allocation15_spill] sm:$0xff]  ;;  %v17303_v43 = vld [vmem:[#allocation82_spill] sm:$0xff] }
 0xa0f   :  { %v8187_v27 = vsub.f32 %v17298_v61, %v7937_v59  ;;  %7762 = vadd.xlane.f32.xlu0 %v11018_v18  ;;  %9767 = vst [vmem:[%s16648_s11 + $0x18] sm:$0xff] %v9463_v62   ;;  %v11022_v49 = vpop.eup %11021  ;;  %v7510_v34 = vmul.f32 1.442695, %v15878_v54  ;;  %v17307_v62 = vld [vmem:[#allocation16_spill] sm:$0xff]  ;;  %v15936_v12 = vadd.f32 %v15557_v51, %v15571_v29  ;;  %v17311_v29 = vld [vmem:[#allocation106_spill] sm:$0xff] }
 0xa10   :  { %7764 = vadd.xlane.f32.xlu1 %v11020_v40  ;;  %v7687_v56 = vpop.xlane.xlu0 %7686  ;;  %v11024_v46 = vpop.eup %11023  ;;  %v15890_v40 = vsub.f32 %v17301_v28, %v15551_v21  ;;  %v7512_v57 = vmul.f32 1.442695, %v15883_v63  ;;  %v15905_v21 = vadd.f32 %v15557_v51, %v15546_v13  ;;  %v15919_v61 = vsub.f32 %v17307_v62, %v15581_v38  ;;  %v17312_v62 = vld [vmem:[#allocation89_spill] sm:$0xff] }
 0xa11   :  { %v9458_v18 = vpack.c.bf16 %v8187_v27, %v8186_v26  ;;  %11029 = vlog2.f32 %v7687_v56  ;;  %v7689_v6 = vpop.xlane.xlu1 %7688  ;;  %v15898_v27 = vsub.f32 %v17303_v43, %v15565_v10  ;;  %v15915_v10 = vadd.f32 %v15557_v51, %v15563_v44  ;;  %v17310_v43 = vld [vmem:[#allocation48_spill] sm:$0xff] }
 0xa12   :  { %11031 = vlog2.f32 %v7689_v6  ;;  %17302 = vst [vmem:[#allocation76_spill] sm:$0xff] %v15890_v40  ;;  %17308 = vst [vmem:[#allocation80_spill] sm:$0xff] %v15919_v61  ;;  %v15929_v44 = vadd.f32 %v15557_v51, %v15549_v16  ;;  %v7518_v38 = vmul.f32 1.442695, %v15909_v32  ;;  %v17309_v16 = vld [vmem:[#allocation85_spill] sm:$0xff] }
 0xa13   :  { %9766 = vst [vmem:[%s16648_s11 + $0x10] sm:$0xff] %v9458_v18   ;;  %7758 = vadd.xlane.f32.xlu0 %v11022_v49  ;;  %11033 = vpow2.f32 %v7514_v60  ;;  %17304 = vst [vmem:[#allocation97_spill] sm:$0xff] %v15898_v27  ;;  %v7522_v60 = vmul.f32 1.442695, %v15890_v40  ;;  %v7524_v13 = vmul.f32 1.442695, %v15898_v27 }
 0xa14   :  { %7760 = vadd.xlane.f32.xlu1 %v11024_v46  ;;  %v15900_v26 = vpop.xlane.xlu0 %7210  ;;  %11035 = vpow2.f32 %v7516_v3  ;;  %v7520_v18 = vmul.f32 1.442695, %v15919_v61  ;;  %v17314_v27 = vld [vmem:[#allocation4_spill] sm:$0xff] }
 0xa15   :  { %v15911_v59 = vpop.xlane.xlu1 %7212  ;;  %11037 = vpow2.f32 %v7510_v34  ;;  %v15942_v34 = vsub.f32 %v17309_v16, %v15593_v48 }
 0xa16   :  { %11039 = vpow2.f32 %v7512_v57 }
 0xa17   :  { %7282 = vmax.xlane.f32.xlu0 %v15905_v21  ;;  %v11026_v42 = vpop.eup %11025  ;;  %11041 = vpow2.f32 %v7522_v60  ;;  %v17313_v60 = vld [vmem:[#allocation3_spill] sm:$0xff] }
 0xa18   :  { %7284 = vmax.xlane.f32.xlu1 %v15915_v10  ;;  %v15925_v39 = vpop.xlane.xlu0 %7206  ;;  %v11028_v3 = vpop.eup %11027  ;;  %v7947_v6 = vmul.f32 0.6931472, %v11026_v42  ;;  %11043 = vpow2.f32 %v7524_v13  ;;  %v15948_v42 = vsub.f32 %v17312_v62, %v17311_v29 }
 0xa19   :  { %v15932_v56 = vpop.xlane.xlu1 %7208  ;;  %v7949_v46 = vmul.f32 0.6931472, %v11028_v3  ;;  %11045 = vpow2.f32 %v7518_v38  ;;  %v7530_v38 = vmul.f32 1.442695, %v15942_v34 }
 0xa1a   :  { %v8192_v57 = vsub.f32 %v17310_v43, %v7947_v6  ;;  %11047 = vpow2.f32 %v7520_v18  ;;  %v17315_v6 = vld [vmem:[#allocation51_spill] sm:$0xff]  ;;  %v17316_v43 = vld [vmem:[#allocation17_spill] sm:$0xff]  ;;  %v17318_v18 = vld [vmem:[#allocation88_spill] sm:$0xff] }
 0xa1b   :  { %v11030_v49 = vpop.eup %11029  ;;  %7278 = vmax.xlane.f32.xlu0 %v15929_v44  ;;  %v8193_v3 = vsub.f32 %v17313_v60, %v7949_v46  ;;  %v15956_v29 = vsub.f32 %v17316_v43, %v15606_v47 }
 0xa1c   :  { %v11032_v28 = vpop.eup %11031  ;;  %v7943_v8 = vmul.f32 0.6931472, %v11030_v49  ;;  %7280 = vmax.xlane.f32.xlu1 %v15936_v12  ;;  %v7699_v51 = vpop.xlane.xlu0 %7698 }
 0xa1d   :  { %v7945_v61 = vmul.f32 0.6931472, %v11032_v28  ;;  %v7701_v32 = vpop.xlane.xlu1 %7700  ;;  %v11034_v13 = vpop.eup %11033  ;;  %v9473_v40 = vpack.c.bf16 %v8193_v3, %v8192_v57  ;;  %11049 = vlog2.f32 %v7699_v51  ;;  %17317 = vst [vmem:[#allocation41_spill] sm:$0xff] %v15956_v29  ;;  %v7532_v28 = vmul.f32 1.442695, %v15948_v42 }
 0xa1e   :  { %v8190_v48 = vsub.f32 %v17314_v27, %v7943_v8  ;;  %v11036_v16 = vpop.eup %11035  ;;  %11051 = vlog2.f32 %v7701_v32  ;;  %v15961_v27 = vsub.f32 %v17318_v18, %v15613_v2  ;;  %v17320_v32 = vld [vmem:[#allocation92_spill] sm:$0xff]  ;;  %v7526_v2 = vmul.f32 1.442695, %v15956_v29  ;;  %v17333_v29 = vld [vmem:[#allocation66_spill] sm:$0xff] }
 0xa1f   :  { %v8191_v49 = vsub.f32 %v17315_v6, %v7945_v61  ;;  %7770 = vadd.xlane.f32.xlu0 %v11034_v13  ;;  %9769 = vst [vmem:[%s16648_s11 + $0x28] sm:$0xff] %v9473_v40   ;;  %v11038_v8 = vpop.eup %11037  ;;  %v15968_v51 = vsub.f32 %v17320_v32, %v15616_v25  ;;  %v17322_v40 = vld [vmem:[#allocation18_spill] sm:$0xff]  ;;  %v17324_v13 = vld [vmem:[#allocation91_spill] sm:$0xff] }
 0xa20   :  { %7772 = vadd.xlane.f32.xlu1 %v11036_v16  ;;  %v7695_v46 = vpop.xlane.xlu0 %7694  ;;  %17319 = vst [vmem:[#allocation96_spill] sm:$0xff] %v15961_v27  ;;  %v11040_v47 = vpop.eup %11039  ;;  %v15976_v62 = vsub.f32 %v17322_v40, %v15623_v4  ;;  %v7528_v25 = vmul.f32 1.442695, %v15961_v27 }
 0xa21   :  { %v9468_v61 = vpack.c.bf16 %v8191_v49, %v8190_v48  ;;  %11053 = vlog2.f32 %v7695_v46  ;;  %v7697_v57 = vpop.xlane.xlu1 %7696  ;;  %17321 = vst [vmem:[#allocation14_spill] sm:$0xff] %v15968_v51  ;;  %v11042_v3 = vpop.eup %11041  ;;  %v15983_v48 = vsub.f32 %v17324_v13, %v15631_v0  ;;  %v17326_v49 = vld [vmem:[#allocation19_spill] sm:$0xff]  ;;  %v7538_v43 = vmul.f32 1.442695, %v15968_v51 }
 0xa22   :  { %11055 = vlog2.f32 %v7697_v57  ;;  %17323 = vst [vmem:[#allocation2_spill] sm:$0xff] %v15976_v62  ;;  %v11044_v6 = vpop.eup %11043 }
 0xa23   :  { %9768 = vst [vmem:[%s16648_s11 + $0x20] sm:$0xff] %v9468_v61   ;;  %7766 = vadd.xlane.f32.xlu0 %v11038_v8  ;;  %11057 = vpow2.f32 %v7530_v38  ;;  %17325 = vst [vmem:[#allocation42_spill] sm:$0xff] %v15983_v48  ;;  %v15989_v38 = vsub.f32 %v17326_v49, %v15637_v55  ;;  %v11046_v4 = vpop.eup %11045  ;;  %v7534_v61 = vmul.f32 1.442695, %v15983_v48 }
 0xa24   :  { %7768 = vadd.xlane.f32.xlu1 %v11040_v47  ;;  %v15978_v60 = vpop.xlane.xlu0 %7218  ;;  %11059 = vpow2.f32 %v7532_v28  ;;  %v11048_v46 = vpop.eup %11047  ;;  %v7540_v28 = vmul.f32 1.442695, %v15976_v62  ;;  %v17330_v62 = vld [vmem:[#allocation21_spill] sm:$0xff] }
 0xa25   :  { %v15985_v16 = vpop.xlane.xlu1 %7220  ;;  %17327 = vst [vmem:[#allocation44_spill] sm:$0xff] %v15989_v38  ;;  %11061 = vpow2.f32 %v7526_v2  ;;  %v7536_v55 = vmul.f32 1.442695, %v15989_v38  ;;  %v16006_v38 = vsub.f32 %v17330_v62, %v15655_v52 }
 0xa26   :  { %11063 = vpow2.f32 %v7528_v25 }
 0xa27   :  { %7778 = vadd.xlane.f32.xlu0 %v11042_v3  ;;  %v11050_v0 = vpop.eup %11049  ;;  %11065 = vpow2.f32 %v7538_v43  ;;  %v17328_v3 = vld [vmem:[#allocation20_spill] sm:$0xff] }
 0xa28   :  { %7780 = vadd.xlane.f32.xlu1 %v11044_v6  ;;  %v15993_v18 = vpop.xlane.xlu0 %7214  ;;  %v11052_v8 = vpop.eup %11051  ;;  %v7955_v47 = vmul.f32 0.6931472, %v11050_v0  ;;  %11067 = vpow2.f32 %v7540_v28  ;;  %v16001_v13 = vsub.f32 %v17328_v3, %v15649_v23  ;;  %v17329_v6 = vld [vmem:[#allocation57_spill] sm:$0xff]  ;;  %v17331_v0 = vld [vmem:[#allocation60_spill] sm:$0xff]  ;;  %v17332_v28 = vld [vmem:[#allocation63_spill] sm:$0xff] }
 0xa29   :  { %v15996_v57 = vpop.xlane.xlu1 %7216  ;;  %v7957_v40 = vmul.f32 0.6931472, %v11052_v8  ;;  %11069 = vpow2.f32 %v7534_v61  ;;  %v17334_v61 = vld [vmem:[#allocation23_spill] sm:$0xff] }
 0xa2a   :  { %v8196_v25 = vsub.f32 %v17329_v6, %v7955_v47  ;;  %11071 = vpow2.f32 %v7536_v55  ;;  %v16014_v52 = vsub.f32 %v17334_v61, %v15662_v30  ;;  %v17335_v55 = vld [vmem:[#allocation24_spill] sm:$0xff] }
 0xa2b   :  { %v11054_v32 = vpop.eup %11053  ;;  %7774 = vadd.xlane.f32.xlu0 %v11046_v4  ;;  %v8197_v43 = vsub.f32 %v17331_v0, %v7957_v40  ;;  %v16019_v40 = vsub.f32 %v17335_v55, %v15669_v14 }
 0xa2c   :  { %v11056_v2 = vpop.eup %11055  ;;  %v7951_v49 = vmul.f32 0.6931472, %v11054_v32  ;;  %7776 = vadd.xlane.f32.xlu1 %v11048_v46  ;;  %v7707_v48 = vpop.xlane.xlu0 %7706  ;;  %v7546_v46 = vmul.f32 1.442695, %v16001_v13  ;;  %v7548_v32 = vmul.f32 1.442695, %v16006_v38 }
 0xa2d   :  { %v7953_v8 = vmul.f32 0.6931472, %v11056_v2  ;;  %v7709_v4 = vpop.xlane.xlu1 %7708  ;;  %v11058_v51 = vpop.eup %11057  ;;  %v9483_v3 = vpack.c.bf16 %v8197_v43, %v8196_v25  ;;  %11073 = vlog2.f32 %v7707_v48  ;;  %v17336_v2 = vld [vmem:[#allocation25_spill] sm:$0xff]  ;;  %v7542_v14 = vmul.f32 1.442695, %v16014_v52  ;;  %v17338_v25 = vld [vmem:[#allocation26_spill] sm:$0xff] }
 0xa2e   :  { %v8194_v27 = vsub.f32 %v17332_v28, %v7951_v49  ;;  %v11060_v23 = vpop.eup %11059  ;;  %11075 = vlog2.f32 %v7709_v4  ;;  %v16026_v6 = vsub.f32 %v17336_v2, %v15672_v31  ;;  %v7544_v31 = vmul.f32 1.442695, %v16019_v40  ;;  %v17340_v43 = vld [vmem:[#allocation27_spill] sm:$0xff] }
 0xa2f   :  { %v8195_v47 = vsub.f32 %v17333_v29, %v7953_v8  ;;  %7786 = vadd.xlane.f32.xlu0 %v11058_v51  ;;  %9771 = vst [vmem:[%s16648_s11 + $0x38] sm:$0xff] %v9483_v3   ;;  %v11062_v48 = vpop.eup %11061  ;;  %v16041_v8 = vsub.f32 %v17340_v43, %v15687_v36 }
 0xa30   :  { %7788 = vadd.xlane.f32.xlu1 %v11060_v23  ;;  %v7703_v62 = vpop.xlane.xlu0 %7702  ;;  %v11064_v30 = vpop.eup %11063  ;;  %17337 = vst [vmem:[#allocation79_spill] sm:$0xff] %v16026_v6  ;;  %v17342_v23 = vld [vmem:[#allocation28_spill] sm:$0xff] }
 0xa31   :  { %v9478_v29 = vpack.c.bf16 %v8195_v47, %v8194_v27  ;;  %11077 = vlog2.f32 %v7703_v62  ;;  %v7705_v51 = vpop.xlane.xlu1 %7704  ;;  %v16034_v27 = vsub.f32 %v17338_v25, %v15679_v15  ;;  %v11066_v0 = vpop.eup %11065  ;;  %17341 = vst [vmem:[#allocation15_spill] sm:$0xff] %v16041_v8  ;;  %v16047_v3 = vsub.f32 %v17342_v23, %v15693_v22  ;;  %v17346_v23 = vld [vmem:[#allocation31_spill] sm:$0xff] }
 0xa32   :  { %11079 = vlog2.f32 %v7705_v51  ;;  %v11068_v28 = vpop.eup %11067  ;;  %v7554_v47 = vmul.f32 1.442695, %v16026_v6  ;;  %v17349_v6 = vld [vmem:[#allocation90_spill] sm:$0xff] }
 0xa33   :  { %9770 = vst [vmem:[%s16648_s11 + $0x30] sm:$0xff] %v9478_v29   ;;  %7782 = vadd.xlane.f32.xlu0 %v11062_v48  ;;  %11081 = vpow2.f32 %v7546_v46  ;;  %17339 = vst [vmem:[#allocation83_spill] sm:$0xff] %v16034_v27  ;;  %v11070_v15 = vpop.eup %11069  ;;  %v7556_v61 = vmul.f32 1.442695, %v16034_v27  ;;  %v7552_v22 = vmul.f32 1.442695, %v16047_v3 }
 0xa34   :  { %7784 = vadd.xlane.f32.xlu1 %v11064_v30  ;;  %v16036_v49 = vpop.xlane.xlu0 %7226  ;;  %11083 = vpow2.f32 %v7548_v32  ;;  %17343 = vst [vmem:[#allocation82_spill] sm:$0xff] %v16047_v3  ;;  %v11072_v46 = vpop.eup %11071  ;;  %v7550_v32 = vmul.f32 1.442695, %v16041_v8  ;;  %v16064_v3 = vsub.f32 %v17346_v23, %v15711_v20 }
 0xa35   :  { %v16043_v4 = vpop.xlane.xlu1 %7228  ;;  %11085 = vpow2.f32 %v7542_v14  ;;  %v17344_v14 = vld [vmem:[#allocation30_spill] sm:$0xff] }
 0xa36   :  { %11087 = vpow2.f32 %v7544_v31  ;;  %v16059_v25 = vsub.f32 %v17344_v14, %v15705_v11 }
 0xa37   :  { %7794 = vadd.xlane.f32.xlu0 %v11066_v0  ;;  %v11074_v36 = vpop.eup %11073  ;;  %11089 = vpow2.f32 %v7554_v47  ;;  %v17345_v0 = vld [vmem:[#allocation81_spill] sm:$0xff] }
 0xa38   :  { %7796 = vadd.xlane.f32.xlu1 %v11068_v28  ;;  %v16051_v62 = vpop.xlane.xlu0 %7222  ;;  %v11076_v29 = vpop.eup %11075  ;;  %v7963_v51 = vmul.f32 0.6931472, %v11074_v36  ;;  %11091 = vpow2.f32 %v7556_v61  ;;  %v17347_v36 = vld [vmem:[#allocation84_spill] sm:$0xff]  ;;  %v17348_v61 = vld [vmem:[#allocation87_spill] sm:$0xff] }
 0xa39   :  { %v16054_v55 = vpop.xlane.xlu1 %7224  ;;  %v7965_v30 = vmul.f32 0.6931472, %v11076_v29  ;;  %11093 = vpow2.f32 %v7550_v32  ;;  %v17350_v32 = vld [vmem:[#allocation34_spill] sm:$0xff] }
 0xa3a   :  { %v8200_v31 = vsub.f32 %v17345_v0, %v7963_v51  ;;  %11095 = vpow2.f32 %v7552_v22  ;;  %v16072_v20 = vsub.f32 %v17350_v32, %v15718_v45  ;;  %v17351_v22 = vld [vmem:[#allocation36_spill] sm:$0xff] }
 0xa3b   :  { %v11078_v48 = vpop.eup %11077  ;;  %7790 = vadd.xlane.f32.xlu0 %v11070_v15  ;;  %v8201_v47 = vsub.f32 %v17347_v36, %v7965_v30  ;;  %v7564_v30 = vmul.f32 1.442695, %v16064_v3 }
 0xa3c   :  { %v11080_v2 = vpop.eup %11079  ;;  %v7959_v43 = vmul.f32 0.6931472, %v11078_v48  ;;  %7792 = vadd.xlane.f32.xlu1 %v11072_v46  ;;  %v7715_v28 = vpop.xlane.xlu0 %7714  ;;  %v7562_v46 = vmul.f32 1.442695, %v16059_v25 }
 0xa3d   :  { %v7961_v29 = vmul.f32 0.6931472, %v11080_v2  ;;  %v7717_v15 = vpop.xlane.xlu1 %7716  ;;  %v11082_v8 = vpop.eup %11081  ;;  %v9493_v14 = vpack.c.bf16 %v8201_v47, %v8200_v31  ;;  %11097 = vlog2.f32 %v7715_v28  ;;  %v16077_v2 = vsub.f32 %v17351_v22, %v15725_v33  ;;  %v17353_v31 = vld [vmem:[#allocation37_spill] sm:$0xff]  ;;  %v17355_v28 = vld [vmem:[#allocation38_spill] sm:$0xff]  ;;  %v17357_v47 = vld [vmem:[#allocation39_spill] sm:$0xff] }
 0xa3e   :  { %v8198_v27 = vsub.f32 %v17348_v61, %v7959_v43  ;;  %v11084_v11 = vpop.eup %11083  ;;  %11099 = vlog2.f32 %v7717_v15  ;;  %v16084_v43 = vsub.f32 %v17353_v31, %v15728_v50  ;;  %v7558_v33 = vmul.f32 1.442695, %v16072_v20 }
 0xa3f   :  { %v8199_v51 = vsub.f32 %v17349_v6, %v7961_v29  ;;  %7802 = vadd.xlane.f32.xlu0 %v11082_v8  ;;  %17352 = vst [vmem:[#allocation86_spill] sm:$0xff] %v16077_v2  ;;  %9773 = vst [vmem:[%s16648_s11 + $0x48] sm:$0xff] %v9493_v14   ;;  %v11086_v0 = vpop.eup %11085  ;;  %v7560_v50 = vmul.f32 1.442695, %v16077_v2  ;;  %v16099_v29 = vsub.f32 %v17357_v47, %v15743_v53  ;;  %v17367_v2 = vld [vmem:[#allocation8_spill] sm:$0xff] }
 0xa40   :  { %7804 = vadd.xlane.f32.xlu1 %v11084_v11  ;;  %v7711_v48 = vpop.xlane.xlu0 %7710  ;;  %v11088_v45 = vpop.eup %11087  ;;  %17354 = vst [vmem:[#allocation16_spill] sm:$0xff] %v16084_v43  ;;  %v17359_v11 = vld [vmem:[#allocation40_spill] sm:$0xff] }
 0xa41   :  { %v9488_v6 = vpack.c.bf16 %v8199_v51, %v8198_v27  ;;  %11101 = vlog2.f32 %v7711_v48  ;;  %v7713_v8 = vpop.xlane.xlu1 %7712  ;;  %v16092_v27 = vsub.f32 %v17355_v28, %v15735_v5  ;;  %v11090_v36 = vpop.eup %11089  ;;  %17358 = vst [vmem:[#allocation48_spill] sm:$0xff] %v16099_v29  ;;  %v16105_v14 = vsub.f32 %v17359_v11, %v15749_v7  ;;  %v17363_v11 = vld [vmem:[#allocation12_spill] sm:$0xff] }
 0xa42   :  { %11103 = vlog2.f32 %v7713_v8  ;;  %v11092_v61 = vpop.eup %11091  ;;  %v7570_v51 = vmul.f32 1.442695, %v16084_v43 }
 0xa43   :  { %9772 = vst [vmem:[%s16648_s11 + $0x40] sm:$0xff] %v9488_v6   ;;  %7798 = vadd.xlane.f32.xlu0 %v11086_v0  ;;  %11105 = vpow2.f32 %v7562_v46  ;;  %17356 = vst [vmem:[#allocation85_spill] sm:$0xff] %v16092_v27  ;;  %v11094_v5 = vpop.eup %11093  ;;  %v7572_v32 = vmul.f32 1.442695, %v16092_v27  ;;  %v7568_v7 = vmul.f32 1.442695, %v16105_v14 }
 0xa44   :  { %7800 = vadd.xlane.f32.xlu1 %v11088_v45  ;;  %v16094_v23 = vpop.xlane.xlu0 %7234  ;;  %11107 = vpow2.f32 %v7564_v30  ;;  %17360 = vst [vmem:[#allocation106_spill] sm:$0xff] %v16105_v14  ;;  %v11096_v46 = vpop.eup %11095  ;;  %v7566_v30 = vmul.f32 1.442695, %v16099_v29  ;;  %v17364_v29 = vld [vmem:[#allocation45_spill] sm:$0xff] }
 0xa45   :  { %v16101_v15 = vpop.xlane.xlu1 %7236  ;;  %11109 = vpow2.f32 %v7558_v33  ;;  %v17361_v33 = vld [vmem:[#allocation47_spill] sm:$0xff]  ;;  %v16122_v14 = vsub.f32 %v17364_v29, %v17363_v11  ;;  %v17374_v11 = vld [vmem:[#allocation50_spill] sm:$0xff] }
 0xa46   :  { %11111 = vpow2.f32 %v7560_v50  ;;  %v16117_v28 = vsub.f32 %v17361_v33, %v15776_v58 }
 0xa47   :  { %7810 = vadd.xlane.f32.xlu0 %v11090_v36  ;;  %v11098_v53 = vpop.eup %11097  ;;  %11113 = vpow2.f32 %v7570_v51  ;;  %v17362_v36 = vld [vmem:[#allocation22_spill] sm:$0xff] }
 0xa48   :  { %7812 = vadd.xlane.f32.xlu1 %v11092_v61  ;;  %v16109_v48 = vpop.xlane.xlu0 %7230  ;;  %v11100_v6 = vpop.eup %11099  ;;  %v7971_v8 = vmul.f32 0.6931472, %v11098_v53  ;;  %11115 = vpow2.f32 %v7572_v32  ;;  %v17365_v53 = vld [vmem:[#allocation55_spill] sm:$0xff] }
 0xa49   :  { %v16112_v22 = vpop.xlane.xlu1 %7232  ;;  %v7973_v45 = vmul.f32 0.6931472, %v11100_v6  ;;  %11117 = vpow2.f32 %v7566_v30  ;;  %v17366_v32 = vld [vmem:[#allocation7_spill] sm:$0xff]  ;;  %v17368_v30 = vld [vmem:[#allocation125_spill] sm:$0xff] }
 0xa4a   :  { %v8204_v50 = vsub.f32 %v17362_v36, %v7971_v8  ;;  %11119 = vpow2.f32 %v7568_v7  ;;  %v17371_v7 = vld [vmem:[#allocation127_spill] sm:$0xff]  ;;  %v17372_v36 = vld [vmem:[#allocation46_spill] sm:$0xff] }
 0xa4b   :  { %v11102_v0 = vpop.eup %11101  ;;  %7806 = vadd.xlane.f32.xlu0 %v11094_v5  ;;  %v8205_v51 = vsub.f32 %v17365_v53, %v7973_v45  ;;  %v16142_v53 = vsub.f32 %v17374_v11, %v15834_v24 }
 0xa4c   :  { %v11104_v31 = vpop.eup %11103  ;;  %v7967_v47 = vmul.f32 0.6931472, %v11102_v0  ;;  %7808 = vadd.xlane.f32.xlu1 %v11096_v46  ;;  %v7723_v61 = vpop.xlane.xlu0 %7722  ;;  %v7578_v46 = vmul.f32 1.442695, %v16117_v28  ;;  %v17369_v0 = vld [vmem:[#allocation43_spill] sm:$0xff] }
 0xa4d   :  { %v7969_v6 = vmul.f32 0.6931472, %v11104_v31  ;;  %v7725_v5 = vpop.xlane.xlu1 %7724  ;;  %v11106_v27 = vpop.eup %11105  ;;  %v9503_v33 = vpack.c.bf16 %v8205_v51, %v8204_v50  ;;  %11121 = vlog2.f32 %v7723_v61  ;;  %v16130_v29 = vsub.f32 %v17369_v0, %v17368_v30  ;;  %17375 = vst [vmem:[#allocation4_spill] sm:$0xff] %v16142_v53  ;;  %v17380_v30 = vld [vmem:[#allocation49_spill] sm:$0xff] }
 0xa4e   :  { %v8202_v43 = vsub.f32 %v17366_v32, %v7967_v47  ;;  %v11108_v58 = vpop.eup %11107  ;;  %11123 = vlog2.f32 %v7725_v5  ;;  %v7580_v31 = vmul.f32 1.442695, %v16122_v14  ;;  %v16135_v47 = vsub.f32 %v17372_v36, %v17371_v7 }
 0xa4f   :  { %v8203_v8 = vsub.f32 %v17367_v2, %v7969_v6  ;;  %7818 = vadd.xlane.f32.xlu0 %v11106_v27  ;;  %17370 = vst [vmem:[#allocation89_spill] sm:$0xff] %v16130_v29  ;;  %9775 = vst [vmem:[%s16648_s11 + $0x58] sm:$0xff] %v9503_v33   ;;  %v11110_v50 = vpop.eup %11109  ;;  %v7574_v51 = vmul.f32 1.442695, %v16130_v29  ;;  %v17376_v6 = vld [vmem:[#allocation53_spill] sm:$0xff]  ;;  %v16163_v0 = vsub.f32 %v17380_v30, %v15855_v1  ;;  %v17387_v29 = vld [vmem:[#allocation99_spill] sm:$0xff] }
 0xa50   :  { %7820 = vadd.xlane.f32.xlu1 %v11108_v58  ;;  %v7719_v45 = vpop.xlane.xlu0 %7718  ;;  %17373 = vst [vmem:[#allocation3_spill] sm:$0xff] %v16135_v47  ;;  %v11112_v61 = vpop.eup %11111  ;;  %v7576_v24 = vmul.f32 1.442695, %v16135_v47  ;;  %v17378_v58 = vld [vmem:[#allocation54_spill] sm:$0xff] }
 0xa51   :  { %v9498_v2 = vpack.c.bf16 %v8203_v8, %v8202_v43  ;;  %11125 = vlog2.f32 %v7719_v45  ;;  %v7721_v27 = vpop.xlane.xlu1 %7720  ;;  %v16150_v43 = vsub.f32 %v17376_v6, %v15841_v37  ;;  %v11114_v32 = vpop.eup %11113  ;;  %v16157_v33 = vsub.f32 %v17378_v58, %v15849_v41  ;;  %17381 = vst [vmem:[#allocation88_spill] sm:$0xff] %v16163_v0 }
 0xa52   :  { %11127 = vlog2.f32 %v7721_v27  ;;  %v7586_v45 = vmul.f32 1.442695, %v16142_v53  ;;  %v7584_v1 = vmul.f32 1.442695, %v16163_v0 }
 0xa53   :  { %9774 = vst [vmem:[%s16648_s11 + $0x50] sm:$0xff] %v9498_v2   ;;  %7814 = vadd.xlane.f32.xlu0 %v11110_v50  ;;  %11129 = vpow2.f32 %v7578_v46  ;;  %17377 = vst [vmem:[#allocation51_spill] sm:$0xff] %v16150_v43  ;;  %v11116_v46 = vpop.eup %11115  ;;  %v7582_v2 = vmul.f32 1.442695, %v16157_v33 }
 0xa54   :  { %7816 = vadd.xlane.f32.xlu1 %v11112_v61  ;;  %v16152_v5 = vpop.xlane.xlu0 %7242  ;;  %11131 = vpow2.f32 %v7580_v31  ;;  %17379 = vst [vmem:[#allocation17_spill] sm:$0xff] %v16157_v33  ;;  %v11118_v37 = vpop.eup %11117  ;;  %v7588_v31 = vmul.f32 1.442695, %v16150_v43  ;;  %v17384_v43 = vld [vmem:[#allocation72_spill] sm:$0xff] }
 0xa55   :  { %v16159_v8 = vpop.xlane.xlu1 %7244  ;;  %v11120_v7 = vpop.eup %11119  ;;  %11133 = vpow2.f32 %v7574_v51  ;;  %v16180_v0 = vsub.f32 %v17384_v43, %v15911_v59 }
 0xa56   :  { %11135 = vpow2.f32 %v7576_v24 }
 0xa57   :  { %7826 = vadd.xlane.f32.xlu0 %v11114_v32  ;;  %v11122_v41 = vpop.eup %11121  ;;  %11137 = vpow2.f32 %v7586_v45  ;;  %v17382_v32 = vld [vmem:[#allocation69_spill] sm:$0xff] }
 0xa58   :  { %7828 = vadd.xlane.f32.xlu1 %v11116_v46  ;;  %v16167_v36 = vpop.xlane.xlu0 %7238  ;;  %v11124_v50 = vpop.eup %11123  ;;  %v7979_v61 = vmul.f32 0.6931472, %v11122_v41  ;;  %11139 = vpow2.f32 %v7588_v31  ;;  %v16175_v58 = vsub.f32 %v17382_v32, %v15900_v26  ;;  %v17383_v46 = vld [vmem:[#allocation9_spill] sm:$0xff]  ;;  %v17385_v41 = vld [vmem:[#allocation95_spill] sm:$0xff]  ;;  %v17386_v31 = vld [vmem:[#allocation98_spill] sm:$0xff] }
 0xa59   :  { %v16170_v27 = vpop.xlane.xlu1 %7240  ;;  %v7981_v6 = vmul.f32 0.6931472, %v11124_v50  ;;  %11141 = vpow2.f32 %v7582_v2  ;;  %v17388_v2 = vld [vmem:[#allocation75_spill] sm:$0xff] }
 0xa5a   :  { %v8208_v24 = vsub.f32 %v17383_v46, %v7979_v61  ;;  %11143 = vpow2.f32 %v7584_v1  ;;  %v16188_v59 = vsub.f32 %v17388_v2, %v15925_v39  ;;  %v17389_v1 = vld [vmem:[#allocation78_spill] sm:$0xff] }
 0xa5b   :  { %v11126_v11 = vpop.eup %11125  ;;  %7822 = vadd.xlane.f32.xlu0 %v11118_v37  ;;  %v8209_v45 = vsub.f32 %v17385_v41, %v7981_v6  ;;  %v16193_v6 = vsub.f32 %v17389_v1, %v15932_v56 }
 0xa5c   :  { %v11128_v51 = vpop.eup %11127  ;;  %v7975_v30 = vmul.f32 0.6931472, %v11126_v11  ;;  %7824 = vadd.xlane.f32.xlu1 %v11120_v7  ;;  %v7731_v33 = vpop.xlane.xlu0 %7730  ;;  %v7594_v7 = vmul.f32 1.442695, %v16175_v58  ;;  %v7596_v11 = vmul.f32 1.442695, %v16180_v0 }
 0xa5d   :  { %v7977_v50 = vmul.f32 0.6931472, %v11128_v51  ;;  %v7733_v37 = vpop.xlane.xlu1 %7732  ;;  %v11130_v53 = vpop.eup %11129  ;;  %v9513_v32 = vpack.c.bf16 %v8209_v45, %v8208_v24  ;;  %11145 = vlog2.f32 %v7731_v33  ;;  %v17390_v51 = vld [vmem:[#allocation93_spill] sm:$0xff]  ;;  %v7590_v56 = vmul.f32 1.442695, %v16188_v59  ;;  %v17392_v24 = vld [vmem:[#allocation94_spill] sm:$0xff] }
 0xa5e   :  { %v8206_v47 = vsub.f32 %v17386_v31, %v7975_v30  ;;  %v11132_v26 = vpop.eup %11131  ;;  %11147 = vlog2.f32 %v7733_v37  ;;  %v16200_v46 = vsub.f32 %v17390_v51, %v15978_v60  ;;  %v7592_v60 = vmul.f32 1.442695, %v16193_v6  ;;  %v17394_v45 = vld [vmem:[#allocation5_spill] sm:$0xff] }
 0xa5f   :  { %v8207_v61 = vsub.f32 %v17387_v29, %v7977_v50  ;;  %7834 = vadd.xlane.f32.xlu0 %v11130_v53  ;;  %9777 = vst [vmem:[%s16648_s11 + $0x68] sm:$0xff] %v9513_v32   ;;  %v11134_v33 = vpop.eup %11133  ;;  %v16215_v50 = vsub.f32 %v17394_v45, %v15993_v18 }
 0xa60   :  { %7836 = vadd.xlane.f32.xlu1 %v11132_v26  ;;  %v7727_v43 = vpop.xlane.xlu0 %7726  ;;  %v11136_v39 = vpop.eup %11135  ;;  %17391 = vst [vmem:[#allocation92_spill] sm:$0xff] %v16200_v46  ;;  %v17396_v26 = vld [vmem:[#allocation56_spill] sm:$0xff] }
 0xa61   :  { %v9508_v29 = vpack.c.bf16 %v8207_v61, %v8206_v47  ;;  %11149 = vlog2.f32 %v7727_v43  ;;  %v7729_v53 = vpop.xlane.xlu1 %7728  ;;  %v16208_v47 = vsub.f32 %v17392_v24, %v15985_v16  ;;  %v11138_v41 = vpop.eup %11137  ;;  %17395 = vst [vmem:[#allocation91_spill] sm:$0xff] %v16215_v50  ;;  %v16221_v32 = vsub.f32 %v17396_v26, %v15996_v57  ;;  %v17400_v26 = vld [vmem:[#allocation65_spill] sm:$0xff] }
 0xa62   :  { %11151 = vlog2.f32 %v7729_v53  ;;  %v11140_v31 = vpop.eup %11139  ;;  %v7602_v61 = vmul.f32 1.442695, %v16200_v46  ;;  %v17403_v46 = vld [vmem:[#allocation108_spill] sm:$0xff] }
 0xa63   :  { %9776 = vst [vmem:[%s16648_s11 + $0x60] sm:$0xff] %v9508_v29   ;;  %7830 = vadd.xlane.f32.xlu0 %v11134_v33  ;;  %11153 = vpow2.f32 %v7594_v7  ;;  %17393 = vst [vmem:[#allocation18_spill] sm:$0xff] %v16208_v47  ;;  %v11142_v16 = vpop.eup %11141  ;;  %v7604_v2 = vmul.f32 1.442695, %v16208_v47  ;;  %v7600_v57 = vmul.f32 1.442695, %v16221_v32 }
 0xa64   :  { %7832 = vadd.xlane.f32.xlu1 %v11136_v39  ;;  %v16210_v30 = vpop.xlane.xlu0 %7250  ;;  %11155 = vpow2.f32 %v7596_v11  ;;  %17397 = vst [vmem:[#allocation19_spill] sm:$0xff] %v16221_v32  ;;  %v11144_v7 = vpop.eup %11143  ;;  %v7598_v11 = vmul.f32 1.442695, %v16215_v50  ;;  %v16238_v32 = vsub.f32 %v17400_v26, %v16043_v4 }
 0xa65   :  { %v16217_v37 = vpop.xlane.xlu1 %7252  ;;  %11157 = vpow2.f32 %v7590_v56  ;;  %v17398_v56 = vld [vmem:[#allocation62_spill] sm:$0xff] }
 0xa66   :  { %11159 = vpow2.f32 %v7592_v60  ;;  %v16233_v24 = vsub.f32 %v17398_v56, %v16036_v49 }
 0xa67   :  { %7842 = vadd.xlane.f32.xlu0 %v11138_v41  ;;  %v11146_v18 = vpop.eup %11145  ;;  %11161 = vpow2.f32 %v7602_v61  ;;  %v17399_v41 = vld [vmem:[#allocation104_spill] sm:$0xff] }
 0xa68   :  { %7844 = vadd.xlane.f32.xlu1 %v11140_v31  ;;  %v16225_v43 = vpop.xlane.xlu0 %7246  ;;  %v11148_v29 = vpop.eup %11147  ;;  %v7987_v53 = vmul.f32 0.6931472, %v11146_v18  ;;  %11163 = vpow2.f32 %v7604_v2  ;;  %v17401_v18 = vld [vmem:[#allocation105_spill] sm:$0xff]  ;;  %v17402_v2 = vld [vmem:[#allocation107_spill] sm:$0xff] }
 0xa69   :  { %v16228_v1 = vpop.xlane.xlu1 %7248  ;;  %v7989_v39 = vmul.f32 0.6931472, %v11148_v29  ;;  %11165 = vpow2.f32 %v7598_v11  ;;  %v17404_v11 = vld [vmem:[#allocation61_spill] sm:$0xff] }
 0xa6a   :  { %v8212_v60 = vsub.f32 %v17399_v41, %v7987_v53  ;;  %11167 = vpow2.f32 %v7600_v57  ;;  %v16246_v4 = vsub.f32 %v17404_v11, %v16051_v62  ;;  %v17405_v57 = vld [vmem:[#allocation64_spill] sm:$0xff] }
 0xa6b   :  { %v11150_v33 = vpop.eup %11149  ;;  %7838 = vadd.xlane.f32.xlu0 %v11142_v16  ;;  %v8213_v61 = vsub.f32 %v17401_v18, %v7989_v39  ;;  %v7612_v39 = vmul.f32 1.442695, %v16238_v32 }
 0xa6c   :  { %v11152_v51 = vpop.eup %11151  ;;  %v7983_v45 = vmul.f32 0.6931472, %v11150_v33  ;;  %7840 = vadd.xlane.f32.xlu1 %v11144_v7  ;;  %v7739_v31 = vpop.xlane.xlu0 %7738  ;;  %v7610_v7 = vmul.f32 1.442695, %v16233_v24 }
 0xa6d   :  { %v7985_v29 = vmul.f32 0.6931472, %v11152_v51  ;;  %v7741_v16 = vpop.xlane.xlu1 %7740  ;;  %v11154_v50 = vpop.eup %11153  ;;  %v9523_v56 = vpack.c.bf16 %v8213_v61, %v8212_v60  ;;  %11169 = vlog2.f32 %v7739_v31  ;;  %v16251_v51 = vsub.f32 %v17405_v57, %v16054_v55  ;;  %v17406_v60 = vld [vmem:[#allocation100_spill] sm:$0xff]  ;;  %v17408_v31 = vld [vmem:[#allocation101_spill] sm:$0xff]  ;;  %v17410_v61 = vld [vmem:[#allocation102_spill] sm:$0xff] }
 0xa6e   :  { %v8210_v47 = vsub.f32 %v17402_v2, %v7983_v45  ;;  %v11156_v49 = vpop.eup %11155  ;;  %11171 = vlog2.f32 %v7741_v16  ;;  %v16258_v45 = vsub.f32 %v17406_v60, %v16094_v23  ;;  %v7606_v55 = vmul.f32 1.442695, %v16246_v4 }
 0xa6f   :  { %v8211_v53 = vsub.f32 %v17403_v46, %v7985_v29  ;;  %7850 = vadd.xlane.f32.xlu0 %v11154_v50  ;;  %9779 = vst [vmem:[%s16648_s11 + $0x78] sm:$0xff] %v9523_v56   ;;  %v11158_v41 = vpop.eup %11157  ;;  %v7608_v23 = vmul.f32 1.442695, %v16251_v51  ;;  %v16273_v29 = vsub.f32 %v17410_v61, %v16109_v48 }
 0xa70   :  { %7852 = vadd.xlane.f32.xlu1 %v11156_v49  ;;  %v7735_v33 = vpop.xlane.xlu0 %7734  ;;  %v11160_v62 = vpop.eup %11159  ;;  %17407 = vst [vmem:[#allocation20_spill] sm:$0xff] %v16258_v45  ;;  %v17412_v49 = vld [vmem:[#allocation103_spill] sm:$0xff] }
 0xa71   :  { %v9518_v46 = vpack.c.bf16 %v8211_v53, %v8210_v47  ;;  %11173 = vlog2.f32 %v7735_v33  ;;  %v7737_v50 = vpop.xlane.xlu1 %7736  ;;  %v16266_v47 = vsub.f32 %v17408_v31, %v16101_v15  ;;  %v11162_v18 = vpop.eup %11161  ;;  %17411 = vst [vmem:[#allocation21_spill] sm:$0xff] %v16273_v29  ;;  %v16279_v56 = vsub.f32 %v17412_v49, %v16112_v22  ;;  %v17416_v49 = vld [vmem:[#allocation110_spill] sm:$0xff] }
 0xa72   :  { %11175 = vlog2.f32 %v7737_v50  ;;  %v11164_v2 = vpop.eup %11163  ;;  %v7618_v53 = vmul.f32 1.442695, %v16258_v45  ;;  %v17419_v45 = vld [vmem:[#allocation116_spill] sm:$0xff] }
 0xa73   :  { %9778 = vst [vmem:[%s16648_s11 + $0x70] sm:$0xff] %v9518_v46   ;;  %7846 = vadd.xlane.f32.xlu0 %v11158_v41  ;;  %11177 = vpow2.f32 %v7610_v7  ;;  %17409 = vst [vmem:[#allocation57_spill] sm:$0xff] %v16266_v47  ;;  %v11166_v15 = vpop.eup %11165  ;;  %v7620_v11 = vmul.f32 1.442695, %v16266_v47  ;;  %v7616_v22 = vmul.f32 1.442695, %v16279_v56 }
 0xa74   :  { %7848 = vadd.xlane.f32.xlu1 %v11160_v62  ;;  %v16268_v26 = vpop.xlane.xlu0 %7258  ;;  %11179 = vpow2.f32 %v7612_v39  ;;  %17413 = vst [vmem:[#allocation60_spill] sm:$0xff] %v16279_v56  ;;  %v11168_v7 = vpop.eup %11167  ;;  %v7614_v39 = vmul.f32 1.442695, %v16273_v29  ;;  %v16296_v56 = vsub.f32 %v17416_v49, %v16159_v8 }
 0xa75   :  { %v16275_v16 = vpop.xlane.xlu1 %7260  ;;  %11181 = vpow2.f32 %v7606_v55  ;;  %v17414_v55 = vld [vmem:[#allocation109_spill] sm:$0xff] }
 0xa76   :  { %11183 = vpow2.f32 %v7608_v23  ;;  %v16291_v31 = vsub.f32 %v17414_v55, %v16152_v5 }
 0xa77   :  { %7858 = vadd.xlane.f32.xlu0 %v11162_v18  ;;  %v11170_v48 = vpop.eup %11169  ;;  %11185 = vpow2.f32 %v7618_v53  ;;  %v17415_v18 = vld [vmem:[#allocation113_spill] sm:$0xff] }
 0xa78   :  { %7860 = vadd.xlane.f32.xlu1 %v11164_v2  ;;  %v16283_v33 = vpop.xlane.xlu0 %7254  ;;  %v11172_v46 = vpop.eup %11171  ;;  %v7995_v50 = vmul.f32 0.6931472, %v11170_v48  ;;  %11187 = vpow2.f32 %v7620_v11  ;;  %v17417_v48 = vld [vmem:[#allocation114_spill] sm:$0xff]  ;;  %v17418_v11 = vld [vmem:[#allocation115_spill] sm:$0xff] }
 0xa79   :  { %v16286_v57 = vpop.xlane.xlu1 %7256  ;;  %v7997_v62 = vmul.f32 0.6931472, %v11172_v46  ;;  %11189 = vpow2.f32 %v7614_v39  ;;  %v17420_v39 = vld [vmem:[#allocation111_spill] sm:$0xff] }
 0xa7a   :  { %v8216_v23 = vsub.f32 %v17415_v18, %v7995_v50  ;;  %11191 = vpow2.f32 %v7616_v22  ;;  %v16304_v8 = vsub.f32 %v17420_v39, %v16167_v36  ;;  %v17421_v22 = vld [vmem:[#allocation112_spill] sm:$0xff] }
 0xa7b   :  { %v11174_v41 = vpop.eup %11173  ;;  %7854 = vadd.xlane.f32.xlu0 %v11166_v15  ;;  %v8217_v53 = vsub.f32 %v17417_v48, %v7997_v62  ;;  %v7628_v62 = vmul.f32 1.442695, %v16296_v56 }
 0xa7c   :  { %v11176_v60 = vpop.eup %11175  ;;  %v7991_v61 = vmul.f32 0.6931472, %v11174_v41  ;;  %7856 = vadd.xlane.f32.xlu1 %v11168_v7  ;;  %v7747_v2 = vpop.xlane.xlu0 %7746  ;;  %v7626_v7 = vmul.f32 1.442695, %v16291_v31 }
 0xa7d   :  { %v7993_v46 = vmul.f32 0.6931472, %v11176_v60  ;;  %v7749_v15 = vpop.xlane.xlu1 %7748  ;;  %v11178_v29 = vpop.eup %11177  ;;  %v9533_v55 = vpack.c.bf16 %v8217_v53, %v8216_v23  ;;  %11193 = vlog2.f32 %v7747_v2  ;;  %v16309_v60 = vsub.f32 %v17421_v22, %v16170_v27  ;;  %v17422_v23 = vld [vmem:[#allocation117_spill] sm:$0xff]  ;;  %v17424_v2 = vld [vmem:[#allocation118_spill] sm:$0xff] }
 0xa7e   :  { %v8214_v47 = vsub.f32 %v17418_v11, %v7991_v61  ;;  %v11180_v5 = vpop.eup %11179  ;;  %11195 = vlog2.f32 %v7749_v15  ;;  %v16316_v61 = vsub.f32 %v17422_v23, %v16210_v30  ;;  %v7622_v27 = vmul.f32 1.442695, %v16304_v8  ;;  %v17426_v30 = vld [vmem:[#allocation119_spill] sm:$0xff] }
 0xa7f   :  { %v8215_v50 = vsub.f32 %v17419_v45, %v7993_v46  ;;  %7866 = vadd.xlane.f32.xlu0 %v11178_v29  ;;  %9781 = vst [vmem:[%s16648_s11 + $0x88] sm:$0xff] %v9533_v55   ;;  %v11182_v18 = vpop.eup %11181  ;;  %v7624_v53 = vmul.f32 1.442695, %v16309_v60  ;;  %v16329_v46 = vsub.f32 %v17426_v30, %v16225_v43 }
 0xa80   :  { %7868 = vadd.xlane.f32.xlu1 %v11180_v5  ;;  %v7743_v41 = vpop.xlane.xlu0 %7742  ;;  %v11184_v36 = vpop.eup %11183  ;;  %17423 = vst [vmem:[#allocation63_spill] sm:$0xff] %v16316_v61  ;;  %v17428_v5 = vld [vmem:[#allocation120_spill] sm:$0xff] }
 0xa81   :  { %v9528_v45 = vpack.c.bf16 %v8215_v50, %v8214_v47  ;;  %11197 = vlog2.f32 %v7743_v41  ;;  %v7745_v29 = vpop.xlane.xlu1 %7744  ;;  %v16324_v47 = vsub.f32 %v17424_v2, %v16217_v37  ;;  %v11186_v48 = vpop.eup %11185  ;;  %17427 = vst [vmem:[#allocation23_spill] sm:$0xff] %v16329_v46  ;;  %v16333_v55 = vsub.f32 %v17428_v5, %v16228_v1  ;;  %v17432_v5 = vld [vmem:[#allocation122_spill] sm:$0xff] }
 0xa82   :  { %11199 = vlog2.f32 %v7745_v29  ;;  %v11188_v11 = vpop.eup %11187  ;;  %v7634_v37 = vmul.f32 1.442695, %v16316_v61  ;;  %v7630_v43 = vmul.f32 1.442695, %v16329_v46  ;;  %v17435_v61 = vld [vmem:[#allocation71_spill] sm:$0xff] }
 0xa83   :  { %9780 = vst [vmem:[%s16648_s11 + $0x80] sm:$0xff] %v9528_v45   ;;  %7862 = vadd.xlane.f32.xlu0 %v11182_v18  ;;  %11201 = vpow2.f32 %v7626_v7  ;;  %17425 = vst [vmem:[#allocation66_spill] sm:$0xff] %v16324_v47  ;;  %v11190_v50 = vpop.eup %11189  ;;  %v7636_v39 = vmul.f32 1.442695, %v16324_v47  ;;  %v7632_v29 = vmul.f32 1.442695, %v16333_v55 }
 0xa84   :  { %7864 = vadd.xlane.f32.xlu1 %v11184_v36  ;;  %v7267_v49 = vpop.xlane.xlu0 %7266  ;;  %11203 = vpow2.f32 %v7628_v62  ;;  %17429 = vst [vmem:[#allocation24_spill] sm:$0xff] %v16333_v55  ;;  %v11192_v7 = vpop.eup %11191  ;;  %v16346_v55 = vsub.f32 %v17432_v5, %v16275_v16 }
 0xa85   :  { %v7269_v15 = vpop.xlane.xlu1 %7268  ;;  %11205 = vpow2.f32 %v7622_v27  ;;  %v17430_v27 = vld [vmem:[#allocation52_spill] sm:$0xff] }
 0xa86   :  { %11207 = vpow2.f32 %v7624_v53  ;;  %v16341_v2 = vsub.f32 %v17430_v27, %v16268_v26 }
 0xa87   :  { %7874 = vadd.xlane.f32.xlu0 %v11186_v48  ;;  %v11194_v62 = vpop.eup %11193  ;;  %11209 = vpow2.f32 %v7634_v37  ;;  %v17431_v48 = vld [vmem:[#allocation121_spill] sm:$0xff] }
 0xa88   :  { %7876 = vadd.xlane.f32.xlu1 %v11188_v11  ;;  %v7263_v41 = vpop.xlane.xlu0 %7262  ;;  %v11196_v45 = vpop.eup %11195  ;;  %v8003_v1 = vmul.f32 0.6931472, %v11194_v62  ;;  %11211 = vpow2.f32 %v7636_v39  ;;  %v17433_v62 = vld [vmem:[#allocation10_spill] sm:$0xff]  ;;  %v17434_v39 = vld [vmem:[#allocation67_spill] sm:$0xff] }
 0xa89   :  { %v7265_v22 = vpop.xlane.xlu1 %7264  ;;  %v8005_v36 = vmul.f32 0.6931472, %v11196_v45  ;;  %11213 = vpow2.f32 %v7630_v43  ;;  %v17436_v43 = vld [vmem:[#allocation123_spill] sm:$0xff] }
 0xa8a   :  { %v8220_v30 = vsub.f32 %v17431_v48, %v8003_v1  ;;  %11215 = vpow2.f32 %v7632_v29  ;;  %v16354_v16 = vsub.f32 %v17436_v43, %v16283_v33  ;;  %v17437_v29 = vld [vmem:[#allocation58_spill] sm:$0xff] }
 0xa8b   :  { %v11198_v18 = vpop.eup %11197  ;;  %7870 = vadd.xlane.f32.xlu0 %v11190_v50  ;;  %v8221_v37 = vsub.f32 %v17433_v62, %v8005_v36  ;;  %v7644_v36 = vmul.f32 1.442695, %v16346_v55 }
 0xa8c   :  { %v11200_v23 = vpop.eup %11199  ;;  %v7999_v53 = vmul.f32 0.6931472, %v11198_v18  ;;  %7872 = vadd.xlane.f32.xlu1 %v11192_v7  ;;  %v7755_v11 = vpop.xlane.xlu0 %7754  ;;  %v7642_v7 = vmul.f32 1.442695, %v16341_v2 }
 0xa8d   :  { %v8001_v45 = vmul.f32 0.6931472, %v11200_v23  ;;  %v7757_v50 = vpop.xlane.xlu1 %7756  ;;  %v11202_v46 = vpop.eup %11201  ;;  %v9543_v27 = vpack.c.bf16 %v8221_v37, %v8220_v30  ;;  %11217 = vlog2.f32 %v7755_v11  ;;  %v16359_v23 = vsub.f32 %v17437_v29, %v16286_v57  ;;  %v17438_v30 = vld [vmem:[#allocation74_spill] sm:$0xff]  ;;  %v17439_v11 = vld [vmem:[#allocation124_spill] sm:$0xff] }
 0xa8e   :  { %v8218_v47 = vsub.f32 %v17434_v39, %v7999_v53  ;;  %v11204_v26 = vpop.eup %11203  ;;  %11219 = vlog2.f32 %v7757_v50  ;;  %v16368_v53 = vsub.f32 %v17438_v30, %v7267_v49  ;;  %v7638_v57 = vmul.f32 1.442695, %v16354_v16 }
 0xa8f   :  { %v8219_v1 = vsub.f32 %v17435_v61, %v8001_v45  ;;  %7882 = vadd.xlane.f32.xlu0 %v11202_v46  ;;  %9783 = vst [vmem:[%s16648_s11 + $0x98] sm:$0xff] %v9543_v27   ;;  %v11206_v48 = vpop.eup %11205  ;;  %v16372_v5 = vsub.f32 %v17439_v11, %v7269_v15  ;;  %v7640_v37 = vmul.f32 1.442695, %v16359_v23  ;;  %v17441_v45 = vld [vmem:[#allocation126_spill] sm:$0xff]  ;;  %v16379_v49 = vsub.f32 %v15801_v17, %v7265_v22  ;;  %v17445_v11 = vld [vmem:[#allocation32_spill] sm:$0xff] }
 0xa90   :  { %7884 = vadd.xlane.f32.xlu1 %v11204_v26  ;;  %v7751_v18 = vpop.xlane.xlu0 %7750  ;;  %v11208_v33 = vpop.eup %11207  ;;  %v16376_v50 = vsub.f32 %v17441_v45, %v7263_v41  ;;  %v17446_v45 = vld [vmem:[#allocation11_spill] sm:$0xff] }
 0xa91   :  { %v9538_v61 = vpack.c.bf16 %v8219_v1, %v8218_v47  ;;  %11221 = vlog2.f32 %v7751_v18  ;;  %v7753_v46 = vpop.xlane.xlu1 %7752  ;;  %17440 = vst [vmem:[#allocation25_spill] sm:$0xff] %v16372_v5  ;;  %v11210_v62 = vpop.eup %11209  ;;  %17443 = vst [vmem:[#allocation27_spill] sm:$0xff] %v16379_v49  ;;  %v7650_v1 = vmul.f32 1.442695, %v16368_v53 }
 0xa92   :  { %11223 = vlog2.f32 %v7753_v46  ;;  %17442 = vst [vmem:[#allocation26_spill] sm:$0xff] %v16376_v50  ;;  %v11212_v26 = vpop.eup %11211  ;;  %v7646_v41 = vmul.f32 1.442695, %v16376_v50 }
 0xa93   :  { %9782 = vst [vmem:[%s16648_s11 + $0x90] sm:$0xff] %v9538_v61   ;;  %7878 = vadd.xlane.f32.xlu0 %v11206_v48  ;;  %11225 = vpow2.f32 %v7642_v7  ;;  %v11214_v27 = vpop.eup %11213  ;;  %v7652_v7 = vmul.f32 1.442695, %v16372_v5  ;;  %v7648_v61 = vmul.f32 1.442695, %v16379_v49  ;;  %v17447_v49 = vld [vmem:[#allocation35_spill] sm:$0xff] }
 0xa94   :  { %7880 = vadd.xlane.f32.xlu1 %v11208_v33  ;;  %v7275_v47 = vpop.xlane.xlu0 %7274  ;;  %11227 = vpow2.f32 %v7644_v36  ;;  %v11216_v15 = vpop.eup %11215  ;;  %v17444_v33 = vld [vmem:[#allocation6_spill] sm:$0xff] }
 0xa95   :  { %v7277_v39 = vpop.xlane.xlu1 %7276  ;;  %11229 = vpow2.f32 %v7638_v57 }
 0xa96   :  { %11231 = vpow2.f32 %v7640_v37 }
 0xa97   :  { %7890 = vadd.xlane.f32.xlu0 %v11210_v62  ;;  %v11218_v18 = vpop.eup %11217  ;;  %11233 = vpow2.f32 %v7650_v1  ;;  %v16387_v62 = vsub.f32 %v17445_v11, %v7275_v47 }
 0xa98   :  { %7892 = vadd.xlane.f32.xlu1 %v11212_v26  ;;  %v7271_v43 = vpop.xlane.xlu0 %7270  ;;  %v11220_v29 = vpop.eup %11219  ;;  %v8011_v17 = vmul.f32 0.6931472, %v11218_v18  ;;  %11235 = vpow2.f32 %v7652_v7  ;;  %v16391_v18 = vsub.f32 %v17447_v49, %v7277_v39 }
 0xa99   :  { %v7273_v36 = vpop.xlane.xlu1 %7272  ;;  %v8013_v46 = vmul.f32 0.6931472, %v11220_v29  ;;  %11237 = vpow2.f32 %v7646_v41  ;;  %v7658_v47 = vmul.f32 1.442695, %v16387_v62 }
 0xa9a   :  { %v8224_v30 = vsub.f32 %v17444_v33, %v8011_v17  ;;  %11239 = vpow2.f32 %v7648_v61  ;;  %v7660_v61 = vmul.f32 1.442695, %v16391_v18 }
 0xa9b   :  { %v11222_v22 = vpop.eup %11221  ;;  %7886 = vadd.xlane.f32.xlu0 %v11214_v27  ;;  %v8225_v26 = vsub.f32 %v17446_v45, %v8013_v46  ;;  %v17448_v27 = vld [vmem:[#allocation59_spill] sm:$0xff]  ;;  %v16404_v46 = vsub.f32 %v15859_v19, %v7273_v36 }
 0xa9c   :  { %v11224_v48 = vpop.eup %11223  ;;  %v8007_v57 = vmul.f32 0.6931472, %v11222_v22  ;;  %7888 = vadd.xlane.f32.xlu1 %v11216_v15  ;;  %v7763_v37 = vpop.xlane.xlu0 %7762  ;;  %v17449_v22 = vld [vmem:[#allocation70_spill] sm:$0xff]  ;;  %v17450_v15 = vld [vmem:[#allocation13_spill] sm:$0xff] }
 0xa9d   :  { %v8009_v50 = vmul.f32 0.6931472, %v11224_v48  ;;  %v7765_v1 = vpop.xlane.xlu1 %7764  ;;  %v11226_v29 = vpop.eup %11225  ;;  %v9553_v17 = vpack.c.bf16 %v8225_v26, %v8224_v30  ;;  %11241 = vlog2.f32 %v7763_v37  ;;  %v16397_v41 = vsub.f32 %v17450_v15, %v7271_v43 }
 0xa9e   :  { %v8222_v7 = vsub.f32 %v17448_v27, %v8007_v57  ;;  %v11228_v5 = vpop.eup %11227  ;;  %11243 = vlog2.f32 %v7765_v1  ;;  %v7656_v19 = vmul.f32 1.442695, %v16404_v46 }
 0xa9f   :  { %v8223_v33 = vsub.f32 %v17449_v22, %v8009_v50  ;;  %7898 = vadd.xlane.f32.xlu0 %v11226_v29  ;;  %9785 = vst [vmem:[%s16648_s11 + $0xa8] sm:$0xff] %v9553_v17   ;;  %v11230_v48 = vpop.eup %11229 }
 0xaa0   :  { %7900 = vadd.xlane.f32.xlu1 %v11228_v5  ;;  %v7759_v39 = vpop.xlane.xlu0 %7758  ;;  %v11232_v30 = vpop.eup %11231  ;;  %v7654_v5 = vmul.f32 1.442695, %v16397_v41 }
 0xaa1   :  { %v9548_v49 = vpack.c.bf16 %v8223_v33, %v8222_v7  ;;  %11245 = vlog2.f32 %v7759_v39  ;;  %v7761_v50 = vpop.xlane.xlu1 %7760  ;;  %v11234_v57 = vpop.eup %11233 }
 0xaa2   :  { %11247 = vlog2.f32 %v7761_v50  ;;  %v11236_v37 = vpop.eup %11235  ;;  %v17451_v50 = vld [vmem:[#allocation73_spill] sm:$0xff] }
 0xaa3   :  { %9784 = vst [vmem:[%s16648_s11 + $0xa0] sm:$0xff] %v9548_v49   ;;  %7894 = vadd.xlane.f32.xlu0 %v11230_v48  ;;  %11249 = vpow2.f32 %v7658_v47  ;;  %v11238_v26 = vpop.eup %11237 }
 0xaa4   :  { %7896 = vadd.xlane.f32.xlu1 %v11232_v30  ;;  %v7283_v43 = vpop.xlane.xlu0 %7282  ;;  %11251 = vpow2.f32 %v7660_v61  ;;  %v11240_v29 = vpop.eup %11239 }
 0xaa5   :  { %v16412_v36 = vsub.f32 %v15905_v21, %v7283_v43  ;;  %v7285_v11 = vpop.xlane.xlu1 %7284  ;;  %11253 = vpow2.f32 %v7654_v5  ;;  %v17452_v43 = vld [vmem:[#allocation29_spill] sm:$0xff] }
 0xaa6   :  { %v16415_v45 = vsub.f32 %v15915_v10, %v7285_v11  ;;  %11255 = vpow2.f32 %v7656_v19 }
 0xaa7   :  { %v7666_v1 = vmul.f32 1.442695, %v16412_v36  ;;  %7906 = vadd.xlane.f32.xlu0 %v11234_v57  ;;  %v11242_v17 = vpop.eup %11241 }
 0xaa8   :  { %v7668_v27 = vmul.f32 1.442695, %v16415_v45  ;;  %7908 = vadd.xlane.f32.xlu1 %v11236_v37  ;;  %v7279_v7 = vpop.xlane.xlu0 %7278  ;;  %v11244_v33 = vpop.eup %11243  ;;  %v8019_v47 = vmul.f32 0.6931472, %v11242_v17  ;;  %v17453_v37 = vld [vmem:[#allocation77_spill] sm:$0xff] }
 0xaa9   :  { %v16420_v21 = vsub.f32 %v15929_v44, %v7279_v7  ;;  %v7281_v22 = vpop.xlane.xlu1 %7280  ;;  %v8021_v39 = vmul.f32 0.6931472, %v11244_v33  ;;  %11257 = vpow2.f32 %v7666_v1  ;;  %v17454_v17 = vld [vmem:[#allocation33_spill] sm:$0xff] }
 0xaaa   :  { %v16423_v10 = vsub.f32 %v15936_v12, %v7281_v22  ;;  %v8228_v48 = vsub.f32 %v17451_v50, %v8019_v47  ;;  %11259 = vpow2.f32 %v7668_v27 }
 0xaab   :  { %v11246_v15 = vpop.eup %11245  ;;  %v7662_v49 = vmul.f32 1.442695, %v16420_v21  ;;  %7902 = vadd.xlane.f32.xlu0 %v11238_v26  ;;  %v8229_v57 = vsub.f32 %v17452_v43, %v8021_v39 }
 0xaac   :  { %v11248_v61 = vpop.eup %11247  ;;  %v8015_v30 = vmul.f32 0.6931472, %v11246_v15  ;;  %v7664_v44 = vmul.f32 1.442695, %v16423_v10  ;;  %7904 = vadd.xlane.f32.xlu1 %v11240_v29  ;;  %v7771_v5 = vpop.xlane.xlu0 %7770 }
 0xaad   :  { %v8017_v19 = vmul.f32 0.6931472, %v11248_v61  ;;  %11261 = vpow2.f32 %v7662_v49  ;;  %v7773_v12 = vpop.xlane.xlu1 %7772  ;;  %v11250_v11 = vpop.eup %11249  ;;  %v9563_v26 = vpack.c.bf16 %v8229_v57, %v8228_v48 }
 0xaae   :  { %v8226_v1 = vsub.f32 %v17453_v37, %v8015_v30  ;;  %11263 = vpow2.f32 %v7664_v44  ;;  %v11252_v7 = vpop.eup %11251 }
 0xaaf   :  { %v8227_v22 = vsub.f32 %v17454_v17, %v8017_v19  ;;  %11265 = vlog2.f32 %v7771_v5  ;;  %7914 = vadd.xlane.f32.xlu0 %v11250_v11  ;;  %9787 = vst [vmem:[%s16648_s11 + $0xb8] sm:$0xff] %v9563_v26   ;;  %v11254_v47 = vpop.eup %11253 }
 0xab0   :  { %11267 = vlog2.f32 %v7773_v12  ;;  %7916 = vadd.xlane.f32.xlu1 %v11252_v7  ;;  %v7767_v27 = vpop.xlane.xlu0 %7766  ;;  %v11256_v15 = vpop.eup %11255 }
 0xab1   :  { %v9558_v29 = vpack.c.bf16 %v8227_v22, %v8226_v1  ;;  %11269 = vlog2.f32 %v7767_v27  ;;  %v7769_v33 = vpop.xlane.xlu1 %7768 }
 0xab2   :  { %11271 = vlog2.f32 %v7769_v33 }
 0xab3   :  { %9786 = vst [vmem:[%s16648_s11 + $0xb0] sm:$0xff] %v9558_v29   ;;  %7910 = vadd.xlane.f32.xlu0 %v11254_v47  ;;  %v11258_v49 = vpop.eup %11257 }
 0xab4   :  { %7912 = vadd.xlane.f32.xlu1 %v11256_v15  ;;  %v7779_v39 = vpop.xlane.xlu0 %7778  ;;  %v11260_v50 = vpop.eup %11259 }
 0xab5   :  { %11273 = vlog2.f32 %v7779_v39  ;;  %v7781_v61 = vpop.xlane.xlu1 %7780 }
 0xab6   :  { %11275 = vlog2.f32 %v7781_v61 }
 0xab7   :  { %v11262_v48 = vpop.eup %11261 }
 0xab8   :  { %v11264_v30 = vpop.eup %11263  ;;  %7918 = vadd.xlane.f32.xlu0 %v11262_v48  ;;  %v7775_v44 = vpop.xlane.xlu0 %7774 }
 0xab9   :  { %v11266_v5 = vpop.eup %11265  ;;  %11277 = vlog2.f32 %v7775_v44  ;;  %7920 = vadd.xlane.f32.xlu1 %v11264_v30  ;;  %v7777_v43 = vpop.xlane.xlu1 %7776 }
 0xaba   :  { %v11268_v57 = vpop.eup %11267  ;;  %v8027_v19 = vmul.f32 0.6931472, %v11266_v5  ;;  %11279 = vlog2.f32 %v7777_v43 }
 0xabb   :  { %v11270_v12 = vpop.eup %11269  ;;  %v8029_v11 = vmul.f32 0.6931472, %v11268_v57 }
 0xabc   :  { %v11272_v37 = vpop.eup %11271  ;;  %v8232_v1 = vsub.f32 %v15864_v35, %v8027_v19  ;;  %v8023_v7 = vmul.f32 0.6931472, %v11270_v12  ;;  %7922 = vadd.xlane.f32.xlu0 %v11258_v49  ;;  %v7787_v26 = vpop.xlane.xlu0 %7786 }
 0xabd   :  { %v8233_v17 = vsub.f32 %v15870_v9, %v8029_v11  ;;  %v8025_v22 = vmul.f32 0.6931472, %v11272_v37  ;;  %11281 = vlog2.f32 %v7787_v26  ;;  %7924 = vadd.xlane.f32.xlu1 %v11260_v50  ;;  %v7789_v27 = vpop.xlane.xlu1 %7788  ;;  %v17455_v50 = vld [vmem:[#allocation76_spill] sm:$0xff] }
 0xabe   :  { %v8230_v29 = vsub.f32 %v15878_v54, %v8023_v7  ;;  %11283 = vlog2.f32 %v7789_v27  ;;  %v17457_v37 = vld [vmem:[#allocation68_spill] sm:$0xff] }
 0xabf   :  { %v11274_v33 = vpop.eup %11273  ;;  %v9573_v47 = vpack.c.bf16 %v8233_v17, %v8232_v1  ;;  %v8231_v15 = vsub.f32 %v15883_v63, %v8025_v22  ;;  %v17456_v63 = vld [vmem:[#allocation97_spill] sm:$0xff]  ;;  %v17458_v26 = vld [vmem:[#allocation80_spill] sm:$0xff] }
 0xac0   :  { %v11276_v39 = vpop.eup %11275  ;;  %v8035_v61 = vmul.f32 0.6931472, %v11274_v33  ;;  %v7783_v48 = vpop.xlane.xlu0 %7782 }
 0xac1   :  { %9789 = vst [vmem:[%s16648_s11 + $0xc8] sm:$0xff] %v9573_v47   ;;  %v9568_v35 = vpack.c.bf16 %v8231_v15, %v8230_v29  ;;  %v8037_v9 = vmul.f32 0.6931472, %v11276_v39  ;;  %11285 = vlog2.f32 %v7783_v48  ;;  %v7785_v49 = vpop.xlane.xlu1 %7784 }
 0xac2   :  { %v8236_v30 = vsub.f32 %v17455_v50, %v8035_v61  ;;  %11287 = vlog2.f32 %v7785_v49 }
 0xac3   :  { %v11278_v54 = vpop.eup %11277  ;;  %9788 = vst [vmem:[%s16648_s11 + $0xc0] sm:$0xff] %v9568_v35   ;;  %v8237_v44 = vsub.f32 %v17456_v63, %v8037_v9  ;;  %v17459_v63 = vld [vmem:[#allocation41_spill] sm:$0xff] }
 0xac4   :  { %v11280_v5 = vpop.eup %11279  ;;  %v8031_v43 = vmul.f32 0.6931472, %v11278_v54  ;;  %v7795_v57 = vpop.xlane.xlu0 %7794 }
 0xac5   :  { %v9583_v19 = vpack.c.bf16 %v8237_v44, %v8236_v30  ;;  %v8033_v12 = vmul.f32 0.6931472, %v11280_v5  ;;  %11289 = vlog2.f32 %v7795_v57  ;;  %v7797_v11 = vpop.xlane.xlu1 %7796 }
 0xac6   :  { %v8234_v1 = vsub.f32 %v17457_v37, %v8031_v43  ;;  %11291 = vlog2.f32 %v7797_v11 }
 0xac7   :  { %v11282_v7 = vpop.eup %11281  ;;  %9791 = vst [vmem:[%s16648_s11 + $0xd8] sm:$0xff] %v9583_v19   ;;  %v8235_v17 = vsub.f32 %v17458_v26, %v8033_v12 }
 0xac8   :  { %v11284_v22 = vpop.eup %11283  ;;  %v8043_v27 = vmul.f32 0.6931472, %v11282_v7  ;;  %v7791_v29 = vpop.xlane.xlu0 %7790 }
 0xac9   :  { %v9578_v33 = vpack.c.bf16 %v8235_v17, %v8234_v1  ;;  %v8045_v47 = vmul.f32 0.6931472, %v11284_v22  ;;  %11293 = vlog2.f32 %v7791_v29  ;;  %v7793_v15 = vpop.xlane.xlu1 %7792  ;;  %v17461_v1 = vld [vmem:[#allocation14_spill] sm:$0xff] }
 0xaca   :  { %v8240_v39 = vsub.f32 %v15942_v34, %v8043_v27  ;;  %11295 = vlog2.f32 %v7793_v15  ;;  %v17460_v34 = vld [vmem:[#allocation96_spill] sm:$0xff]  ;;  %v17462_v17 = vld [vmem:[#allocation2_spill] sm:$0xff] }
 0xacb   :  { %v11286_v61 = vpop.eup %11285  ;;  %9790 = vst [vmem:[%s16648_s11 + $0xd0] sm:$0xff] %v9578_v33   ;;  %v8241_v48 = vsub.f32 %v15948_v42, %v8045_v47 }
 0xacc   :  { %v11288_v35 = vpop.eup %11287  ;;  %v8039_v9 = vmul.f32 0.6931472, %v11286_v61  ;;  %v7803_v49 = vpop.xlane.xlu0 %7802  ;;  %v17463_v61 = vld [vmem:[#allocation42_spill] sm:$0xff] }
 0xacd   :  { %v9593_v50 = vpack.c.bf16 %v8241_v48, %v8240_v39  ;;  %v8041_v30 = vmul.f32 0.6931472, %v11288_v35  ;;  %11297 = vlog2.f32 %v7803_v49  ;;  %v7805_v54 = vpop.xlane.xlu1 %7804 }
 0xace   :  { %v8238_v44 = vsub.f32 %v17459_v63, %v8039_v9  ;;  %11299 = vlog2.f32 %v7805_v54  ;;  %v17464_v9 = vld [vmem:[#allocation44_spill] sm:$0xff] }
 0xacf   :  { %v11290_v5 = vpop.eup %11289  ;;  %9793 = vst [vmem:[%s16648_s11 + $0xe8] sm:$0xff] %v9593_v50   ;;  %v8239_v43 = vsub.f32 %v17460_v34, %v8041_v30 }
 0xad0   :  { %v11292_v57 = vpop.eup %11291  ;;  %v8051_v19 = vmul.f32 0.6931472, %v11290_v5  ;;  %v7799_v42 = vpop.xlane.xlu0 %7798 }
 0xad1   :  { %v9588_v12 = vpack.c.bf16 %v8239_v43, %v8238_v44  ;;  %v8053_v11 = vmul.f32 0.6931472, %v11292_v57  ;;  %11301 = vlog2.f32 %v7799_v42  ;;  %v7801_v37 = vpop.xlane.xlu1 %7800 }
 0xad2   :  { %v8244_v7 = vsub.f32 %v17461_v1, %v8051_v19  ;;  %11303 = vlog2.f32 %v7801_v37 }
 0xad3   :  { %v11294_v26 = vpop.eup %11293  ;;  %9792 = vst [vmem:[%s16648_s11 + $0xe0] sm:$0xff] %v9588_v12   ;;  %v8245_v22 = vsub.f32 %v17462_v17, %v8053_v11 }
 0xad4   :  { %v11296_v27 = vpop.eup %11295  ;;  %v8047_v29 = vmul.f32 0.6931472, %v11294_v26  ;;  %v7811_v33 = vpop.xlane.xlu0 %7810 }
 0xad5   :  { %v9603_v47 = vpack.c.bf16 %v8245_v22, %v8244_v7  ;;  %v8049_v15 = vmul.f32 0.6931472, %v11296_v27  ;;  %11305 = vlog2.f32 %v7811_v33  ;;  %v7813_v39 = vpop.xlane.xlu1 %7812 }
 0xad6   :  { %v8242_v48 = vsub.f32 %v17463_v61, %v8047_v29  ;;  %11307 = vlog2.f32 %v7813_v39 }
 0xad7   :  { %v11298_v35 = vpop.eup %11297  ;;  %9795 = vst [vmem:[%s16648_s11 + $0xf8] sm:$0xff] %v9603_v47   ;;  %v8243_v49 = vsub.f32 %v17464_v9, %v8049_v15  ;;  %v17465_v47 = vld [vmem:[#allocation79_spill] sm:$0xff] }
 0xad8   :  { %v11300_v50 = vpop.eup %11299  ;;  %v8059_v30 = vmul.f32 0.6931472, %v11298_v35  ;;  %v7807_v54 = vpop.xlane.xlu0 %7806 }
 0xad9   :  { %v9598_v63 = vpack.c.bf16 %v8243_v49, %v8242_v48  ;;  %v8061_v44 = vmul.f32 0.6931472, %v11300_v50  ;;  %11309 = vlog2.f32 %v7807_v54  ;;  %v7809_v5 = vpop.xlane.xlu1 %7808 }
 0xada   :  { %v8248_v34 = vsub.f32 %v16001_v13, %v8059_v30  ;;  %11311 = vlog2.f32 %v7809_v5  ;;  %v17467_v30 = vld [vmem:[#allocation15_spill] sm:$0xff] }
 0xadb   :  { %v11302_v43 = vpop.eup %11301  ;;  %9794 = vst [vmem:[%s16648_s11 + $0xf0] sm:$0xff] %v9598_v63   ;;  %v8249_v57 = vsub.f32 %v16006_v38, %v8061_v44  ;;  %v17468_v44 = vld [vmem:[#allocation82_spill] sm:$0xff] }
 0xadc   :  { %v11304_v19 = vpop.eup %11303  ;;  %v8055_v42 = vmul.f32 0.6931472, %v11302_v43  ;;  %v7819_v12 = vpop.xlane.xlu0 %7818 }
 0xadd   :  { %v9613_v11 = vpack.c.bf16 %v8249_v57, %v8248_v34  ;;  %v8057_v37 = vmul.f32 0.6931472, %v11304_v19  ;;  %11313 = vlog2.f32 %v7819_v12  ;;  %v7821_v1 = vpop.xlane.xlu1 %7820 }
 0xade   :  { %v8246_v7 = vsub.f32 %v16014_v52, %v8055_v42  ;;  %11315 = vlog2.f32 %v7821_v1  ;;  %v17466_v52 = vld [vmem:[#allocation83_spill] sm:$0xff] }
 0xadf   :  { %v11306_v26 = vpop.eup %11305  ;;  %9797 = vst [vmem:[%s16648_s11 + $0x108] sm:$0xff] %v9613_v11   ;;  %v8247_v13 = vsub.f32 %v16019_v40, %v8057_v37 }
 0xae0   :  { %v11308_v17 = vpop.eup %11307  ;;  %v8067_v22 = vmul.f32 0.6931472, %v11306_v26  ;;  %v7815_v38 = vpop.xlane.xlu0 %7814 }
 0xae1   :  { %v9608_v27 = vpack.c.bf16 %v8247_v13, %v8246_v7  ;;  %v8069_v29 = vmul.f32 0.6931472, %v11308_v17  ;;  %11317 = vlog2.f32 %v7815_v38  ;;  %v7817_v33 = vpop.xlane.xlu1 %7816 }
 0xae2   :  { %v8252_v15 = vsub.f32 %v17465_v47, %v8067_v22  ;;  %11319 = vlog2.f32 %v7817_v33 }
 0xae3   :  { %v11310_v39 = vpop.eup %11309  ;;  %9796 = vst [vmem:[%s16648_s11 + $0x100] sm:$0xff] %v9608_v27   ;;  %v8253_v61 = vsub.f32 %v17466_v52, %v8069_v29 }
 0xae4   :  { %v11312_v48 = vpop.eup %11311  ;;  %v8063_v35 = vmul.f32 0.6931472, %v11310_v39  ;;  %v7827_v40 = vpop.xlane.xlu0 %7826 }
 0xae5   :  { %v9623_v9 = vpack.c.bf16 %v8253_v61, %v8252_v15  ;;  %v8065_v49 = vmul.f32 0.6931472, %v11312_v48  ;;  %11321 = vlog2.f32 %v7827_v40  ;;  %v7829_v50 = vpop.xlane.xlu1 %7828  ;;  %v17470_v48 = vld [vmem:[#allocation16_spill] sm:$0xff] }
 0xae6   :  { %v8250_v54 = vsub.f32 %v17467_v30, %v8063_v35  ;;  %11323 = vlog2.f32 %v7829_v50 }
 0xae7   :  { %v11314_v63 = vpop.eup %11313  ;;  %9799 = vst [vmem:[%s16648_s11 + $0x118] sm:$0xff] %v9623_v9   ;;  %v8251_v5 = vsub.f32 %v17468_v44, %v8065_v49 }
 0xae8   :  { %v11316_v34 = vpop.eup %11315  ;;  %v8075_v43 = vmul.f32 0.6931472, %v11314_v63  ;;  %v7823_v57 = vpop.xlane.xlu0 %7822 }
 0xae9   :  { %v9618_v19 = vpack.c.bf16 %v8251_v5, %v8250_v54  ;;  %v8077_v42 = vmul.f32 0.6931472, %v11316_v34  ;;  %11325 = vlog2.f32 %v7823_v57  ;;  %v7825_v12 = vpop.xlane.xlu1 %7824  ;;  %v17472_v5 = vld [vmem:[#allocation48_spill] sm:$0xff]  ;;  %v17473_v57 = vld [vmem:[#allocation106_spill] sm:$0xff] }
 0xaea   :  { %v8256_v11 = vsub.f32 %v16059_v25, %v8075_v43  ;;  %11327 = vlog2.f32 %v7825_v12  ;;  %v17469_v25 = vld [vmem:[#allocation86_spill] sm:$0xff] }
 0xaeb   :  { %v11318_v37 = vpop.eup %11317  ;;  %9798 = vst [vmem:[%s16648_s11 + $0x110] sm:$0xff] %v9618_v19   ;;  %v8257_v1 = vsub.f32 %v16064_v3, %v8077_v42 }
 0xaec   :  { %v11320_v7 = vpop.eup %11319  ;;  %v8071_v26 = vmul.f32 0.6931472, %v11318_v37  ;;  %v7835_v13 = vpop.xlane.xlu0 %7834 }
 0xaed   :  { %v9633_v17 = vpack.c.bf16 %v8257_v1, %v8256_v11  ;;  %v8073_v22 = vmul.f32 0.6931472, %v11320_v7  ;;  %11329 = vlog2.f32 %v7835_v13  ;;  %v7837_v38 = vpop.xlane.xlu1 %7836 }
 0xaee   :  { %v8254_v27 = vsub.f32 %v16072_v20, %v8071_v26  ;;  %11331 = vlog2.f32 %v7837_v38  ;;  %v17471_v20 = vld [vmem:[#allocation85_spill] sm:$0xff] }
 0xaef   :  { %v11322_v29 = vpop.eup %11321  ;;  %9801 = vst [vmem:[%s16648_s11 + $0x128] sm:$0xff] %v9633_v17   ;;  %v8255_v33 = vsub.f32 %v17469_v25, %v8073_v22 }
 0xaf0   :  { %v11324_v47 = vpop.eup %11323  ;;  %v8083_v15 = vmul.f32 0.6931472, %v11322_v29  ;;  %v7831_v3 = vpop.xlane.xlu0 %7830 }
 0xaf1   :  { %v9628_v39 = vpack.c.bf16 %v8255_v33, %v8254_v27  ;;  %v8085_v52 = vmul.f32 0.6931472, %v11324_v47  ;;  %11333 = vlog2.f32 %v7831_v3  ;;  %v7833_v61 = vpop.xlane.xlu1 %7832  ;;  %v17474_v47 = vld [vmem:[#allocation89_spill] sm:$0xff] }
 0xaf2   :  { %v8260_v35 = vsub.f32 %v17470_v48, %v8083_v15  ;;  %11335 = vlog2.f32 %v7833_v61 }
 0xaf3   :  { %v11326_v40 = vpop.eup %11325  ;;  %9800 = vst [vmem:[%s16648_s11 + $0x120] sm:$0xff] %v9628_v39   ;;  %v8261_v9 = vsub.f32 %v17471_v20, %v8085_v52  ;;  %v17476_v20 = vld [vmem:[#allocation4_spill] sm:$0xff] }
 0xaf4   :  { %v11328_v49 = vpop.eup %11327  ;;  %v8079_v50 = vmul.f32 0.6931472, %v11326_v40  ;;  %v7843_v30 = vpop.xlane.xlu0 %7842 }
 0xaf5   :  { %v9643_v54 = vpack.c.bf16 %v8261_v9, %v8260_v35  ;;  %v8081_v63 = vmul.f32 0.6931472, %v11328_v49  ;;  %11337 = vlog2.f32 %v7843_v30  ;;  %v7845_v44 = vpop.xlane.xlu1 %7844 }
 0xaf6   :  { %v8258_v34 = vsub.f32 %v17472_v5, %v8079_v50  ;;  %11339 = vlog2.f32 %v7845_v44  ;;  %v17477_v50 = vld [vmem:[#allocation51_spill] sm:$0xff] }
 0xaf7   :  { %v11330_v43 = vpop.eup %11329  ;;  %9803 = vst [vmem:[%s16648_s11 + $0x138] sm:$0xff] %v9643_v54   ;;  %v8259_v19 = vsub.f32 %v17473_v57, %v8081_v63  ;;  %v17478_v57 = vld [vmem:[#allocation17_spill] sm:$0xff] }
 0xaf8   :  { %v11332_v42 = vpop.eup %11331  ;;  %v8091_v12 = vmul.f32 0.6931472, %v11330_v43  ;;  %v7839_v11 = vpop.xlane.xlu0 %7838 }
 0xaf9   :  { %v9638_v37 = vpack.c.bf16 %v8259_v19, %v8258_v34  ;;  %v8093_v1 = vmul.f32 0.6931472, %v11332_v42  ;;  %11341 = vlog2.f32 %v7839_v11  ;;  %v7841_v7 = vpop.xlane.xlu1 %7840 }
 0xafa   :  { %v8264_v26 = vsub.f32 %v16117_v28, %v8091_v12  ;;  %11343 = vlog2.f32 %v7841_v7  ;;  %v17475_v28 = vld [vmem:[#allocation3_spill] sm:$0xff]  ;;  %v17479_v12 = vld [vmem:[#allocation88_spill] sm:$0xff] }
 0xafb   :  { %v11334_v13 = vpop.eup %11333  ;;  %9802 = vst [vmem:[%s16648_s11 + $0x130] sm:$0xff] %v9638_v37   ;;  %v8265_v17 = vsub.f32 %v16122_v14, %v8093_v1 }
 0xafc   :  { %v11336_v22 = vpop.eup %11335  ;;  %v8087_v38 = vmul.f32 0.6931472, %v11334_v13  ;;  %v7851_v27 = vpop.xlane.xlu0 %7850 }
 0xafd   :  { %v9653_v29 = vpack.c.bf16 %v8265_v17, %v8264_v26  ;;  %v8089_v25 = vmul.f32 0.6931472, %v11336_v22  ;;  %11345 = vlog2.f32 %v7851_v27  ;;  %v7853_v33 = vpop.xlane.xlu1 %7852 }
 0xafe   :  { %v8262_v15 = vsub.f32 %v17474_v47, %v8087_v38  ;;  %11347 = vlog2.f32 %v7853_v33 }
 0xaff   :  { %v11338_v3 = vpop.eup %11337  ;;  %9805 = vst [vmem:[%s16648_s11 + $0x148] sm:$0xff] %v9653_v29   ;;  %v8263_v39 = vsub.f32 %v17475_v28, %v8089_v25 }
 0xb00   :  { %v11340_v52 = vpop.eup %11339  ;;  %v8099_v61 = vmul.f32 0.6931472, %v11338_v3  ;;  %v7847_v14 = vpop.xlane.xlu0 %7846 }
 0xb01   :  { %v9648_v48 = vpack.c.bf16 %v8263_v39, %v8262_v15  ;;  %v8101_v35 = vmul.f32 0.6931472, %v11340_v52  ;;  %11349 = vlog2.f32 %v7847_v14  ;;  %v7849_v40 = vpop.xlane.xlu1 %7848 }
 0xb02   :  { %v8268_v9 = vsub.f32 %v17476_v20, %v8099_v61  ;;  %11351 = vlog2.f32 %v7849_v40  ;;  %v17480_v40 = vld [vmem:[#allocation92_spill] sm:$0xff] }
 0xb03   :  { %v11342_v49 = vpop.eup %11341  ;;  %9804 = vst [vmem:[%s16648_s11 + $0x140] sm:$0xff] %v9648_v48   ;;  %v8269_v30 = vsub.f32 %v17477_v50, %v8101_v35 }
 0xb04   :  { %v11344_v54 = vpop.eup %11343  ;;  %v8095_v63 = vmul.f32 0.6931472, %v11342_v49  ;;  %v7859_v44 = vpop.xlane.xlu0 %7858 }
 0xb05   :  { %v9663_v5 = vpack.c.bf16 %v8269_v30, %v8268_v9  ;;  %v8097_v34 = vmul.f32 0.6931472, %v11344_v54  ;;  %11353 = vlog2.f32 %v7859_v44  ;;  %v7861_v43 = vpop.xlane.xlu1 %7860 }
 0xb06   :  { %v8266_v19 = vsub.f32 %v17478_v57, %v8095_v63  ;;  %11355 = vlog2.f32 %v7861_v43  ;;  %v17483_v57 = vld [vmem:[#allocation19_spill] sm:$0xff] }
 0xb07   :  { %v11346_v42 = vpop.eup %11345  ;;  %9807 = vst [vmem:[%s16648_s11 + $0x158] sm:$0xff] %v9663_v5   ;;  %v8267_v11 = vsub.f32 %v17479_v12, %v8097_v34  ;;  %v17482_v5 = vld [vmem:[#allocation91_spill] sm:$0xff] }
 0xb08   :  { %v11348_v37 = vpop.eup %11347  ;;  %v8107_v1 = vmul.f32 0.6931472, %v11346_v42  ;;  %v7855_v7 = vpop.xlane.xlu0 %7854 }
 0xb09   :  { %v9658_v26 = vpack.c.bf16 %v8267_v11, %v8266_v19  ;;  %v8109_v13 = vmul.f32 0.6931472, %v11348_v37  ;;  %11357 = vlog2.f32 %v7855_v7  ;;  %v7857_v17 = vpop.xlane.xlu1 %7856 }
 0xb0a   :  { %v8272_v22 = vsub.f32 %v16175_v58, %v8107_v1  ;;  %11359 = vlog2.f32 %v7857_v17 }
 0xb0b   :  { %v11350_v38 = vpop.eup %11349  ;;  %9806 = vst [vmem:[%s16648_s11 + $0x150] sm:$0xff] %v9658_v26   ;;  %v8273_v27 = vsub.f32 %v16180_v0, %v8109_v13 }
 0xb0c   :  { %v11352_v29 = vpop.eup %11351  ;;  %v8103_v25 = vmul.f32 0.6931472, %v11350_v38  ;;  %v7867_v33 = vpop.xlane.xlu0 %7866 }
 0xb0d   :  { %v9673_v47 = vpack.c.bf16 %v8273_v27, %v8272_v22  ;;  %v8105_v15 = vmul.f32 0.6931472, %v11352_v29  ;;  %11361 = vlog2.f32 %v7867_v33  ;;  %v7869_v3 = vpop.xlane.xlu1 %7868 }
 0xb0e   :  { %v8270_v28 = vsub.f32 %v16188_v59, %v8103_v25  ;;  %11363 = vlog2.f32 %v7869_v3  ;;  %v17481_v59 = vld [vmem:[#allocation18_spill] sm:$0xff] }
 0xb0f   :  { %v11354_v39 = vpop.eup %11353  ;;  %9809 = vst [vmem:[%s16648_s11 + $0x168] sm:$0xff] %v9673_v47   ;;  %v8271_v58 = vsub.f32 %v16193_v6, %v8105_v15 }
 0xb10   :  { %v11356_v52 = vpop.eup %11355  ;;  %v8115_v61 = vmul.f32 0.6931472, %v11354_v39  ;;  %v7863_v0 = vpop.xlane.xlu0 %7862 }
 0xb11   :  { %v9668_v14 = vpack.c.bf16 %v8271_v58, %v8270_v28  ;;  %v8117_v48 = vmul.f32 0.6931472, %v11356_v52  ;;  %11365 = vlog2.f32 %v7863_v0  ;;  %v7865_v35 = vpop.xlane.xlu1 %7864 }
 0xb12   :  { %v8276_v20 = vsub.f32 %v17480_v40, %v8115_v61  ;;  %11367 = vlog2.f32 %v7865_v35  ;;  %v17484_v61 = vld [vmem:[#allocation20_spill] sm:$0xff] }
 0xb13   :  { %v11358_v9 = vpop.eup %11357  ;;  %9808 = vst [vmem:[%s16648_s11 + $0x160] sm:$0xff] %v9668_v14   ;;  %v8277_v49 = vsub.f32 %v17481_v59, %v8117_v48 }
 0xb14   :  { %v11360_v50 = vpop.eup %11359  ;;  %v8111_v30 = vmul.f32 0.6931472, %v11358_v9  ;;  %v7875_v6 = vpop.xlane.xlu0 %7874 }
 0xb15   :  { %v9683_v54 = vpack.c.bf16 %v8277_v49, %v8276_v20  ;;  %v8113_v63 = vmul.f32 0.6931472, %v11360_v50  ;;  %11369 = vlog2.f32 %v7875_v6  ;;  %v7877_v44 = vpop.xlane.xlu1 %7876  ;;  %v17486_v49 = vld [vmem:[#allocation21_spill] sm:$0xff]  ;;  %v17487_v6 = vld [vmem:[#allocation60_spill] sm:$0xff] }
 0xb16   :  { %v8274_v34 = vsub.f32 %v17482_v5, %v8111_v30  ;;  %11371 = vlog2.f32 %v7877_v44 }
 0xb17   :  { %v11362_v43 = vpop.eup %11361  ;;  %9811 = vst [vmem:[%s16648_s11 + $0x178] sm:$0xff] %v9683_v54   ;;  %v8275_v19 = vsub.f32 %v17483_v57, %v8113_v63 }
 0xb18   :  { %v11364_v42 = vpop.eup %11363  ;;  %v8123_v12 = vmul.f32 0.6931472, %v11362_v43  ;;  %v7871_v11 = vpop.xlane.xlu0 %7870 }
 0xb19   :  { %v9678_v37 = vpack.c.bf16 %v8275_v19, %v8274_v34  ;;  %v8125_v1 = vmul.f32 0.6931472, %v11364_v42  ;;  %11373 = vlog2.f32 %v7871_v11  ;;  %v7873_v7 = vpop.xlane.xlu1 %7872 }
 0xb1a   :  { %v8280_v26 = vsub.f32 %v16233_v24, %v8123_v12  ;;  %11375 = vlog2.f32 %v7873_v7 }
 0xb1b   :  { %v11366_v13 = vpop.eup %11365  ;;  %9810 = vst [vmem:[%s16648_s11 + $0x170] sm:$0xff] %v9678_v37   ;;  %v8281_v17 = vsub.f32 %v16238_v32, %v8125_v1 }
 0xb1c   :  { %v11368_v22 = vpop.eup %11367  ;;  %v8119_v38 = vmul.f32 0.6931472, %v11366_v13  ;;  %v7883_v27 = vpop.xlane.xlu0 %7882 }
 0xb1d   :  { %v9693_v29 = vpack.c.bf16 %v8281_v17, %v8280_v26  ;;  %v8121_v25 = vmul.f32 0.6931472, %v11368_v22  ;;  %11377 = vlog2.f32 %v7883_v27  ;;  %v7885_v33 = vpop.xlane.xlu1 %7884 }
 0xb1e   :  { %v8278_v47 = vsub.f32 %v16246_v4, %v8119_v38  ;;  %11379 = vlog2.f32 %v7885_v33  ;;  %v17485_v4 = vld [vmem:[#allocation57_spill] sm:$0xff] }
 0xb1f   :  { %v11370_v15 = vpop.eup %11369  ;;  %9813 = vst [vmem:[%s16648_s11 + $0x188] sm:$0xff] %v9693_v29   ;;  %v8279_v24 = vsub.f32 %v16251_v51, %v8121_v25 }
 0xb20   :  { %v11372_v3 = vpop.eup %11371  ;;  %v8131_v28 = vmul.f32 0.6931472, %v11370_v15  ;;  %v7879_v32 = vpop.xlane.xlu0 %7878 }
 0xb21   :  { %v9688_v39 = vpack.c.bf16 %v8279_v24, %v8278_v47  ;;  %v8133_v58 = vmul.f32 0.6931472, %v11372_v3  ;;  %11381 = vlog2.f32 %v7879_v32  ;;  %v7881_v52 = vpop.xlane.xlu1 %7880  ;;  %v17488_v47 = vld [vmem:[#allocation63_spill] sm:$0xff] }
 0xb22   :  { %v8284_v0 = vsub.f32 %v17484_v61, %v8131_v28  ;;  %11383 = vlog2.f32 %v7881_v52  ;;  %v17490_v61 = vld [vmem:[#allocation23_spill] sm:$0xff] }
 0xb23   :  { %v11374_v14 = vpop.eup %11373  ;;  %9812 = vst [vmem:[%s16648_s11 + $0x180] sm:$0xff] %v9688_v39   ;;  %v8285_v48 = vsub.f32 %v17485_v4, %v8133_v58  ;;  %v17491_v4 = vld [vmem:[#allocation24_spill] sm:$0xff] }
 0xb24   :  { %v11376_v35 = vpop.eup %11375  ;;  %v8127_v40 = vmul.f32 0.6931472, %v11374_v14  ;;  %v7891_v51 = vpop.xlane.xlu0 %7890 }
 0xb25   :  { %v9703_v20 = vpack.c.bf16 %v8285_v48, %v8284_v0  ;;  %v8129_v9 = vmul.f32 0.6931472, %v11376_v35  ;;  %11385 = vlog2.f32 %v7891_v51  ;;  %v7893_v59 = vpop.xlane.xlu1 %7892 }
 0xb26   :  { %v8282_v50 = vsub.f32 %v17486_v49, %v8127_v40  ;;  %11387 = vlog2.f32 %v7893_v59 }
 0xb27   :  { %v11378_v30 = vpop.eup %11377  ;;  %9815 = vst [vmem:[%s16648_s11 + $0x198] sm:$0xff] %v9703_v20   ;;  %v8283_v54 = vsub.f32 %v17487_v6, %v8129_v9 }
 0xb28   :  { %v11380_v63 = vpop.eup %11379  ;;  %v8139_v44 = vmul.f32 0.6931472, %v11378_v30  ;;  %v7887_v5 = vpop.xlane.xlu0 %7886 }
 0xb29   :  { %v9698_v34 = vpack.c.bf16 %v8283_v54, %v8282_v50  ;;  %v8141_v43 = vmul.f32 0.6931472, %v11380_v63  ;;  %11389 = vlog2.f32 %v7887_v5  ;;  %v7889_v57 = vpop.xlane.xlu1 %7888 }
 0xb2a   :  { %v8288_v19 = vsub.f32 %v16291_v31, %v8139_v44  ;;  %11391 = vlog2.f32 %v7889_v57 }
 0xb2b   :  { %v11382_v42 = vpop.eup %11381  ;;  %9814 = vst [vmem:[%s16648_s11 + $0x190] sm:$0xff] %v9698_v34   ;;  %v8289_v12 = vsub.f32 %v16296_v56, %v8141_v43 }
 0xb2c   :  { %v11384_v11 = vpop.eup %11383  ;;  %v8135_v37 = vmul.f32 0.6931472, %v11382_v42  ;;  %v7899_v1 = vpop.xlane.xlu0 %7898 }
 0xb2d   :  { %v9713_v7 = vpack.c.bf16 %v8289_v12, %v8288_v19  ;;  %v8137_v26 = vmul.f32 0.6931472, %v11384_v11  ;;  %11393 = vlog2.f32 %v7899_v1  ;;  %v7901_v13 = vpop.xlane.xlu1 %7900 }
 0xb2e   :  { %v8286_v17 = vsub.f32 %v16304_v8, %v8135_v37  ;;  %11395 = vlog2.f32 %v7901_v13  ;;  %v17489_v8 = vld [vmem:[#allocation66_spill] sm:$0xff] }
 0xb2f   :  { %v11386_v22 = vpop.eup %11385  ;;  %9817 = vst [vmem:[%s16648_s11 + $0x1a8] sm:$0xff] %v9713_v7   ;;  %v8287_v31 = vsub.f32 %v16309_v60, %v8137_v26 }
 0xb30   :  { %v11388_v38 = vpop.eup %11387  ;;  %v8147_v27 = vmul.f32 0.6931472, %v11386_v22  ;;  %v7895_v56 = vpop.xlane.xlu0 %7894 }
 0xb31   :  { %v9708_v29 = vpack.c.bf16 %v8287_v31, %v8286_v17  ;;  %v8149_v25 = vmul.f32 0.6931472, %v11388_v38  ;;  %11397 = vlog2.f32 %v7895_v56  ;;  %v7897_v33 = vpop.xlane.xlu1 %7896  ;;  %v17493_v38 = vld [vmem:[#allocation26_spill] sm:$0xff] }
 0xb32   :  { %v8292_v15 = vsub.f32 %v17488_v47, %v8147_v27  ;;  %11399 = vlog2.f32 %v7897_v33 }
 0xb33   :  { %v11390_v24 = vpop.eup %11389  ;;  %9816 = vst [vmem:[%s16648_s11 + $0x1a0] sm:$0xff] %v9708_v29   ;;  %v8293_v3 = vsub.f32 %v17489_v8, %v8149_v25 }
 0xb34   :  { %v11392_v28 = vpop.eup %11391  ;;  %v8143_v32 = vmul.f32 0.6931472, %v11390_v24  ;;  %v7907_v60 = vpop.xlane.xlu0 %7906 }
 0xb35   :  { %v9723_v39 = vpack.c.bf16 %v8293_v3, %v8292_v15  ;;  %v8145_v58 = vmul.f32 0.6931472, %v11392_v28  ;;  %11401 = vlog2.f32 %v7907_v60  ;;  %v7909_v52 = vpop.xlane.xlu1 %7908 }
 0xb36   :  { %v8290_v0 = vsub.f32 %v17490_v61, %v8143_v32  ;;  %11403 = vlog2.f32 %v7909_v52 }
 0xb37   :  { %v11394_v14 = vpop.eup %11393  ;;  %9819 = vst [vmem:[%s16648_s11 + $0x1b8] sm:$0xff] %v9723_v39   ;;  %v8291_v48 = vsub.f32 %v17491_v4, %v8145_v58 }
 0xb38   :  { %v11396_v35 = vpop.eup %11395  ;;  %v8155_v40 = vmul.f32 0.6931472, %v11394_v14  ;;  %v7903_v51 = vpop.xlane.xlu0 %7902 }
 0xb39   :  { %v9718_v20 = vpack.c.bf16 %v8291_v48, %v8290_v0  ;;  %v8157_v9 = vmul.f32 0.6931472, %v11396_v35  ;;  %11405 = vlog2.f32 %v7903_v51  ;;  %v7905_v59 = vpop.xlane.xlu1 %7904 }
 0xb3a   :  { %v8296_v49 = vsub.f32 %v16341_v2, %v8155_v40  ;;  %11407 = vlog2.f32 %v7905_v59 }
 0xb3b   :  { %v11398_v50 = vpop.eup %11397  ;;  %9818 = vst [vmem:[%s16648_s11 + $0x1b0] sm:$0xff] %v9718_v20   ;;  %v8297_v30 = vsub.f32 %v16346_v55, %v8157_v9 }
 0xb3c   :  { %v11400_v6 = vpop.eup %11399  ;;  %v8151_v54 = vmul.f32 0.6931472, %v11398_v50  ;;  %v7915_v63 = vpop.xlane.xlu0 %7914 }
 0xb3d   :  { %v9733_v44 = vpack.c.bf16 %v8297_v30, %v8296_v49  ;;  %v8153_v5 = vmul.f32 0.6931472, %v11400_v6  ;;  %11409 = vlog2.f32 %v7915_v63  ;;  %v7917_v34 = vpop.xlane.xlu1 %7916 }
 0xb3e   :  { %v8294_v43 = vsub.f32 %v16354_v16, %v8151_v54  ;;  %11411 = vlog2.f32 %v7917_v34  ;;  %v17492_v16 = vld [vmem:[#allocation25_spill] sm:$0xff] }
 0xb3f   :  { %v11402_v57 = vpop.eup %11401  ;;  %9821 = vst [vmem:[%s16648_s11 + $0x1c8] sm:$0xff] %v9733_v44   ;;  %v8295_v2 = vsub.f32 %v16359_v23, %v8153_v5 }
 0xb40   :  { %v11404_v19 = vpop.eup %11403  ;;  %v8163_v42 = vmul.f32 0.6931472, %v11402_v57  ;;  %v7911_v55 = vpop.xlane.xlu0 %7910 }
 0xb41   :  { %v9728_v12 = vpack.c.bf16 %v8295_v2, %v8294_v43  ;;  %v8165_v11 = vmul.f32 0.6931472, %v11404_v19  ;;  %11413 = vlog2.f32 %v7911_v55  ;;  %v7913_v37 = vpop.xlane.xlu1 %7912 }
 0xb42   :  { %v8300_v1 = vsub.f32 %v16368_v53, %v8163_v42  ;;  %11415 = vlog2.f32 %v7913_v37  ;;  %v17494_v53 = vld [vmem:[#allocation27_spill] sm:$0xff] }
 0xb43   :  { %v11406_v7 = vpop.eup %11405  ;;  %9820 = vst [vmem:[%s16648_s11 + $0x1c0] sm:$0xff] %v9728_v12   ;;  %v8301_v26 = vsub.f32 %v17492_v16, %v8165_v11 }
 0xb44   :  { %v11408_v13 = vpop.eup %11407  ;;  %v8159_v17 = vmul.f32 0.6931472, %v11406_v7 }
 0xb45   :  { %v9743_v23 = vpack.c.bf16 %v8301_v26, %v8300_v1  ;;  %v8161_v22 = vmul.f32 0.6931472, %v11408_v13  ;;  %v7919_v31 = vpop.xlane.xlu0 %7918 }
 0xb46   :  { %v8298_v27 = vsub.f32 %v17493_v38, %v8159_v17  ;;  %11417 = vlog2.f32 %v7919_v31  ;;  %v7921_v56 = vpop.xlane.xlu1 %7920 }
 0xb47   :  { %v11410_v29 = vpop.eup %11409  ;;  %9823 = vst [vmem:[%s16648_s11 + $0x1d8] sm:$0xff] %v9743_v23   ;;  %v8299_v25 = vsub.f32 %v17494_v53, %v8161_v22  ;;  %11419 = vlog2.f32 %v7921_v56 }
 0xb48   :  { %v11412_v33 = vpop.eup %11411  ;;  %v8171_v47 = vmul.f32 0.6931472, %v11410_v29 }
 0xb49   :  { %v9738_v15 = vpack.c.bf16 %v8299_v25, %v8298_v27  ;;  %v8173_v24 = vmul.f32 0.6931472, %v11412_v33  ;;  %v7923_v8 = vpop.xlane.xlu0 %7922 }
 0xb4a   :  { %v8304_v3 = vsub.f32 %v16387_v62, %v8171_v47  ;;  %11421 = vlog2.f32 %v7923_v8  ;;  %v7925_v28 = vpop.xlane.xlu1 %7924 }
 0xb4b   :  { %v11414_v32 = vpop.eup %11413  ;;  %9822 = vst [vmem:[%s16648_s11 + $0x1d0] sm:$0xff] %v9738_v15   ;;  %v8305_v60 = vsub.f32 %v16391_v18, %v8173_v24  ;;  %11423 = vlog2.f32 %v7925_v28 }
 0xb4c   :  { %v11416_v39 = vpop.eup %11415  ;;  %v8167_v58 = vmul.f32 0.6931472, %v11414_v32 }
 0xb4d   :  { %v9753_v52 = vpack.c.bf16 %v8305_v60, %v8304_v3  ;;  %v8169_v61 = vmul.f32 0.6931472, %v11416_v39 }
 0xb4e   :  { %v8302_v0 = vsub.f32 %v16397_v41, %v8167_v58 }
 0xb4f   :  { %9825 = vst [vmem:[%s16648_s11 + $0x1e8] sm:$0xff] %v9753_v52   ;;  %v8303_v62 = vsub.f32 %v16404_v46, %v8169_v61 }
 0xb50   :  { %v11418_v14 = vpop.eup %11417 }
 0xb51   :  { %v11420_v4 = vpop.eup %11419  ;;  %v9748_v48 = vpack.c.bf16 %v8303_v62, %v8302_v0  ;;  %v8175_v35 = vmul.f32 0.6931472, %v11418_v14 }
 0xb52   :  { %v8177_v40 = vmul.f32 0.6931472, %v11420_v4 }
 0xb53   :  { %9824 = vst [vmem:[%s16648_s11 + $0x1e0] sm:$0xff] %v9748_v48   ;;  %v8306_v18 = vsub.f32 %v16420_v21, %v8175_v35 }
 0xb54   :  { %v11422_v51 = vpop.eup %11421  ;;  %v8307_v41 = vsub.f32 %v16423_v10, %v8177_v40 }
 0xb55   :  { %v11424_v20 = vpop.eup %11423  ;;  %v8179_v9 = vmul.f32 0.6931472, %v11422_v51 }
 0xb56   :  { %v9758_v59 = vpack.c.bf16 %v8307_v41, %v8306_v18  ;;  %v8181_v49 = vmul.f32 0.6931472, %v11424_v20 }
 0xb57   :  { %v8308_v46 = vsub.f32 %v16412_v36, %v8179_v9 }
 0xb58   :  { %9826 = vst [vmem:[%s16648_s11 + $0x1f0] sm:$0xff] %v9758_v59   ;;  %v8309_v50 = vsub.f32 %v16415_v45, %v8181_v49 }
 0xb5a   :  { %v9763_v30 = vpack.c.bf16 %v8309_v50, %v8308_v46 }
 0xb5c   :  { %9827 = vst [vmem:[%s16648_s11 + $0x1f8] sm:$0xff] %v9763_v30  }

</bundles_post_ra>
